<compile_context>
chip_gen: v5e
topology: v5e:2x2
jax: 0.10.0
libtpu: 0.0.40
codegen_flags: <defaults>
</compile_context>

<pallas_src>
import numpy as np
import jax
import jax.numpy as jnp
from jax.experimental import pallas as pl
from jax.experimental.pallas import tpu as pltpu


# --------------------------------------------------------------------------------------
# Fused forward kernel: one grid step == one batch element
# --------------------------------------------------------------------------------------
def _fused_kernel(p1_ref, h_ref, w1_ref, b1_ref, w2_ref, b2_ref, w3_ref, b3_ref,
                  wfc_ref, bfc_ref, wih_ref, whh_ref, bih_ref, bhh_ref,
                  whd_ref, bhd_ref, heads_ref, hn_ref):
    f32 = jnp.float32
    H = h_ref.shape[-1]

    # ---- conv1 (per stride-2 phase) + conv2 via shift-and-add tap accumulation ----
    # a1 phase grid is 10x10 (flat 100 rows).  conv2 output lives on rows m = oh*10+ow
    # of an 89-row map; rows with m % 10 == 9 are don't-care.
    g2 = jnp.zeros((89, 64), f32)
    for pi in range(2):
        for pj in range(2):
            ph = pi * 2 + pj
            a1p = jnp.maximum(
                jnp.dot(p1_ref[0, ph], w1_ref[...], preferred_element_type=f32)
                + b1_ref[...], 0.0)                                     # (100, 32)
            for di in range(2):
                for dj in range(2):
                    t = (2 * di + pi) * 4 + (2 * dj + pj)               # conv2 tap id
                    base = di * 10 + dj
                    g2 = g2 + jnp.dot(a1p[base:base + 89, :], w2_ref[t],
                                      preferred_element_type=f32)
    a2 = jnp.maximum(g2 + b2_ref[...], 0.0)                             # (89, 64)

    # ---- conv3 via shift-and-add (rows n = r*10 + w; w<7 valid, rest don't-care) ----
    g3 = jnp.zeros((67, 32), f32)
    for si in range(3):
        for sj in range(3):
            base = si * 10 + sj
            g3 = g3 + jnp.dot(a2[base:base + 67, :], w3_ref[si * 3 + sj],
                              preferred_element_type=f32)
    a3 = jnp.maximum(g3 + b3_ref[...], 0.0)                             # (67, 32)

    # ---- Linear(1568, H) + ReLU: per-channel VPU accumulation.  wfc is packed on the
    # same 67-row layout with zeros on the don't-care rows, so no flatten is needed.
    z = jnp.zeros((67, H), f32)
    for c in range(32):
        z = z + a3[:, c:c + 1] * wfc_ref[c]                             # (67,1)*(67,H)
    xfc = jnp.maximum(jnp.sum(z, axis=0, keepdims=True) + bfc_ref[...], 0.0)   # (1, H)

    # ---- GRUCell (gate-packed (H,3H) weights: 2 matmuls) ----
    h = h_ref[0]                                                        # (1, H)
    gi = jnp.dot(xfc, wih_ref[...], preferred_element_type=f32) + bih_ref[...]
    gh = jnp.dot(h, whh_ref[...], preferred_element_type=f32) + bhh_ref[...]
    r = jax.nn.sigmoid(gi[:, 0:H] + gh[:, 0:H])
    u = jax.nn.sigmoid(gi[:, H:2 * H] + gh[:, H:2 * H])
    n = jnp.tanh(gi[:, 2 * H:3 * H] + r * gh[:, 2 * H:3 * H])
    h_new = (1.0 - u) * n + u * h
    hn_ref[0] = h_new

    # ---- merged policy/critic head: one (H,2) matmul, sigmoid on policy column only ----
    hd = jnp.dot(h_new, whd_ref[...], preferred_element_type=f32) + bhd_ref[...]
    col = jax.lax.broadcasted_iota(jnp.int32, hd.shape, 1)
    heads_ref[0] = jnp.where(col == 0, jax.nn.sigmoid(hd), hd)


def _fused_call(p1, state3, pp):
    B = p1.shape[0]
    H = state3.shape[-1]

    def rspec(a):                                  # resident (weight) block spec
        nd = a.ndim
        return pl.BlockSpec(a.shape, lambda i, _n=nd: (0,) * _n)

    weights = (pp["c1_w"], pp["c1_b"], pp["c2_w"], pp["c2_b"], pp["c3_w"], pp["c3_b"],
               pp["fc_w"], pp["fc_b"], pp["gru_w_ih"], pp["gru_w_hh"],
               pp["gru_b_ih"], pp["gru_b_hh"], pp["head_w"], pp["head_b"])

    return pl.pallas_call(
        _fused_kernel,
        grid=(B,),
        in_specs=[pl.BlockSpec((1, 4, 100, 64), lambda i: (i, 0, 0, 0)),   # conv1 patches
                  pl.BlockSpec((1, 1, H), lambda i: (i, 0, 0))]            # GRU state
                 + [rspec(w) for w in weights],
        out_specs=[pl.BlockSpec((1, 1, 2), lambda i: (i, 0, 0)),
                   pl.BlockSpec((1, 1, H), lambda i: (i, 0, 0))],
        out_shape=(jax.ShapeDtypeStruct((B, 1, 2), jnp.float32),
                   jax.ShapeDtypeStruct((B, 1, H), jnp.float32)),
        compiler_params=pltpu.CompilerParams(dimension_semantics=("parallel",)),
    )(p1, state3, *weights)


# --------------------------------------------------------------------------------------
# Forward pass (semantics of Model.forward)
# --------------------------------------------------------------------------------------
def forward(pp, x, state):
    B = x.shape[0]
    H = state.shape[1]

    # global normalize with torch-style unbiased std, hoisted out of the kernel
    mean = jnp.mean(x)
    std = jnp.std(x, ddof=1)
    xn = (x.reshape(B, 80, 80, 1) - mean) / std
    xp = jnp.pad(xn, ((0, 0), (2, 2), (2, 2), (0, 0)))                   # (B,84,84,1)

    # TODO(synk): conv1 patch (im2col) extraction stays as XLA slicing glue (fuses under
    # jit); everything after it runs inside the single fused Pallas kernel.
    cols = [xp[:, ti:ti + 77:4, tj:tj + 77:4, 0]
            for ti in range(8) for tj in range(8)]
    P1 = jnp.stack(cols, axis=-1)                                        # (B,20,20,64)
    # stride-2 phase packing so the in-kernel conv2 only needs contiguous slices
    phases = [P1[:, pi::2, pj::2, :] for pi in range(2) for pj in range(2)]
    p1 = jnp.stack(phases, axis=1).reshape(B, 4, 100, 64)                # (B,4,100,64)

    heads, new_state = _fused_call(p1, state.reshape(B, 1, H), pp)
    return heads[:, 0, 0], heads[:, 0, 1], new_state.reshape(B, H)


# --------------------------------------------------------------------------------------
# Params: PyTorch-layout init + one-time packing into kernel-friendly layouts
# --------------------------------------------------------------------------------------
def init_params(key, gru_sz):
    def uniform(k, shape, fan_in):
        bound = 1.0 / np.sqrt(fan_in)
        return jax.random.uniform(k, shape, jnp.float32, -bound, bound)

    ks = jax.random.split(key, 16)
    H = gru_sz
    return {
        "c1_w": uniform(ks[0], (32, 1, 8, 8), 64),
        "c1_b": uniform(ks[1], (32,), 64),
        "c2_w": uniform(ks[2], (64, 32, 4, 4), 512),
        "c2_b": uniform(ks[3], (64,), 512),
        "c3_w": uniform(ks[4], (32, 64, 3, 3), 576),
        "c3_b": uniform(ks[5], (32,), 576),
        "fc_w": uniform(ks[6], (H, 32 * 7 * 7), 1568),
        "fc_b": uniform(ks[7], (H,), 1568),
        "policy_w": uniform(ks[8], (1, H), H),
        "policy_b": uniform(ks[9], (1,), H),
        "critic_w": uniform(ks[10], (1, H), H),
        "critic_b": uniform(ks[11], (1,), H),
        "gru_w_ih": uniform(ks[12], (3 * H, H), H),
        "gru_w_hh": uniform(ks[13], (3 * H, H), H),
        "gru_b_ih": uniform(ks[14], (3 * H,), H),
        "gru_b_hh": uniform(ks[15], (3 * H,), H),
    }


def prepare_params(params):
    """One-time weight packing (hoisted out of forward)."""
    H = params["gru_b_ih"].shape[0] // 3

    # conv1: (32,1,8,8) -> (64,32), row order = (ti, tj) matching the im2col columns
    c1_w = params["c1_w"].transpose(2, 3, 1, 0).reshape(64, 32)
    # conv2: (64,32,4,4) -> per-tap (16,32,64), tap id t = i2*4 + j2
    c2_w = params["c2_w"].transpose(2, 3, 1, 0).reshape(16, 32, 64)
    # conv3: (32,64,3,3) -> per-tap (9,64,32), tap id s = si*3 + sj
    c3_w = params["c3_w"].transpose(2, 3, 1, 0).reshape(9, 64, 32)

    # FC: torch flatten order is (c, h, w); kernel feeds it the conv3 map whose rows are
    # n = h*10 + w (w in [0,7) valid, rest don't-care -> zero weights).
    fc3d = jnp.transpose(params["fc_w"].reshape(H, 32, 7, 7), (1, 2, 3, 0))  # (32,7,7,H)
    fc67 = jnp.zeros((32, 7, 10, H), jnp.float32).at[:, :, :7, :].set(fc3d)
    fc67 = fc67.reshape(32, 70, H)[:, :67, :]                                # (32,67,H)

    return {
        "c1_w": c1_w, "c1_b": params["c1_b"].reshape(1, 32),
        "c2_w": c2_w, "c2_b": params["c2_b"].reshape(1, 64),
        "c3_w": c3_w, "c3_b": params["c3_b"].reshape(1, 32),
        "fc_w": fc67, "fc_b": params["fc_b"].reshape(1, H),
        "gru_w_ih": params["gru_w_ih"].T,            # (H, 3H), columns [r | z | n]
        "gru_w_hh": params["gru_w_hh"].T,
        "gru_b_ih": params["gru_b_ih"].reshape(1, 3 * H),
        "gru_b_hh": params["gru_b_hh"].reshape(1, 3 * H),
        "head_w": jnp.concatenate([params["policy_w"], params["critic_w"]], axis=0).T,
        "head_b": jnp.concatenate([params["policy_b"], params["critic_b"]],
                                  axis=0).reshape(1, 2),
    }


# --------------------------------------------------------------------------------------
# Pure-JAX reference (used only for a correctness check in __main__)
# --------------------------------------------------------------------------------------
def ref_forward(params, x, state):
    H = state.shape[1]
    hp = jax.lax.Precision.HIGHEST
    dn = ("NCHW", "OIHW", "NCHW")
    xn = (x - jnp.mean(x)) / jnp.std(x, ddof=1)
    y = jax.nn.relu(jax.lax.conv_general_dilated(xn, params["c1_w"], (4, 4),
                                                 ((2, 2), (2, 2)), dimension_numbers=dn,
                                                 precision=hp)
                    + params["c1_b"][None, :, None, None])
    y = jax.nn.relu(jax.lax.conv_general_dilated(y, params["c2_w"], (2, 2),
                                                 ((0, 0), (0, 0)), dimension_numbers=dn,
                                                 precision=hp)
                    + params["c2_b"][None, :, None, None])
    y = jax.nn.relu(jax.lax.conv_general_dilated(y, params["c3_w"], (1, 1),
                                                 ((0, 0), (0, 0)), dimension_numbers=dn,
                                                 precision=hp)
                    + params["c3_b"][None, :, None, None])
    f = y.reshape(y.shape[0], -1)
    f = jax.nn.relu(jnp.dot(f, params["fc_w"].T, precision=hp) + params["fc_b"])
    gi = jnp.dot(f, params["gru_w_ih"].T, precision=hp) + params["gru_b_ih"]
    gh = jnp.dot(state, params["gru_w_hh"].T, precision=hp) + params["gru_b_hh"]
    r = jax.nn.sigmoid(gi[:, :H] + gh[:, :H])
    u = jax.nn.sigmoid(gi[:, H:2 * H] + gh[:, H:2 * H])
    n = jnp.tanh(gi[:, 2 * H:] + r * gh[:, 2 * H:])
    h_new = (1.0 - u) * n + u * state
    p = jax.nn.sigmoid(jnp.dot(h_new, params["policy_w"].T, precision=hp)
                       + params["policy_b"]).reshape(-1)
    v = (jnp.dot(h_new, params["critic_w"].T, precision=hp)
         + params["critic_b"]).reshape(-1)
    return p, v, h_new


if __name__ == "__main__":
    gru_sz = 32
    B = 2

    key = jax.random.PRNGKey(0)
    k_params, k_x, k_h = jax.random.split(key, 3)

    params = init_params(k_params, gru_sz)
    prepped = prepare_params(params)

    # Input spatial 80x80 is implied by Linear(32*7*7, gru_sz) after the conv stack.
    x = jax.random.normal(k_x, (B, 1, 80, 80), jnp.float32)
    state = jax.random.normal(k_h, (B, gru_sz), jnp.float32)

    fwd = jax.jit(forward)
    p, value, new_state = fwd(prepped, x, state)
    jax.block_until_ready((p, value, new_state))

    assert p.shape == (B,) and value.shape == (B,) and new_state.shape == (B, gru_sz)

    p_ref, v_ref, s_ref = jax.jit(ref_forward)(params, x, state)
    np.testing.assert_allclose(np.asarray(p), np.asarray(p_ref), atol=2e-3, rtol=2e-3)
    np.testing.assert_allclose(np.asarray(value), np.asarray(v_ref), atol=2e-3, rtol=2e-3)
    np.testing.assert_allclose(np.asarray(new_state), np.asarray(s_ref), atol=2e-3, rtol=2e-3)

    print("KERNEL_OK")
</pallas_src>

<mosaic_0001>
module attributes {stable_mosaic.version = 11 : i64} {
  func.func @_fused_kernel(%arg0: i32, %arg1: memref<1x4x100x64xf32, #tpu.memory_space<vmem>>, %arg2: memref<1x1x32xf32, #tpu.memory_space<vmem>>, %arg3: memref<64x32xf32, #tpu.memory_space<vmem>>, %arg4: memref<1x32xf32, #tpu.memory_space<vmem>>, %arg5: memref<16x32x64xf32, #tpu.memory_space<vmem>>, %arg6: memref<1x64xf32, #tpu.memory_space<vmem>>, %arg7: memref<9x64x32xf32, #tpu.memory_space<vmem>>, %arg8: memref<1x32xf32, #tpu.memory_space<vmem>>, %arg9: memref<32x67x32xf32, #tpu.memory_space<vmem>>, %arg10: memref<1x32xf32, #tpu.memory_space<vmem>>, %arg11: memref<32x96xf32, #tpu.memory_space<vmem>>, %arg12: memref<32x96xf32, #tpu.memory_space<vmem>>, %arg13: memref<1x96xf32, #tpu.memory_space<vmem>>, %arg14: memref<1x96xf32, #tpu.memory_space<vmem>>, %arg15: memref<32x2xf32, #tpu.memory_space<vmem>>, %arg16: memref<1x2xf32, #tpu.memory_space<vmem>>, %arg17: memref<1x1x2xf32, #tpu.memory_space<vmem>>, %arg18: memref<1x1x32xf32, #tpu.memory_space<vmem>>) attributes {dimension_semantics = [#tpu.dimension_semantics<parallel>], iteration_bounds = array<i64: 2>, scalar_prefetch = 0 : i64, scratch_operands = 0 : i64, tpu.core_type = #tpu.core_type<tc>, window_params = [{transform_indices = @transform_0, window_bounds = array<i64: 1, 4, 100, 64>}, {transform_indices = @transform_1, window_bounds = array<i64: 1, 1, 32>}, {pipeline_mode = #tpu.pipeline_mode<synchronous>, transform_indices = @transform_2, window_bounds = array<i64: 64, 32>}, {pipeline_mode = #tpu.pipeline_mode<synchronous>, transform_indices = @transform_3, window_bounds = array<i64: 1, 32>}, {pipeline_mode = #tpu.pipeline_mode<synchronous>, transform_indices = @transform_4, window_bounds = array<i64: 16, 32, 64>}, {pipeline_mode = #tpu.pipeline_mode<synchronous>, transform_indices = @transform_5, window_bounds = array<i64: 1, 64>}, {pipeline_mode = #tpu.pipeline_mode<synchronous>, transform_indices = @transform_6, window_bounds = array<i64: 9, 64, 32>}, {pipeline_mode = #tpu.pipeline_mode<synchronous>, transform_indices = @transform_7, window_bounds = array<i64: 1, 32>}, {pipeline_mode = #tpu.pipeline_mode<synchronous>, transform_indices = @transform_8, window_bounds = array<i64: 32, 67, 32>}, {pipeline_mode = #tpu.pipeline_mode<synchronous>, transform_indices = @transform_9, window_bounds = array<i64: 1, 32>}, {pipeline_mode = #tpu.pipeline_mode<synchronous>, transform_indices = @transform_10, window_bounds = array<i64: 32, 96>}, {pipeline_mode = #tpu.pipeline_mode<synchronous>, transform_indices = @transform_11, window_bounds = array<i64: 32, 96>}, {pipeline_mode = #tpu.pipeline_mode<synchronous>, transform_indices = @transform_12, window_bounds = array<i64: 1, 96>}, {pipeline_mode = #tpu.pipeline_mode<synchronous>, transform_indices = @transform_13, window_bounds = array<i64: 1, 96>}, {pipeline_mode = #tpu.pipeline_mode<synchronous>, transform_indices = @transform_14, window_bounds = array<i64: 32, 2>}, {pipeline_mode = #tpu.pipeline_mode<synchronous>, transform_indices = @transform_15, window_bounds = array<i64: 1, 2>}, {transform_indices = @transform_16, window_bounds = array<i64: 1, 1, 2>}, {transform_indices = @transform_17, window_bounds = array<i64: 1, 1, 32>}]} {
    %cst = arith.constant 0.000000e+00 : f32
    %0 = vector.broadcast %cst : f32 to vector<89x64xf32>
    %c0 = arith.constant 0 : index
    %c0_0 = arith.constant 0 : index
    %c0_1 = arith.constant 0 : index
    %c0_2 = arith.constant 0 : index
    %1 = vector.load %arg1[%c0, %c0_0, %c0_1, %c0_2] : memref<1x4x100x64xf32, #tpu.memory_space<vmem>>, vector<1x1x100x64xf32>
    %2 = vector.shape_cast %1 : vector<1x1x100x64xf32> to vector<100x64xf32>
    %c0_3 = arith.constant 0 : index
    %c0_4 = arith.constant 0 : index
    %3 = vector.load %arg3[%c0_3, %c0_4] : memref<64x32xf32, #tpu.memory_space<vmem>>, vector<64x32xf32>
    %cst_5 = arith.constant dense<0.000000e+00> : vector<100x32xf32>
    %4 = tpu.matmul %2, %3, %cst_5 {dimension_numbers = #tpu.dot_dimension_numbers<[1], [0], [0], [1], [0, 0, 1, 1], [], []>} : vector<100x64xf32>, vector<64x32xf32>, vector<100x32xf32> -> vector<100x32xf32>
    %c0_6 = arith.constant 0 : index
    %c0_7 = arith.constant 0 : index
    %5 = vector.load %arg4[%c0_6, %c0_7] : memref<1x32xf32, #tpu.memory_space<vmem>>, vector<1x32xf32>
    %6 = vector.broadcast %5 : vector<1x32xf32> to vector<100x32xf32>
    %7 = arith.addf %4, %6 : vector<100x32xf32>
    %cst_8 = arith.constant 0.000000e+00 : f32
    %8 = vector.broadcast %cst_8 : f32 to vector<100x32xf32>
    %9 = arith.maximumf %7, %8 : vector<100x32xf32>
    %10 = vector.extract_strided_slice %9 {offsets = [0, 0], sizes = [89, 32], strides = [1, 1]} : vector<100x32xf32> to vector<89x32xf32>
    %c0_9 = arith.constant 0 : index
    %c0_10 = arith.constant 0 : index
    %c0_11 = arith.constant 0 : index
    %11 = vector.load %arg5[%c0_9, %c0_10, %c0_11] : memref<16x32x64xf32, #tpu.memory_space<vmem>>, vector<1x32x64xf32>
    %12 = vector.shape_cast %11 : vector<1x32x64xf32> to vector<32x64xf32>
    %cst_12 = arith.constant dense<0.000000e+00> : vector<89x64xf32>
    %13 = tpu.matmul %10, %12, %cst_12 {dimension_numbers = #tpu.dot_dimension_numbers<[1], [0], [0], [1], [0, 0, 1, 1], [], []>} : vector<89x32xf32>, vector<32x64xf32>, vector<89x64xf32> -> vector<89x64xf32>
    %14 = arith.addf %0, %13 : vector<89x64xf32>
    %15 = vector.extract_strided_slice %9 {offsets = [1, 0], sizes = [89, 32], strides = [1, 1]} : vector<100x32xf32> to vector<89x32xf32>
    %c2 = arith.constant 2 : index
    %c0_13 = arith.constant 0 : index
    %c0_14 = arith.constant 0 : index
    %16 = vector.load %arg5[%c2, %c0_13, %c0_14] : memref<16x32x64xf32, #tpu.memory_space<vmem>>, vector<1x32x64xf32>
    %17 = vector.shape_cast %16 : vector<1x32x64xf32> to vector<32x64xf32>
    %cst_15 = arith.constant dense<0.000000e+00> : vector<89x64xf32>
    %18 = tpu.matmul %15, %17, %cst_15 {dimension_numbers = #tpu.dot_dimension_numbers<[1], [0], [0], [1], [0, 0, 1, 1], [], []>} : vector<89x32xf32>, vector<32x64xf32>, vector<89x64xf32> -> vector<89x64xf32>
    %19 = arith.addf %14, %18 : vector<89x64xf32>
    %20 = vector.extract_strided_slice %9 {offsets = [10, 0], sizes = [89, 32], strides = [1, 1]} : vector<100x32xf32> to vector<89x32xf32>
    %c8 = arith.constant 8 : index
    %c0_16 = arith.constant 0 : index
    %c0_17 = arith.constant 0 : index
    %21 = vector.load %arg5[%c8, %c0_16, %c0_17] : memref<16x32x64xf32, #tpu.memory_space<vmem>>, vector<1x32x64xf32>
    %22 = vector.shape_cast %21 : vector<1x32x64xf32> to vector<32x64xf32>
    %cst_18 = arith.constant dense<0.000000e+00> : vector<89x64xf32>
    %23 = tpu.matmul %20, %22, %cst_18 {dimension_numbers = #tpu.dot_dimension_numbers<[1], [0], [0], [1], [0, 0, 1, 1], [], []>} : vector<89x32xf32>, vector<32x64xf32>, vector<89x64xf32> -> vector<89x64xf32>
    %24 = arith.addf %19, %23 : vector<89x64xf32>
    %25 = vector.extract_strided_slice %9 {offsets = [11, 0], sizes = [89, 32], strides = [1, 1]} : vector<100x32xf32> to vector<89x32xf32>
    %c10 = arith.constant 10 : index
    %c0_19 = arith.constant 0 : index
    %c0_20 = arith.constant 0 : index
    %26 = vector.load %arg5[%c10, %c0_19, %c0_20] : memref<16x32x64xf32, #tpu.memory_space<vmem>>, vector<1x32x64xf32>
    %27 = vector.shape_cast %26 : vector<1x32x64xf32> to vector<32x64xf32>
    %cst_21 = arith.constant dense<0.000000e+00> : vector<89x64xf32>
    %28 = tpu.matmul %25, %27, %cst_21 {dimension_numbers = #tpu.dot_dimension_numbers<[1], [0], [0], [1], [0, 0, 1, 1], [], []>} : vector<89x32xf32>, vector<32x64xf32>, vector<89x64xf32> -> vector<89x64xf32>
    %29 = arith.addf %24, %28 : vector<89x64xf32>
    %c0_22 = arith.constant 0 : index
    %c1 = arith.constant 1 : index
    %c0_23 = arith.constant 0 : index
    %c0_24 = arith.constant 0 : index
    %30 = vector.load %arg1[%c0_22, %c1, %c0_23, %c0_24] : memref<1x4x100x64xf32, #tpu.memory_space<vmem>>, vector<1x1x100x64xf32>
    %31 = vector.shape_cast %30 : vector<1x1x100x64xf32> to vector<100x64xf32>
    %c0_25 = arith.constant 0 : index
    %c0_26 = arith.constant 0 : index
    %32 = vector.load %arg3[%c0_25, %c0_26] : memref<64x32xf32, #tpu.memory_space<vmem>>, vector<64x32xf32>
    %cst_27 = arith.constant dense<0.000000e+00> : vector<100x32xf32>
    %33 = tpu.matmul %31, %32, %cst_27 {dimension_numbers = #tpu.dot_dimension_numbers<[1], [0], [0], [1], [0, 0, 1, 1], [], []>} : vector<100x64xf32>, vector<64x32xf32>, vector<100x32xf32> -> vector<100x32xf32>
    %c0_28 = arith.constant 0 : index
    %c0_29 = arith.constant 0 : index
    %34 = vector.load %arg4[%c0_28, %c0_29] : memref<1x32xf32, #tpu.memory_space<vmem>>, vector<1x32xf32>
    %35 = vector.broadcast %34 : vector<1x32xf32> to vector<100x32xf32>
    %36 = arith.addf %33, %35 : vector<100x32xf32>
    %cst_30 = arith.constant 0.000000e+00 : f32
    %37 = vector.broadcast %cst_30 : f32 to vector<100x32xf32>
    %38 = arith.maximumf %36, %37 : vector<100x32xf32>
    %39 = vector.extract_strided_slice %38 {offsets = [0, 0], sizes = [89, 32], strides = [1, 1]} : vector<100x32xf32> to vector<89x32xf32>
    %c1_31 = arith.constant 1 : index
    %c0_32 = arith.constant 0 : index
    %c0_33 = arith.constant 0 : index
    %40 = vector.load %arg5[%c1_31, %c0_32, %c0_33] : memref<16x32x64xf32, #tpu.memory_space<vmem>>, vector<1x32x64xf32>
    %41 = vector.shape_cast %40 : vector<1x32x64xf32> to vector<32x64xf32>
    %cst_34 = arith.constant dense<0.000000e+00> : vector<89x64xf32>
    %42 = tpu.matmul %39, %41, %cst_34 {dimension_numbers = #tpu.dot_dimension_numbers<[1], [0], [0], [1], [0, 0, 1, 1], [], []>} : vector<89x32xf32>, vector<32x64xf32>, vector<89x64xf32> -> vector<89x64xf32>
    %43 = arith.addf %29, %42 : vector<89x64xf32>
    %44 = vector.extract_strided_slice %38 {offsets = [1, 0], sizes = [89, 32], strides = [1, 1]} : vector<100x32xf32> to vector<89x32xf32>
    %c3 = arith.constant 3 : index
    %c0_35 = arith.constant 0 : index
    %c0_36 = arith.constant 0 : index
    %45 = vector.load %arg5[%c3, %c0_35, %c0_36] : memref<16x32x64xf32, #tpu.memory_space<vmem>>, vector<1x32x64xf32>
    %46 = vector.shape_cast %45 : vector<1x32x64xf32> to vector<32x64xf32>
    %cst_37 = arith.constant dense<0.000000e+00> : vector<89x64xf32>
    %47 = tpu.matmul %44, %46, %cst_37 {dimension_numbers = #tpu.dot_dimension_numbers<[1], [0], [0], [1], [0, 0, 1, 1], [], []>} : vector<89x32xf32>, vector<32x64xf32>, vector<89x64xf32> -> vector<89x64xf32>
    %48 = arith.addf %43, %47 : vector<89x64xf32>
    %49 = vector.extract_strided_slice %38 {offsets = [10, 0], sizes = [89, 32], strides = [1, 1]} : vector<100x32xf32> to vector<89x32xf32>
    %c9 = arith.constant 9 : index
    %c0_38 = arith.constant 0 : index
    %c0_39 = arith.constant 0 : index
    %50 = vector.load %arg5[%c9, %c0_38, %c0_39] : memref<16x32x64xf32, #tpu.memory_space<vmem>>, vector<1x32x64xf32>
    %51 = vector.shape_cast %50 : vector<1x32x64xf32> to vector<32x64xf32>
    %cst_40 = arith.constant dense<0.000000e+00> : vector<89x64xf32>
    %52 = tpu.matmul %49, %51, %cst_40 {dimension_numbers = #tpu.dot_dimension_numbers<[1], [0], [0], [1], [0, 0, 1, 1], [], []>} : vector<89x32xf32>, vector<32x64xf32>, vector<89x64xf32> -> vector<89x64xf32>
    %53 = arith.addf %48, %52 : vector<89x64xf32>
    %54 = vector.extract_strided_slice %38 {offsets = [11, 0], sizes = [89, 32], strides = [1, 1]} : vector<100x32xf32> to vector<89x32xf32>
    %c11 = arith.constant 11 : index
    %c0_41 = arith.constant 0 : index
    %c0_42 = arith.constant 0 : index
    %55 = vector.load %arg5[%c11, %c0_41, %c0_42] : memref<16x32x64xf32, #tpu.memory_space<vmem>>, vector<1x32x64xf32>
    %56 = vector.shape_cast %55 : vector<1x32x64xf32> to vector<32x64xf32>
    %cst_43 = arith.constant dense<0.000000e+00> : vector<89x64xf32>
    %57 = tpu.matmul %54, %56, %cst_43 {dimension_numbers = #tpu.dot_dimension_numbers<[1], [0], [0], [1], [0, 0, 1, 1], [], []>} : vector<89x32xf32>, vector<32x64xf32>, vector<89x64xf32> -> vector<89x64xf32>
    %58 = arith.addf %53, %57 : vector<89x64xf32>
    %c0_44 = arith.constant 0 : index
    %c2_45 = arith.constant 2 : index
    %c0_46 = arith.constant 0 : index
    %c0_47 = arith.constant 0 : index
    %59 = vector.load %arg1[%c0_44, %c2_45, %c0_46, %c0_47] : memref<1x4x100x64xf32, #tpu.memory_space<vmem>>, vector<1x1x100x64xf32>
    %60 = vector.shape_cast %59 : vector<1x1x100x64xf32> to vector<100x64xf32>
    %c0_48 = arith.constant 0 : index
    %c0_49 = arith.constant 0 : index
    %61 = vector.load %arg3[%c0_48, %c0_49] : memref<64x32xf32, #tpu.memory_space<vmem>>, vector<64x32xf32>
    %cst_50 = arith.constant dense<0.000000e+00> : vector<100x32xf32>
    %62 = tpu.matmul %60, %61, %cst_50 {dimension_numbers = #tpu.dot_dimension_numbers<[1], [0], [0], [1], [0, 0, 1, 1], [], []>} : vector<100x64xf32>, vector<64x32xf32>, vector<100x32xf32> -> vector<100x32xf32>
    %c0_51 = arith.constant 0 : index
    %c0_52 = arith.constant 0 : index
    %63 = vector.load %arg4[%c0_51, %c0_52] : memref<1x32xf32, #tpu.memory_space<vmem>>, vector<1x32xf32>
    %64 = vector.broadcast %63 : vector<1x32xf32> to vector<100x32xf32>
    %65 = arith.addf %62, %64 : vector<100x32xf32>
    %cst_53 = arith.constant 0.000000e+00 : f32
    %66 = vector.broadcast %cst_53 : f32 to vector<100x32xf32>
    %67 = arith.maximumf %65, %66 : vector<100x32xf32>
    %68 = vector.extract_strided_slice %67 {offsets = [0, 0], sizes = [89, 32], strides = [1, 1]} : vector<100x32xf32> to vector<89x32xf32>
    %c4 = arith.constant 4 : index
    %c0_54 = arith.constant 0 : index
    %c0_55 = arith.constant 0 : index
    %69 = vector.load %arg5[%c4, %c0_54, %c0_55] : memref<16x32x64xf32, #tpu.memory_space<vmem>>, vector<1x32x64xf32>
    %70 = vector.shape_cast %69 : vector<1x32x64xf32> to vector<32x64xf32>
    %cst_56 = arith.constant dense<0.000000e+00> : vector<89x64xf32>
    %71 = tpu.matmul %68, %70, %cst_56 {dimension_numbers = #tpu.dot_dimension_numbers<[1], [0], [0], [1], [0, 0, 1, 1], [], []>} : vector<89x32xf32>, vector<32x64xf32>, vector<89x64xf32> -> vector<89x64xf32>
    %72 = arith.addf %58, %71 : vector<89x64xf32>
    %73 = vector.extract_strided_slice %67 {offsets = [1, 0], sizes = [89, 32], strides = [1, 1]} : vector<100x32xf32> to vector<89x32xf32>
    %c6 = arith.constant 6 : index
    %c0_57 = arith.constant 0 : index
    %c0_58 = arith.constant 0 : index
    %74 = vector.load %arg5[%c6, %c0_57, %c0_58] : memref<16x32x64xf32, #tpu.memory_space<vmem>>, vector<1x32x64xf32>
    %75 = vector.shape_cast %74 : vector<1x32x64xf32> to vector<32x64xf32>
    %cst_59 = arith.constant dense<0.000000e+00> : vector<89x64xf32>
    %76 = tpu.matmul %73, %75, %cst_59 {dimension_numbers = #tpu.dot_dimension_numbers<[1], [0], [0], [1], [0, 0, 1, 1], [], []>} : vector<89x32xf32>, vector<32x64xf32>, vector<89x64xf32> -> vector<89x64xf32>
    %77 = arith.addf %72, %76 : vector<89x64xf32>
    %78 = vector.extract_strided_slice %67 {offsets = [10, 0], sizes = [89, 32], strides = [1, 1]} : vector<100x32xf32> to vector<89x32xf32>
    %c12 = arith.constant 12 : index
    %c0_60 = arith.constant 0 : index
    %c0_61 = arith.constant 0 : index
    %79 = vector.load %arg5[%c12, %c0_60, %c0_61] : memref<16x32x64xf32, #tpu.memory_space<vmem>>, vector<1x32x64xf32>
    %80 = vector.shape_cast %79 : vector<1x32x64xf32> to vector<32x64xf32>
    %cst_62 = arith.constant dense<0.000000e+00> : vector<89x64xf32>
    %81 = tpu.matmul %78, %80, %cst_62 {dimension_numbers = #tpu.dot_dimension_numbers<[1], [0], [0], [1], [0, 0, 1, 1], [], []>} : vector<89x32xf32>, vector<32x64xf32>, vector<89x64xf32> -> vector<89x64xf32>
    %82 = arith.addf %77, %81 : vector<89x64xf32>
    %83 = vector.extract_strided_slice %67 {offsets = [11, 0], sizes = [89, 32], strides = [1, 1]} : vector<100x32xf32> to vector<89x32xf32>
    %c14 = arith.constant 14 : index
    %c0_63 = arith.constant 0 : index
    %c0_64 = arith.constant 0 : index
    %84 = vector.load %arg5[%c14, %c0_63, %c0_64] : memref<16x32x64xf32, #tpu.memory_space<vmem>>, vector<1x32x64xf32>
    %85 = vector.shape_cast %84 : vector<1x32x64xf32> to vector<32x64xf32>
    %cst_65 = arith.constant dense<0.000000e+00> : vector<89x64xf32>
    %86 = tpu.matmul %83, %85, %cst_65 {dimension_numbers = #tpu.dot_dimension_numbers<[1], [0], [0], [1], [0, 0, 1, 1], [], []>} : vector<89x32xf32>, vector<32x64xf32>, vector<89x64xf32> -> vector<89x64xf32>
    %87 = arith.addf %82, %86 : vector<89x64xf32>
    %c0_66 = arith.constant 0 : index
    %c3_67 = arith.constant 3 : index
    %c0_68 = arith.constant 0 : index
    %c0_69 = arith.constant 0 : index
    %88 = vector.load %arg1[%c0_66, %c3_67, %c0_68, %c0_69] : memref<1x4x100x64xf32, #tpu.memory_space<vmem>>, vector<1x1x100x64xf32>
    %89 = vector.shape_cast %88 : vector<1x1x100x64xf32> to vector<100x64xf32>
    %c0_70 = arith.constant 0 : index
    %c0_71 = arith.constant 0 : index
    %90 = vector.load %arg3[%c0_70, %c0_71] : memref<64x32xf32, #tpu.memory_space<vmem>>, vector<64x32xf32>
    %cst_72 = arith.constant dense<0.000000e+00> : vector<100x32xf32>
    %91 = tpu.matmul %89, %90, %cst_72 {dimension_numbers = #tpu.dot_dimension_numbers<[1], [0], [0], [1], [0, 0, 1, 1], [], []>} : vector<100x64xf32>, vector<64x32xf32>, vector<100x32xf32> -> vector<100x32xf32>
    %c0_73 = arith.constant 0 : index
    %c0_74 = arith.constant 0 : index
    %92 = vector.load %arg4[%c0_73, %c0_74] : memref<1x32xf32, #tpu.memory_space<vmem>>, vector<1x32xf32>
    %93 = vector.broadcast %92 : vector<1x32xf32> to vector<100x32xf32>
    %94 = arith.addf %91, %93 : vector<100x32xf32>
    %cst_75 = arith.constant 0.000000e+00 : f32
    %95 = vector.broadcast %cst_75 : f32 to vector<100x32xf32>
    %96 = arith.maximumf %94, %95 : vector<100x32xf32>
    %97 = vector.extract_strided_slice %96 {offsets = [0, 0], sizes = [89, 32], strides = [1, 1]} : vector<100x32xf32> to vector<89x32xf32>
    %c5 = arith.constant 5 : index
    %c0_76 = arith.constant 0 : index
    %c0_77 = arith.constant 0 : index
    %98 = vector.load %arg5[%c5, %c0_76, %c0_77] : memref<16x32x64xf32, #tpu.memory_space<vmem>>, vector<1x32x64xf32>
    %99 = vector.shape_cast %98 : vector<1x32x64xf32> to vector<32x64xf32>
    %cst_78 = arith.constant dense<0.000000e+00> : vector<89x64xf32>
    %100 = tpu.matmul %97, %99, %cst_78 {dimension_numbers = #tpu.dot_dimension_numbers<[1], [0], [0], [1], [0, 0, 1, 1], [], []>} : vector<89x32xf32>, vector<32x64xf32>, vector<89x64xf32> -> vector<89x64xf32>
    %101 = arith.addf %87, %100 : vector<89x64xf32>
    %102 = vector.extract_strided_slice %96 {offsets = [1, 0], sizes = [89, 32], strides = [1, 1]} : vector<100x32xf32> to vector<89x32xf32>
    %c7 = arith.constant 7 : index
    %c0_79 = arith.constant 0 : index
    %c0_80 = arith.constant 0 : index
    %103 = vector.load %arg5[%c7, %c0_79, %c0_80] : memref<16x32x64xf32, #tpu.memory_space<vmem>>, vector<1x32x64xf32>
    %104 = vector.shape_cast %103 : vector<1x32x64xf32> to vector<32x64xf32>
    %cst_81 = arith.constant dense<0.000000e+00> : vector<89x64xf32>
    %105 = tpu.matmul %102, %104, %cst_81 {dimension_numbers = #tpu.dot_dimension_numbers<[1], [0], [0], [1], [0, 0, 1, 1], [], []>} : vector<89x32xf32>, vector<32x64xf32>, vector<89x64xf32> -> vector<89x64xf32>
    %106 = arith.addf %101, %105 : vector<89x64xf32>
    %107 = vector.extract_strided_slice %96 {offsets = [10, 0], sizes = [89, 32], strides = [1, 1]} : vector<100x32xf32> to vector<89x32xf32>
    %c13 = arith.constant 13 : index
    %c0_82 = arith.constant 0 : index
    %c0_83 = arith.constant 0 : index
    %108 = vector.load %arg5[%c13, %c0_82, %c0_83] : memref<16x32x64xf32, #tpu.memory_space<vmem>>, vector<1x32x64xf32>
    %109 = vector.shape_cast %108 : vector<1x32x64xf32> to vector<32x64xf32>
    %cst_84 = arith.constant dense<0.000000e+00> : vector<89x64xf32>
    %110 = tpu.matmul %107, %109, %cst_84 {dimension_numbers = #tpu.dot_dimension_numbers<[1], [0], [0], [1], [0, 0, 1, 1], [], []>} : vector<89x32xf32>, vector<32x64xf32>, vector<89x64xf32> -> vector<89x64xf32>
    %111 = arith.addf %106, %110 : vector<89x64xf32>
    %112 = vector.extract_strided_slice %96 {offsets = [11, 0], sizes = [89, 32], strides = [1, 1]} : vector<100x32xf32> to vector<89x32xf32>
    %c15 = arith.constant 15 : index
    %c0_85 = arith.constant 0 : index
    %c0_86 = arith.constant 0 : index
    %113 = vector.load %arg5[%c15, %c0_85, %c0_86] : memref<16x32x64xf32, #tpu.memory_space<vmem>>, vector<1x32x64xf32>
    %114 = vector.shape_cast %113 : vector<1x32x64xf32> to vector<32x64xf32>
    %cst_87 = arith.constant dense<0.000000e+00> : vector<89x64xf32>
    %115 = tpu.matmul %112, %114, %cst_87 {dimension_numbers = #tpu.dot_dimension_numbers<[1], [0], [0], [1], [0, 0, 1, 1], [], []>} : vector<89x32xf32>, vector<32x64xf32>, vector<89x64xf32> -> vector<89x64xf32>
    %116 = arith.addf %111, %115 : vector<89x64xf32>
    %c0_88 = arith.constant 0 : index
    %c0_89 = arith.constant 0 : index
    %117 = vector.load %arg6[%c0_88, %c0_89] : memref<1x64xf32, #tpu.memory_space<vmem>>, vector<1x64xf32>
    %118 = vector.broadcast %117 : vector<1x64xf32> to vector<89x64xf32>
    %119 = arith.addf %116, %118 : vector<89x64xf32>
    %cst_90 = arith.constant 0.000000e+00 : f32
    %120 = vector.broadcast %cst_90 : f32 to vector<89x64xf32>
    %121 = arith.maximumf %119, %120 : vector<89x64xf32>
    %cst_91 = arith.constant 0.000000e+00 : f32
    %122 = vector.broadcast %cst_91 : f32 to vector<67x32xf32>
    %123 = vector.extract_strided_slice %121 {offsets = [0, 0], sizes = [67, 64], strides = [1, 1]} : vector<89x64xf32> to vector<67x64xf32>
    %c0_92 = arith.constant 0 : index
    %c0_93 = arith.constant 0 : index
    %c0_94 = arith.constant 0 : index
    %124 = vector.load %arg7[%c0_92, %c0_93, %c0_94] : memref<9x64x32xf32, #tpu.memory_space<vmem>>, vector<1x64x32xf32>
    %125 = vector.shape_cast %124 : vector<1x64x32xf32> to vector<64x32xf32>
    %cst_95 = arith.constant dense<0.000000e+00> : vector<67x32xf32>
    %126 = tpu.matmul %123, %125, %cst_95 {dimension_numbers = #tpu.dot_dimension_numbers<[1], [0], [0], [1], [0, 0, 1, 1], [], []>} : vector<67x64xf32>, vector<64x32xf32>, vector<67x32xf32> -> vector<67x32xf32>
    %127 = arith.addf %122, %126 : vector<67x32xf32>
    %128 = vector.extract_strided_slice %121 {offsets = [1, 0], sizes = [67, 64], strides = [1, 1]} : vector<89x64xf32> to vector<67x64xf32>
    %c1_96 = arith.constant 1 : index
    %c0_97 = arith.constant 0 : index
    %c0_98 = arith.constant 0 : index
    %129 = vector.load %arg7[%c1_96, %c0_97, %c0_98] : memref<9x64x32xf32, #tpu.memory_space<vmem>>, vector<1x64x32xf32>
    %130 = vector.shape_cast %129 : vector<1x64x32xf32> to vector<64x32xf32>
    %cst_99 = arith.constant dense<0.000000e+00> : vector<67x32xf32>
    %131 = tpu.matmul %128, %130, %cst_99 {dimension_numbers = #tpu.dot_dimension_numbers<[1], [0], [0], [1], [0, 0, 1, 1], [], []>} : vector<67x64xf32>, vector<64x32xf32>, vector<67x32xf32> -> vector<67x32xf32>
    %132 = arith.addf %127, %131 : vector<67x32xf32>
    %133 = vector.extract_strided_slice %121 {offsets = [2, 0], sizes = [67, 64], strides = [1, 1]} : vector<89x64xf32> to vector<67x64xf32>
    %c2_100 = arith.constant 2 : index
    %c0_101 = arith.constant 0 : index
    %c0_102 = arith.constant 0 : index
    %134 = vector.load %arg7[%c2_100, %c0_101, %c0_102] : memref<9x64x32xf32, #tpu.memory_space<vmem>>, vector<1x64x32xf32>
    %135 = vector.shape_cast %134 : vector<1x64x32xf32> to vector<64x32xf32>
    %cst_103 = arith.constant dense<0.000000e+00> : vector<67x32xf32>
    %136 = tpu.matmul %133, %135, %cst_103 {dimension_numbers = #tpu.dot_dimension_numbers<[1], [0], [0], [1], [0, 0, 1, 1], [], []>} : vector<67x64xf32>, vector<64x32xf32>, vector<67x32xf32> -> vector<67x32xf32>
    %137 = arith.addf %132, %136 : vector<67x32xf32>
    %138 = vector.extract_strided_slice %121 {offsets = [10, 0], sizes = [67, 64], strides = [1, 1]} : vector<89x64xf32> to vector<67x64xf32>
    %c3_104 = arith.constant 3 : index
    %c0_105 = arith.constant 0 : index
    %c0_106 = arith.constant 0 : index
    %139 = vector.load %arg7[%c3_104, %c0_105, %c0_106] : memref<9x64x32xf32, #tpu.memory_space<vmem>>, vector<1x64x32xf32>
    %140 = vector.shape_cast %139 : vector<1x64x32xf32> to vector<64x32xf32>
    %cst_107 = arith.constant dense<0.000000e+00> : vector<67x32xf32>
    %141 = tpu.matmul %138, %140, %cst_107 {dimension_numbers = #tpu.dot_dimension_numbers<[1], [0], [0], [1], [0, 0, 1, 1], [], []>} : vector<67x64xf32>, vector<64x32xf32>, vector<67x32xf32> -> vector<67x32xf32>
    %142 = arith.addf %137, %141 : vector<67x32xf32>
    %143 = vector.extract_strided_slice %121 {offsets = [11, 0], sizes = [67, 64], strides = [1, 1]} : vector<89x64xf32> to vector<67x64xf32>
    %c4_108 = arith.constant 4 : index
    %c0_109 = arith.constant 0 : index
    %c0_110 = arith.constant 0 : index
    %144 = vector.load %arg7[%c4_108, %c0_109, %c0_110] : memref<9x64x32xf32, #tpu.memory_space<vmem>>, vector<1x64x32xf32>
    %145 = vector.shape_cast %144 : vector<1x64x32xf32> to vector<64x32xf32>
    %cst_111 = arith.constant dense<0.000000e+00> : vector<67x32xf32>
    %146 = tpu.matmul %143, %145, %cst_111 {dimension_numbers = #tpu.dot_dimension_numbers<[1], [0], [0], [1], [0, 0, 1, 1], [], []>} : vector<67x64xf32>, vector<64x32xf32>, vector<67x32xf32> -> vector<67x32xf32>
    %147 = arith.addf %142, %146 : vector<67x32xf32>
    %148 = vector.extract_strided_slice %121 {offsets = [12, 0], sizes = [67, 64], strides = [1, 1]} : vector<89x64xf32> to vector<67x64xf32>
    %c5_112 = arith.constant 5 : index
    %c0_113 = arith.constant 0 : index
    %c0_114 = arith.constant 0 : index
    %149 = vector.load %arg7[%c5_112, %c0_113, %c0_114] : memref<9x64x32xf32, #tpu.memory_space<vmem>>, vector<1x64x32xf32>
    %150 = vector.shape_cast %149 : vector<1x64x32xf32> to vector<64x32xf32>
    %cst_115 = arith.constant dense<0.000000e+00> : vector<67x32xf32>
    %151 = tpu.matmul %148, %150, %cst_115 {dimension_numbers = #tpu.dot_dimension_numbers<[1], [0], [0], [1], [0, 0, 1, 1], [], []>} : vector<67x64xf32>, vector<64x32xf32>, vector<67x32xf32> -> vector<67x32xf32>
    %152 = arith.addf %147, %151 : vector<67x32xf32>
    %153 = vector.extract_strided_slice %121 {offsets = [20, 0], sizes = [67, 64], strides = [1, 1]} : vector<89x64xf32> to vector<67x64xf32>
    %c6_116 = arith.constant 6 : index
    %c0_117 = arith.constant 0 : index
    %c0_118 = arith.constant 0 : index
    %154 = vector.load %arg7[%c6_116, %c0_117, %c0_118] : memref<9x64x32xf32, #tpu.memory_space<vmem>>, vector<1x64x32xf32>
    %155 = vector.shape_cast %154 : vector<1x64x32xf32> to vector<64x32xf32>
    %cst_119 = arith.constant dense<0.000000e+00> : vector<67x32xf32>
    %156 = tpu.matmul %153, %155, %cst_119 {dimension_numbers = #tpu.dot_dimension_numbers<[1], [0], [0], [1], [0, 0, 1, 1], [], []>} : vector<67x64xf32>, vector<64x32xf32>, vector<67x32xf32> -> vector<67x32xf32>
    %157 = arith.addf %152, %156 : vector<67x32xf32>
    %158 = vector.extract_strided_slice %121 {offsets = [21, 0], sizes = [67, 64], strides = [1, 1]} : vector<89x64xf32> to vector<67x64xf32>
    %c7_120 = arith.constant 7 : index
    %c0_121 = arith.constant 0 : index
    %c0_122 = arith.constant 0 : index
    %159 = vector.load %arg7[%c7_120, %c0_121, %c0_122] : memref<9x64x32xf32, #tpu.memory_space<vmem>>, vector<1x64x32xf32>
    %160 = vector.shape_cast %159 : vector<1x64x32xf32> to vector<64x32xf32>
    %cst_123 = arith.constant dense<0.000000e+00> : vector<67x32xf32>
    %161 = tpu.matmul %158, %160, %cst_123 {dimension_numbers = #tpu.dot_dimension_numbers<[1], [0], [0], [1], [0, 0, 1, 1], [], []>} : vector<67x64xf32>, vector<64x32xf32>, vector<67x32xf32> -> vector<67x32xf32>
    %162 = arith.addf %157, %161 : vector<67x32xf32>
    %163 = vector.extract_strided_slice %121 {offsets = [22, 0], sizes = [67, 64], strides = [1, 1]} : vector<89x64xf32> to vector<67x64xf32>
    %c8_124 = arith.constant 8 : index
    %c0_125 = arith.constant 0 : index
    %c0_126 = arith.constant 0 : index
    %164 = vector.load %arg7[%c8_124, %c0_125, %c0_126] : memref<9x64x32xf32, #tpu.memory_space<vmem>>, vector<1x64x32xf32>
    %165 = vector.shape_cast %164 : vector<1x64x32xf32> to vector<64x32xf32>
    %cst_127 = arith.constant dense<0.000000e+00> : vector<67x32xf32>
    %166 = tpu.matmul %163, %165, %cst_127 {dimension_numbers = #tpu.dot_dimension_numbers<[1], [0], [0], [1], [0, 0, 1, 1], [], []>} : vector<67x64xf32>, vector<64x32xf32>, vector<67x32xf32> -> vector<67x32xf32>
    %167 = arith.addf %162, %166 : vector<67x32xf32>
    %c0_128 = arith.constant 0 : index
    %c0_129 = arith.constant 0 : index
    %168 = vector.load %arg8[%c0_128, %c0_129] : memref<1x32xf32, #tpu.memory_space<vmem>>, vector<1x32xf32>
    %169 = vector.broadcast %168 : vector<1x32xf32> to vector<67x32xf32>
    %170 = arith.addf %167, %169 : vector<67x32xf32>
    %cst_130 = arith.constant 0.000000e+00 : f32
    %171 = vector.broadcast %cst_130 : f32 to vector<67x32xf32>
    %172 = arith.maximumf %170, %171 : vector<67x32xf32>
    %cst_131 = arith.constant 0.000000e+00 : f32
    %173 = vector.broadcast %cst_131 : f32 to vector<67x32xf32>
    %174 = vector.extract_strided_slice %172 {offsets = [0, 0], sizes = [67, 1], strides = [1, 1]} : vector<67x32xf32> to vector<67x1xf32>
    %c0_132 = arith.constant 0 : index
    %c0_133 = arith.constant 0 : index
    %c0_134 = arith.constant 0 : index
    %175 = vector.load %arg9[%c0_132, %c0_133, %c0_134] : memref<32x67x32xf32, #tpu.memory_space<vmem>>, vector<1x67x32xf32>
    %176 = vector.shape_cast %175 : vector<1x67x32xf32> to vector<67x32xf32>
    %177 = vector.broadcast %174 : vector<67x1xf32> to vector<67x32xf32>
    %178 = arith.mulf %177, %176 : vector<67x32xf32>
    %179 = arith.addf %173, %178 : vector<67x32xf32>
    %180 = vector.extract_strided_slice %172 {offsets = [0, 1], sizes = [67, 1], strides = [1, 1]} : vector<67x32xf32> to vector<67x1xf32>
    %c1_135 = arith.constant 1 : index
    %c0_136 = arith.constant 0 : index
    %c0_137 = arith.constant 0 : index
    %181 = vector.load %arg9[%c1_135, %c0_136, %c0_137] : memref<32x67x32xf32, #tpu.memory_space<vmem>>, vector<1x67x32xf32>
    %182 = vector.shape_cast %181 : vector<1x67x32xf32> to vector<67x32xf32>
    %183 = vector.broadcast %180 : vector<67x1xf32> to vector<67x32xf32>
    %184 = arith.mulf %183, %182 : vector<67x32xf32>
    %185 = arith.addf %179, %184 : vector<67x32xf32>
    %186 = vector.extract_strided_slice %172 {offsets = [0, 2], sizes = [67, 1], strides = [1, 1]} : vector<67x32xf32> to vector<67x1xf32>
    %c2_138 = arith.constant 2 : index
    %c0_139 = arith.constant 0 : index
    %c0_140 = arith.constant 0 : index
    %187 = vector.load %arg9[%c2_138, %c0_139, %c0_140] : memref<32x67x32xf32, #tpu.memory_space<vmem>>, vector<1x67x32xf32>
    %188 = vector.shape_cast %187 : vector<1x67x32xf32> to vector<67x32xf32>
    %189 = vector.broadcast %186 : vector<67x1xf32> to vector<67x32xf32>
    %190 = arith.mulf %189, %188 : vector<67x32xf32>
    %191 = arith.addf %185, %190 : vector<67x32xf32>
    %192 = vector.extract_strided_slice %172 {offsets = [0, 3], sizes = [67, 1], strides = [1, 1]} : vector<67x32xf32> to vector<67x1xf32>
    %c3_141 = arith.constant 3 : index
    %c0_142 = arith.constant 0 : index
    %c0_143 = arith.constant 0 : index
    %193 = vector.load %arg9[%c3_141, %c0_142, %c0_143] : memref<32x67x32xf32, #tpu.memory_space<vmem>>, vector<1x67x32xf32>
    %194 = vector.shape_cast %193 : vector<1x67x32xf32> to vector<67x32xf32>
    %195 = vector.broadcast %192 : vector<67x1xf32> to vector<67x32xf32>
    %196 = arith.mulf %195, %194 : vector<67x32xf32>
    %197 = arith.addf %191, %196 : vector<67x32xf32>
    %198 = vector.extract_strided_slice %172 {offsets = [0, 4], sizes = [67, 1], strides = [1, 1]} : vector<67x32xf32> to vector<67x1xf32>
    %c4_144 = arith.constant 4 : index
    %c0_145 = arith.constant 0 : index
    %c0_146 = arith.constant 0 : index
    %199 = vector.load %arg9[%c4_144, %c0_145, %c0_146] : memref<32x67x32xf32, #tpu.memory_space<vmem>>, vector<1x67x32xf32>
    %200 = vector.shape_cast %199 : vector<1x67x32xf32> to vector<67x32xf32>
    %201 = vector.broadcast %198 : vector<67x1xf32> to vector<67x32xf32>
    %202 = arith.mulf %201, %200 : vector<67x32xf32>
    %203 = arith.addf %197, %202 : vector<67x32xf32>
    %204 = vector.extract_strided_slice %172 {offsets = [0, 5], sizes = [67, 1], strides = [1, 1]} : vector<67x32xf32> to vector<67x1xf32>
    %c5_147 = arith.constant 5 : index
    %c0_148 = arith.constant 0 : index
    %c0_149 = arith.constant 0 : index
    %205 = vector.load %arg9[%c5_147, %c0_148, %c0_149] : memref<32x67x32xf32, #tpu.memory_space<vmem>>, vector<1x67x32xf32>
    %206 = vector.shape_cast %205 : vector<1x67x32xf32> to vector<67x32xf32>
    %207 = vector.broadcast %204 : vector<67x1xf32> to vector<67x32xf32>
    %208 = arith.mulf %207, %206 : vector<67x32xf32>
    %209 = arith.addf %203, %208 : vector<67x32xf32>
    %210 = vector.extract_strided_slice %172 {offsets = [0, 6], sizes = [67, 1], strides = [1, 1]} : vector<67x32xf32> to vector<67x1xf32>
    %c6_150 = arith.constant 6 : index
    %c0_151 = arith.constant 0 : index
    %c0_152 = arith.constant 0 : index
    %211 = vector.load %arg9[%c6_150, %c0_151, %c0_152] : memref<32x67x32xf32, #tpu.memory_space<vmem>>, vector<1x67x32xf32>
    %212 = vector.shape_cast %211 : vector<1x67x32xf32> to vector<67x32xf32>
    %213 = vector.broadcast %210 : vector<67x1xf32> to vector<67x32xf32>
    %214 = arith.mulf %213, %212 : vector<67x32xf32>
    %215 = arith.addf %209, %214 : vector<67x32xf32>
    %216 = vector.extract_strided_slice %172 {offsets = [0, 7], sizes = [67, 1], strides = [1, 1]} : vector<67x32xf32> to vector<67x1xf32>
    %c7_153 = arith.constant 7 : index
    %c0_154 = arith.constant 0 : index
    %c0_155 = arith.constant 0 : index
    %217 = vector.load %arg9[%c7_153, %c0_154, %c0_155] : memref<32x67x32xf32, #tpu.memory_space<vmem>>, vector<1x67x32xf32>
    %218 = vector.shape_cast %217 : vector<1x67x32xf32> to vector<67x32xf32>
    %219 = vector.broadcast %216 : vector<67x1xf32> to vector<67x32xf32>
    %220 = arith.mulf %219, %218 : vector<67x32xf32>
    %221 = arith.addf %215, %220 : vector<67x32xf32>
    %222 = vector.extract_strided_slice %172 {offsets = [0, 8], sizes = [67, 1], strides = [1, 1]} : vector<67x32xf32> to vector<67x1xf32>
    %c8_156 = arith.constant 8 : index
    %c0_157 = arith.constant 0 : index
    %c0_158 = arith.constant 0 : index
    %223 = vector.load %arg9[%c8_156, %c0_157, %c0_158] : memref<32x67x32xf32, #tpu.memory_space<vmem>>, vector<1x67x32xf32>
    %224 = vector.shape_cast %223 : vector<1x67x32xf32> to vector<67x32xf32>
    %225 = vector.broadcast %222 : vector<67x1xf32> to vector<67x32xf32>
    %226 = arith.mulf %225, %224 : vector<67x32xf32>
    %227 = arith.addf %221, %226 : vector<67x32xf32>
    %228 = vector.extract_strided_slice %172 {offsets = [0, 9], sizes = [67, 1], strides = [1, 1]} : vector<67x32xf32> to vector<67x1xf32>
    %c9_159 = arith.constant 9 : index
    %c0_160 = arith.constant 0 : index
    %c0_161 = arith.constant 0 : index
    %229 = vector.load %arg9[%c9_159, %c0_160, %c0_161] : memref<32x67x32xf32, #tpu.memory_space<vmem>>, vector<1x67x32xf32>
    %230 = vector.shape_cast %229 : vector<1x67x32xf32> to vector<67x32xf32>
    %231 = vector.broadcast %228 : vector<67x1xf32> to vector<67x32xf32>
    %232 = arith.mulf %231, %230 : vector<67x32xf32>
    %233 = arith.addf %227, %232 : vector<67x32xf32>
    %234 = vector.extract_strided_slice %172 {offsets = [0, 10], sizes = [67, 1], strides = [1, 1]} : vector<67x32xf32> to vector<67x1xf32>
    %c10_162 = arith.constant 10 : index
    %c0_163 = arith.constant 0 : index
    %c0_164 = arith.constant 0 : index
    %235 = vector.load %arg9[%c10_162, %c0_163, %c0_164] : memref<32x67x32xf32, #tpu.memory_space<vmem>>, vector<1x67x32xf32>
    %236 = vector.shape_cast %235 : vector<1x67x32xf32> to vector<67x32xf32>
    %237 = vector.broadcast %234 : vector<67x1xf32> to vector<67x32xf32>
    %238 = arith.mulf %237, %236 : vector<67x32xf32>
    %239 = arith.addf %233, %238 : vector<67x32xf32>
    %240 = vector.extract_strided_slice %172 {offsets = [0, 11], sizes = [67, 1], strides = [1, 1]} : vector<67x32xf32> to vector<67x1xf32>
    %c11_165 = arith.constant 11 : index
    %c0_166 = arith.constant 0 : index
    %c0_167 = arith.constant 0 : index
    %241 = vector.load %arg9[%c11_165, %c0_166, %c0_167] : memref<32x67x32xf32, #tpu.memory_space<vmem>>, vector<1x67x32xf32>
    %242 = vector.shape_cast %241 : vector<1x67x32xf32> to vector<67x32xf32>
    %243 = vector.broadcast %240 : vector<67x1xf32> to vector<67x32xf32>
    %244 = arith.mulf %243, %242 : vector<67x32xf32>
    %245 = arith.addf %239, %244 : vector<67x32xf32>
    %246 = vector.extract_strided_slice %172 {offsets = [0, 12], sizes = [67, 1], strides = [1, 1]} : vector<67x32xf32> to vector<67x1xf32>
    %c12_168 = arith.constant 12 : index
    %c0_169 = arith.constant 0 : index
    %c0_170 = arith.constant 0 : index
    %247 = vector.load %arg9[%c12_168, %c0_169, %c0_170] : memref<32x67x32xf32, #tpu.memory_space<vmem>>, vector<1x67x32xf32>
    %248 = vector.shape_cast %247 : vector<1x67x32xf32> to vector<67x32xf32>
    %249 = vector.broadcast %246 : vector<67x1xf32> to vector<67x32xf32>
    %250 = arith.mulf %249, %248 : vector<67x32xf32>
    %251 = arith.addf %245, %250 : vector<67x32xf32>
    %252 = vector.extract_strided_slice %172 {offsets = [0, 13], sizes = [67, 1], strides = [1, 1]} : vector<67x32xf32> to vector<67x1xf32>
    %c13_171 = arith.constant 13 : index
    %c0_172 = arith.constant 0 : index
    %c0_173 = arith.constant 0 : index
    %253 = vector.load %arg9[%c13_171, %c0_172, %c0_173] : memref<32x67x32xf32, #tpu.memory_space<vmem>>, vector<1x67x32xf32>
    %254 = vector.shape_cast %253 : vector<1x67x32xf32> to vector<67x32xf32>
    %255 = vector.broadcast %252 : vector<67x1xf32> to vector<67x32xf32>
    %256 = arith.mulf %255, %254 : vector<67x32xf32>
    %257 = arith.addf %251, %256 : vector<67x32xf32>
    %258 = vector.extract_strided_slice %172 {offsets = [0, 14], sizes = [67, 1], strides = [1, 1]} : vector<67x32xf32> to vector<67x1xf32>
    %c14_174 = arith.constant 14 : index
    %c0_175 = arith.constant 0 : index
    %c0_176 = arith.constant 0 : index
    %259 = vector.load %arg9[%c14_174, %c0_175, %c0_176] : memref<32x67x32xf32, #tpu.memory_space<vmem>>, vector<1x67x32xf32>
    %260 = vector.shape_cast %259 : vector<1x67x32xf32> to vector<67x32xf32>
    %261 = vector.broadcast %258 : vector<67x1xf32> to vector<67x32xf32>
    %262 = arith.mulf %261, %260 : vector<67x32xf32>
    %263 = arith.addf %257, %262 : vector<67x32xf32>
    %264 = vector.extract_strided_slice %172 {offsets = [0, 15], sizes = [67, 1], strides = [1, 1]} : vector<67x32xf32> to vector<67x1xf32>
    %c15_177 = arith.constant 15 : index
    %c0_178 = arith.constant 0 : index
    %c0_179 = arith.constant 0 : index
    %265 = vector.load %arg9[%c15_177, %c0_178, %c0_179] : memref<32x67x32xf32, #tpu.memory_space<vmem>>, vector<1x67x32xf32>
    %266 = vector.shape_cast %265 : vector<1x67x32xf32> to vector<67x32xf32>
    %267 = vector.broadcast %264 : vector<67x1xf32> to vector<67x32xf32>
    %268 = arith.mulf %267, %266 : vector<67x32xf32>
    %269 = arith.addf %263, %268 : vector<67x32xf32>
    %270 = vector.extract_strided_slice %172 {offsets = [0, 16], sizes = [67, 1], strides = [1, 1]} : vector<67x32xf32> to vector<67x1xf32>
    %c16 = arith.constant 16 : index
    %c0_180 = arith.constant 0 : index
    %c0_181 = arith.constant 0 : index
    %271 = vector.load %arg9[%c16, %c0_180, %c0_181] : memref<32x67x32xf32, #tpu.memory_space<vmem>>, vector<1x67x32xf32>
    %272 = vector.shape_cast %271 : vector<1x67x32xf32> to vector<67x32xf32>
    %273 = vector.broadcast %270 : vector<67x1xf32> to vector<67x32xf32>
    %274 = arith.mulf %273, %272 : vector<67x32xf32>
    %275 = arith.addf %269, %274 : vector<67x32xf32>
    %276 = vector.extract_strided_slice %172 {offsets = [0, 17], sizes = [67, 1], strides = [1, 1]} : vector<67x32xf32> to vector<67x1xf32>
    %c17 = arith.constant 17 : index
    %c0_182 = arith.constant 0 : index
    %c0_183 = arith.constant 0 : index
    %277 = vector.load %arg9[%c17, %c0_182, %c0_183] : memref<32x67x32xf32, #tpu.memory_space<vmem>>, vector<1x67x32xf32>
    %278 = vector.shape_cast %277 : vector<1x67x32xf32> to vector<67x32xf32>
    %279 = vector.broadcast %276 : vector<67x1xf32> to vector<67x32xf32>
    %280 = arith.mulf %279, %278 : vector<67x32xf32>
    %281 = arith.addf %275, %280 : vector<67x32xf32>
    %282 = vector.extract_strided_slice %172 {offsets = [0, 18], sizes = [67, 1], strides = [1, 1]} : vector<67x32xf32> to vector<67x1xf32>
    %c18 = arith.constant 18 : index
    %c0_184 = arith.constant 0 : index
    %c0_185 = arith.constant 0 : index
    %283 = vector.load %arg9[%c18, %c0_184, %c0_185] : memref<32x67x32xf32, #tpu.memory_space<vmem>>, vector<1x67x32xf32>
    %284 = vector.shape_cast %283 : vector<1x67x32xf32> to vector<67x32xf32>
    %285 = vector.broadcast %282 : vector<67x1xf32> to vector<67x32xf32>
    %286 = arith.mulf %285, %284 : vector<67x32xf32>
    %287 = arith.addf %281, %286 : vector<67x32xf32>
    %288 = vector.extract_strided_slice %172 {offsets = [0, 19], sizes = [67, 1], strides = [1, 1]} : vector<67x32xf32> to vector<67x1xf32>
    %c19 = arith.constant 19 : index
    %c0_186 = arith.constant 0 : index
    %c0_187 = arith.constant 0 : index
    %289 = vector.load %arg9[%c19, %c0_186, %c0_187] : memref<32x67x32xf32, #tpu.memory_space<vmem>>, vector<1x67x32xf32>
    %290 = vector.shape_cast %289 : vector<1x67x32xf32> to vector<67x32xf32>
    %291 = vector.broadcast %288 : vector<67x1xf32> to vector<67x32xf32>
    %292 = arith.mulf %291, %290 : vector<67x32xf32>
    %293 = arith.addf %287, %292 : vector<67x32xf32>
    %294 = vector.extract_strided_slice %172 {offsets = [0, 20], sizes = [67, 1], strides = [1, 1]} : vector<67x32xf32> to vector<67x1xf32>
    %c20 = arith.constant 20 : index
    %c0_188 = arith.constant 0 : index
    %c0_189 = arith.constant 0 : index
    %295 = vector.load %arg9[%c20, %c0_188, %c0_189] : memref<32x67x32xf32, #tpu.memory_space<vmem>>, vector<1x67x32xf32>
    %296 = vector.shape_cast %295 : vector<1x67x32xf32> to vector<67x32xf32>
    %297 = vector.broadcast %294 : vector<67x1xf32> to vector<67x32xf32>
    %298 = arith.mulf %297, %296 : vector<67x32xf32>
    %299 = arith.addf %293, %298 : vector<67x32xf32>
    %300 = vector.extract_strided_slice %172 {offsets = [0, 21], sizes = [67, 1], strides = [1, 1]} : vector<67x32xf32> to vector<67x1xf32>
    %c21 = arith.constant 21 : index
    %c0_190 = arith.constant 0 : index
    %c0_191 = arith.constant 0 : index
    %301 = vector.load %arg9[%c21, %c0_190, %c0_191] : memref<32x67x32xf32, #tpu.memory_space<vmem>>, vector<1x67x32xf32>
    %302 = vector.shape_cast %301 : vector<1x67x32xf32> to vector<67x32xf32>
    %303 = vector.broadcast %300 : vector<67x1xf32> to vector<67x32xf32>
    %304 = arith.mulf %303, %302 : vector<67x32xf32>
    %305 = arith.addf %299, %304 : vector<67x32xf32>
    %306 = vector.extract_strided_slice %172 {offsets = [0, 22], sizes = [67, 1], strides = [1, 1]} : vector<67x32xf32> to vector<67x1xf32>
    %c22 = arith.constant 22 : index
    %c0_192 = arith.constant 0 : index
    %c0_193 = arith.constant 0 : index
    %307 = vector.load %arg9[%c22, %c0_192, %c0_193] : memref<32x67x32xf32, #tpu.memory_space<vmem>>, vector<1x67x32xf32>
    %308 = vector.shape_cast %307 : vector<1x67x32xf32> to vector<67x32xf32>
    %309 = vector.broadcast %306 : vector<67x1xf32> to vector<67x32xf32>
    %310 = arith.mulf %309, %308 : vector<67x32xf32>
    %311 = arith.addf %305, %310 : vector<67x32xf32>
    %312 = vector.extract_strided_slice %172 {offsets = [0, 23], sizes = [67, 1], strides = [1, 1]} : vector<67x32xf32> to vector<67x1xf32>
    %c23 = arith.constant 23 : index
    %c0_194 = arith.constant 0 : index
    %c0_195 = arith.constant 0 : index
    %313 = vector.load %arg9[%c23, %c0_194, %c0_195] : memref<32x67x32xf32, #tpu.memory_space<vmem>>, vector<1x67x32xf32>
    %314 = vector.shape_cast %313 : vector<1x67x32xf32> to vector<67x32xf32>
    %315 = vector.broadcast %312 : vector<67x1xf32> to vector<67x32xf32>
    %316 = arith.mulf %315, %314 : vector<67x32xf32>
    %317 = arith.addf %311, %316 : vector<67x32xf32>
    %318 = vector.extract_strided_slice %172 {offsets = [0, 24], sizes = [67, 1], strides = [1, 1]} : vector<67x32xf32> to vector<67x1xf32>
    %c24 = arith.constant 24 : index
    %c0_196 = arith.constant 0 : index
    %c0_197 = arith.constant 0 : index
    %319 = vector.load %arg9[%c24, %c0_196, %c0_197] : memref<32x67x32xf32, #tpu.memory_space<vmem>>, vector<1x67x32xf32>
    %320 = vector.shape_cast %319 : vector<1x67x32xf32> to vector<67x32xf32>
    %321 = vector.broadcast %318 : vector<67x1xf32> to vector<67x32xf32>
    %322 = arith.mulf %321, %320 : vector<67x32xf32>
    %323 = arith.addf %317, %322 : vector<67x32xf32>
    %324 = vector.extract_strided_slice %172 {offsets = [0, 25], sizes = [67, 1], strides = [1, 1]} : vector<67x32xf32> to vector<67x1xf32>
    %c25 = arith.constant 25 : index
    %c0_198 = arith.constant 0 : index
    %c0_199 = arith.constant 0 : index
    %325 = vector.load %arg9[%c25, %c0_198, %c0_199] : memref<32x67x32xf32, #tpu.memory_space<vmem>>, vector<1x67x32xf32>
    %326 = vector.shape_cast %325 : vector<1x67x32xf32> to vector<67x32xf32>
    %327 = vector.broadcast %324 : vector<67x1xf32> to vector<67x32xf32>
    %328 = arith.mulf %327, %326 : vector<67x32xf32>
    %329 = arith.addf %323, %328 : vector<67x32xf32>
    %330 = vector.extract_strided_slice %172 {offsets = [0, 26], sizes = [67, 1], strides = [1, 1]} : vector<67x32xf32> to vector<67x1xf32>
    %c26 = arith.constant 26 : index
    %c0_200 = arith.constant 0 : index
    %c0_201 = arith.constant 0 : index
    %331 = vector.load %arg9[%c26, %c0_200, %c0_201] : memref<32x67x32xf32, #tpu.memory_space<vmem>>, vector<1x67x32xf32>
    %332 = vector.shape_cast %331 : vector<1x67x32xf32> to vector<67x32xf32>
    %333 = vector.broadcast %330 : vector<67x1xf32> to vector<67x32xf32>
    %334 = arith.mulf %333, %332 : vector<67x32xf32>
    %335 = arith.addf %329, %334 : vector<67x32xf32>
    %336 = vector.extract_strided_slice %172 {offsets = [0, 27], sizes = [67, 1], strides = [1, 1]} : vector<67x32xf32> to vector<67x1xf32>
    %c27 = arith.constant 27 : index
    %c0_202 = arith.constant 0 : index
    %c0_203 = arith.constant 0 : index
    %337 = vector.load %arg9[%c27, %c0_202, %c0_203] : memref<32x67x32xf32, #tpu.memory_space<vmem>>, vector<1x67x32xf32>
    %338 = vector.shape_cast %337 : vector<1x67x32xf32> to vector<67x32xf32>
    %339 = vector.broadcast %336 : vector<67x1xf32> to vector<67x32xf32>
    %340 = arith.mulf %339, %338 : vector<67x32xf32>
    %341 = arith.addf %335, %340 : vector<67x32xf32>
    %342 = vector.extract_strided_slice %172 {offsets = [0, 28], sizes = [67, 1], strides = [1, 1]} : vector<67x32xf32> to vector<67x1xf32>
    %c28 = arith.constant 28 : index
    %c0_204 = arith.constant 0 : index
    %c0_205 = arith.constant 0 : index
    %343 = vector.load %arg9[%c28, %c0_204, %c0_205] : memref<32x67x32xf32, #tpu.memory_space<vmem>>, vector<1x67x32xf32>
    %344 = vector.shape_cast %343 : vector<1x67x32xf32> to vector<67x32xf32>
    %345 = vector.broadcast %342 : vector<67x1xf32> to vector<67x32xf32>
    %346 = arith.mulf %345, %344 : vector<67x32xf32>
    %347 = arith.addf %341, %346 : vector<67x32xf32>
    %348 = vector.extract_strided_slice %172 {offsets = [0, 29], sizes = [67, 1], strides = [1, 1]} : vector<67x32xf32> to vector<67x1xf32>
    %c29 = arith.constant 29 : index
    %c0_206 = arith.constant 0 : index
    %c0_207 = arith.constant 0 : index
    %349 = vector.load %arg9[%c29, %c0_206, %c0_207] : memref<32x67x32xf32, #tpu.memory_space<vmem>>, vector<1x67x32xf32>
    %350 = vector.shape_cast %349 : vector<1x67x32xf32> to vector<67x32xf32>
    %351 = vector.broadcast %348 : vector<67x1xf32> to vector<67x32xf32>
    %352 = arith.mulf %351, %350 : vector<67x32xf32>
    %353 = arith.addf %347, %352 : vector<67x32xf32>
    %354 = vector.extract_strided_slice %172 {offsets = [0, 30], sizes = [67, 1], strides = [1, 1]} : vector<67x32xf32> to vector<67x1xf32>
    %c30 = arith.constant 30 : index
    %c0_208 = arith.constant 0 : index
    %c0_209 = arith.constant 0 : index
    %355 = vector.load %arg9[%c30, %c0_208, %c0_209] : memref<32x67x32xf32, #tpu.memory_space<vmem>>, vector<1x67x32xf32>
    %356 = vector.shape_cast %355 : vector<1x67x32xf32> to vector<67x32xf32>
    %357 = vector.broadcast %354 : vector<67x1xf32> to vector<67x32xf32>
    %358 = arith.mulf %357, %356 : vector<67x32xf32>
    %359 = arith.addf %353, %358 : vector<67x32xf32>
    %360 = vector.extract_strided_slice %172 {offsets = [0, 31], sizes = [67, 1], strides = [1, 1]} : vector<67x32xf32> to vector<67x1xf32>
    %c31 = arith.constant 31 : index
    %c0_210 = arith.constant 0 : index
    %c0_211 = arith.constant 0 : index
    %361 = vector.load %arg9[%c31, %c0_210, %c0_211] : memref<32x67x32xf32, #tpu.memory_space<vmem>>, vector<1x67x32xf32>
    %362 = vector.shape_cast %361 : vector<1x67x32xf32> to vector<67x32xf32>
    %363 = vector.broadcast %360 : vector<67x1xf32> to vector<67x32xf32>
    %364 = arith.mulf %363, %362 : vector<67x32xf32>
    %365 = arith.addf %359, %364 : vector<67x32xf32>
    %cst_212 = arith.constant dense<0.000000e+00> : vector<32xf32>
    %366 = vector.multi_reduction <add>, %365, %cst_212 [0] : vector<67x32xf32> to vector<32xf32>
    %367 = vector.shape_cast %366 : vector<32xf32> to vector<1x32xf32>
    %c0_213 = arith.constant 0 : index
    %c0_214 = arith.constant 0 : index
    %368 = vector.load %arg10[%c0_213, %c0_214] : memref<1x32xf32, #tpu.memory_space<vmem>>, vector<1x32xf32>
    %369 = arith.addf %367, %368 : vector<1x32xf32>
    %cst_215 = arith.constant 0.000000e+00 : f32
    %370 = vector.broadcast %cst_215 : f32 to vector<1x32xf32>
    %371 = arith.maximumf %369, %370 : vector<1x32xf32>
    %c0_216 = arith.constant 0 : index
    %c0_217 = arith.constant 0 : index
    %c0_218 = arith.constant 0 : index
    %372 = vector.load %arg2[%c0_216, %c0_217, %c0_218] : memref<1x1x32xf32, #tpu.memory_space<vmem>>, vector<1x1x32xf32>
    %373 = vector.shape_cast %372 : vector<1x1x32xf32> to vector<1x32xf32>
    %c0_219 = arith.constant 0 : index
    %c0_220 = arith.constant 0 : index
    %374 = vector.load %arg11[%c0_219, %c0_220] : memref<32x96xf32, #tpu.memory_space<vmem>>, vector<32x96xf32>
    %cst_221 = arith.constant dense<0.000000e+00> : vector<1x96xf32>
    %375 = tpu.matmul %371, %374, %cst_221 {dimension_numbers = #tpu.dot_dimension_numbers<[1], [0], [0], [1], [0, 0, 1, 1], [], []>} : vector<1x32xf32>, vector<32x96xf32>, vector<1x96xf32> -> vector<1x96xf32>
    %c0_222 = arith.constant 0 : index
    %c0_223 = arith.constant 0 : index
    %376 = vector.load %arg13[%c0_222, %c0_223] : memref<1x96xf32, #tpu.memory_space<vmem>>, vector<1x96xf32>
    %377 = arith.addf %375, %376 : vector<1x96xf32>
    %c0_224 = arith.constant 0 : index
    %c0_225 = arith.constant 0 : index
    %378 = vector.load %arg12[%c0_224, %c0_225] : memref<32x96xf32, #tpu.memory_space<vmem>>, vector<32x96xf32>
    %cst_226 = arith.constant dense<0.000000e+00> : vector<1x96xf32>
    %379 = tpu.matmul %373, %378, %cst_226 {dimension_numbers = #tpu.dot_dimension_numbers<[1], [0], [0], [1], [0, 0, 1, 1], [], []>} : vector<1x32xf32>, vector<32x96xf32>, vector<1x96xf32> -> vector<1x96xf32>
    %c0_227 = arith.constant 0 : index
    %c0_228 = arith.constant 0 : index
    %380 = vector.load %arg14[%c0_227, %c0_228] : memref<1x96xf32, #tpu.memory_space<vmem>>, vector<1x96xf32>
    %381 = arith.addf %379, %380 : vector<1x96xf32>
    %382 = vector.extract_strided_slice %377 {offsets = [0, 0], sizes = [1, 32], strides = [1, 1]} : vector<1x96xf32> to vector<1x32xf32>
    %383 = vector.extract_strided_slice %381 {offsets = [0, 0], sizes = [1, 32], strides = [1, 1]} : vector<1x96xf32> to vector<1x32xf32>
    %384 = arith.addf %382, %383 : vector<1x32xf32>
    %385 = arith.negf %384 : vector<1x32xf32>
    %386 = math.exp %385 : vector<1x32xf32>
    %cst_229 = arith.constant 1.000000e+00 : f32
    %387 = vector.broadcast %cst_229 : f32 to vector<1x32xf32>
    %388 = arith.addf %387, %386 : vector<1x32xf32>
    %389 = arith.divf %387, %388 : vector<1x32xf32>
    %390 = vector.extract_strided_slice %377 {offsets = [0, 32], sizes = [1, 32], strides = [1, 1]} : vector<1x96xf32> to vector<1x32xf32>
    %391 = vector.extract_strided_slice %381 {offsets = [0, 32], sizes = [1, 32], strides = [1, 1]} : vector<1x96xf32> to vector<1x32xf32>
    %392 = arith.addf %390, %391 : vector<1x32xf32>
    %393 = arith.negf %392 : vector<1x32xf32>
    %394 = math.exp %393 : vector<1x32xf32>
    %cst_230 = arith.constant 1.000000e+00 : f32
    %395 = vector.broadcast %cst_230 : f32 to vector<1x32xf32>
    %396 = arith.addf %395, %394 : vector<1x32xf32>
    %397 = arith.divf %395, %396 : vector<1x32xf32>
    %398 = vector.extract_strided_slice %377 {offsets = [0, 64], sizes = [1, 32], strides = [1, 1]} : vector<1x96xf32> to vector<1x32xf32>
    %399 = vector.extract_strided_slice %381 {offsets = [0, 64], sizes = [1, 32], strides = [1, 1]} : vector<1x96xf32> to vector<1x32xf32>
    %400 = arith.mulf %389, %399 : vector<1x32xf32>
    %401 = arith.addf %398, %400 : vector<1x32xf32>
    %402 = math.tanh %401 : vector<1x32xf32>
    %cst_231 = arith.constant 1.000000e+00 : f32
    %403 = vector.broadcast %cst_231 : f32 to vector<1x32xf32>
    %404 = arith.subf %403, %397 : vector<1x32xf32>
    %405 = arith.mulf %404, %402 : vector<1x32xf32>
    %406 = arith.mulf %397, %373 : vector<1x32xf32>
    %407 = arith.addf %405, %406 : vector<1x32xf32>
    %c0_232 = arith.constant 0 : index
    %c0_233 = arith.constant 0 : index
    %c0_234 = arith.constant 0 : index
    %408 = vector.load %arg18[%c0_232, %c0_233, %c0_234] : memref<1x1x32xf32, #tpu.memory_space<vmem>>, vector<1x1x32xf32>
    %409 = vector.shape_cast %408 : vector<1x1x32xf32> to vector<1x32xf32>
    %410 = vector.shape_cast %407 : vector<1x32xf32> to vector<1x1x32xf32>
    tpu.vector_store %arg18[%c0_232, %c0_233, %c0_234], %410 {strides = array<i32>} : memref<1x1x32xf32, #tpu.memory_space<vmem>>, vector<1x1x32xf32>,
    %c0_235 = arith.constant 0 : index
    %c0_236 = arith.constant 0 : index
    %411 = vector.load %arg15[%c0_235, %c0_236] : memref<32x2xf32, #tpu.memory_space<vmem>>, vector<32x2xf32>
    %cst_237 = arith.constant dense<0.000000e+00> : vector<1x2xf32>
    %412 = tpu.matmul %407, %411, %cst_237 {dimension_numbers = #tpu.dot_dimension_numbers<[1], [0], [0], [1], [0, 0, 1, 1], [], []>} : vector<1x32xf32>, vector<32x2xf32>, vector<1x2xf32> -> vector<1x2xf32>
    %c0_238 = arith.constant 0 : index
    %c0_239 = arith.constant 0 : index
    %413 = vector.load %arg16[%c0_238, %c0_239] : memref<1x2xf32, #tpu.memory_space<vmem>>, vector<1x2xf32>
    %414 = arith.addf %412, %413 : vector<1x2xf32>
    %415 = tpu.iota {dimensions = array<i32: 1>} : vector<1x2xi32>
    %c0_i32 = arith.constant 0 : i32
    %416 = vector.broadcast %c0_i32 : i32 to vector<1x2xi32>
    %417 = arith.cmpi eq, %415, %416 : vector<1x2xi32>
    %418 = arith.negf %414 : vector<1x2xf32>
    %419 = math.exp %418 : vector<1x2xf32>
    %cst_240 = arith.constant 1.000000e+00 : f32
    %420 = vector.broadcast %cst_240 : f32 to vector<1x2xf32>
    %421 = arith.addf %420, %419 : vector<1x2xf32>
    %422 = arith.divf %420, %421 : vector<1x2xf32>
    %423 = arith.select %417, %422, %414 : vector<1x2xi1>, vector<1x2xf32>
    %c0_241 = arith.constant 0 : index
    %c0_242 = arith.constant 0 : index
    %c0_243 = arith.constant 0 : index
    %424 = vector.load %arg17[%c0_241, %c0_242, %c0_243] : memref<1x1x2xf32, #tpu.memory_space<vmem>>, vector<1x1x2xf32>
    %425 = vector.shape_cast %424 : vector<1x1x2xf32> to vector<1x2xf32>
    %426 = vector.shape_cast %423 : vector<1x2xf32> to vector<1x1x2xf32>
    tpu.vector_store %arg17[%c0_241, %c0_242, %c0_243], %426 {strides = array<i32>} : memref<1x1x2xf32, #tpu.memory_space<vmem>>, vector<1x1x2xf32>,
    return
  }
  func.func @transform_0(%arg0: i32) -> (i32, i32, i32, i32) {
    %c0_i32 = arith.constant 0 : i32
    %c0_i32_0 = arith.constant 0 : i32
    %c0_i32_1 = arith.constant 0 : i32
    %c0_i32_2 = arith.constant 0 : i32
    return %arg0, %c0_i32, %c0_i32_0, %c0_i32_1 : i32, i32, i32, i32
  }
  func.func @transform_1(%arg0: i32) -> (i32, i32, i32) {
    %c0_i32 = arith.constant 0 : i32
    %c0_i32_0 = arith.constant 0 : i32
    %c0_i32_1 = arith.constant 0 : i32
    return %arg0, %c0_i32, %c0_i32_0 : i32, i32, i32
  }
  func.func @transform_2(%arg0: i32) -> (i32, i32) {
    %c0_i32 = arith.constant 0 : i32
    %c0_i32_0 = arith.constant 0 : i32
    %c0_i32_1 = arith.constant 0 : i32
    return %c0_i32, %c0_i32_0 : i32, i32
  }
  func.func @transform_3(%arg0: i32) -> (i32, i32) {
    %c0_i32 = arith.constant 0 : i32
    %c0_i32_0 = arith.constant 0 : i32
    %c0_i32_1 = arith.constant 0 : i32
    return %c0_i32, %c0_i32_0 : i32, i32
  }
  func.func @transform_4(%arg0: i32) -> (i32, i32, i32) {
    %c0_i32 = arith.constant 0 : i32
    %c0_i32_0 = arith.constant 0 : i32
    %c0_i32_1 = arith.constant 0 : i32
    %c0_i32_2 = arith.constant 0 : i32
    return %c0_i32, %c0_i32_0, %c0_i32_1 : i32, i32, i32
  }
  func.func @transform_5(%arg0: i32) -> (i32, i32) {
    %c0_i32 = arith.constant 0 : i32
    %c0_i32_0 = arith.constant 0 : i32
    %c0_i32_1 = arith.constant 0 : i32
    return %c0_i32, %c0_i32_0 : i32, i32
  }
  func.func @transform_6(%arg0: i32) -> (i32, i32, i32) {
    %c0_i32 = arith.constant 0 : i32
    %c0_i32_0 = arith.constant 0 : i32
    %c0_i32_1 = arith.constant 0 : i32
    %c0_i32_2 = arith.constant 0 : i32
    return %c0_i32, %c0_i32_0, %c0_i32_1 : i32, i32, i32
  }
  func.func @transform_7(%arg0: i32) -> (i32, i32) {
    %c0_i32 = arith.constant 0 : i32
    %c0_i32_0 = arith.constant 0 : i32
    %c0_i32_1 = arith.constant 0 : i32
    return %c0_i32, %c0_i32_0 : i32, i32
  }
  func.func @transform_8(%arg0: i32) -> (i32, i32, i32) {
    %c0_i32 = arith.constant 0 : i32
    %c0_i32_0 = arith.constant 0 : i32
    %c0_i32_1 = arith.constant 0 : i32
    %c0_i32_2 = arith.constant 0 : i32
    return %c0_i32, %c0_i32_0, %c0_i32_1 : i32, i32, i32
  }
  func.func @transform_9(%arg0: i32) -> (i32, i32) {
    %c0_i32 = arith.constant 0 : i32
    %c0_i32_0 = arith.constant 0 : i32
    %c0_i32_1 = arith.constant 0 : i32
    return %c0_i32, %c0_i32_0 : i32, i32
  }
  func.func @transform_10(%arg0: i32) -> (i32, i32) {
    %c0_i32 = arith.constant 0 : i32
    %c0_i32_0 = arith.constant 0 : i32
    %c0_i32_1 = arith.constant 0 : i32
    return %c0_i32, %c0_i32_0 : i32, i32
  }
  func.func @transform_11(%arg0: i32) -> (i32, i32) {
    %c0_i32 = arith.constant 0 : i32
    %c0_i32_0 = arith.constant 0 : i32
    %c0_i32_1 = arith.constant 0 : i32
    return %c0_i32, %c0_i32_0 : i32, i32
  }
  func.func @transform_12(%arg0: i32) -> (i32, i32) {
    %c0_i32 = arith.constant 0 : i32
    %c0_i32_0 = arith.constant 0 : i32
    %c0_i32_1 = arith.constant 0 : i32
    return %c0_i32, %c0_i32_0 : i32, i32
  }
  func.func @transform_13(%arg0: i32) -> (i32, i32) {
    %c0_i32 = arith.constant 0 : i32
    %c0_i32_0 = arith.constant 0 : i32
    %c0_i32_1 = arith.constant 0 : i32
    return %c0_i32, %c0_i32_0 : i32, i32
  }
  func.func @transform_14(%arg0: i32) -> (i32, i32) {
    %c0_i32 = arith.constant 0 : i32
    %c0_i32_0 = arith.constant 0 : i32
    %c0_i32_1 = arith.constant 0 : i32
    return %c0_i32, %c0_i32_0 : i32, i32
  }
  func.func @transform_15(%arg0: i32) -> (i32, i32) {
    %c0_i32 = arith.constant 0 : i32
    %c0_i32_0 = arith.constant 0 : i32
    %c0_i32_1 = arith.constant 0 : i32
    return %c0_i32, %c0_i32_0 : i32, i32
  }
  func.func @transform_16(%arg0: i32) -> (i32, i32, i32) {
    %c0_i32 = arith.constant 0 : i32
    %c0_i32_0 = arith.constant 0 : i32
    %c0_i32_1 = arith.constant 0 : i32
    return %arg0, %c0_i32, %c0_i32_0 : i32, i32, i32
  }
  func.func @transform_17(%arg0: i32) -> (i32, i32, i32) {
    %c0_i32 = arith.constant 0 : i32
    %c0_i32_0 = arith.constant 0 : i32
    %c0_i32_1 = arith.constant 0 : i32
    return %arg0, %c0_i32, %c0_i32_0 : i32, i32, i32
  }
}

</mosaic_0001>

<bundles_post_ra>
// kernel: forward.1
= control target key start
LH: loop header
LB: loop body
LE: loop exit
PB: predicated region body
PF: predicated region fallthrough
CT: control target
= control target key end

     0   :  { %s11469_s0 = inlined_call_operand.vmem [shape: f32[2,4,100,64], index: 0, kind: input, shape index: {}]   ;;  %s11470_s1 = inlined_call_operand.vmem [shape: f32[2,1,32], index: 1, kind: input, shape index: {}]   ;;  %s11471_s2 = inlined_call_operand.vmem [shape: f32[64,32], index: 2, kind: input, shape index: {}]   ;;  %s11472_s3 = inlined_call_operand.vmem [shape: f32[1,32], index: 3, kind: input, shape index: {}]   ;;  %s11473_s4 = inlined_call_operand.vmem [shape: f32[16,32,64], index: 4, kind: input, shape index: {}]   ;;  %s11474_s5 = inlined_call_operand.vmem [shape: f32[1,64], index: 5, kind: input, shape index: {}]   ;;  %s11475_s6 = inlined_call_operand.vmem [shape: f32[9,64,32], index: 6, kind: input, shape index: {}]   ;;  %s11476_s7 = inlined_call_operand.vmem [shape: f32[1,32], index: 7, kind: input, shape index: {}]   ;;  %s11477_s8 = inlined_call_operand.vmem [shape: f32[32,67,32], index: 8, kind: input, shape index: {}]   ;;  %s11478_s9 = inlined_call_operand.vmem [shape: f32[1,32], index: 9, kind: input, shape index: {}]   ;;  %s11479_s10 = inlined_call_operand.vmem [shape: f32[32,96], index: 10, kind: input, shape index: {}]   ;;  %s11480_s11 = inlined_call_operand.vmem [shape: f32[32,96], index: 11, kind: input, shape index: {}]   ;;  %s11481_s12 = inlined_call_operand.vmem [shape: f32[1,96], index: 12, kind: input, shape index: {}]   ;;  %s11482_s13 = inlined_call_operand.vmem [shape: f32[1,96], index: 13, kind: input, shape index: {}]   ;;  %s11483_s14 = inlined_call_operand.vmem [shape: f32[32,2], index: 14, kind: input, shape index: {}]   ;;  %s11484_s15 = inlined_call_operand.vmem [shape: f32[1,2], index: 15, kind: input, shape index: {}]   ;;  %s11485_s16 = inlined_call_operand.vmem [shape: f32[2,1,2], index: 16, kind: output, shape index: {0}]   ;;  %s11486_s17 = inlined_call_operand.hbm [shape: f32[2,1,32], index: 17, kind: output, shape index: {1}]  }
   0x1   :  { %11568 = sst [smem:[#allocation64_spill]] %s11469_s0 }
   0x2   :  { %11569 = sst [smem:[#allocation65_spill]] %s11470_s1 }
   0x3   :  { %11570 = sst [smem:[#allocation66_spill]] %s11471_s2 }
   0x4   :  { %11571 = sst [smem:[#allocation67_spill]] %s11472_s3 }
   0x5   :  { %11572 = sst [smem:[#allocation68_spill]] %s11473_s4 }
   0x6   :  { %11573 = sst [smem:[#allocation69_spill]] %s11474_s5 }
   0x7   :  { %11574 = sst [smem:[#allocation70_spill]] %s11475_s6 }
   0x8   :  { %23 = vsyncpa [#allocation3], 0 }
   0x9   :  { %25 = vsyncpa [#allocation3 + $0x1], 0  ;;  %s7423_s24 = smov 0   ;;  %s7425_s25 = smov 0  }
   0xa   :  { %s7427_s26 = smov 0   ;;  %s7429_s27 = smov 0  }
   0xb LB: > { %11575 = sst [smem:[#allocation5_spill]] %s7284_s24  ;;  %s7444_s28 = sadd.s32 4294967295, %s7296_s27   ;;  %s7296_s27 = sphi %s7429_s27, %s11775_s27   ;;  %s7292_s26 = sphi %s7427_s26, %s11777_s26   ;;  %s7288_s25 = sphi %s7425_s25, %s11779_s25   ;;  %s7284_s24 = sphi %s7423_s24, %s11778_s24  }
   0xc   : > { %11576 = sst [smem:[#allocation6_spill]] %s7292_s26  ;;  %s6069_s29 = sadd.s32 4294967294, %s7296_s27  }
   0xd   : > { %s7448_s0 = sadd.s32 1, %s7296_s27   ;;  %s410_s30 = sadd.s32 1, %s7292_s26 }
   0xe   : > { %11577 = sst [smem:[#allocation7_spill]] %s7448_s0  ;;  %s407_s18 = ssub.s32 %s7296_s27, %s7448_s0 }
   0xf   : > { %p420_p0 = scmp.ne.s32.totalorder %s7292_s26, %s7288_s25  ;;  %p408_p1 = scmp.eq.s32.totalorder %s407_s18, 0 }
  0x10   : > { %p421_p2 = scmp.eq.s32.totalorder %s7444_s28, 1  ;;  %p426_p3 = scmp.ne.s32.totalorder %s7288_s25, %s7284_s24 }
  0x11   : > { %p427_p4 = scmp.eq.s32.totalorder %s6069_s29, 1  ;;  %p6072_p7 = scmp.ge.s32.totalorder %s7296_s27, 1 }
  0x12   : > { %s7459_s19 = scalar_select %p408_p1, %s7292_s26, %s410_s30  }
  0x13   : > { %p7461_p5 = por %p421_p2, %p420_p0  ;;  %p7465_p6 = por %p427_p4, %p426_p3 }
  0x14   : > { %11578 = sst [smem:[#allocation8_spill]] %s7459_s19  ;;  %p501_p8 = scmp.lt.s32.totalorder %s7296_s27, 3 }
  0x15   : > { %s11580_s20 = scalar_select %p7465_p6, 1, 0 }
  0x16   : > { %p502_p9 = pnand %p6072_p7, %p501_p8 }
  0x17   : > { %11581 = sst [smem:[#allocation9_spill]] %s11580_s20 }
  0x18   : > { %505 = sbr.rel (%p502_p9) target bundleno = 3022 (0xbce), region = 84 }
  0x1d   : > { %s11582_s2 = sld [smem:[#allocation66_spill]]  ;;  %p558_p10 = scmp.lt.s32.totalorder %s7444_s28, 1  ;;  %vm594_vm0 = vcmask 523264   ;;  %vm748_vm1 = vcmask 261120   ;;  %vm724_vm2 = vcmask 1046528   ;;  %vm1027_vm3 = vcmask 1044480  }
  0x1e   : > { %s11583_s23 = sld [smem:[#allocation64_spill]]  ;;  %vm909_vm4 = vcmask 1045504   ;;  %vm3347_vm5 = vcmask 1043456   ;;  %vm3514_vm6 = vcmask 1042432   ;;  %vm3613_vm7 = vcmask 1041408   ;;  %s7330_s0 = smov 64  }
  0x1f   : > { %s7489_s19 = scalar_select %p558_p10, %s7444_s28, 1  ;;  %vm5797_vm8 = vcmask 256000   ;;  %vm5913_vm13 = vcmask 253952  }
  0x20   : > { %s11584_s4 = sld [smem:[#allocation68_spill]]  ;;  %s7331_s21 = smov 32  }
  0x21   : > { %s6856_s30 = smul.u32 416, %s7489_s19  ;;  %s11585_s3 = sld [smem:[#allocation67_spill]] }
  0x22   : > { %s11601_s6 = sld [smem:[#allocation70_spill]]  ;;  %s7332_s22 = smov 96  }
  0x23   : > { %v7474_v0 = vld [vmem:[%s11582_s2 + $0x38] sm:$0xff]  ;;  %v7479_v1 = vld [vmem:[%s11582_s2 + $0x30] sm:$0xff]  ;;  %v7486_v2 = vld [vmem:[%s11582_s2 + $0x28] sm:$0xff]  ;;  %s11609_s5 = sld [smem:[#allocation69_spill]] }
  0x24   : > { %642 = vmatpush.msra.mxu0 %v7474_v0  ;;  %v7495_v3 = vld [vmem:[%s11582_s2 + $0x20] sm:$0xff]  ;;  %v7501_v4 = vld [vmem:[%s11582_s2 + $0x18] sm:$0xff]  ;;  %v7508_v5 = vld [vmem:[%s11582_s2 + $0x10] sm:$0xff]  ;;  %s7519_s29 = scalar_lea.vmem %s11583_s23, %s6856_s30  ;;  %s556_s30 = sand.u32 1, %s7288_s25  }
  0x25   : > { %v7514_v6 = vld [vmem:[%s11582_s2 + $0x8] sm:$0xff]  ;;  %v7525_v7 = vld [vmem:[%s11582_s2] sm:$0xff]  ;;  %v571_v10 = vld [vmem:[%s7519_s29 + $0x10] sm:$0xff]  ;;  %s11772_s2 = sld [smem:[#allocation65_spill]] }
  0x26   : > { %643 = vmatpush.msra.mxu0 %v7479_v1  ;;  %v569_v8 = vld [vmem:[%s7519_s29] sm:$0xff]  ;;  %v570_v9 = vld [vmem:[%s7519_s29 + $0x8] sm:$0xff]  ;;  %v572_v11 = vld [vmem:[%s7519_s29 + $0x18] sm:$0xff] }
  0x27   : > { %v573_v12 = vld [vmem:[%s7519_s29 + $0x20] sm:$0xff]  ;;  %v574_v13 = vld [vmem:[%s7519_s29 + $0x28] sm:$0xff]  ;;  %v575_v14 = vld [vmem:[%s7519_s29 + $0x30] sm:$0xff] }
  0x28   : > { %644 = vmatpush.msra.mxu0 %v7486_v2  ;;  %v576_v15 = vld [vmem:[%s7519_s29 + $0x38] sm:$0xff]  ;;  %v577_v16 = vld [vmem:[%s7519_s29 + $0x40] sm:$0xff]  ;;  %v578_v18 = vld [vmem:[%s7519_s29 + $0x48] sm:$0xff] }
  0x29   : > { %v706_v17 = vld [vmem:[%s11584_s4 + $0x18] sm:$0xff]  ;;  %v579_v19 = vld [vmem:[%s7519_s29 + $0x50] sm:$0xff]  ;;  %v581_v22 = vld [vmem:[%s7519_s29 + $0x60] sm:$0xf] }
  0x2a   : > { %645 = vmatpush.msra.mxu0 %v7495_v3  ;;  %862 = vmatpush.msra.mxu2 %v706_v17  ;;  %v580_v20 = vld [vmem:[%s7519_s29 + $0x58] sm:$0xff]  ;;  %v705_v21 = vld [vmem:[%s11584_s4 + $0x10] sm:$0xff]  ;;  %v704_v23 = vld [vmem:[%s11584_s4 + $0x8] sm:$0xff] }
  0x2b   : > { %v703_v24 = vld [vmem:[%s11584_s4] sm:$0xff]  ;;  %v6090_v25 = vld [vmem:[%s11584_s4 + $0x58] sm:$0xff]  ;;  %v6089_v26 = vld [vmem:[%s11584_s4 + $0x50] sm:$0xff]  ;;  %s11406_s24 = scalar_lea.vmem %s11772_s2, %s7489_s19  ;;  %s5982_s2 = scalar_lea.hbm %s11486_s17, %s7444_s28 }
  0x2c   : > { %646 = vmatpush.msra.mxu0 %v7501_v4  ;;  %863 = vmatpush.msra.mxu2 %v705_v21  ;;  %v6088_v27 = vld [vmem:[%s11584_s4 + $0x48] sm:$0xff]  ;;  %v6087_v28 = vld [vmem:[%s11584_s4 + $0x40] sm:$0xff] }
  0x2d   : > { %6848 = vmatpush.msra.mxu1 %v6090_v25  ;;  %6849 = vmatpush.msra.mxu3 %v6090_v25  ;;  %v7590_v29 = vld [vmem:[%s11585_s3] ss:$0 sm:$0xff] }
  0x2e   : > { %647 = vmatpush.msra.mxu0 %v7508_v5  ;;  %864 = vmatpush.msra.mxu2 %v704_v23 }
  0x2f   : > { %6850 = vmatpush.msra.mxu1 %v6089_v26  ;;  %6851 = vmatpush.msra.mxu3 %v6089_v26 }
  0x30   : > { %648 = vmatpush.msra.mxu0 %v7514_v6  ;;  %865 = vmatpush.msra.mxu2 %v703_v24  ;;  %v6133_v24 = vld [vmem:[%s11584_s4 + $0x150] sm:$0xff] }
  0x31   : > { %6852 = vmatpush.msra.mxu1 %v6088_v27  ;;  %6853 = vmatpush.msra.mxu3 %v6088_v27 }
  0x32   : > { %649 = vmatpush.msra.mxu0 %v7525_v7  ;;  %1201 = vmatpush.msrb.mxu2 %v7474_v0 }
  0x33   : > { %6074 = vmatmul.msk.f32.vlgmr.msra.gmra.mxu0 %vm594_vm0, %v569_v8  ;;  %6854 = vmatpush.msra.mxu1 %v6087_v28 }
  0x34   : > { %1202 = vmatpush.msrb.mxu2 %v7479_v1  ;;  %785 = vmatpush.msrb.mxu0 %v6090_v25 }
  0x35   : > { %6855 = vmatpush.msra.mxu3 %v6087_v28 }
  0x36   : > { %1203 = vmatpush.msrb.mxu2 %v7486_v2  ;;  %786 = vmatpush.msrb.mxu0 %v6089_v26  ;;  %v6132_v26 = vld [vmem:[%s11584_s4 + $0x148] sm:$0xff] }
  0x38   : > { %1204 = vmatpush.msrb.mxu2 %v7495_v3  ;;  %787 = vmatpush.msrb.mxu0 %v6088_v27 }
  0x3a   : > { %1205 = vmatpush.msrb.mxu2 %v7501_v4  ;;  %788 = vmatpush.msrb.mxu0 %v6087_v28  ;;  %v6131_v28 = vld [vmem:[%s11584_s4 + $0x140] sm:$0xff] }
  0x3b   : > { %6075 = vmatmul.msk.f32.gmra.mxu0 %vm594_vm0, %v570_v9 }
  0x3c   : > { %1206 = vmatpush.msrb.mxu2 %v7508_v5 }
  0x3e   : > { %1207 = vmatpush.msrb.mxu2 %v7514_v6 }
  0x40   : > { %1208 = vmatpush.msrb.mxu2 %v7525_v7 }
  0x43   : > { %6076 = vmatmul.msk.f32.gmra.mxu0 %vm594_vm0, %v571_v10 }
  0x4b   : > { %6077 = vmatmul.msk.f32.gmra.mxu0 %vm594_vm0, %v572_v11 }
  0x53   : > { %6078 = vmatmul.msk.f32.gmra.mxu0 %vm594_vm0, %v573_v12 }
  0x5b   : > { %6079 = vmatmul.msk.f32.gmra.mxu0 %vm594_vm0, %v574_v13 }
  0x63   : > { %6080 = vmatmul.msk.f32.gmra.mxu0 %vm594_vm0, %v575_v14 }
  0x6b   : > { %6081 = vmatmul.msk.f32.gmra.mxu0 %vm594_vm0, %v576_v15 }
  0x73   : > { %6082 = vmatmul.msk.f32.gmra.mxu0 %vm594_vm0, %v577_v16 }
  0x7b   : > { %6083 = vmatmul.msk.f32.gmra.mxu0 %vm594_vm0, %v578_v18 }
  0x83   : > { %6084 = vmatmul.msk.f32.gmra.mxu0 %vm594_vm0, %v579_v19 }
  0x8b   : > { %6085 = vmatmul.msk.f32.gmra.mxu0 %vm594_vm0, %v580_v20 }
  0x93   : > { %6086 = vmatmul.msk.f32.gmra.mxu0 %vm594_vm0, %v581_v22  ;;  %v6134_v22 = vld [vmem:[%s11584_s4 + $0x158] sm:$0xff] }
  0x94   : > { %1087 = vmatpush.msrb.mxu1 %v6134_v22 }
  0x96   : > { %1088 = vmatpush.msrb.mxu1 %v6133_v24 }
  0x98   : > { %1089 = vmatpush.msrb.mxu1 %v6132_v26 }
  0x9a   : > { %1090 = vmatpush.msrb.mxu1 %v6131_v28 }
  0xb0   : > { %v651_v30 = vpop.f32.mrf.mxu0 }
  0xb1   : > { %v652_v31 = vadd.f32 %v7590_v29, %v651_v30 }
  0xb3   : > { %v690_v32 = vmax.f32 %v652_v31, 0.0 }
  0xb5   : > { %6103 = vmatmul.msk.f32.vlgmr.msra.gmra.mxu2 %vm748_vm1, %v690_v32  ;;  %v725_v36 = vrot.slane %v690_v32, 1 }
  0xb6   : > { %1781 = vmatpush.msra.mxu2 %v7474_v0 }
  0xb8   : > { %v654_v33 = vpop.f32.mrf.mxu0  ;;  %1782 = vmatpush.msra.mxu2 %v7479_v1 }
  0xb9   : > { %v655_v34 = vadd.f32 %v7590_v29, %v654_v33 }
  0xba   : > { %1783 = vmatpush.msra.mxu2 %v7486_v2 }
  0xbb   : > { %v691_v35 = vmax.f32 %v655_v34, 0.0 }
  0xbc   : > { %1784 = vmatpush.msra.mxu2 %v7495_v3 }
  0xbd   : > { %6104 = vmatmul.msk.f32.gmra.mxu2 %vm748_vm1, %v691_v35  ;;  %v726_v37 = vrot.slane %v691_v35, 1  ;;  %v1028_v42 = vrot.slane %v691_v35, 3  ;;  %v910_v45 = vrot.slane %v691_v35, 2 }
  0xbe   : > { %1785 = vmatpush.msra.mxu2 %v7501_v4 }
  0xbf   : > { %v727_v38 = vsel %vm724_vm2, %v725_v36, %v726_v37 }
  0xc0   : > { %v657_v39 = vpop.f32.mrf.mxu0  ;;  %6091 = vmatmul.msk.f32.vlgmr.msrb.gmra.mxu0 %vm748_vm1, %v727_v38  ;;  %1786 = vmatpush.msra.mxu2 %v7508_v5 }
  0xc1   : > { %v658_v40 = vadd.f32 %v7590_v29, %v657_v39 }
  0xc2   : > { %1787 = vmatpush.msra.mxu2 %v7514_v6 }
  0xc3   : > { %v692_v41 = vmax.f32 %v658_v40, 0.0 }
  0xc4   : > { %1788 = vmatpush.msra.mxu2 %v7525_v7 }
  0xc5   : > { %6105 = vmatmul.msk.f32.gmra.mxu2 %vm748_vm1, %v692_v41  ;;  %v728_v43 = vrot.slane %v692_v41, 1  ;;  %v1029_v44 = vrot.slane %v692_v41, 3  ;;  %v911_v46 = vrot.slane %v692_v41, 2 }
  0xc7   : > { %v729_v47 = vsel %vm724_vm2, %v726_v37, %v728_v43  ;;  %v7610_v48 = vsel %vm1027_vm3, %v1028_v42, %v1029_v44  ;;  %v7613_v49 = vsel %vm909_vm4, %v910_v45, %v911_v46 }
  0xc8   : > { %v660_v50 = vpop.f32.mrf.mxu0  ;;  %6092 = vmatmul.msk.f32.vlgmr.msra.gmra.mxu1 %vm748_vm1, %v729_v47 }
  0xc9   : > { %v661_v51 = vadd.f32 %v7590_v29, %v660_v50 }
  0xcb   : > { %v693_v52 = vmax.f32 %v661_v51, 0.0 }
  0xcd   : > { %6106 = vmatmul.msk.f32.gmra.mxu2 %vm748_vm1, %v693_v52  ;;  %v730_v53 = vrot.slane %v693_v52, 1  ;;  %v1031_v54 = vrot.slane %v693_v52, 3  ;;  %v913_v55 = vrot.slane %v693_v52, 2 }
  0xcf   : > { %v731_v56 = vsel %vm724_vm2, %v728_v43, %v730_v53  ;;  %v7620_v57 = vsel %vm1027_vm3, %v1029_v44, %v1031_v54  ;;  %v7623_v58 = vsel %vm909_vm4, %v911_v46, %v913_v55 }
  0xd0   : > { %v663_v59 = vpop.f32.mrf.mxu0  ;;  %6093 = vmatmul.msk.f32.gmra.mxu1 %vm748_vm1, %v731_v56  ;;  %v6118_v56 = vld [vmem:[%s11584_s4 + $0x118] sm:$0xff] }
  0xd1   : > { %v664_v60 = vadd.f32 %v7590_v29, %v663_v59  ;;  %v6117_v59 = vld [vmem:[%s11584_s4 + $0x110] sm:$0xff]  ;;  %969 = vmatpush.msrb.mxu3 %v6118_v56 }
  0xd3   : > { %v694_v61 = vmax.f32 %v664_v60, 0.0  ;;  %970 = vmatpush.msrb.mxu3 %v6117_v59  ;;  %v6237_v59 = vld [vmem:[%s7519_s29 + $0xd0] sm:$0xff] }
  0xd5   : > { %6107 = vmatmul.msk.f32.gmra.mxu2 %vm748_vm1, %v694_v61  ;;  %v732_v62 = vrot.slane %v694_v61, 1  ;;  %v1033_v63 = vrot.slane %v694_v61, 3  ;;  %v915_v8 = vrot.slane %v694_v61, 2  ;;  %v6116_v61 = vld [vmem:[%s11584_s4 + $0x108] sm:$0xff] }
  0xd6   : > { %971 = vmatpush.msrb.mxu3 %v6116_v61 }
  0xd7   : > { %v733_v9 = vsel %vm724_vm2, %v730_v53, %v732_v62  ;;  %v7630_v10 = vsel %vm1027_vm3, %v1031_v54, %v1033_v63  ;;  %v7633_v11 = vsel %vm909_vm4, %v913_v55, %v915_v8 }
  0xd8   : > { %v666_v12 = vpop.f32.mrf.mxu0  ;;  %6094 = vmatmul.msk.f32.gmra.mxu1 %vm748_vm1, %v733_v9 }
  0xd9   : > { %v667_v13 = vadd.f32 %v7590_v29, %v666_v12 }
  0xdb   : > { %v695_v14 = vmax.f32 %v667_v13, 0.0 }
  0xdd   : > { %6108 = vmatmul.msk.f32.gmra.mxu2 %vm748_vm1, %v695_v14  ;;  %v734_v15 = vrot.slane %v695_v14, 1  ;;  %v1035_v16 = vrot.slane %v695_v14, 3  ;;  %v917_v17 = vrot.slane %v695_v14, 2 }
  0xdf   : > { %v735_v18 = vsel %vm724_vm2, %v732_v62, %v734_v15  ;;  %v7640_v19 = vsel %vm1027_vm3, %v1033_v63, %v1035_v16  ;;  %v7643_v20 = vsel %vm909_vm4, %v915_v8, %v917_v17  ;;  %v6115_v8 = vld [vmem:[%s11584_s4 + $0x100] sm:$0xff] }
  0xe0   : > { %v669_v21 = vpop.f32.mrf.mxu0  ;;  %6095 = vmatmul.msk.f32.gmra.mxu1 %vm748_vm1, %v735_v18  ;;  %972 = vmatpush.msrb.mxu3 %v6115_v8  ;;  %v6191_v8 = vld [vmem:[%s11584_s4 + $0x70] sm:$0xff] }
  0xe1   : > { %v670_v23 = vadd.f32 %v7590_v29, %v669_v21 }
  0xe3   : > { %v696_v25 = vmax.f32 %v670_v23, 0.0 }
  0xe5   : > { %6109 = vmatmul.msk.f32.gmra.mxu2 %vm748_vm1, %v696_v25  ;;  %v736_v27 = vrot.slane %v696_v25, 1  ;;  %v1037_v30 = vrot.slane %v696_v25, 3  ;;  %v919_v31 = vrot.slane %v696_v25, 2 }
  0xe7   : > { %v737_v32 = vsel %vm724_vm2, %v734_v15, %v736_v27  ;;  %v7662_v33 = vsel %vm1027_vm3, %v1035_v16, %v1037_v30  ;;  %v7665_v34 = vsel %vm909_vm4, %v917_v17, %v919_v31 }
  0xe8   : > { %v672_v35 = vpop.f32.mrf.mxu0  ;;  %6096 = vmatmul.msk.f32.gmra.mxu1 %vm748_vm1, %v737_v32 }
  0xe9   : > { %v673_v36 = vadd.f32 %v7590_v29, %v672_v35 }
  0xeb   : > { %v697_v37 = vmax.f32 %v673_v36, 0.0 }
  0xed   : > { %6110 = vmatmul.msk.f32.gmra.mxu2 %vm748_vm1, %v697_v37  ;;  %v738_v38 = vrot.slane %v697_v37, 1  ;;  %v1039_v39 = vrot.slane %v697_v37, 3  ;;  %v921_v40 = vrot.slane %v697_v37, 2 }
  0xef   : > { %v739_v41 = vsel %vm724_vm2, %v736_v27, %v738_v38  ;;  %v7672_v42 = vsel %vm1027_vm3, %v1037_v30, %v1039_v39  ;;  %v7675_v43 = vsel %vm909_vm4, %v919_v31, %v921_v40 }
  0xf0   : > { %v675_v44 = vpop.f32.mrf.mxu0  ;;  %6097 = vmatmul.msk.f32.gmra.mxu1 %vm748_vm1, %v739_v41 }
  0xf1   : > { %v676_v45 = vadd.f32 %v7590_v29, %v675_v44 }
  0xf3   : > { %v698_v46 = vmax.f32 %v676_v45, 0.0  ;;  %v6157_v45 = vld [vmem:[%s7519_s29 + $0xb8] sm:$0xff] }
  0xf5   : > { %6111 = vmatmul.msk.f32.gmra.mxu2 %vm748_vm1, %v698_v46  ;;  %v740_v47 = vrot.slane %v698_v46, 1  ;;  %v1041_v50 = vrot.slane %v698_v46, 3  ;;  %v923_v51 = vrot.slane %v698_v46, 2 }
  0xf7   : > { %v741_v52 = vsel %vm724_vm2, %v738_v38, %v740_v47  ;;  %v7682_v53 = vsel %vm1027_vm3, %v1039_v39, %v1041_v50  ;;  %v7685_v54 = vsel %vm909_vm4, %v921_v40, %v923_v51  ;;  %v6147_v38 = vld [vmem:[%s7519_s29 + $0x68] sm:$0xff]  ;;  %v6148_v39 = vld [vmem:[%s7519_s29 + $0x70] sm:$0xff] }
  0xf8   : > { %v678_v55 = vpop.f32.mrf.mxu0  ;;  %6098 = vmatmul.msk.f32.gmra.mxu1 %vm748_vm1, %v741_v52 }
  0xf9   : > { %v679_v60 = vadd.f32 %v7590_v29, %v678_v55 }
  0xfb   : > { %v699_v62 = vmax.f32 %v679_v60, 0.0 }
  0xfd   : > { %6112 = vmatmul.msk.f32.gmra.mxu2 %vm748_vm1, %v699_v62  ;;  %v742_v63 = vrot.slane %v699_v62, 1  ;;  %v1043_v9 = vrot.slane %v699_v62, 3  ;;  %v925_v12 = vrot.slane %v699_v62, 2  ;;  %v6192_v62 = vld [vmem:[%s11584_s4 + $0x78] sm:$0xff] }
  0xfe   : > { %1432 = vmatpush.msra.mxu0 %v6192_v62  ;;  %v6244_v62 = vld [vmem:[%s7519_s29 + $0x108] sm:$0xff] }
  0xff   : > { %v743_v13 = vsel %vm724_vm2, %v740_v47, %v742_v63  ;;  %v7704_v14 = vsel %vm1027_vm3, %v1041_v50, %v1043_v9  ;;  %v7707_v15 = vsel %vm909_vm4, %v923_v51, %v925_v12  ;;  %v6173_v47 = vld [vmem:[%s11584_s4 + $0x20] sm:$0xff] }
 0x100   : > { %v681_v16 = vpop.f32.mrf.mxu0  ;;  %6099 = vmatmul.msk.f32.gmra.mxu1 %vm748_vm1, %v743_v13  ;;  %v6158_v50 = vld [vmem:[%s7519_s29 + $0xc0] sm:$0xff]  ;;  %1433 = vmatpush.msra.mxu0 %v6191_v8  ;;  %v6208_v13 = vld [vmem:[%s11584_s4 + $0x138] sm:$0xff]  ;;  %v6222_v8 = vld [vmem:[%s11584_s4 + $0x168] sm:$0xff] }
 0x101   : > { %v682_v17 = vadd.f32 %v7590_v29, %v681_v16  ;;  %1550 = vmatpush.msra.mxu1 %v6208_v13 }
 0x103   : > { %v700_v18 = vmax.f32 %v682_v17, 0.0  ;;  %v6239_v17 = vld [vmem:[%s7519_s29 + $0xe0] sm:$0xff] }
 0x105   : > { %6113 = vmatmul.msk.f32.gmra.mxu2 %vm748_vm1, %v700_v18  ;;  %v744_v21 = vrot.slane %v700_v18, 1  ;;  %v1045_v22 = vrot.slane %v700_v18, 3  ;;  %v927_v23 = vrot.slane %v700_v18, 2  ;;  %v6207_v18 = vld [vmem:[%s11584_s4 + $0x130] sm:$0xff] }
 0x106   : > { %1551 = vmatpush.msra.mxu1 %v6207_v18 }
 0x107   : > { %v745_v24 = vsel %vm724_vm2, %v742_v63, %v744_v21  ;;  %v1046_v25 = vsel %vm1027_vm3, %v1043_v9, %v1045_v22  ;;  %v7715_v26 = vsel %vm909_vm4, %v925_v12, %v927_v23  ;;  %v6238_v63 = vld [vmem:[%s7519_s29 + $0xd8] sm:$0xff]  ;;  %v6190_v9 = vld [vmem:[%s11584_s4 + $0x68] sm:$0xff] }
 0x108   : > { %v684_v27 = vpop.f32.mrf.mxu0  ;;  %6100 = vmatmul.msk.f32.vlgmr.msra.gmra.mxu3 %vm748_vm1, %v745_v24  ;;  %6135 = vmatmul.msk.f32.vlgmr.msrb.gmra.mxu1 %vm748_vm1, %v7610_v48  ;;  %v6224_v12 = vld [vmem:[%s11584_s4 + $0x178] sm:$0xff]  ;;  %v6205_v24 = vld [vmem:[%s11584_s4 + $0x120] sm:$0xff] }
 0x109   : > { %v685_v28 = vadd.f32 %v7590_v29, %v684_v27  ;;  %1434 = vmatpush.msra.mxu0 %v6190_v9 }
 0x10b   : > { %v7721_v30 = vmax.f32 %v685_v28, 0.0 }
 0x10d   : > { %6114 = vmatmul.msk.f32.gmra.mxu2 %vm748_vm1, %v7721_v30  ;;  %v746_v31 = vrot.slane %v7721_v30, 1  ;;  %v1047_v32 = vrot.slane %v7721_v30, 3  ;;  %v929_v35 = vrot.slane %v7721_v30, 2 }
 0x10f   : > { %v747_v36 = vsel %vm724_vm2, %v744_v21, %v746_v31  ;;  %v1048_v48 = vsel %vm1027_vm3, %v1045_v22, %v1047_v32  ;;  %v7735_v37 = vsel %vm909_vm4, %v927_v23, %v929_v35  ;;  %v6206_v22 = vld [vmem:[%s11584_s4 + $0x128] sm:$0xff]  ;;  %v6266_v23 = vld [vmem:[%s11584_s4 + $0x98] sm:$0xff] }
 0x110   : > { %6101 = vmatmul.msk.f32.gmra.mxu3 %vm748_vm1, %v747_v36  ;;  %6136 = vmatmul.msk.f32.gmra.mxu1 %vm748_vm1, %v7620_v57  ;;  %v687_v57 = vpop.f32.mrf.mxu0  ;;  %v6223_v36 = vld [vmem:[%s11584_s4 + $0x170] sm:$0xff] }
 0x111   : > { %1552 = vmatpush.msra.mxu1 %v6206_v22 }
 0x113   : > { %1553 = vmatpush.msra.mxu1 %v6205_v24 }
 0x115   : > { %6160 = vmatmul.msk.f32.vlgmr.msrb.gmra.mxu2 %vm594_vm0, %v6147_v38 }
 0x116   : > { %2361 = vmatpush.msrb.mxu2 %v7474_v0  ;;  %v6176_v0 = vld [vmem:[%s11584_s4 + $0x38] sm:$0xff] }
 0x117   : > { %1315 = vmatpush.msra.mxu3 %v6176_v0  ;;  %v6242_v0 = vld [vmem:[%s7519_s29 + $0xf8] sm:$0xff] }
 0x118   : > { %6102 = vmatmul.msk.f32.gmra.mxu3 %vm748_vm1, %v746_v31  ;;  %6137 = vmatmul.msk.f32.gmra.mxu1 %vm748_vm1, %v7630_v10  ;;  %v6154_v10 = vld [vmem:[%s7519_s29 + $0xa0] sm:$0xff] }
 0x119   : > { %2362 = vmatpush.msrb.mxu2 %v7479_v1  ;;  %v6149_v1 = vld [vmem:[%s7519_s29 + $0x78] sm:$0xff] }
 0x11b   : > { %2363 = vmatpush.msrb.mxu2 %v7486_v2  ;;  %v6150_v2 = vld [vmem:[%s7519_s29 + $0x80] sm:$0xff] }
 0x11d   : > { %6161 = vmatmul.msk.f32.gmra.mxu2 %vm594_vm0, %v6148_v39 }
 0x11e   : > { %2364 = vmatpush.msrb.mxu2 %v7495_v3  ;;  %v6151_v3 = vld [vmem:[%s7519_s29 + $0x88] sm:$0xff] }
 0x120   : > { %6119 = vmatmul.msk.f32.vlgmr.msrb.gmra.mxu3 %vm748_vm1, %v7613_v49  ;;  %6138 = vmatmul.msk.f32.gmra.mxu1 %vm748_vm1, %v7640_v19  ;;  %v6153_v49 = vld [vmem:[%s7519_s29 + $0x98] sm:$0xff] }
 0x121   : > { %2365 = vmatpush.msrb.mxu2 %v7501_v4 }
 0x123   : > { %2366 = vmatpush.msrb.mxu2 %v7508_v5  ;;  %v6175_v5 = vld [vmem:[%s11584_s4 + $0x30] sm:$0xff] }
 0x124   : > { %1316 = vmatpush.msra.mxu3 %v6175_v5 }
 0x125   : > { %6162 = vmatmul.msk.f32.gmra.mxu2 %vm594_vm0, %v6149_v1 }
 0x126   : > { %2367 = vmatpush.msrb.mxu2 %v7514_v6  ;;  %v6152_v6 = vld [vmem:[%s7519_s29 + $0x90] sm:$0xff] }
 0x128   : > { %6120 = vmatmul.msk.f32.gmra.mxu3 %vm748_vm1, %v7623_v58  ;;  %6139 = vmatmul.msk.f32.gmra.mxu1 %vm748_vm1, %v7662_v33  ;;  %v6174_v33 = vld [vmem:[%s11584_s4 + $0x28] sm:$0xff] }
 0x129   : > { %2368 = vmatpush.msrb.mxu2 %v7525_v7  ;;  %1317 = vmatpush.msra.mxu3 %v6174_v33 }
 0x12b   : > { %1318 = vmatpush.msra.mxu3 %v6173_v47 }
 0x12d   : > { %6163 = vmatmul.msk.f32.gmra.mxu2 %vm594_vm0, %v6150_v2  ;;  %1667 = vmatpush.msrb.mxu3 %v6224_v12  ;;  %v6265_v2 = vld [vmem:[%s11584_s4 + $0x90] sm:$0xff] }
 0x12f   : > { %1668 = vmatpush.msrb.mxu3 %v6223_v36 }
 0x130   : > { %6121 = vmatmul.msk.f32.gmra.mxu3 %vm748_vm1, %v7633_v11  ;;  %6140 = vmatmul.msk.f32.gmra.mxu1 %vm748_vm1, %v7672_v42  ;;  %v688_v11 = vadd.f32 %v7590_v29, %v687_v57 }
 0x131   : > { %1669 = vmatpush.msrb.mxu3 %v6222_v8 }
 0x132   : > { %v702_v19 = vmax.f32 %v688_v11, 0.0 }
 0x134   : > { %v1049_v40 = vrot.slane %v702_v19, 3  ;;  %v931_v51 = vrot.slane %v702_v19, 2  ;;  %v6243_v19 = vld [vmem:[%s7519_s29 + $0x100] sm:$0xff] }
 0x135   : > { %6164 = vmatmul.msk.f32.gmra.mxu2 %vm594_vm0, %v6151_v3 }
 0x136   : > { %v1050_v41 = vsel %vm1027_vm3, %v1047_v32, %v1049_v40  ;;  %v932_v52 = vsel %vm909_vm4, %v929_v35, %v931_v51  ;;  %v6241_v32 = vld [vmem:[%s7519_s29 + $0xf0] sm:$0xff] }
 0x138   : > { %v7776_v4 = vpop.f32.mrf.mxu2  ;;  %6122 = vmatmul.msk.f32.gmra.mxu3 %vm748_vm1, %v7643_v20  ;;  %6141 = vmatmul.msk.f32.gmra.mxu1 %vm748_vm1, %v7682_v53 }
 0x13d   : > { %6165 = vmatmul.msk.f32.gmra.mxu2 %vm594_vm0, %v6152_v6 }
 0x140   : > { %v7787_v7 = vpop.f32.mrf.mxu2  ;;  %6123 = vmatmul.msk.f32.gmra.mxu3 %vm748_vm1, %v7665_v34  ;;  %6142 = vmatmul.msk.f32.gmra.mxu1 %vm748_vm1, %v7704_v14  ;;  %v6155_v34 = vld [vmem:[%s7519_s29 + $0xa8] sm:$0xff]  ;;  %v6189_v14 = vld [vmem:[%s11584_s4 + $0x60] sm:$0xff] }
 0x141   : > { %1435 = vmatpush.msra.mxu0 %v6189_v14 }
 0x143   : > { %1895 = vmatpush.msrb.mxu0 %v6266_v23 }
 0x145   : > { %6166 = vmatmul.msk.f32.gmra.mxu2 %vm594_vm0, %v6153_v49  ;;  %v7846_v55 = vpop.f32.mrf.mxu1  ;;  %1896 = vmatpush.msrb.mxu0 %v6265_v2 }
 0x148   : > { %v7795_v58 = vpop.f32.mrf.mxu2  ;;  %6124 = vmatmul.msk.f32.gmra.mxu3 %vm748_vm1, %v7675_v43  ;;  %6143 = vmatmul.msk.f32.gmra.mxu1 %vm748_vm1, %v1046_v25  ;;  %v6156_v43 = vld [vmem:[%s7519_s29 + $0xb0] sm:$0xff] }
 0x14d   : > { %6167 = vmatmul.msk.f32.gmra.mxu2 %vm594_vm0, %v6154_v10  ;;  %v7854_v60 = vpop.f32.mrf.mxu1 }
 0x150   : > { %v7803_v20 = vpop.f32.mrf.mxu2  ;;  %6125 = vmatmul.msk.f32.gmra.mxu3 %vm748_vm1, %v7685_v54  ;;  %6144 = vmatmul.msk.f32.gmra.mxu1 %vm748_vm1, %v1048_v48  ;;  %v6159_v54 = vld [vmem:[%s7519_s29 + $0xc8] sm:$0xf] }
 0x155   : > { %6168 = vmatmul.msk.f32.gmra.mxu2 %vm594_vm0, %v6155_v34  ;;  %v7880_v16 = vpop.f32.mrf.mxu1 }
 0x158   : > { %v7816_v42 = vpop.f32.mrf.mxu2  ;;  %6126 = vmatmul.msk.f32.gmra.mxu3 %vm748_vm1, %v7707_v15  ;;  %6145 = vmatmul.msk.f32.gmra.mxu1 %vm748_vm1, %v1050_v41 }
 0x15d   : > { %6169 = vmatmul.msk.f32.gmra.mxu2 %vm594_vm0, %v6156_v43  ;;  %v7901_v27 = vpop.f32.mrf.mxu1 }
 0x160   : > { %v7823_v44 = vpop.f32.mrf.mxu2  ;;  %6127 = vmatmul.msk.f32.gmra.mxu3 %vm748_vm1, %v7715_v26  ;;  %6146 = vmatmul.msk.f32.gmra.mxu1 %vm748_vm1, %v1049_v40  ;;  %v6240_v26 = vld [vmem:[%s7519_s29 + $0xe8] sm:$0xff] }
 0x165   : > { %6170 = vmatmul.msk.f32.gmra.mxu2 %vm594_vm0, %v6157_v45  ;;  %v7911_v48 = vpop.f32.mrf.mxu1 }
 0x168   : > { %v7830_v46 = vpop.f32.mrf.mxu2  ;;  %6128 = vmatmul.msk.f32.gmra.mxu3 %vm748_vm1, %v7735_v37 }
 0x16d   : > { %6171 = vmatmul.msk.f32.gmra.mxu2 %vm594_vm0, %v6158_v50  ;;  %v7924_v6 = vpop.f32.mrf.mxu1 }
 0x170   : > { %v7842_v53 = vpop.f32.mrf.mxu2  ;;  %6129 = vmatmul.msk.f32.gmra.mxu3 %vm748_vm1, %v932_v52 }
 0x175   : > { %6172 = vmatmul.msk.f32.gmra.mxu2 %vm594_vm0, %v6159_v54  ;;  %v7941_v54 = vpop.f32.mrf.mxu1 }
 0x178   : > { %v7849_v56 = vpop.f32.mrf.mxu2  ;;  %6130 = vmatmul.msk.f32.gmra.mxu3 %vm748_vm1, %v931_v51 }
 0x17d   : > { %6250 = vmatmul.msk.f32.vlgmr.msra.gmra.mxu2 %vm594_vm0, %v6237_v59 }
 0x180   : > { %v7856_v61 = vpop.f32.mrf.mxu2 }
 0x185   : > { %6251 = vmatmul.msk.f32.gmra.mxu2 %vm594_vm0, %v6238_v63 }
 0x188   : > { %v7878_v15 = vpop.f32.mrf.mxu2 }
 0x189   : > { %11586 = vst [vmem:[#allocation10_spill] sm:$0xff] %v7878_v15  ;;  %v6334_v15 = vld [vmem:[%s7519_s29 + $0x170] sm:$0xff] }
 0x18b   : > { %v7886_v21 = vpop.f32.mrf.mxu3 }
 0x18d   : > { %6252 = vmatmul.msk.f32.gmra.mxu2 %vm594_vm0, %v6239_v17 }
 0x190   : > { %v7898_v25 = vpop.f32.mrf.mxu2 }
 0x191   : > { %11587 = vst [vmem:[#allocation11_spill] sm:$0xff] %v7898_v25 }
 0x193   : > { %v7904_v28 = vpop.f32.mrf.mxu3 }
 0x194   : > { %11588 = vst [vmem:[#allocation12_spill] sm:$0xff] %v7904_v28 }
 0x195   : > { %6253 = vmatmul.msk.f32.gmra.mxu2 %vm594_vm0, %v6240_v26  ;;  %v6245_v26 = vld [vmem:[%s7519_s29 + $0x110] sm:$0xff] }
 0x198   : > { %v1210_v30 = vpop.f32.mrf.mxu2 }
 0x199   : > { %v1211_v31 = vadd.f32 %v7590_v29, %v1210_v30  ;;  %v7961_v30 = vpop.f32.mrf.mxu1 }
 0x19b   : > { %v1249_v35 = vmax.f32 %v1211_v31, 0.0  ;;  %v7915_v37 = vpop.f32.mrf.mxu3 }
 0x19c   : > { %11589 = vst [vmem:[#allocation13_spill] sm:$0xff] %v7915_v37 }
 0x19d   : > { %6177 = vmatmul.msk.f32.vlgmr.msra.gmra.mxu3 %vm748_vm1, %v1249_v35  ;;  %6254 = vmatmul.msk.f32.gmra.mxu2 %vm594_vm0, %v6241_v32  ;;  %v1373_v3 = vrot.slane %v1249_v35, 1  ;;  %v6264_v32 = vld [vmem:[%s11584_s4 + $0x88] sm:$0xff] }
 0x19e   : > { %1897 = vmatpush.msrb.mxu0 %v6264_v32 }
 0x1a0   : > { %v1213_v38 = vpop.f32.mrf.mxu2 }
 0x1a1   : > { %v1214_v39 = vadd.f32 %v7590_v29, %v1213_v38 }
 0x1a3   : > { %v1250_v1 = vmax.f32 %v1214_v39, 0.0  ;;  %v7929_v11 = vpop.f32.mrf.mxu3 }
 0x1a5   : > { %6178 = vmatmul.msk.f32.gmra.mxu3 %vm748_vm1, %v1250_v1  ;;  %6255 = vmatmul.msk.f32.gmra.mxu2 %vm594_vm0, %v6242_v0  ;;  %v1374_v5 = vrot.slane %v1250_v1, 1  ;;  %v1608_v34 = vrot.slane %v1250_v1, 3  ;;  %v1491_v43 = vrot.slane %v1250_v1, 2 }
 0x1a7   : > { %v1375_v49 = vsel %vm724_vm2, %v1373_v3, %v1374_v5 }
 0x1a8   : > { %v1216_v57 = vpop.f32.mrf.mxu2  ;;  %6193 = vmatmul.msk.f32.vlgmr.msra.gmra.mxu0 %vm748_vm1, %v1375_v49  ;;  %v6246_v49 = vld [vmem:[%s7519_s29 + $0x118] sm:$0xff] }
 0x1a9   : > { %v1217_v10 = vadd.f32 %v7590_v29, %v1216_v57 }
 0x1ab   : > { %v1251_v33 = vmax.f32 %v1217_v10, 0.0  ;;  %v7948_v9 = vpop.f32.mrf.mxu3  ;;  %v7979_v10 = vpop.f32.mrf.mxu1 }
 0x1ad   : > { %v1609_v40 = vrot.slane %v1251_v33, 3  ;;  %6179 = vmatmul.msk.f32.gmra.mxu3 %vm748_vm1, %v1251_v33  ;;  %6256 = vmatmul.msk.f32.gmra.mxu2 %vm594_vm0, %v6243_v19  ;;  %v1376_v41 = vrot.slane %v1251_v33, 1  ;;  %v1492_v45 = vrot.slane %v1251_v33, 2 }
 0x1af   : > { %v1377_v47 = vsel %vm724_vm2, %v1374_v5, %v1376_v41  ;;  %v1493_v50 = vsel %vm909_vm4, %v1491_v43, %v1492_v45  ;;  %v7937_v51 = vsel %vm1027_vm3, %v1608_v34, %v1609_v40 }
 0x1b0   : > { %v1219_v52 = vpop.f32.mrf.mxu2  ;;  %6194 = vmatmul.msk.f32.gmra.mxu0 %vm748_vm1, %v1377_v47  ;;  %6209 = vmatmul.msk.f32.vlgmr.msra.gmra.mxu1 %vm748_vm1, %v1493_v50 }
 0x1b1   : > { %v1220_v59 = vadd.f32 %v7590_v29, %v1219_v52  ;;  %v6247_v52 = vld [vmem:[%s7519_s29 + $0x120] sm:$0xff] }
 0x1b3   : > { %v1252_v63 = vmax.f32 %v1220_v59, 0.0  ;;  %v7968_v39 = vpop.f32.mrf.mxu3 }
 0x1b5   : > { %6180 = vmatmul.msk.f32.gmra.mxu3 %vm748_vm1, %v1252_v63  ;;  %6257 = vmatmul.msk.f32.gmra.mxu2 %vm594_vm0, %v6244_v62  ;;  %v1378_v12 = vrot.slane %v1252_v63, 1  ;;  %v1494_v13 = vrot.slane %v1252_v63, 2  ;;  %v1611_v14 = vrot.slane %v1252_v63, 3  ;;  %v6221_v62 = vld [vmem:[%s11584_s4 + $0x160] sm:$0xff] }
 0x1b6   : > { %1670 = vmatpush.msrb.mxu3 %v6221_v62 }
 0x1b7   : > { %v1379_v17 = vsel %vm724_vm2, %v1376_v41, %v1378_v12  ;;  %v1495_v18 = vsel %vm909_vm4, %v1492_v45, %v1494_v13  ;;  %v7955_v22 = vsel %vm1027_vm3, %v1609_v40, %v1611_v14 }
 0x1b8   : > { %v1222_v23 = vpop.f32.mrf.mxu2  ;;  %6195 = vmatmul.msk.f32.gmra.mxu0 %vm748_vm1, %v1379_v17  ;;  %6210 = vmatmul.msk.f32.gmra.mxu1 %vm748_vm1, %v1495_v18 }
 0x1b9   : > { %v1223_v24 = vadd.f32 %v7590_v29, %v1222_v23 }
 0x1bb   : > { %v1253_v31 = vmax.f32 %v1223_v24, 0.0  ;;  %v7988_v45 = vpop.f32.mrf.mxu3 }
 0x1bd   : > { %6181 = vmatmul.msk.f32.gmra.mxu3 %vm748_vm1, %v1253_v31  ;;  %6258 = vmatmul.msk.f32.gmra.mxu2 %vm594_vm0, %v6245_v26  ;;  %v1380_v35 = vrot.slane %v1253_v31, 1  ;;  %v1496_v36 = vrot.slane %v1253_v31, 2  ;;  %v1613_v38 = vrot.slane %v1253_v31, 3  ;;  %v6248_v31 = vld [vmem:[%s7519_s29 + $0x128] sm:$0xff] }
 0x1bf   : > { %v1381_v0 = vsel %vm724_vm2, %v1378_v12, %v1380_v35  ;;  %v1497_v1 = vsel %vm909_vm4, %v1494_v13, %v1496_v36  ;;  %v7973_v2 = vsel %vm1027_vm3, %v1611_v14, %v1613_v38  ;;  %v7999_v13 = vpop.f32.mrf.mxu1 }
 0x1c0   : > { %v1225_v3 = vpop.f32.mrf.mxu2  ;;  %6196 = vmatmul.msk.f32.gmra.mxu0 %vm748_vm1, %v1381_v0  ;;  %6211 = vmatmul.msk.f32.gmra.mxu1 %vm748_vm1, %v1497_v1 }
 0x1c1   : > { %v1226_v5 = vadd.f32 %v7590_v29, %v1225_v3 }
 0x1c3   : > { %v1254_v57 = vmax.f32 %v1226_v5, 0.0  ;;  %v8009_v26 = vpop.f32.mrf.mxu3 }
 0x1c5   : > { %6182 = vmatmul.msk.f32.gmra.mxu3 %vm748_vm1, %v1254_v57  ;;  %6259 = vmatmul.msk.f32.gmra.mxu2 %vm594_vm0, %v6246_v49  ;;  %v1382_v19 = vrot.slane %v1254_v57, 1  ;;  %v1498_v33 = vrot.slane %v1254_v57, 2  ;;  %v1615_v34 = vrot.slane %v1254_v57, 3 }
 0x1c7   : > { %v1383_v40 = vsel %vm724_vm2, %v1380_v35, %v1382_v19  ;;  %v1499_v41 = vsel %vm909_vm4, %v1496_v36, %v1498_v33  ;;  %v7986_v43 = vsel %vm1027_vm3, %v1613_v38, %v1615_v34  ;;  %v6263_v35 = vld [vmem:[%s11584_s4 + $0x80] sm:$0xff]  ;;  %v8024_v57 = vpop.f32.mrf.mxu1 }
 0x1c8   : > { %v1228_v47 = vpop.f32.mrf.mxu2  ;;  %6197 = vmatmul.msk.f32.gmra.mxu0 %vm748_vm1, %v1383_v40  ;;  %6212 = vmatmul.msk.f32.gmra.mxu1 %vm748_vm1, %v1499_v41 }
 0x1c9   : > { %v1229_v50 = vadd.f32 %v7590_v29, %v1228_v47  ;;  %1898 = vmatpush.msrb.mxu0 %v6263_v35 }
 0x1cb   : > { %v1255_v59 = vmax.f32 %v1229_v50, 0.0  ;;  %v8028_v40 = vpop.f32.mrf.mxu3 }
 0x1cd   : > { %6183 = vmatmul.msk.f32.gmra.mxu3 %vm748_vm1, %v1255_v59  ;;  %6260 = vmatmul.msk.f32.gmra.mxu2 %vm594_vm0, %v6247_v52  ;;  %v1384_v63 = vrot.slane %v1255_v59, 1  ;;  %v1500_v8 = vrot.slane %v1255_v59, 2  ;;  %v1617_v12 = vrot.slane %v1255_v59, 3 }
 0x1cf   : > { %v1385_v14 = vsel %vm724_vm2, %v1382_v19, %v1384_v63  ;;  %v1501_v17 = vsel %vm909_vm4, %v1498_v33, %v1500_v8  ;;  %v8004_v18 = vsel %vm1027_vm3, %v1615_v34, %v1617_v12  ;;  %v6249_v33 = vld [vmem:[%s7519_s29 + $0x130] sm:$0xf] }
 0x1d0   : > { %v1231_v23 = vpop.f32.mrf.mxu2  ;;  %6198 = vmatmul.msk.f32.gmra.mxu0 %vm748_vm1, %v1385_v14  ;;  %6213 = vmatmul.msk.f32.gmra.mxu1 %vm748_vm1, %v1501_v17  ;;  %v8041_v14 = vpop.f32.mrf.mxu1 }
 0x1d1   : > { %v1232_v24 = vadd.f32 %v7590_v29, %v1231_v23 }
 0x1d3   : > { %v1256_v32 = vmax.f32 %v1232_v24, 0.0 }
 0x1d5   : > { %6184 = vmatmul.msk.f32.gmra.mxu3 %vm748_vm1, %v1256_v32  ;;  %6261 = vmatmul.msk.f32.gmra.mxu2 %vm594_vm0, %v6248_v31  ;;  %v1386_v36 = vrot.slane %v1256_v32, 1  ;;  %v1502_v38 = vrot.slane %v1256_v32, 2  ;;  %v1619_v0 = vrot.slane %v1256_v32, 3  ;;  %v6298_v31 = vld [vmem:[%s11584_s4 + $0x198] sm:$0xff] }
 0x1d6   : > { %v6282_v32 = vld [vmem:[%s11584_s4 + $0xd8] sm:$0xff]  ;;  %2130 = vmatpush.msra.mxu3 %v6298_v31 }
 0x1d7   : > { %v1387_v1 = vsel %vm724_vm2, %v1384_v63, %v1386_v36  ;;  %v1503_v3 = vsel %vm909_vm4, %v1500_v8, %v1502_v38  ;;  %v8020_v5 = vsel %vm1027_vm3, %v1617_v12, %v1619_v0  ;;  %v6327_v12 = vld [vmem:[%s7519_s29 + $0x138] sm:$0xff]  ;;  %2012 = vmatpush.msrb.mxu1 %v6282_v32 }
 0x1d8   : > { %v1234_v49 = vpop.f32.mrf.mxu2  ;;  %6199 = vmatmul.msk.f32.gmra.mxu0 %vm748_vm1, %v1387_v1  ;;  %6214 = vmatmul.msk.f32.gmra.mxu1 %vm748_vm1, %v1503_v3 }
 0x1d9   : > { %v1235_v19 = vadd.f32 %v7590_v29, %v1234_v49 }
 0x1db   : > { %v1257_v34 = vmax.f32 %v1235_v19, 0.0  ;;  %v6328_v19 = vld [vmem:[%s7519_s29 + $0x140] sm:$0xff] }
 0x1dd   : > { %6185 = vmatmul.msk.f32.gmra.mxu3 %vm748_vm1, %v1257_v34  ;;  %6262 = vmatmul.msk.f32.gmra.mxu2 %vm594_vm0, %v6249_v33  ;;  %v1388_v41 = vrot.slane %v1257_v34, 1  ;;  %v1504_v47 = vrot.slane %v1257_v34, 2  ;;  %v1621_v50 = vrot.slane %v1257_v34, 3  ;;  %v6281_v33 = vld [vmem:[%s11584_s4 + $0xd0] sm:$0xff] }
 0x1de   : > { %2013 = vmatpush.msrb.mxu1 %v6281_v33 }
 0x1df   : > { %v1389_v52 = vsel %vm724_vm2, %v1386_v36, %v1388_v41  ;;  %v1505_v59 = vsel %vm909_vm4, %v1502_v38, %v1504_v47  ;;  %v8035_v62 = vsel %vm1027_vm3, %v1619_v0, %v1621_v50  ;;  %v8051_v36 = vpop.f32.mrf.mxu3 }
 0x1e0   : > { %v1237_v63 = vpop.f32.mrf.mxu2  ;;  %6200 = vmatmul.msk.f32.gmra.mxu0 %vm748_vm1, %v1389_v52  ;;  %6215 = vmatmul.msk.f32.gmra.mxu1 %vm748_vm1, %v1505_v59  ;;  %v6314_v59 = vld [vmem:[%s11584_s4 + $0x1d8] sm:$0xff] }
 0x1e1   : > { %v1238_v8 = vadd.f32 %v7590_v29, %v1237_v63  ;;  %2247 = vmatpush.msra.mxu0 %v6314_v59 }
 0x1e3   : > { %v1258_v17 = vmax.f32 %v1238_v8, 0.0  ;;  %v6279_v8 = vld [vmem:[%s11584_s4 + $0xc0] sm:$0xff] }
 0x1e5   : > { %6186 = vmatmul.msk.f32.gmra.mxu3 %vm748_vm1, %v1258_v17  ;;  %v1390_v23 = vrot.slane %v1258_v17, 1  ;;  %v1506_v24 = vrot.slane %v1258_v17, 2  ;;  %6340 = vmatmul.msk.f32.vlgmr.msrb.gmra.mxu2 %vm594_vm0, %v6327_v12  ;;  %v1623_v35 = vrot.slane %v1258_v17, 3 }
 0x1e7   : > { %v1391_v38 = vsel %vm724_vm2, %v1388_v41, %v1390_v23  ;;  %v1507_v0 = vsel %vm909_vm4, %v1504_v47, %v1506_v24  ;;  %v8056_v1 = vsel %vm1027_vm3, %v1621_v50, %v1623_v35  ;;  %v6280_v41 = vld [vmem:[%s11584_s4 + $0xc8] sm:$0xff]  ;;  %v8068_v47 = vpop.f32.mrf.mxu1  ;;  %v8083_v32 = vpop.f32.mrf.mxu3 }
 0x1e8   : > { %v1240_v3 = vpop.f32.mrf.mxu2  ;;  %6201 = vmatmul.msk.f32.gmra.mxu0 %vm748_vm1, %v1391_v38  ;;  %6216 = vmatmul.msk.f32.gmra.mxu1 %vm748_vm1, %v1507_v0 }
 0x1e9   : > { %v1241_v49 = vadd.f32 %v7590_v29, %v1240_v3  ;;  %2014 = vmatpush.msrb.mxu1 %v6280_v41  ;;  %v6329_v3 = vld [vmem:[%s7519_s29 + $0x148] sm:$0xff] }
 0x1eb   : > { %v1259_v34 = vmax.f32 %v1241_v49, 0.0  ;;  %2015 = vmatpush.msrb.mxu1 %v6279_v8 }
 0x1ed   : > { %6187 = vmatmul.msk.f32.gmra.mxu3 %vm748_vm1, %v1259_v34  ;;  %v1392_v50 = vrot.slane %v1259_v34, 1  ;;  %v1508_v52 = vrot.slane %v1259_v34, 2  ;;  %6341 = vmatmul.msk.f32.gmra.mxu2 %vm594_vm0, %v6328_v19  ;;  %v1625_v63 = vrot.slane %v1259_v34, 3 }
 0x1ef   : > { %v1393_v12 = vsel %vm724_vm2, %v1390_v23, %v1392_v50  ;;  %v1509_v17 = vsel %vm909_vm4, %v1506_v24, %v1508_v52  ;;  %v8081_v31 = vsel %vm1027_vm3, %v1623_v35, %v1625_v63  ;;  %v8091_v19 = vpop.f32.mrf.mxu1 }
 0x1f0   : > { %v1243_v38 = vpop.f32.mrf.mxu2  ;;  %6202 = vmatmul.msk.f32.gmra.mxu0 %vm748_vm1, %v1393_v12  ;;  %6217 = vmatmul.msk.f32.gmra.mxu1 %vm748_vm1, %v1509_v17  ;;  %v8101_v12 = vpop.f32.mrf.mxu3  ;;  %v6330_v17 = vld [vmem:[%s7519_s29 + $0x150] sm:$0xff] }
 0x1f1   : > { %v1244_v0 = vadd.f32 %v7590_v29, %v1243_v38 }
 0x1f3   : > { %v1260_v49 = vmax.f32 %v1244_v0, 0.0 }
 0x1f5   : > { %6188 = vmatmul.msk.f32.gmra.mxu3 %vm748_vm1, %v1260_v49  ;;  %v1394_v23 = vrot.slane %v1260_v49, 1  ;;  %v1510_v24 = vrot.slane %v1260_v49, 2  ;;  %6342 = vmatmul.msk.f32.gmra.mxu2 %vm594_vm0, %v6329_v3  ;;  %v1627_v35 = vrot.slane %v1260_v49, 3 }
 0x1f7   : > { %v1395_v33 = vsel %vm724_vm2, %v1392_v50, %v1394_v23  ;;  %v1511_v34 = vsel %vm909_vm4, %v1508_v52, %v1510_v24  ;;  %v8096_v41 = vsel %vm1027_vm3, %v1625_v63, %v1627_v35  ;;  %v6297_v50 = vld [vmem:[%s11584_s4 + $0x190] sm:$0xff] }
 0x1f8   : > { %v1246_v59 = vpop.f32.mrf.mxu2  ;;  %6203 = vmatmul.msk.f32.gmra.mxu0 %vm748_vm1, %v1395_v33  ;;  %6218 = vmatmul.msk.f32.gmra.mxu1 %vm748_vm1, %v1511_v34  ;;  %v8119_v33 = vpop.f32.mrf.mxu1 }
 0x1f9   : > { %v1247_v8 = vadd.f32 %v7590_v29, %v1246_v59  ;;  %2131 = vmatpush.msra.mxu3 %v6297_v50  ;;  %v6331_v59 = vld [vmem:[%s7519_s29 + $0x158] sm:$0xff] }
 0x1fb   : > { %v1261_v38 = vmax.f32 %v1247_v8, 0.0 }
 0x1fd   : > { %v1512_v52 = vrot.slane %v1261_v38, 2  ;;  %v8107_v63 = vrot.slane %v1261_v38, 3  ;;  %6225 = vmatmul.msk.f32.vlgmr.msrb.gmra.mxu3 %vm748_vm1, %v7937_v51  ;;  %6343 = vmatmul.msk.f32.gmra.mxu2 %vm594_vm0, %v6330_v17  ;;  %v6313_v51 = vld [vmem:[%s11584_s4 + $0x1d0] sm:$0xff]  ;;  %v6332_v17 = vld [vmem:[%s7519_s29 + $0x160] sm:$0xff] }
 0x1fe   : > { %2248 = vmatpush.msra.mxu0 %v6313_v51  ;;  %v6333_v51 = vld [vmem:[%s7519_s29 + $0x168] sm:$0xff] }
 0x1ff   : > { %v1513_v0 = vsel %vm909_vm4, %v1510_v24, %v1512_v52  ;;  %v8115_v3 = vsel %vm1027_vm3, %v1627_v35, %v8107_v63  ;;  %v8126_v24 = vpop.f32.mrf.mxu3 }
 0x200   : > { %6204 = vmatmul.msk.f32.gmra.mxu0 %vm748_vm1, %v1394_v23  ;;  %6219 = vmatmul.msk.f32.gmra.mxu1 %vm748_vm1, %v1513_v0  ;;  %v1790_v49 = vpop.f32.mrf.mxu2  ;;  %v8135_v38 = vpop.f32.mrf.mxu1 }
 0x201   : > { %v1791_v34 = vadd.f32 %v7590_v29, %v1790_v49 }
 0x203   : > { %v1829_v8 = vmax.f32 %v1791_v34, 0.0 }
 0x205   : > { %6226 = vmatmul.msk.f32.gmra.mxu3 %vm748_vm1, %v7955_v22  ;;  %6344 = vmatmul.msk.f32.gmra.mxu2 %vm594_vm0, %v6331_v59  ;;  %v1953_v0 = vrot.slane %v1829_v8, 1 }
 0x207   : > { %v8140_v22 = vpop.f32.mrf.mxu3 }
 0x208   : > { %6220 = vmatmul.msk.f32.gmra.mxu1 %vm748_vm1, %v1512_v52  ;;  %v1793_v23 = vpop.f32.mrf.mxu2  ;;  %6267 = vmatmul.msk.f32.vlgmr.msrb.gmra.mxu0 %vm748_vm1, %v1829_v8  ;;  %11590 = vst [vmem:[#allocation14_spill] sm:$0xff] %v8140_v22  ;;  %v6296_v8 = vld [vmem:[%s11584_s4 + $0x188] sm:$0xff] }
 0x209   : > { %v1794_v35 = vadd.f32 %v7590_v29, %v1793_v23  ;;  %v8148_v29 = vld [vmem:[%s11585_s3] ss:$0 sm:$0xff]  ;;  %2132 = vmatpush.msra.mxu3 %v6296_v8 }
 0x20b   : > { %v1830_v50 = vmax.f32 %v1794_v35, 0.0  ;;  %v8155_v35 = vpop.f32.mrf.mxu1 }
 0x20d   : > { %v1954_v49 = vrot.slane %v1830_v50, 1  ;;  %6227 = vmatmul.msk.f32.gmra.mxu3 %vm748_vm1, %v7973_v2  ;;  %6345 = vmatmul.msk.f32.gmra.mxu2 %vm594_vm0, %v6332_v17  ;;  %v2071_v23 = vrot.slane %v1830_v50, 2  ;;  %v2188_v17 = vrot.slane %v1830_v50, 3 }
 0x20f   : > { %v1955_v52 = vsel %vm724_vm2, %v1953_v0, %v1954_v49  ;;  %v8167_v22 = vpop.f32.mrf.mxu3 }
 0x210   : > { %v1796_v34 = vpop.f32.mrf.mxu2  ;;  %6268 = vmatmul.msk.f32.gmra.mxu0 %vm748_vm1, %v1830_v50  ;;  %6283 = vmatmul.msk.f32.vlgmr.msrb.gmra.mxu1 %vm748_vm1, %v1955_v52  ;;  %11591 = vst [vmem:[#allocation15_spill] sm:$0xff] %v8167_v22 }
 0x211   : > { %v1797_v59 = vadd.f32 %v8148_v29, %v1796_v34  ;;  %v790_v34 = vpop.f32.mrf.mxu0 }
 0x213   : > { %v1831_v2 = vmax.f32 %v1797_v59, 0.0 }
 0x215   : > { %v2072_v0 = vrot.slane %v1831_v2, 2  ;;  %v2189_v52 = vrot.slane %v1831_v2, 3  ;;  %6228 = vmatmul.msk.f32.gmra.mxu3 %vm748_vm1, %v7986_v43  ;;  %v1956_v25 = vrot.slane %v1831_v2, 1  ;;  %6346 = vmatmul.msk.f32.gmra.mxu2 %vm594_vm0, %v6333_v51  ;;  %v868_v43 = vadd.f32 %v7776_v4, %v790_v34  ;;  %v8181_v34 = vpop.f32.mrf.mxu1 }
 0x217   : > { %v1957_v59 = vsel %vm724_vm2, %v1954_v49, %v1956_v25  ;;  %v8162_v37 = vsel %vm909_vm4, %v2071_v23, %v2072_v0  ;;  %v8165_v8 = vsel %vm1027_vm3, %v2188_v17, %v2189_v52  ;;  %v1010_v49 = vadd.f32 %v7929_v11, %v868_v43  ;;  %v6312_v23 = vld [vmem:[%s11584_s4 + $0x1c8] sm:$0xff] }
 0x218   : > { %v1799_v50 = vpop.f32.mrf.mxu2  ;;  %6269 = vmatmul.msk.f32.gmra.mxu0 %vm748_vm1, %v1831_v2  ;;  %6284 = vmatmul.msk.f32.gmra.mxu1 %vm748_vm1, %v1957_v59 }
 0x219   : > { %v1800_v51 = vadd.f32 %v8148_v29, %v1799_v50  ;;  %2249 = vmatpush.msra.mxu0 %v6312_v23  ;;  %v1128_v59 = vadd.f32 %v7979_v10, %v1010_v49 }
 0x21b   : > { %v1832_v28 = vmax.f32 %v1800_v51, 0.0 }
 0x21d   : > { %6229 = vmatmul.msk.f32.gmra.mxu3 %vm748_vm1, %v8004_v18  ;;  %v1958_v17 = vrot.slane %v1832_v28, 1  ;;  %6347 = vmatmul.msk.f32.gmra.mxu2 %vm594_vm0, %v6334_v15  ;;  %v2074_v2 = vrot.slane %v1832_v28, 2  ;;  %v2191_v4 = vrot.slane %v1832_v28, 3  ;;  %v871_v15 = vadd.f32 %v7787_v7, %v7846_v55 }
 0x21f   : > { %v1959_v11 = vsel %vm724_vm2, %v1956_v25, %v1958_v17  ;;  %v8186_v50 = vsel %vm909_vm4, %v2072_v0, %v2074_v2  ;;  %v8189_v43 = vsel %vm1027_vm3, %v2189_v52, %v2191_v4  ;;  %v6335_v25 = vld [vmem:[%s7519_s29 + $0x178] sm:$0xff]  ;;  %v1011_v0 = vadd.f32 %v7948_v9, %v871_v15  ;;  %v8217_v15 = vpop.f32.mrf.mxu1 }
 0x220   : > { %v1320_v51 = vpop.f32.mrf.mxu3  ;;  %v1802_v18 = vpop.f32.mrf.mxu2  ;;  %6270 = vmatmul.msk.f32.gmra.mxu0 %vm748_vm1, %v1832_v28  ;;  %6285 = vmatmul.msk.f32.gmra.mxu1 %vm748_vm1, %v1959_v11 }
 0x221   : > { %v8195_v23 = vadd.f32 %v1320_v51, %v1128_v59  ;;  %v1803_v10 = vadd.f32 %v8148_v29, %v1802_v18  ;;  %v1129_v7 = vadd.f32 %v7999_v13, %v1011_v0 }
 0x223   : > { %v1833_v49 = vmax.f32 %v1803_v10, 0.0 }
 0x225   : > { %v8200_v22 = vpop.f32.mrf.mxu0  ;;  %6230 = vmatmul.msk.f32.gmra.mxu3 %vm748_vm1, %v8020_v5  ;;  %v1960_v52 = vrot.slane %v1833_v49, 1  ;;  %6348 = vmatmul.msk.f32.gmra.mxu2 %vm594_vm0, %v6335_v25  ;;  %v2076_v28 = vrot.slane %v1833_v49, 2  ;;  %v2193_v11 = vrot.slane %v1833_v49, 3  ;;  %v874_v5 = vadd.f32 %v7795_v58, %v7854_v60  ;;  %v6295_v25 = vld [vmem:[%s11584_s4 + $0x180] sm:$0xff] }
 0x226   : > { %2133 = vmatpush.msra.mxu3 %v6295_v25 }
 0x227   : > { %v1961_v55 = vsel %vm724_vm2, %v1958_v17, %v1960_v52  ;;  %v8208_v59 = vsel %vm909_vm4, %v2074_v2, %v2076_v28  ;;  %v8211_v9 = vsel %vm1027_vm3, %v2191_v4, %v2193_v11  ;;  %v6336_v2 = vld [vmem:[%s7519_s29 + $0x180] sm:$0xff]  ;;  %v1012_v10 = vadd.f32 %v7968_v39, %v874_v5 }
 0x228   : > { %v1323_v51 = vpop.f32.mrf.mxu3  ;;  %v1805_v18 = vpop.f32.mrf.mxu2  ;;  %6271 = vmatmul.msk.f32.gmra.mxu0 %vm748_vm1, %v1833_v49  ;;  %6286 = vmatmul.msk.f32.gmra.mxu1 %vm748_vm1, %v1961_v55 }
 0x229   : > { %v8219_v13 = vadd.f32 %v1323_v51, %v1129_v7  ;;  %v1806_v17 = vadd.f32 %v8148_v29, %v1805_v18  ;;  %v1130_v7 = vadd.f32 %v8024_v57, %v1012_v10  ;;  %v6311_v10 = vld [vmem:[%s11584_s4 + $0x1c0] sm:$0xff] }
 0x22a   : > { %2250 = vmatpush.msra.mxu0 %v6311_v10 }
 0x22b   : > { %v1834_v4 = vmax.f32 %v1806_v17, 0.0  ;;  %v8244_v17 = vpop.f32.mrf.mxu1 }
 0x22d   : > { %v8227_v0 = vpop.f32.mrf.mxu0  ;;  %6231 = vmatmul.msk.f32.gmra.mxu3 %vm748_vm1, %v8035_v62  ;;  %v1962_v58 = vrot.slane %v1834_v4, 1  ;;  %6349 = vmatmul.msk.f32.gmra.mxu2 %vm594_vm0, %v6336_v2  ;;  %v2078_v60 = vrot.slane %v1834_v4, 2  ;;  %v2195_v49 = vrot.slane %v1834_v4, 3  ;;  %v877_v62 = vadd.f32 %v7803_v20, %v7880_v16 }
 0x22f   : > { %v1963_v39 = vsel %vm724_vm2, %v1960_v52, %v1962_v58  ;;  %v8235_v55 = vsel %vm909_vm4, %v2076_v28, %v2078_v60  ;;  %v8238_v51 = vsel %vm1027_vm3, %v2193_v11, %v2195_v49  ;;  %v6337_v28 = vld [vmem:[%s7519_s29 + $0x188] sm:$0xff]  ;;  %v1013_v2 = vadd.f32 %v7988_v45, %v877_v62 }
 0x230   : > { %v1326_v18 = vpop.f32.mrf.mxu3  ;;  %v1808_v5 = vpop.f32.mrf.mxu2  ;;  %6272 = vmatmul.msk.f32.gmra.mxu0 %vm748_vm1, %v1834_v4  ;;  %6287 = vmatmul.msk.f32.gmra.mxu1 %vm748_vm1, %v1963_v39 }
 0x231   : > { %v8246_v57 = vadd.f32 %v1326_v18, %v1130_v7  ;;  %v1809_v52 = vadd.f32 %v8148_v29, %v1808_v5  ;;  %v1131_v7 = vadd.f32 %v8041_v14, %v1013_v2  ;;  %v6404_v2 = vld [vmem:[%s11584_s4 + $0x1f8] sm:$0xff] }
 0x232   : > { %2827 = vmatpush.msra.mxu2 %v6404_v2 }
 0x233   : > { %v1835_v11 = vmax.f32 %v1809_v52, 0.0  ;;  %v8271_v52 = vpop.f32.mrf.mxu1 }
 0x235   : > { %v8254_v4 = vpop.f32.mrf.mxu0  ;;  %6232 = vmatmul.msk.f32.gmra.mxu3 %vm748_vm1, %v8056_v1  ;;  %v1964_v20 = vrot.slane %v1835_v11, 1  ;;  %6350 = vmatmul.msk.f32.gmra.mxu2 %vm594_vm0, %v6337_v28  ;;  %v2080_v16 = vrot.slane %v1835_v11, 2  ;;  %v2197_v25 = vrot.slane %v1835_v11, 3  ;;  %v880_v1 = vadd.f32 %v7816_v42, %v7901_v27 }
 0x237   : > { %v1965_v45 = vsel %vm724_vm2, %v1962_v58, %v1964_v20  ;;  %v8262_v39 = vsel %vm909_vm4, %v2078_v60, %v2080_v16  ;;  %v8265_v18 = vsel %vm1027_vm3, %v2195_v49, %v2197_v25  ;;  %v6338_v60 = vld [vmem:[%s7519_s29 + $0x190] sm:$0xff]  ;;  %v1014_v28 = vadd.f32 %v8009_v26, %v880_v1 }
 0x238   : > { %v1329_v5 = vpop.f32.mrf.mxu3  ;;  %v1811_v62 = vpop.f32.mrf.mxu2  ;;  %6273 = vmatmul.msk.f32.gmra.mxu0 %vm748_vm1, %v1835_v11  ;;  %6288 = vmatmul.msk.f32.gmra.mxu1 %vm748_vm1, %v1965_v45 }
 0x239   : > { %v8273_v14 = vadd.f32 %v1329_v5, %v1131_v7  ;;  %v1812_v58 = vadd.f32 %v8148_v29, %v1811_v62  ;;  %v1132_v7 = vadd.f32 %v8068_v47, %v1014_v28 }
 0x23b   : > { %v1836_v49 = vmax.f32 %v1812_v58, 0.0 }
 0x23d   : > { %v8281_v11 = vpop.f32.mrf.mxu0  ;;  %6233 = vmatmul.msk.f32.gmra.mxu3 %vm748_vm1, %v8081_v31  ;;  %v1966_v42 = vrot.slane %v1836_v49, 1  ;;  %6351 = vmatmul.msk.f32.gmra.mxu2 %vm594_vm0, %v6338_v60  ;;  %v2082_v27 = vrot.slane %v1836_v49, 2  ;;  %v2199_v10 = vrot.slane %v1836_v49, 3  ;;  %v883_v31 = vadd.f32 %v7823_v44, %v7911_v48  ;;  %v6356_v44 = vld [vmem:[%s11584_s4 + $0xb8] sm:$0xff] }
 0x23e   : > { %2475 = vmatpush.msra.mxu1 %v6356_v44 }
 0x23f   : > { %v1967_v26 = vsel %vm724_vm2, %v1964_v20, %v1966_v42  ;;  %v8289_v45 = vsel %vm909_vm4, %v2080_v16, %v2082_v27  ;;  %v8292_v5 = vsel %vm1027_vm3, %v2197_v25, %v2199_v10  ;;  %v1015_v20 = vadd.f32 %v8028_v40, %v883_v31  ;;  %v8302_v16 = vpop.f32.mrf.mxu1 }
 0x240   : > { %v1332_v62 = vpop.f32.mrf.mxu3  ;;  %v1814_v1 = vpop.f32.mrf.mxu2  ;;  %6274 = vmatmul.msk.f32.gmra.mxu0 %vm748_vm1, %v1836_v49  ;;  %6289 = vmatmul.msk.f32.gmra.mxu1 %vm748_vm1, %v1967_v26  ;;  %v6372_v49 = vld [vmem:[%s11584_s4 + $0xf8] sm:$0xff]  ;;  %v886_v31 = vadd.f32 %v7830_v46, %v7924_v6  ;;  %v6354_v46 = vld [vmem:[%s11584_s4 + $0xa8] sm:$0xff] }
 0x241   : > { %v8298_v58 = vadd.f32 %v1332_v62, %v1132_v7  ;;  %v1815_v47 = vadd.f32 %v8148_v29, %v1814_v1  ;;  %2592 = vmatpush.msrb.mxu3 %v6372_v49  ;;  %v1133_v40 = vadd.f32 %v8091_v19, %v1015_v20 }
 0x243   : > { %v1837_v60 = vmax.f32 %v1815_v47, 0.0 }
 0x245   : > { %v8304_v25 = vpop.f32.mrf.mxu0  ;;  %6234 = vmatmul.msk.f32.gmra.mxu3 %vm748_vm1, %v8096_v41  ;;  %v1968_v28 = vrot.slane %v1837_v60, 1  ;;  %v2084_v48 = vrot.slane %v1837_v60, 2  ;;  %v2201_v2 = vrot.slane %v1837_v60, 3 }
 0x247   : > { %v1969_v7 = vsel %vm724_vm2, %v1966_v42, %v1968_v28  ;;  %v8317_v26 = vsel %vm909_vm4, %v2082_v27, %v2084_v48  ;;  %v8320_v41 = vsel %vm1027_vm3, %v2199_v10, %v2201_v2  ;;  %v6388_v42 = vld [vmem:[%s11584_s4 + $0x1b8] sm:$0xff]  ;;  %v6355_v27 = vld [vmem:[%s11584_s4 + $0xb0] sm:$0xff]  ;;  %v1016_v10 = vadd.f32 %v8051_v36, %v886_v31  ;;  %v8339_v6 = vpop.f32.mrf.mxu1  ;;  %v6353_v36 = vld [vmem:[%s11584_s4 + $0xa0] sm:$0xff] }
 0x248   : > { %v1335_v62 = vpop.f32.mrf.mxu3  ;;  %v1817_v1 = vpop.f32.mrf.mxu2  ;;  %6275 = vmatmul.msk.f32.gmra.mxu0 %vm748_vm1, %v1837_v60  ;;  %6290 = vmatmul.msk.f32.gmra.mxu1 %vm748_vm1, %v1969_v7 }
 0x249   : > { %v8326_v47 = vadd.f32 %v1335_v62, %v1133_v40  ;;  %v1818_v19 = vadd.f32 %v8148_v29, %v1817_v1  ;;  %2710 = vmatpush.msrb.mxu0 %v6388_v42  ;;  %2476 = vmatpush.msra.mxu1 %v6355_v27  ;;  %v1134_v7 = vadd.f32 %v8119_v33, %v1016_v10 }
 0x24a   : > { %v889_v42 = vadd.f32 %v7842_v53, %v7941_v54 }
 0x24b   : > { %v1838_v20 = vmax.f32 %v1818_v19, 0.0  ;;  %2477 = vmatpush.msra.mxu1 %v6354_v46 }
 0x24d   : > { %v8341_v60 = vpop.f32.mrf.mxu0  ;;  %6235 = vmatmul.msk.f32.gmra.mxu3 %vm748_vm1, %v8115_v3  ;;  %v1970_v49 = vrot.slane %v1838_v20, 1  ;;  %v2086_v44 = vrot.slane %v1838_v20, 2  ;;  %v2203_v40 = vrot.slane %v1838_v20, 3  ;;  %2478 = vmatpush.msra.mxu1 %v6353_v36  ;;  %v6403_v36 = vld [vmem:[%s11584_s4 + $0x1f0] sm:$0xff] }
 0x24e   : > { %2828 = vmatpush.msra.mxu2 %v6403_v36 }
 0x24f   : > { %v1971_v62 = vsel %vm724_vm2, %v1968_v28, %v1970_v49  ;;  %v8351_v1 = vsel %vm909_vm4, %v2084_v48, %v2086_v44  ;;  %v8354_v31 = vsel %vm1027_vm3, %v2201_v2, %v2203_v40  ;;  %v1017_v28 = vadd.f32 %v8083_v32, %v889_v42  ;;  %v8371_v53 = vpop.f32.mrf.mxu1 }
 0x250   : > { %v1338_v3 = vpop.f32.mrf.mxu3  ;;  %v1820_v19 = vpop.f32.mrf.mxu2  ;;  %6276 = vmatmul.msk.f32.gmra.mxu0 %vm748_vm1, %v1838_v20  ;;  %6291 = vmatmul.msk.f32.gmra.mxu1 %vm748_vm1, %v1971_v62 }
 0x251   : > { %v8360_v27 = vadd.f32 %v1338_v3, %v1134_v7  ;;  %v1821_v33 = vadd.f32 %v8148_v29, %v1820_v19  ;;  %v1135_v54 = vadd.f32 %v8135_v38, %v1017_v28  ;;  %v892_v19 = vadd.f32 %v7849_v56, %v7961_v30 }
 0x253   : > { %v1839_v48 = vmax.f32 %v1821_v33, 0.0 }
 0x255   : > { %v8364_v10 = vpop.f32.mrf.mxu0  ;;  %6236 = vmatmul.msk.f32.gmra.mxu3 %vm748_vm1, %v8107_v63  ;;  %v1972_v2 = vrot.slane %v1839_v48, 1  ;;  %v2088_v46 = vrot.slane %v1839_v48, 2  ;;  %v2205_v20 = vrot.slane %v1839_v48, 3 }
 0x257   : > { %v1973_v7 = vsel %vm724_vm2, %v1970_v49, %v1972_v2  ;;  %v8376_v32 = vsel %vm909_vm4, %v2086_v44, %v2088_v46  ;;  %v8379_v62 = vsel %vm1027_vm3, %v2203_v40, %v2205_v20  ;;  %v6371_v49 = vld [vmem:[%s11584_s4 + $0xf0] sm:$0xff]  ;;  %v1018_v44 = vadd.f32 %v8101_v12, %v892_v19 }
 0x258   : > { %v1341_v63 = vpop.f32.mrf.mxu3  ;;  %v1823_v3 = vpop.f32.mrf.mxu2  ;;  %6277 = vmatmul.msk.f32.gmra.mxu0 %vm748_vm1, %v1839_v48  ;;  %6292 = vmatmul.msk.f32.gmra.mxu1 %vm748_vm1, %v1973_v7 }
 0x259   : > { %v8385_v42 = vadd.f32 %v1341_v63, %v1135_v54  ;;  %v1824_v38 = vadd.f32 %v8148_v29, %v1823_v3  ;;  %2593 = vmatpush.msrb.mxu3 %v6371_v49  ;;  %v1136_v48 = vadd.f32 %v8155_v35, %v1018_v44  ;;  %v895_v35 = vadd.f32 %v7856_v61, %v7886_v21  ;;  %v6339_v21 = vld [vmem:[%s7519_s29 + $0x198] sm:$0xf]  ;;  %v11593_v44 = vld [vmem:[#allocation10_spill] sm:$0xff]  ;;  %s5986_s29 = sshll.u32 %s5982_s2, 4  ;;  %s5987_s29 = int_to_ptr.hbm [resolvable:$true] %s5986_s29 }
 0x25a   : > { %v11592_v49 = vld [vmem:[#allocation12_spill] sm:$0xff]  ;;  %6352 = vmatmul.msk.f32.gmra.mxu2 %vm594_vm0, %v6339_v21 }
 0x25b   : > { %v8392_v40 = vmax.f32 %v1824_v38, 0.0  ;;  %v1019_v63 = vadd.f32 %v8126_v24, %v895_v35 }
 0x25d   : > { %v8394_v33 = vpop.f32.mrf.mxu0  ;;  %6299 = vmatmul.msk.f32.vlgmr.msra.gmra.mxu3 %vm748_vm1, %v8162_v37  ;;  %v1974_v56 = vrot.slane %v8392_v40, 1  ;;  %v2090_v30 = vrot.slane %v8392_v40, 2  ;;  %v2207_v28 = vrot.slane %v8392_v40, 3  ;;  %v1137_v19 = vadd.f32 %v8181_v34, %v1019_v63 }
 0x25f   : > { %v1975_v36 = vsel %vm724_vm2, %v1972_v2, %v1974_v56  ;;  %v8406_v12 = vsel %vm909_vm4, %v2088_v46, %v2090_v30  ;;  %v8411_v54 = vsel %vm1027_vm3, %v2205_v20, %v2207_v28  ;;  %v8420_v2 = vpop.f32.mrf.mxu1  ;;  %v6387_v20 = vld [vmem:[%s11584_s4 + $0x1b0] sm:$0xff] }
 0x260   : > { %v1344_v37 = vpop.f32.mrf.mxu3  ;;  %v8413_v7 = vpop.f32.mrf.mxu2  ;;  %6278 = vmatmul.msk.f32.gmra.mxu0 %vm748_vm1, %v8392_v40  ;;  %6293 = vmatmul.msk.f32.gmra.mxu1 %vm748_vm1, %v1975_v36 }
 0x261   : > { %v8422_v46 = vadd.f32 %v1344_v37, %v1136_v48  ;;  %2711 = vmatpush.msrb.mxu0 %v6387_v20  ;;  %v898_v48 = vadd.f32 %v11593_v44, %v11592_v49 }
 0x265   : > { %v8428_v3 = vpop.f32.mrf.mxu0  ;;  %6300 = vmatmul.msk.f32.gmra.mxu3 %vm748_vm1, %v8186_v50  ;;  %v11594_v50 = vld [vmem:[#allocation14_spill] sm:$0xff] }
 0x266   : > { %v1020_v34 = vadd.f32 %v11594_v50, %v898_v48 }
 0x267   : > { %v8446_v37 = vpop.f32.mrf.mxu1 }
 0x268   : > { %v1347_v38 = vpop.f32.mrf.mxu3  ;;  %6294 = vmatmul.msk.f32.gmra.mxu1 %vm748_vm1, %v1974_v56  ;;  %6315 = vmatmul.msk.f32.vlgmr.msra.gmra.mxu0 %vm748_vm1, %v8165_v8  ;;  %v2370_v61 = vpop.f32.mrf.mxu2  ;;  %v1138_v8 = vadd.f32 %v8217_v15, %v1020_v34  ;;  %v6402_v15 = vld [vmem:[%s11584_s4 + $0x1e8] sm:$0xff] }
 0x269   : > { %v8439_v36 = vadd.f32 %v1347_v38, %v1137_v19  ;;  %v8442_v24 = vadd.f32 %v8148_v29, %v2370_v61  ;;  %v11595_v19 = vld [vmem:[#allocation13_spill] sm:$0xff]  ;;  %v11596_v38 = vld [vmem:[#allocation11_spill] sm:$0xff]  ;;  %2829 = vmatpush.msra.mxu2 %v6402_v15 }
 0x26a   : > { %v901_v61 = vadd.f32 %v11596_v38, %v11595_v19  ;;  %v6386_v38 = vld [vmem:[%s11584_s4 + $0x1a8] sm:$0xff] }
 0x26b   : > { %v2409_v56 = vmax.f32 %v8442_v24, 0.0  ;;  %2712 = vmatpush.msrb.mxu0 %v6386_v38 }
 0x26d   : > { %v8449_v35 = vpop.f32.mrf.mxu0  ;;  %6301 = vmatmul.msk.f32.gmra.mxu3 %vm748_vm1, %v8208_v59  ;;  %v6370_v59 = vld [vmem:[%s11584_s4 + $0xe8] sm:$0xff] }
 0x26e   : > { %2594 = vmatpush.msrb.mxu3 %v6370_v59 }
 0x26f   : > { %v8471_v24 = vpop.f32.mrf.mxu1 }
 0x270   : > { %v1350_v20 = vpop.f32.mrf.mxu3  ;;  %6316 = vmatmul.msk.f32.gmra.mxu0 %vm748_vm1, %v8189_v43  ;;  %6357 = vmatmul.msk.f32.vlgmr.msra.gmra.mxu1 %vm748_vm1, %v2409_v56  ;;  %v2373_v63 = vpop.f32.mrf.mxu2  ;;  %v11597_v43 = vld [vmem:[#allocation15_spill] sm:$0xff] }
 0x271   : > { %v8459_v21 = vadd.f32 %v1350_v20, %v1138_v8  ;;  %v2374_v49 = vadd.f32 %v8148_v29, %v2373_v63  ;;  %v1021_v44 = vadd.f32 %v11597_v43, %v901_v61 }
 0x273   : > { %v8469_v48 = vmax.f32 %v2374_v49, 0.0  ;;  %v1139_v34 = vadd.f32 %v8244_v17, %v1021_v44  ;;  %v1473_v17 = vadd.f32 %v8200_v22, %v8195_v23 }
 0x275   : > { %v8473_v50 = vpop.f32.mrf.mxu0  ;;  %6302 = vmatmul.msk.f32.gmra.mxu3 %vm748_vm1, %v8235_v55 }
 0x277   : > { %v8497_v49 = vpop.f32.mrf.mxu1 }
 0x278   : > { %v1353_v8 = vpop.f32.mrf.mxu3  ;;  %6317 = vmatmul.msk.f32.gmra.mxu0 %vm748_vm1, %v8211_v9  ;;  %6358 = vmatmul.msk.f32.gmra.mxu1 %vm748_vm1, %v8469_v48  ;;  %v2376_v20 = vpop.f32.mrf.mxu2  ;;  %v1591_v9 = vadd.f32 %v8271_v52, %v1473_v17  ;;  %v2533_v17 = vrot.slane %v2409_v56, 1 }
 0x279   : > { %v8482_v63 = vadd.f32 %v1353_v8, %v1139_v34  ;;  %v2377_v19 = vadd.f32 %v8148_v29, %v2376_v20 }
 0x27b   : > { %v8488_v55 = vmax.f32 %v2377_v19, 0.0 }
 0x27d   : > { %v8492_v61 = vpop.f32.mrf.mxu0  ;;  %6303 = vmatmul.msk.f32.gmra.mxu3 %vm748_vm1, %v8262_v39  ;;  %v1474_v39 = vadd.f32 %v8227_v0, %v8219_v13  ;;  %v6369_v0 = vld [vmem:[%s11584_s4 + $0xe0] sm:$0xff] }
 0x27e   : > { %2595 = vmatpush.msrb.mxu3 %v6369_v0  ;;  %v2769_v0 = vrot.slane %v8488_v55, 3 }
 0x27f   : > { %v8519_v8 = vpop.f32.mrf.mxu1 }
 0x280   : > { %v1672_v59 = vpop.f32.mrf.mxu3  ;;  %6318 = vmatmul.msk.f32.gmra.mxu0 %vm748_vm1, %v8238_v51  ;;  %6359 = vmatmul.msk.f32.gmra.mxu1 %vm748_vm1, %v8488_v55  ;;  %v2379_v15 = vpop.f32.mrf.mxu2  ;;  %v1592_v51 = vadd.f32 %v8302_v16, %v1474_v39  ;;  %v1475_v16 = vadd.f32 %v8254_v4, %v8246_v57  ;;  %v6385_v4 = vld [vmem:[%s11584_s4 + $0x1a0] sm:$0xff] }
 0x281   : > { %v8503_v43 = vadd.f32 %v1672_v59, %v1591_v9  ;;  %v2380_v22 = vadd.f32 %v8148_v29, %v2379_v15  ;;  %v2534_v9 = vrot.slane %v8469_v48, 1  ;;  %2713 = vmatpush.msrb.mxu0 %v6385_v4 }
 0x282   : > { %v1593_v38 = vadd.f32 %v8339_v6, %v1475_v16 }
 0x283   : > { %v8506_v23 = vmax.f32 %v2380_v22, 0.0  ;;  %v8553_v6 = vsel %vm724_vm2, %v2533_v17, %v2534_v9 }
 0x285   : > { %v8510_v52 = vpop.f32.mrf.mxu0  ;;  %6304 = vmatmul.msk.f32.gmra.mxu3 %vm748_vm1, %v8289_v45  ;;  %v6401_v45 = vld [vmem:[%s11584_s4 + $0x1e0] sm:$0xff]  ;;  %s7254_s4 = scalar_lea.hbm %s11486_s17, 2 }
 0x286   : > { %2830 = vmatpush.msra.mxu2 %v6401_v45 }
 0x288   : > { %v1675_v44 = vpop.f32.mrf.mxu3  ;;  %6319 = vmatmul.msk.f32.gmra.mxu0 %vm748_vm1, %v8265_v18  ;;  %6360 = vmatmul.msk.f32.gmra.mxu1 %vm748_vm1, %v8506_v23  ;;  %v2382_v34 = vpop.f32.mrf.mxu2 }
 0x289   : > { %v8521_v20 = vadd.f32 %v1675_v44, %v1592_v51  ;;  %v2383_v13 = vadd.f32 %v8148_v29, %v2382_v34  ;;  %v2651_v44 = vrot.slane %v8469_v48, 2  ;;  %v2768_v34 = vrot.slane %v8469_v48, 3 }
 0x28b   : > { %v8530_v18 = vmax.f32 %v2383_v13, 0.0  ;;  %v2652_v13 = vrot.slane %v8488_v55, 2  ;;  %v2770_v48 = vsel %vm1027_vm3, %v2768_v34, %v2769_v0 }
 0x28c   : > { %6405 = vmatmul.msk.f32.vlgmr.msra.gmra.mxu2 %vm748_vm1, %v2770_v48 }
 0x28d   : > { %v8534_v19 = vpop.f32.mrf.mxu0  ;;  %6305 = vmatmul.msk.f32.gmra.mxu3 %vm748_vm1, %v8317_v26  ;;  %v8550_v26 = vpop.f32.mrf.mxu1 }
 0x290   : > { %v1678_v59 = vpop.f32.mrf.mxu3  ;;  %6320 = vmatmul.msk.f32.gmra.mxu0 %vm748_vm1, %v8292_v5  ;;  %6361 = vmatmul.msk.f32.gmra.mxu1 %vm748_vm1, %v8530_v18  ;;  %v2385_v15 = vpop.f32.mrf.mxu2  ;;  %v1476_v5 = vadd.f32 %v8281_v11, %v8273_v14 }
 0x291   : > { %v8544_v22 = vadd.f32 %v1678_v59, %v1593_v38  ;;  %v2386_v57 = vadd.f32 %v8148_v29, %v2385_v15  ;;  %v8581_v38 = vsel %vm909_vm4, %v2651_v44, %v2652_v13 }
 0x292   : > { %v1594_v51 = vadd.f32 %v8371_v53, %v1476_v5  ;;  %v2536_v53 = vrot.slane %v8488_v55, 1  ;;  %v2771_v5 = vrot.slane %v8506_v23, 3 }
 0x293   : > { %v8557_v56 = vmax.f32 %v2386_v57, 0.0 }
 0x294   : > { %v8578_v16 = vsel %vm724_vm2, %v2534_v9, %v2536_v53  ;;  %v1827_v9 = vadd.f32 %v8148_v29, %v8413_v7  ;;  %v2772_v7 = vsel %vm1027_vm3, %v2769_v0, %v2771_v5 }
 0x295   : > { %v8559_v39 = vpop.f32.mrf.mxu0  ;;  %6306 = vmatmul.msk.f32.gmra.mxu3 %vm748_vm1, %v8351_v1  ;;  %v8588_v59 = vpop.f32.mrf.mxu1  ;;  %6406 = vmatmul.msk.f32.gmra.mxu2 %vm748_vm1, %v2772_v7  ;;  %v2542_v7 = vrot.slane %v8557_v56, 1 }
 0x298   : > { %v1681_v45 = vpop.f32.mrf.mxu3  ;;  %6321 = vmatmul.msk.f32.gmra.mxu0 %vm748_vm1, %v8320_v41  ;;  %6362 = vmatmul.msk.f32.gmra.mxu1 %vm748_vm1, %v8557_v56  ;;  %v2388_v14 = vpop.f32.mrf.mxu2  ;;  %v1477_v41 = vadd.f32 %v8304_v25, %v8298_v58 }
 0x299   : > { %v8572_v11 = vadd.f32 %v1681_v45, %v1594_v51  ;;  %v2389_v1 = vadd.f32 %v8148_v29, %v2388_v14  ;;  %v1478_v45 = vadd.f32 %v8341_v60, %v8326_v47  ;;  %v2773_v60 = vrot.slane %v8530_v18, 3 }
 0x29a   : > { %v1595_v55 = vadd.f32 %v8420_v2, %v1477_v41  ;;  %v2654_v2 = vrot.slane %v8506_v23, 2 }
 0x29b   : > { %v8583_v17 = vmax.f32 %v2389_v1, 0.0  ;;  %v2774_v41 = vsel %vm1027_vm3, %v2771_v5, %v2773_v60 }
 0x29c   : > { %v8615_v34 = vsel %vm909_vm4, %v2652_v13, %v2654_v2 }
 0x29d   : > { %v8590_v15 = vpop.f32.mrf.mxu0  ;;  %6307 = vmatmul.msk.f32.gmra.mxu3 %vm748_vm1, %v8376_v32  ;;  %v2538_v32 = vrot.slane %v8506_v23, 1  ;;  %v1596_v23 = vadd.f32 %v8446_v37, %v1478_v45  ;;  %v8624_v0 = vpop.f32.mrf.mxu1  ;;  %v2656_v37 = vrot.slane %v8530_v18, 2  ;;  %6407 = vmatmul.msk.f32.gmra.mxu2 %vm748_vm1, %v2774_v41 }
 0x29f   : > { %v8609_v51 = vsel %vm724_vm2, %v2536_v53, %v2538_v32 }
 0x2a0   : > { %v1684_v57 = vpop.f32.mrf.mxu3  ;;  %6322 = vmatmul.msk.f32.gmra.mxu0 %vm748_vm1, %v8354_v31  ;;  %6363 = vmatmul.msk.f32.gmra.mxu1 %vm748_vm1, %v8583_v17  ;;  %v2391_v58 = vpop.f32.mrf.mxu2  ;;  %v1841_v31 = vmax.f32 %v1827_v9, 0.0 }
 0x2a1   : > { %v8601_v25 = vadd.f32 %v1684_v57, %v1595_v55  ;;  %v2392_v4 = vadd.f32 %v8148_v29, %v2391_v58  ;;  %v8647_v57 = vsel %vm909_vm4, %v2654_v2, %v2656_v37  ;;  %v1479_v58 = vadd.f32 %v8364_v10, %v8360_v27 }
 0x2a2   : > { %v2092_v1 = vrot.slane %v1841_v31, 2  ;;  %v2775_v10 = vrot.slane %v8557_v56, 3  ;;  %v2209_v45 = vrot.slane %v1841_v31, 3 }
 0x2a3   : > { %v8611_v44 = vmax.f32 %v2392_v4, 0.0  ;;  %v1597_v4 = vadd.f32 %v8471_v24, %v1479_v58  ;;  %v2658_v24 = vrot.slane %v8557_v56, 2 }
 0x2a4   : > { %v2093_v9 = vsel %vm909_vm4, %v2090_v30, %v2092_v1  ;;  %v2210_v31 = vsel %vm1027_vm3, %v2207_v28, %v2209_v45 }
 0x2a5   : > { %v8619_v14 = vpop.f32.mrf.mxu0  ;;  %6308 = vmatmul.msk.f32.gmra.mxu3 %vm748_vm1, %v8406_v12  ;;  %v2540_v12 = vrot.slane %v8530_v18, 1 }
 0x2a7   : > { %v8638_v55 = vsel %vm724_vm2, %v2538_v32, %v2540_v12  ;;  %v8659_v32 = vpop.f32.mrf.mxu1 }
 0x2a8   : > { %v1687_v53 = vpop.f32.mrf.mxu3  ;;  %6323 = vmatmul.msk.f32.gmra.mxu0 %vm748_vm1, %v8379_v62  ;;  %6364 = vmatmul.msk.f32.gmra.mxu1 %vm748_vm1, %v8611_v44  ;;  %v2394_v13 = vpop.f32.mrf.mxu2 }
 0x2a9   : > { %v8630_v48 = vadd.f32 %v1687_v53, %v1596_v23  ;;  %v2395_v47 = vadd.f32 %v8148_v29, %v2394_v13  ;;  %v2776_v23 = vsel %vm1027_vm3, %v2773_v60, %v2775_v10  ;;  %v8675_v13 = vsel %vm909_vm4, %v2656_v37, %v2658_v24 }
 0x2aa   : > { %6408 = vmatmul.msk.f32.gmra.mxu2 %vm748_vm1, %v2776_v23  ;;  %v2662_v23 = vrot.slane %v8611_v44, 2 }
 0x2ab   : > { %v8640_v62 = vmax.f32 %v2395_v47, 0.0  ;;  %v1480_v47 = vadd.f32 %v8394_v33, %v8385_v42  ;;  %v2777_v33 = vrot.slane %v8583_v17, 3 }
 0x2ad   : > { %v8651_v18 = vpop.f32.mrf.mxu0  ;;  %6309 = vmatmul.msk.f32.gmra.mxu3 %vm748_vm1, %v2093_v9  ;;  %v1598_v56 = vadd.f32 %v8497_v49, %v1480_v47  ;;  %v2660_v49 = vrot.slane %v8583_v17, 2  ;;  %v2778_v28 = vsel %vm1027_vm3, %v2775_v10, %v2777_v33 }
 0x2af   : > { %v8695_v40 = vpop.f32.mrf.mxu1  ;;  %v8731_v47 = vsel %vm909_vm4, %v2660_v49, %v2662_v23 }
 0x2b0   : > { %v1690_v5 = vpop.f32.mrf.mxu3  ;;  %6324 = vmatmul.msk.f32.gmra.mxu0 %vm748_vm1, %v8411_v54  ;;  %6365 = vmatmul.msk.f32.gmra.mxu1 %vm748_vm1, %v8640_v62  ;;  %v2397_v30 = vpop.f32.mrf.mxu2  ;;  %v8669_v54 = vsel %vm724_vm2, %v2540_v12, %v2542_v7 }
 0x2b1   : > { %v8661_v2 = vadd.f32 %v1690_v5, %v1597_v4  ;;  %v2398_v27 = vadd.f32 %v8148_v29, %v2397_v30  ;;  %v8705_v4 = vsel %vm909_vm4, %v2658_v24, %v2660_v49  ;;  %v1481_v5 = vadd.f32 %v8428_v3, %v8422_v46 }
 0x2b2   : > { %6409 = vmatmul.msk.f32.gmra.mxu2 %vm748_vm1, %v2778_v28  ;;  %v2779_v46 = vrot.slane %v8611_v44, 3  ;;  %v2546_v3 = vrot.slane %v8611_v44, 1 }
 0x2b3   : > { %v8671_v53 = vmax.f32 %v2398_v27, 0.0 }
 0x2b5   : > { %v8679_v41 = vpop.f32.mrf.mxu0  ;;  %6310 = vmatmul.msk.f32.gmra.mxu3 %vm748_vm1, %v2092_v1  ;;  %v2544_v1 = vrot.slane %v8583_v17, 1  ;;  %v1599_v17 = vadd.f32 %v8519_v8, %v1481_v5 }
 0x2b7   : > { %v8699_v9 = vsel %vm724_vm2, %v2542_v7, %v2544_v1  ;;  %v8725_v8 = vsel %vm724_vm2, %v2544_v1, %v2546_v3 }
 0x2b8   : > { %v1693_v60 = vpop.f32.mrf.mxu3  ;;  %6325 = vmatmul.msk.f32.gmra.mxu0 %vm748_vm1, %v2210_v31  ;;  %6366 = vmatmul.msk.f32.gmra.mxu1 %vm748_vm1, %v8671_v53  ;;  %v2400_v12 = vpop.f32.mrf.mxu2 }
 0x2b9   : > { %v8689_v37 = vadd.f32 %v1693_v60, %v1598_v56  ;;  %v2401_v42 = vadd.f32 %v8148_v29, %v2400_v12  ;;  %v1482_v56 = vadd.f32 %v8449_v35, %v8439_v36  ;;  %v8735_v31 = vpop.f32.mrf.mxu1  ;;  %v2781_v36 = vrot.slane %v8640_v62, 3 }
 0x2ba   : > { %v2548_v35 = vrot.slane %v8640_v62, 1 }
 0x2bb   : > { %v8701_v58 = vmax.f32 %v2401_v42, 0.0  ;;  %v1600_v44 = vadd.f32 %v8550_v26, %v1482_v56  ;;  %v2782_v1 = vsel %vm1027_vm3, %v2779_v46, %v2781_v36 }
 0x2bd   : > { %v8709_v30 = vpop.f32.mrf.mxu0  ;;  %6373 = vmatmul.msk.f32.vlgmr.msrb.gmra.mxu3 %vm748_vm1, %v8553_v6  ;;  %v2780_v6 = vsel %vm1027_vm3, %v2777_v33, %v2779_v46  ;;  %v2664_v33 = vrot.slane %v8640_v62, 2 }
 0x2be   : > { %6410 = vmatmul.msk.f32.gmra.mxu2 %vm748_vm1, %v2780_v6  ;;  %v6424_v6 = vld [vmem:[%s11601_s6 + $0x78] sm:$0xff] }
 0x2bf   : > { %v8756_v26 = vsel %vm909_vm4, %v2662_v23, %v2664_v33  ;;  %2977 = vmatpush.msrb.mxu1 %v6424_v6  ;;  %v6421_v6 = vld [vmem:[%s11601_s6 + $0x60] sm:$0xff] }
 0x2c0   : > { %v1696_v27 = vpop.f32.mrf.mxu3  ;;  %6326 = vmatmul.msk.f32.gmra.mxu0 %vm748_vm1, %v2209_v45  ;;  %6367 = vmatmul.msk.f32.gmra.mxu1 %vm748_vm1, %v8701_v58  ;;  %v2403_v10 = vpop.f32.mrf.mxu2 }
 0x2c1   : > { %v8717_v7 = vadd.f32 %v1696_v27, %v1599_v17  ;;  %v2404_v24 = vadd.f32 %v8148_v29, %v2403_v10  ;;  %v8766_v28 = vpop.f32.mrf.mxu1  ;;  %v2783_v27 = vrot.slane %v8671_v53, 3  ;;  %v2550_v10 = vrot.slane %v8671_v53, 1 }
 0x2c3   : > { %v8727_v45 = vmax.f32 %v2404_v24, 0.0  ;;  %v1484_v24 = vadd.f32 %v8492_v61, %v8482_v63  ;;  %v2785_v63 = vrot.slane %v8701_v58, 3  ;;  %v2552_v61 = vrot.slane %v8701_v58, 1 }
 0x2c5   : > { %v8737_v60 = vpop.f32.mrf.mxu0  ;;  %6374 = vmatmul.msk.f32.gmra.mxu3 %vm748_vm1, %v8578_v16  ;;  %v8753_v16 = vsel %vm724_vm2, %v2546_v3, %v2548_v35  ;;  %v1602_v46 = vadd.f32 %v8624_v0, %v1484_v24  ;;  %v2786_v0 = vsel %vm1027_vm3, %v2783_v27, %v2785_v63  ;;  %v2553_v56 = vsel %vm724_vm2, %v2550_v10, %v2552_v61 }
 0x2c6   : > { %6411 = vmatmul.msk.f32.gmra.mxu2 %vm748_vm1, %v2782_v1 }
 0x2c8   : > { %v1699_v12 = vpop.f32.mrf.mxu3  ;;  %6368 = vmatmul.msk.f32.gmra.mxu1 %vm748_vm1, %v8727_v45  ;;  %6389 = vmatmul.msk.f32.vlgmr.msrb.gmra.mxu0 %vm748_vm1, %v8581_v38  ;;  %v1483_v38 = vadd.f32 %v8473_v50, %v8459_v21  ;;  %v2666_v21 = vrot.slane %v8671_v53, 2  ;;  %v2784_v50 = vsel %vm1027_vm3, %v2781_v36, %v2783_v27  ;;  %v2554_v36 = vrot.slane %v8727_v45, 1 }
 0x2c9   : > { %v8746_v42 = vadd.f32 %v1699_v12, %v1600_v44  ;;  %v8788_v53 = vpop.f32.mrf.mxu1 }
 0x2ca   : > { %v1601_v62 = vadd.f32 %v8588_v59, %v1483_v38  ;;  %v2667_v59 = vsel %vm909_vm4, %v2664_v33, %v2666_v21  ;;  %v2555_v38 = vsel %vm724_vm2, %v2552_v61, %v2554_v36 }
 0x2cd   : > { %v8761_v49 = vpop.f32.mrf.mxu0  ;;  %6375 = vmatmul.msk.f32.gmra.mxu3 %vm748_vm1, %v8609_v51  ;;  %v2551_v51 = vsel %vm724_vm2, %v2548_v35, %v2550_v10  ;;  %v2670_v35 = vrot.slane %v8727_v45, 2 }
 0x2ce   : > { %6412 = vmatmul.msk.f32.gmra.mxu2 %vm748_vm1, %v2784_v50 }
 0x2d0   : > { %v1702_v5 = vpop.f32.mrf.mxu3  ;;  %6390 = vmatmul.msk.f32.gmra.mxu0 %vm748_vm1, %v8615_v34 }
 0x2d1   : > { %v8770_v17 = vadd.f32 %v1702_v5, %v1601_v62  ;;  %v8813_v33 = vpop.f32.mrf.mxu1 }
 0x2d3   : > { %11598 = vst [vmem:[#allocation12_spill] sm:$0xff] %v8770_v17 }
 0x2d5   : > { %v8781_v34 = vpop.f32.mrf.mxu0  ;;  %6376 = vmatmul.msk.f32.gmra.mxu3 %vm748_vm1, %v8638_v55  ;;  %v2668_v55 = vrot.slane %v8701_v58, 2  ;;  %v2787_v58 = vrot.slane %v8727_v45, 3 }
 0x2d6   : > { %11599 = vst [vmem:[#allocation10_spill] sm:$0xff] %v8781_v34  ;;  %6413 = vmatmul.msk.f32.gmra.mxu2 %vm748_vm1, %v2786_v0 }
 0x2d7   : > { %v2788_v1 = vsel %vm1027_vm3, %v2785_v63, %v2787_v58  ;;  %v2671_v62 = vsel %vm909_vm4, %v2668_v55, %v2670_v35 }
 0x2d8   : > { %v1705_v3 = vpop.f32.mrf.mxu3  ;;  %6391 = vmatmul.msk.f32.gmra.mxu0 %vm748_vm1, %v8647_v57  ;;  %v2669_v57 = vsel %vm909_vm4, %v2666_v21, %v2668_v55 }
 0x2d9   : > { %v8790_v23 = vadd.f32 %v1705_v3, %v1602_v46  ;;  %v8830_v27 = vpop.f32.mrf.mxu1 }
 0x2db   : > { %11600 = vst [vmem:[#allocation14_spill] sm:$0xff] %v8790_v23  ;;  %v6464_v23 = vld [vmem:[%s11601_s6 + $0xe0] sm:$0xff] }
 0x2dd   : > { %v8802_v44 = vpop.f32.mrf.mxu0  ;;  %6377 = vmatmul.msk.f32.gmra.mxu3 %vm748_vm1, %v8669_v54  ;;  %v2406_v5 = vpop.f32.mrf.mxu2 }
 0x2de   : > { %11602 = vst [vmem:[#allocation13_spill] sm:$0xff] %v8802_v44  ;;  %6414 = vmatmul.msk.f32.gmra.mxu2 %vm748_vm1, %v2788_v1  ;;  %v6443_v44 = vld [vmem:[%s11601_s6 + $0x80] sm:$0xff] }
 0x2e0   : > { %v8806_v12 = vpop.f32.mrf.mxu3  ;;  %6392 = vmatmul.msk.f32.gmra.mxu0 %vm748_vm1, %v8675_v13  ;;  %v6423_v13 = vld [vmem:[%s11601_s6 + $0x70] sm:$0xff] }
 0x2e1   : > { %2978 = vmatpush.msrb.mxu1 %v6423_v13  ;;  %v6419_v13 = vld [vmem:[%s11601_s6 + $0x50] sm:$0xff] }
 0x2e5   : > { %v8819_v54 = vpop.f32.mrf.mxu0  ;;  %6378 = vmatmul.msk.f32.gmra.mxu3 %vm748_vm1, %v8699_v9  ;;  %v2407_v9 = vadd.f32 %v8148_v29, %v2406_v5  ;;  %v8850_v29 = vpop.f32.mrf.mxu1  ;;  %v6450_v5 = vld [vmem:[%s11601_s6 + $0xb8] sm:$0xff] }
 0x2e6   : > { %3127 = vmatpush.msra.mxu0 %v6450_v5  ;;  %v6449_v5 = vld [vmem:[%s11601_s6 + $0xb0] sm:$0xff] }
 0x2e7   : > { %v2421_v21 = vmax.f32 %v2407_v9, 0.0 }
 0x2e8   : > { %v8826_v45 = vpop.f32.mrf.mxu3  ;;  %6393 = vmatmul.msk.f32.gmra.mxu0 %vm748_vm1, %v8705_v4  ;;  %v6422_v4 = vld [vmem:[%s11601_s6 + $0x68] sm:$0xff] }
 0x2e9   : > { %v2789_v24 = vrot.slane %v2421_v21, 3  ;;  %2979 = vmatpush.msrb.mxu1 %v6422_v4  ;;  %v6418_v4 = vld [vmem:[%s11601_s6 + $0x48] sm:$0xff]  ;;  %3128 = vmatpush.msra.mxu0 %v6449_v5  ;;  %v6446_v5 = vld [vmem:[%s11601_s6 + $0x98] sm:$0xff] }
 0x2eb   : > { %v2790_v46 = vsel %vm1027_vm3, %v2787_v58, %v2789_v24  ;;  %2980 = vmatpush.msrb.mxu1 %v6421_v6  ;;  %v2912_v6 = vld [vmem:[%s11601_s6 + $0x20] sm:$0xff] }
 0x2ec   : > { %6415 = vmatmul.msk.f32.gmra.mxu2 %vm748_vm1, %v2790_v46  ;;  %v2913_v46 = vld [vmem:[%s11601_s6 + $0x28] sm:$0xff] }
 0x2ed   : > { %v8832_v10 = vpop.f32.mrf.mxu0  ;;  %6379 = vmatmul.msk.f32.gmra.mxu3 %vm748_vm1, %v8725_v8 }
 0x2f0   : > { %v8837_v50 = vpop.f32.mrf.mxu3  ;;  %6394 = vmatmul.msk.f32.gmra.mxu0 %vm748_vm1, %v8731_v47 }
 0x2f4   : > { %6416 = vmatmul.msk.f32.gmra.mxu2 %vm748_vm1, %v2789_v24  ;;  %v2914_v24 = vld [vmem:[%s11601_s6 + $0x30] sm:$0xff] }
 0x2f5   : > { %v8846_v3 = vpop.f32.mrf.mxu0  ;;  %6380 = vmatmul.msk.f32.gmra.mxu3 %vm748_vm1, %v8753_v16  ;;  %v8866_v16 = vpop.f32.mrf.mxu1 }
 0x2f8   : > { %v8852_v8 = vpop.f32.mrf.mxu3  ;;  %6395 = vmatmul.msk.f32.gmra.mxu0 %vm748_vm1, %v8756_v26 }
 0x2fd   : > { %v8857_v47 = vpop.f32.mrf.mxu0  ;;  %6381 = vmatmul.msk.f32.gmra.mxu3 %vm748_vm1, %v2551_v51  ;;  %v6420_v51 = vld [vmem:[%s11601_s6 + $0x58] sm:$0xff]  ;;  %v8877_v55 = vpop.f32.mrf.mxu1 }
 0x2fe   : > { %2981 = vmatpush.msrb.mxu1 %v6420_v51 }
 0x300   : > { %v8863_v63 = vpop.f32.mrf.mxu3  ;;  %6396 = vmatmul.msk.f32.gmra.mxu0 %vm748_vm1, %v2667_v59  ;;  %2982 = vmatpush.msrb.mxu1 %v6419_v13  ;;  %v2910_v13 = vld [vmem:[%s11601_s6 + $0x10] sm:$0xff] }
 0x302   : > { %2983 = vmatpush.msrb.mxu1 %v6418_v4 }
 0x305   : > { %v8868_v61 = vpop.f32.mrf.mxu0  ;;  %6382 = vmatmul.msk.f32.gmra.mxu3 %vm748_vm1, %v2553_v56  ;;  %v2672_v56 = vrot.slane %v2421_v21, 2  ;;  %v8885_v58 = vpop.f32.mrf.mxu1 }
 0x306   : > { %11603 = vst [vmem:[#allocation11_spill] sm:$0xff] %v8885_v58 }
 0x308   : > { %v8871_v26 = vpop.f32.mrf.mxu3  ;;  %6397 = vmatmul.msk.f32.gmra.mxu0 %vm748_vm1, %v2669_v57  ;;  %v2673_v57 = vsel %vm909_vm4, %v2670_v35, %v2672_v56 }
 0x30d   : > { %v8879_v0 = vpop.f32.mrf.mxu0  ;;  %6383 = vmatmul.msk.f32.gmra.mxu3 %vm748_vm1, %v2555_v38  ;;  %v2915_v38 = vld [vmem:[%s11601_s6 + $0x38] sm:$0xff]  ;;  %v8908_v9 = vpop.f32.mrf.mxu1 }
 0x30e   : > { %3039 = vmatpush.msra.mxu3 %v2915_v38  ;;  %11604 = vst [vmem:[#allocation15_spill] sm:$0xff] %v8908_v9  ;;  %v6445_v9 = vld [vmem:[%s11601_s6 + $0x90] sm:$0xff] }
 0x310   : > { %v8882_v59 = vpop.f32.mrf.mxu3  ;;  %6398 = vmatmul.msk.f32.gmra.mxu0 %vm748_vm1, %v2671_v62  ;;  %3040 = vmatpush.msra.mxu3 %v2914_v24  ;;  %v2908_v24 = vld [vmem:[%s11601_s6] sm:$0xff] }
 0x312   : > { %3041 = vmatpush.msra.mxu3 %v2913_v46  ;;  %v6448_v46 = vld [vmem:[%s11601_s6 + $0xa8] sm:$0xff] }
 0x313   : > { %3129 = vmatpush.msra.mxu0 %v6448_v46  ;;  %v6417_v46 = vld [vmem:[%s11601_s6 + $0x40] sm:$0xff] }
 0x314   : > { %3042 = vmatpush.msra.mxu3 %v2912_v6  ;;  %v6466_v6 = vld [vmem:[%s11601_s6 + $0xf0] sm:$0xff]  ;;  %2984 = vmatpush.msrb.mxu1 %v6417_v46  ;;  %v1936_v46 = vadd.f32 %v8510_v52, %v8503_v43  ;;  %v6461_v43 = vld [vmem:[%s11601_s6 + $0xc8] sm:$0xff] }
 0x315   : > { %v8887_v1 = vpop.f32.mrf.mxu0  ;;  %6384 = vmatmul.msk.f32.gmra.mxu3 %vm748_vm1, %v2554_v36  ;;  %v6467_v36 = vld [vmem:[%s11601_s6 + $0xf8] sm:$0xff]  ;;  %v2480_v38 = vpop.f32.mrf.mxu1 }
 0x316   : > { %3196 = vmatpush.msrb.mxu2 %v6467_v36  ;;  %v2909_v36 = vld [vmem:[%s11601_s6 + $0x8] sm:$0xff] }
 0x318   : > { %v8897_v62 = vpop.f32.mrf.mxu3  ;;  %6399 = vmatmul.msk.f32.gmra.mxu0 %vm748_vm1, %v2673_v57  ;;  %3197 = vmatpush.msrb.mxu2 %v6466_v6  ;;  %v6465_v6 = vld [vmem:[%s11601_s6 + $0xe8] sm:$0xff] }
 0x31a   : > { %3198 = vmatpush.msrb.mxu2 %v6465_v6 }
 0x31c   : > { %3199 = vmatpush.msrb.mxu2 %v6464_v23 }
 0x31d   : > { %v8903_v35 = vpop.f32.mrf.mxu0 }
 0x320   : > { %v8910_v21 = vpop.f32.mrf.mxu3  ;;  %6400 = vmatmul.msk.f32.gmra.mxu0 %vm748_vm1, %v2672_v56  ;;  %v2911_v56 = vld [vmem:[%s11601_s6 + $0x18] sm:$0xff] }
 0x321   : > { %3043 = vmatpush.msra.mxu3 %v2911_v56  ;;  %v6447_v56 = vld [vmem:[%s11601_s6 + $0xa0] sm:$0xff] }
 0x322   : > { %3130 = vmatpush.msra.mxu0 %v6447_v56 }
 0x323   : > { %3044 = vmatpush.msra.mxu3 %v2910_v13 }
 0x324   : > { %3131 = vmatpush.msra.mxu0 %v6446_v5  ;;  %v6444_v5 = vld [vmem:[%s11601_s6 + $0x88] sm:$0xff] }
 0x325   : > { %v8925_v51 = vpop.f32.mrf.mxu0  ;;  %3045 = vmatpush.msra.mxu3 %v2909_v36  ;;  %v2832_v36 = vpop.f32.mrf.mxu2 }
 0x326   : > { %3132 = vmatpush.msra.mxu0 %v6445_v9  ;;  %v6463_v9 = vld [vmem:[%s11601_s6 + $0xd8] sm:$0xff] }
 0x327   : > { %3046 = vmatpush.msra.mxu3 %v2908_v24  ;;  %v2483_v24 = vpop.f32.mrf.mxu1  ;;  %3200 = vmatpush.msrb.mxu2 %v6463_v9 }
 0x328   : > { %v8930_v57 = vpop.f32.mrf.mxu3  ;;  %3133 = vmatpush.msra.mxu0 %v6444_v5  ;;  %v6462_v5 = vld [vmem:[%s11601_s6 + $0xd0] sm:$0xff] }
 0x329   : > { %3201 = vmatpush.msrb.mxu2 %v6462_v5  ;;  %v1937_v5 = vadd.f32 %v8534_v19, %v8521_v20 }
 0x32a   : > { %3134 = vmatpush.msra.mxu0 %v6443_v44  ;;  %v6484_v44 = vld [vmem:[%s11601_s6 + $0x138] sm:$0xff] }
 0x32b   : > { %3293 = vmatpush.msra.mxu1 %v6484_v44  ;;  %3202 = vmatpush.msrb.mxu2 %v6461_v43  ;;  %v2054_v44 = vadd.f32 %v8695_v40, %v1937_v5 }
 0x32d   : > { %v8944_v4 = vpop.f32.mrf.mxu0  ;;  %v2835_v6 = vpop.f32.mrf.mxu2  ;;  %v2172_v34 = vadd.f32 %v8826_v45, %v2054_v44 }
 0x32f   : > { %v2486_v23 = vpop.f32.mrf.mxu1  ;;  %v2289_v19 = vadd.f32 %v8832_v10, %v2172_v34 }
 0x330   : > { %v8955_v13 = vpop.f32.mrf.mxu3 }
 0x331   : > { %11605 = vst [vmem:[#allocation16_spill] sm:$0xff] %v8955_v13 }
 0x335   : > { %v8969_v56 = vpop.f32.mrf.mxu0  ;;  %v2838_v43 = vpop.f32.mrf.mxu2 }
 0x336   : > { %11606 = vst [vmem:[#allocation17_spill] sm:$0xff] %v8969_v56  ;;  %v2053_v56 = vadd.f32 %v8659_v32, %v1936_v46  ;;  %v6460_v32 = vld [vmem:[%s11601_s6 + $0xc0] sm:$0xff] }
 0x337   : > { %3203 = vmatpush.msrb.mxu2 %v6460_v32  ;;  %v2489_v20 = vpop.f32.mrf.mxu1 }
 0x338   : > { %v8980_v13 = vpop.f32.mrf.mxu3  ;;  %v2171_v52 = vadd.f32 %v8806_v12, %v2053_v56  ;;  %v6483_v12 = vld [vmem:[%s11601_s6 + $0x130] sm:$0xff] }
 0x339   : > { %11607 = vst [vmem:[#allocation18_spill] sm:$0xff] %v8980_v13  ;;  %3294 = vmatpush.msra.mxu1 %v6483_v12 }
 0x33a   : > { %v2288_v9 = vadd.f32 %v8819_v54, %v2171_v52  ;;  %v9014_v54 = vld [vmem:[%s11609_s5] ss:$0 sm:$0xff]  ;;  %v2517_v52 = vadd.f32 %v2483_v24, %v2289_v19 }
 0x33d   : > { %v8994_v13 = vpop.f32.mrf.mxu0  ;;  %v2841_v10 = vpop.f32.mrf.mxu2 }
 0x33e   : > { %11608 = vst [vmem:[#allocation19_spill] sm:$0xff] %v8994_v13  ;;  %v2516_v13 = vadd.f32 %v2480_v38, %v2288_v9 }
 0x33f   : > { %v2492_v24 = vpop.f32.mrf.mxu1 }
 0x340   : > { %v2597_v46 = vpop.f32.mrf.mxu3 }
 0x341   : > { %v2633_v58 = vadd.f32 %v2597_v46, %v2516_v13  ;;  %v1938_v13 = vadd.f32 %v8559_v39, %v8544_v22  ;;  %v6482_v46 = vld [vmem:[%s11601_s6 + $0x128] sm:$0xff] }
 0x342   : > { %3295 = vmatpush.msra.mxu1 %v6482_v46 }
 0x343   : > { %v2055_v9 = vadd.f32 %v8735_v31, %v1938_v13  ;;  %v1939_v31 = vadd.f32 %v8590_v15, %v8572_v11 }
 0x345   : > { %v2715_v56 = vpop.f32.mrf.mxu0  ;;  %v2173_v34 = vadd.f32 %v8837_v50, %v2055_v9  ;;  %v6481_v50 = vld [vmem:[%s11601_s6 + $0x120] sm:$0xff] }
 0x346   : > { %v2751_v17 = vadd.f32 %v2715_v56, %v2633_v58  ;;  %v2056_v56 = vadd.f32 %v8766_v28, %v1939_v31  ;;  %3296 = vmatpush.msra.mxu1 %v6481_v50  ;;  %v1941_v31 = vadd.f32 %v8651_v18, %v8630_v48 }
 0x347   : > { %v2290_v22 = vadd.f32 %v8846_v3, %v2173_v34 }
 0x348   : > { %v2868_v40 = vadd.f32 %v2832_v36, %v2751_v17  ;;  %v2600_v38 = vpop.f32.mrf.mxu3 }
 0x349   : > { %v2634_v58 = vadd.f32 %v2600_v38, %v2517_v52  ;;  %v2518_v44 = vadd.f32 %v2486_v23, %v2290_v22  ;;  %v2174_v38 = vadd.f32 %v8852_v8, %v2056_v56  ;;  %v1940_v8 = vadd.f32 %v8619_v14, %v8601_v25 }
 0x34a   : > { %v2884_v32 = vadd.f32 %v9014_v54, %v2868_v40 }
 0x34b   : > { %v2291_v23 = vadd.f32 %v8857_v47, %v2174_v38  ;;  %v2057_v34 = vadd.f32 %v8788_v53, %v1940_v8  ;;  %v9045_v47 = vpop.f32.mrf.mxu1 }
 0x34c   : > { %v2896_v45 = vmax.f32 %v2884_v32, 0.0 }
 0x34d   : > { %v2718_v5 = vpop.f32.mrf.mxu0  ;;  %v2519_v46 = vadd.f32 %v2489_v20, %v2291_v23  ;;  %v2175_v22 = vadd.f32 %v8863_v63, %v2057_v34 }
 0x34e   : > { %v2752_v17 = vadd.f32 %v2718_v5, %v2634_v58  ;;  %6434 = vmatmul.msk.f32.vlgmr.msra.gmra.mxu3 %vm594_vm0, %v2896_v45  ;;  %v2934_v3 = vrot.slane %v2896_v45, 1  ;;  %v3084_v13 = vrot.slane %v2896_v45, 2  ;;  %v2844_v45 = vpop.f32.mrf.mxu2 }
 0x350   : > { %v2869_v39 = vadd.f32 %v2835_v6, %v2752_v17  ;;  %v2603_v36 = vpop.f32.mrf.mxu3 }
 0x351   : > { %v2635_v40 = vadd.f32 %v2603_v36, %v2518_v44  ;;  %v2292_v44 = vadd.f32 %v8868_v61, %v2175_v22 }
 0x352   : > { %v2885_v12 = vadd.f32 %v9014_v54, %v2869_v39 }
 0x353   : > { %v2520_v18 = vadd.f32 %v2492_v24, %v2292_v44 }
 0x354   : > { %v2897_v19 = vmax.f32 %v2885_v12, 0.0 }
 0x355   : > { %v2721_v6 = vpop.f32.mrf.mxu0 }
 0x356   : > { %v2753_v52 = vadd.f32 %v2721_v6, %v2635_v40  ;;  %6435 = vmatmul.msk.f32.gmra.mxu3 %vm594_vm0, %v2897_v19  ;;  %v2935_v11 = vrot.slane %v2897_v19, 1  ;;  %v3085_v15 = vrot.slane %v2897_v19, 2  ;;  %v3348_v25 = vrot.slane %v2897_v19, 4 }
 0x357   : > { %v3250_v12 = vrot.slane %v2897_v19, 3  ;;  %v2058_v6 = vadd.f32 %v8813_v33, %v1941_v31  ;;  %v2847_v19 = vpop.f32.mrf.mxu2  ;;  %v6480_v33 = vld [vmem:[%s11601_s6 + $0x118] sm:$0xff]  ;;  %v6499_v31 = vld [vmem:[%s11601_s6 + $0x168] sm:$0xff] }
 0x358   : > { %v2870_v28 = vadd.f32 %v2838_v43, %v2753_v52  ;;  %v2606_v32 = vpop.f32.mrf.mxu3  ;;  %v2936_v9 = vsel %vm724_vm2, %v2934_v3, %v2935_v11  ;;  %v3086_v58 = vsel %vm909_vm4, %v3084_v13, %v3085_v15  ;;  %3297 = vmatpush.msra.mxu1 %v6480_v33 }
 0x359   : > { %6425 = vmatmul.msk.f32.vlgmr.msrb.gmra.mxu1 %vm594_vm0, %v2936_v9  ;;  %6451 = vmatmul.msk.f32.vlgmr.msra.gmra.mxu0 %vm594_vm0, %v3086_v58  ;;  %v2636_v17 = vadd.f32 %v2606_v32, %v2519_v46 }
 0x35a   : > { %v2886_v5 = vadd.f32 %v9014_v54, %v2870_v28 }
 0x35c   : > { %v9047_v43 = vmax.f32 %v2886_v5, 0.0 }
 0x35d   : > { %v2724_v39 = vpop.f32.mrf.mxu0 }
 0x35e   : > { %v2754_v14 = vadd.f32 %v2724_v39, %v2636_v17  ;;  %6436 = vmatmul.msk.f32.gmra.mxu3 %vm594_vm0, %v9047_v43  ;;  %v2937_v20 = vrot.slane %v9047_v43, 1  ;;  %v3087_v36 = vrot.slane %v9047_v43, 2  ;;  %v3349_v53 = vrot.slane %v9047_v43, 4 }
 0x35f   : > { %v3251_v63 = vrot.slane %v9047_v43, 3  ;;  %v3515_v24 = vrot.slane %v9047_v43, 5  ;;  %v3614_v46 = vrot.slane %v9047_v43, 6 }
 0x360   : > { %v2871_v56 = vadd.f32 %v2841_v10, %v2754_v14  ;;  %v2609_v40 = vpop.f32.mrf.mxu3  ;;  %v2938_v50 = vsel %vm724_vm2, %v2935_v11, %v2937_v20  ;;  %v3088_v38 = vsel %vm909_vm4, %v3085_v15, %v3087_v36  ;;  %v9062_v3 = vsel %vm3347_vm5, %v3348_v25, %v3349_v53  ;;  %v9079_v15 = vpop.f32.mrf.mxu1 }
 0x361   : > { %6426 = vmatmul.msk.f32.gmra.mxu1 %vm594_vm0, %v2938_v50  ;;  %6452 = vmatmul.msk.f32.gmra.mxu0 %vm594_vm0, %v3088_v38  ;;  %v9068_v48 = vsel %vm1027_vm3, %v3250_v12, %v3251_v63  ;;  %v2176_v10 = vadd.f32 %v8871_v26, %v2058_v6  ;;  %v2637_v52 = vadd.f32 %v2609_v40, %v2520_v18  ;;  %v2850_v40 = vpop.f32.mrf.mxu2 }
 0x362   : > { %v2887_v61 = vadd.f32 %v9014_v54, %v2871_v56  ;;  %6468 = vmatmul.msk.f32.vlgmr.msrb.gmra.mxu2 %vm594_vm0, %v3088_v38  ;;  %v1942_v14 = vadd.f32 %v8679_v41, %v8661_v2 }
 0x363   : > { %v2293_v11 = vadd.f32 %v8879_v0, %v2176_v10  ;;  %v6501_v0 = vld [vmem:[%s11601_s6 + $0x178] sm:$0xff] }
 0x364   : > { %v9073_v13 = vmax.f32 %v2887_v61, 0.0  ;;  %3391 = vmatpush.msrb.mxu3 %v6501_v0  ;;  %v2059_v41 = vadd.f32 %v8830_v27, %v1942_v14  ;;  %v6498_v27 = vld [vmem:[%s11601_s6 + $0x160] sm:$0xff]  ;;  %v6497_v10 = vld [vmem:[%s11601_s6 + $0x158] sm:$0xff]  ;;  %v1943_v0 = vadd.f32 %v8709_v30, %v8689_v37 }
 0x365   : > { %v2727_v23 = vpop.f32.mrf.mxu0  ;;  %v6518_v37 = vld [vmem:[%s11601_s6 + $0x1b8] sm:$0xff] }
 0x366   : > { %v2755_v28 = vadd.f32 %v2727_v23, %v2637_v52  ;;  %6437 = vmatmul.msk.f32.gmra.mxu3 %vm594_vm0, %v9073_v13  ;;  %v2939_v26 = vrot.slane %v9073_v13, 1  ;;  %v3089_v32 = vrot.slane %v9073_v13, 2  ;;  %v3351_v9 = vrot.slane %v9073_v13, 4  ;;  %3460 = vmatpush.msrb.mxu0 %v6518_v37  ;;  %v6533_v37 = vld [vmem:[%s11601_s6 + $0x1e8] sm:$0xff] }
 0x367   : > { %v3253_v58 = vrot.slane %v9073_v13, 3  ;;  %v3516_v8 = vrot.slane %v9073_v13, 5  ;;  %v3615_v5 = vrot.slane %v9073_v13, 6 }
 0x368   : > { %v2872_v34 = vadd.f32 %v2844_v45, %v2755_v28  ;;  %v2612_v17 = vpop.f32.mrf.mxu3  ;;  %v2940_v22 = vsel %vm724_vm2, %v2937_v20, %v2939_v26  ;;  %v3090_v39 = vsel %vm909_vm4, %v3087_v36, %v3089_v32  ;;  %v9097_v25 = vsel %vm3347_vm5, %v3349_v53, %v3351_v9  ;;  %v6500_v45 = vld [vmem:[%s11601_s6 + $0x170] sm:$0xff] }
 0x369   : > { %6427 = vmatmul.msk.f32.gmra.mxu1 %vm594_vm0, %v2940_v22  ;;  %6453 = vmatmul.msk.f32.gmra.mxu0 %vm594_vm0, %v3090_v39  ;;  %v9107_v43 = vsel %vm1027_vm3, %v3251_v63, %v3253_v58  ;;  %v9110_v20 = vsel %vm3514_vm6, %v3515_v24, %v3516_v8  ;;  %v2521_v36 = vadd.f32 %v9045_v47, %v2293_v11  ;;  %v6479_v47 = vld [vmem:[%s11601_s6 + $0x110] sm:$0xff] }
 0x36a   : > { %v2888_v53 = vadd.f32 %v9014_v54, %v2872_v34  ;;  %6469 = vmatmul.msk.f32.gmra.mxu2 %vm594_vm0, %v3090_v39  ;;  %3392 = vmatpush.msrb.mxu3 %v6500_v45  ;;  %v9116_v2 = vsel %vm3613_vm7, %v3614_v46, %v3615_v5  ;;  %v2177_v63 = vadd.f32 %v8882_v59, %v2059_v41  ;;  %v2501_v59 = vpop.f32.mrf.mxu1  ;;  %v6496_v46 = vld [vmem:[%s11601_s6 + $0x150] sm:$0xff]  ;;  %v6478_v34 = vld [vmem:[%s11601_s6 + $0x108] sm:$0xff] }
 0x36b   : > { %v2638_v12 = vadd.f32 %v2612_v17, %v2521_v36  ;;  %3298 = vmatpush.msra.mxu1 %v6479_v47  ;;  %v6495_v17 = vld [vmem:[%s11601_s6 + $0x148] sm:$0xff] }
 0x36c   : > { %v9122_v44 = vmax.f32 %v2888_v53, 0.0  ;;  %3393 = vmatpush.msrb.mxu3 %v6499_v31  ;;  %v2294_v61 = vadd.f32 %v8887_v1, %v2177_v63  ;;  %v6516_v36 = vld [vmem:[%s11601_s6 + $0x1a8] sm:$0xff]  ;;  %v6494_v31 = vld [vmem:[%s11601_s6 + $0x140] sm:$0xff] }
 0x36d   : > { %v2730_v56 = vpop.f32.mrf.mxu0  ;;  %3299 = vmatpush.msra.mxu1 %v6478_v34 }
 0x36e   : > { %v2756_v50 = vadd.f32 %v2730_v56, %v2638_v12  ;;  %6438 = vmatmul.msk.f32.gmra.mxu3 %vm594_vm0, %v9122_v44  ;;  %v2941_v38 = vrot.slane %v9122_v44, 1  ;;  %v3091_v6 = vrot.slane %v9122_v44, 2  ;;  %v3353_v18 = vrot.slane %v9122_v44, 4 }
 0x36f   : > { %3394 = vmatpush.msrb.mxu3 %v6498_v27  ;;  %v3255_v13 = vrot.slane %v9122_v44, 3  ;;  %v3518_v52 = vrot.slane %v9122_v44, 5  ;;  %v3617_v33 = vrot.slane %v9122_v44, 6 }
 0x370   : > { %v2873_v11 = vadd.f32 %v2847_v19, %v2756_v50  ;;  %v2615_v23 = vpop.f32.mrf.mxu3  ;;  %v2942_v24 = vsel %vm724_vm2, %v2939_v26, %v2941_v38  ;;  %v3092_v28 = vsel %vm909_vm4, %v3089_v32, %v3091_v6  ;;  %v9146_v1 = vsel %vm3347_vm5, %v3351_v9, %v3353_v18 }
 0x371   : > { %6428 = vmatmul.msk.f32.gmra.mxu1 %vm594_vm0, %v2942_v24  ;;  %6454 = vmatmul.msk.f32.gmra.mxu0 %vm594_vm0, %v3092_v28  ;;  %v9156_v19 = vsel %vm1027_vm3, %v3253_v58, %v3255_v13  ;;  %v9159_v26 = vsel %vm3514_vm6, %v3516_v8, %v3518_v52  ;;  %v2522_v32 = vadd.f32 %v9079_v15, %v2294_v61 }
 0x372   : > { %v2889_v9 = vadd.f32 %v9014_v54, %v2873_v11  ;;  %6470 = vmatmul.msk.f32.gmra.mxu2 %vm594_vm0, %v3092_v28  ;;  %3395 = vmatpush.msrb.mxu3 %v6497_v10  ;;  %v9170_v30 = vsel %vm3613_vm7, %v3615_v5, %v3617_v33  ;;  %v2060_v58 = vadd.f32 %v8850_v29, %v1943_v0  ;;  %v6517_v5 = vld [vmem:[%s11601_s6 + $0x1b0] sm:$0xff] }
 0x373   : > { %v2639_v15 = vadd.f32 %v2615_v23, %v2522_v32  ;;  %3461 = vmatpush.msrb.mxu0 %v6517_v5  ;;  %v1944_v11 = vadd.f32 %v8737_v60, %v8717_v7  ;;  %v2504_v23 = vpop.f32.mrf.mxu1  ;;  %v6535_v7 = vld [vmem:[%s11601_s6 + $0x1f8] sm:$0xff]  ;;  %v6513_v28 = vld [vmem:[%s11601_s6 + $0x190] sm:$0xff] }
 0x374   : > { %v9173_v8 = vmax.f32 %v2889_v9, 0.0  ;;  %3396 = vmatpush.msrb.mxu3 %v6496_v46  ;;  %v2178_v22 = vadd.f32 %v8897_v62, %v2060_v58  ;;  %v2853_v62 = vpop.f32.mrf.mxu2  ;;  %v6514_v60 = vld [vmem:[%s11601_s6 + $0x198] sm:$0xff]  ;;  %3558 = vmatpush.msra.mxu2 %v6535_v7  ;;  %v6534_v0 = vld [vmem:[%s11601_s6 + $0x1f0] sm:$0xff]  ;;  %v6477_v9 = vld [vmem:[%s11601_s6 + $0x100] sm:$0xff] }
 0x375   : > { %v2733_v29 = vpop.f32.mrf.mxu0  ;;  %3462 = vmatpush.msrb.mxu0 %v6516_v36  ;;  %3300 = vmatpush.msra.mxu1 %v6477_v9 }
 0x376   : > { %v2757_v39 = vadd.f32 %v2733_v29, %v2639_v15  ;;  %6439 = vmatmul.msk.f32.gmra.mxu3 %vm594_vm0, %v9173_v8  ;;  %v2943_v14 = vrot.slane %v9173_v8, 1  ;;  %v3093_v45 = vrot.slane %v9173_v8, 2  ;;  %v3355_v53 = vrot.slane %v9173_v8, 4  ;;  %3559 = vmatpush.msra.mxu2 %v6534_v0  ;;  %v6512_v15 = vld [vmem:[%s11601_s6 + $0x188] sm:$0xff] }
 0x377   : > { %v2295_v41 = vadd.f32 %v8903_v35, %v2178_v22  ;;  %3397 = vmatpush.msrb.mxu3 %v6495_v17  ;;  %v3257_v12 = vrot.slane %v9173_v8, 3  ;;  %v3520_v47 = vrot.slane %v9173_v8, 5  ;;  %v3619_v63 = vrot.slane %v9173_v8, 6  ;;  %v6515_v35 = vld [vmem:[%s11601_s6 + $0x1a0] sm:$0xff] }
 0x378   : > { %v2874_v56 = vadd.f32 %v2850_v40, %v2757_v39  ;;  %v2618_v27 = vpop.f32.mrf.mxu3  ;;  %v2944_v50 = vsel %vm724_vm2, %v2941_v38, %v2943_v14  ;;  %v3094_v61 = vsel %vm909_vm4, %v3091_v6, %v3093_v45  ;;  %v9206_v10 = vsel %vm3347_vm5, %v3353_v18, %v3355_v53  ;;  %3463 = vmatpush.msrb.mxu0 %v6515_v35  ;;  %v6530_v35 = vld [vmem:[%s11601_s6 + $0x1d0] sm:$0xff] }
 0x379   : > { %6429 = vmatmul.msk.f32.gmra.mxu1 %vm594_vm0, %v2944_v50  ;;  %6455 = vmatmul.msk.f32.gmra.mxu0 %vm594_vm0, %v3094_v61  ;;  %v9213_v40 = vsel %vm1027_vm3, %v3255_v13, %v3257_v12  ;;  %v9216_v38 = vsel %vm3514_vm6, %v3518_v52, %v3520_v47  ;;  %v2523_v6 = vadd.f32 %v2501_v59, %v2295_v41 }
 0x37a   : > { %v2890_v24 = vadd.f32 %v9014_v54, %v2874_v56  ;;  %6471 = vmatmul.msk.f32.gmra.mxu2 %vm594_vm0, %v3094_v61  ;;  %3398 = vmatpush.msrb.mxu3 %v6494_v31  ;;  %v9231_v18 = vsel %vm3613_vm7, %v3617_v33, %v3619_v63  ;;  %v2061_v59 = vadd.f32 %v8866_v16, %v1944_v11 }
 0x37b   : > { %v2640_v52 = vadd.f32 %v2618_v27, %v2523_v6  ;;  %3464 = vmatpush.msrb.mxu0 %v6514_v60  ;;  %3560 = vmatpush.msra.mxu2 %v6533_v37  ;;  %v1945_v31 = vadd.f32 %v8761_v49, %v8746_v42  ;;  %v6531_v42 = vld [vmem:[%s11601_s6 + $0x1d8] sm:$0xff]  ;;  %v2507_v50 = vpop.f32.mrf.mxu1 }
 0x37c   : > { %v9234_v13 = vmax.f32 %v2890_v24, 0.0  ;;  %v2179_v44 = vadd.f32 %v8910_v21, %v2061_v59  ;;  %v2856_v56 = vpop.f32.mrf.mxu2  ;;  %v6552_v6 = vld [vmem:[%s11601_s6 + $0x238] sm:$0xff] }
 0x37d   : > { %v2736_v46 = vpop.f32.mrf.mxu0  ;;  %3465 = vmatpush.msrb.mxu0 %v6513_v28  ;;  %3659 = vmatpush.msrb.mxu1 %v6552_v6 }
 0x37e   : > { %v2758_v33 = vadd.f32 %v2736_v46, %v2640_v52  ;;  %6440 = vmatmul.msk.f32.gmra.mxu3 %vm594_vm0, %v9234_v13  ;;  %v2945_v16 = vrot.slane %v9234_v13, 1  ;;  %v3095_v32 = vrot.slane %v9234_v13, 2  ;;  %v3357_v21 = vrot.slane %v9234_v13, 4  ;;  %v11610_v46 = vld [vmem:[#allocation12_spill] sm:$0xff] }
 0x37f   : > { %v2296_v58 = vadd.f32 %v8925_v51, %v2179_v44  ;;  %v3259_v34 = vrot.slane %v9234_v13, 3  ;;  %v3522_v17 = vrot.slane %v9234_v13, 5  ;;  %v3621_v5 = vrot.slane %v9234_v13, 6  ;;  %v6532_v51 = vld [vmem:[%s11601_s6 + $0x1e0] sm:$0xff]  ;;  %3466 = vmatpush.msrb.mxu0 %v6512_v15  ;;  %v6529_v44 = vld [vmem:[%s11601_s6 + $0x1c8] sm:$0xff]  ;;  %v6551_v15 = vld [vmem:[%s11601_s6 + $0x230] sm:$0xff] }
 0x380   : > { %v2875_v22 = vadd.f32 %v2853_v62, %v2758_v33  ;;  %v2621_v29 = vpop.f32.mrf.mxu3  ;;  %v2946_v39 = vsel %vm724_vm2, %v2943_v14, %v2945_v16  ;;  %v3096_v36 = vsel %vm909_vm4, %v3093_v45, %v3095_v32  ;;  %v9267_v41 = vsel %vm3347_vm5, %v3355_v53, %v3357_v21  ;;  %v6511_v14 = vld [vmem:[%s11601_s6 + $0x180] sm:$0xff]  ;;  %3561 = vmatpush.msra.mxu2 %v6532_v51  ;;  %v11613_v51 = vld [vmem:[#allocation16_spill] sm:$0xff] }
 0x381   : > { %6430 = vmatmul.msk.f32.gmra.mxu1 %vm594_vm0, %v2946_v39  ;;  %6456 = vmatmul.msk.f32.gmra.mxu0 %vm594_vm0, %v3096_v36  ;;  %v9277_v45 = vsel %vm1027_vm3, %v3257_v12, %v3259_v34  ;;  %v9280_v62 = vsel %vm3514_vm6, %v3520_v47, %v3522_v17  ;;  %v2524_v53 = vadd.f32 %v2504_v23, %v2296_v58  ;;  %v11611_v33 = vld [vmem:[#allocation10_spill] sm:$0xff] }
 0x382   : > { %v2891_v27 = vadd.f32 %v9014_v54, %v2875_v22  ;;  %6472 = vmatmul.msk.f32.gmra.mxu2 %vm594_vm0, %v3096_v36  ;;  %v9290_v49 = vsel %vm3613_vm7, %v3619_v63, %v3621_v5  ;;  %v2062_v12 = vadd.f32 %v8877_v55, %v1945_v31  ;;  %3467 = vmatpush.msrb.mxu0 %v6511_v14 }
 0x383   : > { %v2641_v61 = vadd.f32 %v2621_v29, %v2524_v53  ;;  %3562 = vmatpush.msra.mxu2 %v6531_v42  ;;  %v1946_v9 = vadd.f32 %v11611_v33, %v11610_v46  ;;  %3660 = vmatpush.msrb.mxu1 %v6551_v15  ;;  %v11617_v33 = vld [vmem:[#allocation15_spill] sm:$0xff] }
 0x384   : > { %v9293_v47 = vmax.f32 %v2891_v27, 0.0  ;;  %v2180_v11 = vadd.f32 %v8930_v57, %v2062_v12 }
 0x385   : > { %v2739_v23 = vpop.f32.mrf.mxu0  ;;  %3563 = vmatpush.msra.mxu2 %v6530_v35 }
 0x386   : > { %v2759_v8 = vadd.f32 %v2739_v23, %v2641_v61  ;;  %6441 = vmatmul.msk.f32.gmra.mxu3 %vm594_vm0, %v9293_v47  ;;  %v2947_v55 = vrot.slane %v9293_v47, 1  ;;  %v3097_v63 = vrot.slane %v9293_v47, 2  ;;  %v3359_v24 = vrot.slane %v9293_v47, 4 }
 0x387   : > { %v2297_v7 = vadd.f32 %v8944_v4, %v2180_v11  ;;  %v3261_v57 = vrot.slane %v9293_v47, 3  ;;  %v3524_v60 = vrot.slane %v9293_v47, 5  ;;  %v3623_v59 = vrot.slane %v9293_v47, 6  ;;  %3564 = vmatpush.msra.mxu2 %v6529_v44 }
 0x388   : > { %v2876_v13 = vadd.f32 %v2856_v56, %v2759_v8  ;;  %v2624_v52 = vpop.f32.mrf.mxu3  ;;  %v2948_v28 = vsel %vm724_vm2, %v2945_v16, %v2947_v55  ;;  %v3098_v0 = vsel %vm909_vm4, %v3095_v32, %v3097_v63  ;;  %v9317_v4 = vsel %vm3347_vm5, %v3357_v21, %v3359_v24  ;;  %v6528_v21 = vld [vmem:[%s11601_s6 + $0x1c0] sm:$0xff]  ;;  %v2510_v56 = vpop.f32.mrf.mxu1 }
 0x389   : > { %6431 = vmatmul.msk.f32.gmra.mxu1 %vm594_vm0, %v2948_v28  ;;  %6457 = vmatmul.msk.f32.gmra.mxu0 %vm594_vm0, %v3098_v0  ;;  %v9324_v37 = vsel %vm1027_vm3, %v3259_v34, %v3261_v57  ;;  %v9327_v16 = vsel %vm3514_vm6, %v3522_v17, %v3524_v60  ;;  %v2525_v32 = vadd.f32 %v2507_v50, %v2297_v7  ;;  %v11612_v34 = vld [vmem:[#allocation11_spill] sm:$0xff]  ;;  %v2859_v17 = vpop.f32.mrf.mxu2 }
 0x38a   : > { %v2892_v58 = vadd.f32 %v9014_v54, %v2876_v13  ;;  %6473 = vmatmul.msk.f32.gmra.mxu2 %vm594_vm0, %v3098_v0  ;;  %v9338_v22 = vsel %vm3613_vm7, %v3621_v5, %v3623_v59  ;;  %v2063_v29 = vadd.f32 %v11612_v34, %v1946_v9  ;;  %v11614_v5 = vld [vmem:[#allocation17_spill] sm:$0xff]  ;;  %v11615_v13 = vld [vmem:[#allocation14_spill] sm:$0xff] }
 0x38b   : > { %v2642_v36 = vadd.f32 %v2624_v52, %v2525_v32  ;;  %3565 = vmatpush.msra.mxu2 %v6528_v21  ;;  %v11616_v52 = vld [vmem:[#allocation13_spill] sm:$0xff] }
 0x38c   : > { %v2904_v39 = vmax.f32 %v2892_v58, 0.0  ;;  %v2181_v31 = vadd.f32 %v11613_v51, %v2063_v29  ;;  %v1947_v28 = vadd.f32 %v11616_v52, %v11615_v13  ;;  %v11618_v58 = vld [vmem:[#allocation18_spill] sm:$0xff] }
 0x38d   : > { %v2742_v14 = vpop.f32.mrf.mxu0 }
 0x38e   : > { %v2760_v53 = vadd.f32 %v2742_v14, %v2642_v36  ;;  %6442 = vmatmul.msk.f32.gmra.mxu3 %vm594_vm0, %v2904_v39  ;;  %v2949_v27 = vrot.slane %v2904_v39, 1  ;;  %v3099_v42 = vrot.slane %v2904_v39, 2  ;;  %v3361_v12 = vrot.slane %v2904_v39, 4 }
 0x38f   : > { %v2298_v50 = vadd.f32 %v11614_v5, %v2181_v31  ;;  %v3263_v47 = vrot.slane %v2904_v39, 3  ;;  %v3526_v61 = vrot.slane %v2904_v39, 5  ;;  %v3625_v35 = vrot.slane %v2904_v39, 6  ;;  %v11619_v39 = vld [vmem:[#allocation19_spill] sm:$0xff] }
 0x390   : > { %v2877_v11 = vadd.f32 %v2859_v17, %v2760_v53  ;;  %v2627_v23 = vpop.f32.mrf.mxu3  ;;  %v2950_v8 = vsel %vm724_vm2, %v2947_v55, %v2949_v27  ;;  %v3100_v6 = vsel %vm909_vm4, %v3097_v63, %v3099_v42  ;;  %v9347_v7 = vsel %vm3347_vm5, %v3359_v24, %v3361_v12  ;;  %v6550_v63 = vld [vmem:[%s11601_s6 + $0x228] sm:$0xff]  ;;  %v2513_v51 = vpop.f32.mrf.mxu1 }
 0x391   : > { %6432 = vmatmul.msk.f32.gmra.mxu1 %vm594_vm0, %v2950_v8  ;;  %6458 = vmatmul.msk.f32.gmra.mxu0 %vm594_vm0, %v3100_v6  ;;  %v9354_v0 = vsel %vm1027_vm3, %v3261_v57, %v3263_v47  ;;  %v9357_v44 = vsel %vm3514_vm6, %v3524_v60, %v3526_v61  ;;  %v2526_v46 = vadd.f32 %v2510_v56, %v2298_v50  ;;  %v2862_v32 = vpop.f32.mrf.mxu2 }
 0x392   : > { %v2893_v55 = vadd.f32 %v9014_v54, %v2877_v11  ;;  %6474 = vmatmul.msk.f32.gmra.mxu2 %vm594_vm0, %v3100_v6  ;;  %v9365_v24 = vsel %vm3613_vm7, %v3623_v59, %v3625_v35  ;;  %v2064_v9 = vadd.f32 %v11617_v33, %v1947_v28  ;;  %3661 = vmatpush.msrb.mxu1 %v6550_v63 }
 0x393   : > { %v2643_v60 = vadd.f32 %v2627_v23, %v2526_v46 }
 0x394   : > { %v9368_v57 = vmax.f32 %v2893_v55, 0.0  ;;  %v2182_v21 = vadd.f32 %v11618_v58, %v2064_v9 }
 0x395   : > { %v2745_v15 = vpop.f32.mrf.mxu0 }
 0x396   : > { %v2761_v34 = vadd.f32 %v2745_v15, %v2643_v60  ;;  %6502 = vmatmul.msk.f32.vlgmr.msrb.gmra.mxu3 %vm594_vm0, %v9062_v3  ;;  %v3182_v29 = vrot.slane %v9368_v57, 2  ;;  %v9375_v17 = vrot.slane %v9368_v57, 4  ;;  %v3265_v59 = vrot.slane %v9368_v57, 3 }
 0x397   : > { %v2299_v36 = vadd.f32 %v11619_v39, %v2182_v21  ;;  %v3528_v31 = vrot.slane %v9368_v57, 5  ;;  %v3627_v56 = vrot.slane %v9368_v57, 6 }
 0x398   : > { %v2878_v14 = vadd.f32 %v2862_v32, %v2761_v34  ;;  %v3183_v53 = vsel %vm909_vm4, %v3099_v42, %v3182_v29  ;;  %v9384_v3 = vsel %vm3347_vm5, %v3361_v12, %v9375_v17  ;;  %v9389_v5 = vsel %vm1027_vm3, %v3263_v47, %v3265_v59  ;;  %v2630_v50 = vpop.f32.mrf.mxu3  ;;  %v6549_v47 = vld [vmem:[%s11601_s6 + $0x220] sm:$0xff]  ;;  %v6548_v32 = vld [vmem:[%s11601_s6 + $0x218] sm:$0xff] }
 0x399   : > { %6433 = vmatmul.msk.f32.gmra.mxu1 %vm594_vm0, %v2949_v27  ;;  %6459 = vmatmul.msk.f32.gmra.mxu0 %vm594_vm0, %v3099_v42  ;;  %v9394_v11 = vsel %vm3514_vm6, %v3526_v61, %v3528_v31  ;;  %v9397_v23 = vsel %vm3613_vm7, %v3625_v35, %v3627_v56  ;;  %v2527_v8 = vadd.f32 %v2513_v51, %v2299_v36  ;;  %v2865_v13 = vpop.f32.mrf.mxu2 }
 0x39a   : > { %v2894_v12 = vadd.f32 %v9014_v54, %v2878_v14  ;;  %6475 = vmatmul.msk.f32.gmra.mxu2 %vm594_vm0, %v3183_v53  ;;  %3662 = vmatpush.msrb.mxu1 %v6549_v47 }
 0x39b   : > { %v2644_v27 = vadd.f32 %v2630_v50, %v2527_v8 }
 0x39c   : > { %v9404_v6 = vmax.f32 %v2894_v12, 0.0  ;;  %3663 = vmatpush.msrb.mxu1 %v6548_v32 }
 0x39d   : > { %v2748_v42 = vpop.f32.mrf.mxu0 }
 0x39e   : > { %v3446_v61 = vrot.slane %v9404_v6, 4  ;;  %v3530_v35 = vrot.slane %v9404_v6, 5  ;;  %v3629_v52 = vrot.slane %v9404_v6, 6  ;;  %v2762_v28 = vadd.f32 %v2748_v42, %v2644_v27  ;;  %6503 = vmatmul.msk.f32.gmra.mxu3 %vm594_vm0, %v9097_v25 }
 0x3a0   : > { %v2879_v46 = vadd.f32 %v2865_v13, %v2762_v28  ;;  %v3447_v55 = vsel %vm3347_vm5, %v9375_v17, %v3446_v61  ;;  %v3531_v63 = vsel %vm3514_vm6, %v3528_v31, %v3530_v35  ;;  %v9419_v33 = vsel %vm3613_vm7, %v3627_v56, %v3629_v52 }
 0x3a1   : > { %6485 = vmatmul.msk.f32.vlgmr.msra.gmra.mxu1 %vm594_vm0, %v9068_v48  ;;  %6519 = vmatmul.msk.f32.vlgmr.msrb.gmra.mxu0 %vm594_vm0, %v9097_v25  ;;  %v6546_v48 = vld [vmem:[%s11601_s6 + $0x208] sm:$0xff]  ;;  %v6545_v25 = vld [vmem:[%s11601_s6 + $0x200] sm:$0xff] }
 0x3a2   : > { %v2895_v9 = vadd.f32 %v9014_v54, %v2879_v46  ;;  %6476 = vmatmul.msk.f32.gmra.mxu2 %vm594_vm0, %v3182_v29  ;;  %v6547_v54 = vld [vmem:[%s11601_s6 + $0x210] sm:$0xff] }
 0x3a3   : > { %3664 = vmatpush.msrb.mxu1 %v6547_v54 }
 0x3a4   : > { %v2907_v60 = vmax.f32 %v2895_v9, 0.0 }
 0x3a5   : > { %3665 = vmatpush.msrb.mxu1 %v6546_v48 }
 0x3a6   : > { %v3631_v58 = vrot.slane %v2907_v60, 6  ;;  %6504 = vmatmul.msk.f32.gmra.mxu3 %vm594_vm0, %v9146_v1 }
 0x3a7   : > { %3666 = vmatpush.msrb.mxu1 %v6545_v25 }
 0x3a8   : > { %v9433_v21 = vsel %vm3613_vm7, %v3629_v52, %v3631_v58 }
 0x3a9   : > { %6486 = vmatmul.msk.f32.gmra.mxu1 %vm594_vm0, %v9107_v43  ;;  %6520 = vmatmul.msk.f32.gmra.mxu0 %vm594_vm0, %v9146_v1 }
 0x3aa   : > { %6536 = vmatmul.msk.f32.vlgmr.msra.gmra.mxu2 %vm594_vm0, %v9110_v20 }
 0x3ae   : > { %6505 = vmatmul.msk.f32.gmra.mxu3 %vm594_vm0, %v9206_v10 }
 0x3b1   : > { %6487 = vmatmul.msk.f32.gmra.mxu1 %vm594_vm0, %v9156_v19  ;;  %6521 = vmatmul.msk.f32.gmra.mxu0 %vm594_vm0, %v9206_v10 }
 0x3b2   : > { %6537 = vmatmul.msk.f32.gmra.mxu2 %vm594_vm0, %v9159_v26 }
 0x3b6   : > { %6506 = vmatmul.msk.f32.gmra.mxu3 %vm594_vm0, %v9267_v41 }
 0x3b9   : > { %6488 = vmatmul.msk.f32.gmra.mxu1 %vm594_vm0, %v9213_v40  ;;  %6522 = vmatmul.msk.f32.gmra.mxu0 %vm594_vm0, %v9267_v41 }
 0x3ba   : > { %6538 = vmatmul.msk.f32.gmra.mxu2 %vm594_vm0, %v9216_v38 }
 0x3be   : > { %6507 = vmatmul.msk.f32.gmra.mxu3 %vm594_vm0, %v9317_v4 }
 0x3c1   : > { %6489 = vmatmul.msk.f32.gmra.mxu1 %vm594_vm0, %v9277_v45  ;;  %6523 = vmatmul.msk.f32.gmra.mxu0 %vm594_vm0, %v9317_v4 }
 0x3c2   : > { %6539 = vmatmul.msk.f32.gmra.mxu2 %vm594_vm0, %v9280_v62 }
 0x3c6   : > { %6508 = vmatmul.msk.f32.gmra.mxu3 %vm594_vm0, %v9347_v7 }
 0x3c9   : > { %6490 = vmatmul.msk.f32.gmra.mxu1 %vm594_vm0, %v9324_v37  ;;  %6524 = vmatmul.msk.f32.gmra.mxu0 %vm594_vm0, %v9347_v7 }
 0x3ca   : > { %6540 = vmatmul.msk.f32.gmra.mxu2 %vm594_vm0, %v9327_v16 }
 0x3ce   : > { %6509 = vmatmul.msk.f32.gmra.mxu3 %vm594_vm0, %v9384_v3 }
 0x3d1   : > { %v3048_v43 = vpop.f32.mrf.mxu3  ;;  %6491 = vmatmul.msk.f32.gmra.mxu1 %vm594_vm0, %v9354_v0  ;;  %6525 = vmatmul.msk.f32.gmra.mxu0 %vm594_vm0, %v9384_v3 }
 0x3d2   : > { %6541 = vmatmul.msk.f32.gmra.mxu2 %vm594_vm0, %v9357_v44 }
 0x3d6   : > { %v2986_v20 = vpop.f32.mrf.mxu1  ;;  %v3136_v1 = vpop.f32.mrf.mxu0  ;;  %6510 = vmatmul.msk.f32.gmra.mxu3 %vm594_vm0, %v9375_v17 }
 0x3d7   : > { %v3049_v19 = vadd.f32 %v3048_v43, %v2986_v20 }
 0x3d9   : > { %v3163_v26 = vadd.f32 %v3136_v1, %v3049_v19  ;;  %v3051_v10 = vpop.f32.mrf.mxu3  ;;  %6492 = vmatmul.msk.f32.gmra.mxu1 %vm594_vm0, %v9389_v5  ;;  %6526 = vmatmul.msk.f32.gmra.mxu0 %vm594_vm0, %v3447_v55 }
 0x3da   : > { %6542 = vmatmul.msk.f32.gmra.mxu2 %vm594_vm0, %v9394_v11 }
 0x3de   : > { %v2989_v40 = vpop.f32.mrf.mxu1  ;;  %v3139_v38 = vpop.f32.mrf.mxu0 }
 0x3df   : > { %v3052_v41 = vadd.f32 %v3051_v10, %v2989_v40 }
 0x3e1   : > { %v3164_v45 = vadd.f32 %v3139_v38, %v3052_v41  ;;  %v3054_v62 = vpop.f32.mrf.mxu3  ;;  %6493 = vmatmul.msk.f32.gmra.mxu1 %vm594_vm0, %v3265_v59  ;;  %6527 = vmatmul.msk.f32.gmra.mxu0 %vm594_vm0, %v3446_v61 }
 0x3e2   : > { %6543 = vmatmul.msk.f32.gmra.mxu2 %vm594_vm0, %v3531_v63 }
 0x3e5   : > { %v3205_v4 = vpop.f32.mrf.mxu2 }
 0x3e6   : > { %v3232_v37 = vadd.f32 %v3205_v4, %v3163_v26  ;;  %v2992_v16 = vpop.f32.mrf.mxu1  ;;  %v3142_v7 = vpop.f32.mrf.mxu0 }
 0x3e7   : > { %v3055_v0 = vadd.f32 %v3054_v62, %v2992_v16 }
 0x3e9   : > { %v3165_v44 = vadd.f32 %v3142_v7, %v3055_v0  ;;  %v3057_v15 = vpop.f32.mrf.mxu3  ;;  %6553 = vmatmul.msk.f32.vlgmr.msrb.gmra.mxu1 %vm594_vm0, %v9116_v2  ;;  %v11512_v7 = vmov 0  }
 0x3ea   : > { %6544 = vmatmul.msk.f32.gmra.mxu2 %vm594_vm0, %v3530_v35  ;;  %6931 = vset.pattern.permute.xlu0 %v11512_v7 }
 0x3ed   : > { %v3208_v57 = vpop.f32.mrf.mxu2 }
 0x3ee   : > { %v3233_v34 = vadd.f32 %v3208_v57, %v3164_v45  ;;  %v2995_v29 = vpop.f32.mrf.mxu1  ;;  %v3145_v17 = vpop.f32.mrf.mxu0 }
 0x3ef   : > { %v3058_v59 = vadd.f32 %v3057_v15, %v2995_v29 }
 0x3f1   : > { %v3166_v39 = vadd.f32 %v3145_v17, %v3058_v59  ;;  %v3060_v36 = vpop.f32.mrf.mxu3  ;;  %6554 = vmatmul.msk.f32.gmra.mxu1 %vm594_vm0, %v9170_v30 }
 0x3f5   : > { %v3211_v51 = vpop.f32.mrf.mxu2 }
 0x3f6   : > { %v3234_v31 = vadd.f32 %v3211_v51, %v3165_v44  ;;  %v2998_v56 = vpop.f32.mrf.mxu1  ;;  %v3148_v14 = vpop.f32.mrf.mxu0 }
 0x3f7   : > { %v3061_v53 = vadd.f32 %v3060_v36, %v2998_v56 }
 0x3f9   : > { %v3167_v2 = vadd.f32 %v3148_v14, %v3061_v53  ;;  %v3063_v3 = vpop.f32.mrf.mxu3  ;;  %6555 = vmatmul.msk.f32.gmra.mxu1 %vm594_vm0, %v9231_v18 }
 0x3fd   : > { %v3214_v5 = vpop.f32.mrf.mxu2 }
 0x3fe   : > { %v3235_v50 = vadd.f32 %v3214_v5, %v3166_v39  ;;  %v3001_v11 = vpop.f32.mrf.mxu1  ;;  %v3151_v8 = vpop.f32.mrf.mxu0 }
 0x3ff   : > { %v3064_v12 = vadd.f32 %v3063_v3, %v3001_v11  ;;  %v9541_v3 = vld [vmem:[%s11476_s7] ss:$0 sm:$0xff] }
 0x401   : > { %v3168_v47 = vadd.f32 %v3151_v8, %v3064_v12  ;;  %6556 = vmatmul.msk.f32.gmra.mxu1 %vm594_vm0, %v9290_v49  ;;  %v3066_v30 = vpop.f32.mrf.mxu3 }
 0x405   : > { %v3217_v6 = vpop.f32.mrf.mxu2 }
 0x406   : > { %v3236_v27 = vadd.f32 %v3217_v6, %v3167_v2  ;;  %v3004_v42 = vpop.f32.mrf.mxu1  ;;  %v3154_v13 = vpop.f32.mrf.mxu0 }
 0x407   : > { %v3067_v61 = vadd.f32 %v3066_v30, %v3004_v42 }
 0x409   : > { %v3169_v35 = vadd.f32 %v3154_v13, %v3067_v61  ;;  %6557 = vmatmul.msk.f32.gmra.mxu1 %vm594_vm0, %v9338_v22  ;;  %v3069_v18 = vpop.f32.mrf.mxu3 }
 0x40d   : > { %v3220_v52 = vpop.f32.mrf.mxu2 }
 0x40e   : > { %v3237_v28 = vadd.f32 %v3220_v52, %v3168_v47  ;;  %v3007_v46 = vpop.f32.mrf.mxu1  ;;  %v3157_v55 = vpop.f32.mrf.mxu0 }
 0x40f   : > { %v3070_v63 = vadd.f32 %v3069_v18, %v3007_v46 }
 0x411   : > { %v3170_v9 = vadd.f32 %v3157_v55, %v3070_v63  ;;  %6558 = vmatmul.msk.f32.gmra.mxu1 %vm594_vm0, %v9365_v24  ;;  %v3072_v32 = vpop.f32.mrf.mxu3  ;;  %v11524_v55 = vmov 6   ;;  %v11510_v63 = vmov 5  }
 0x415   : > { %v3223_v49 = vpop.f32.mrf.mxu2 }
 0x416   : > { %v3238_v60 = vadd.f32 %v3223_v49, %v3169_v35  ;;  %v3010_v58 = vpop.f32.mrf.mxu1  ;;  %v3160_v48 = vpop.f32.mrf.mxu0  ;;  %v11522_v49 = vmov 1  }
 0x417   : > { %v3073_v54 = vadd.f32 %v3072_v32, %v3010_v58 }
 0x419   : > { %v3171_v25 = vadd.f32 %v3160_v48, %v3073_v54  ;;  %6559 = vmatmul.msk.f32.gmra.mxu1 %vm594_vm0, %v9397_v23 }
 0x41d   : > { %v3226_v22 = vpop.f32.mrf.mxu2 }
 0x41e   : > { %v3239_v43 = vadd.f32 %v3226_v22, %v3170_v9  ;;  %v3302_v20 = vpop.f32.mrf.mxu1  ;;  %v3469_v15 = vpop.f32.mrf.mxu0 }
 0x41f   : > { %v3329_v1 = vadd.f32 %v3302_v20, %v3232_v37  ;;  %v11518_v37 = vmov 3   ;;  %v11530_v20 = vmov 9  }
 0x420   : > { %6934 = vset.pattern.permute.xlu2 %v11518_v37 }
 0x421   : > { %6560 = vmatmul.msk.f32.gmra.mxu1 %vm594_vm0, %v9419_v33  ;;  %v11506_v33 = vmov 2  }
 0x422   : > { %6933 = vset.pattern.permute.xlu1 %v11506_v33 }
 0x425   : > { %v3229_v19 = vpop.f32.mrf.mxu2 }
 0x426   : > { %v3240_v26 = vadd.f32 %v3229_v19, %v3171_v25  ;;  %v3305_v24 = vpop.f32.mrf.mxu1  ;;  %v3472_v59 = vpop.f32.mrf.mxu0 }
 0x427   : > { %v3330_v10 = vadd.f32 %v3305_v24, %v3233_v34  ;;  %v11528_v24 = vmov 4  }
 0x429   : > { %6561 = vmatmul.msk.f32.gmra.mxu1 %vm594_vm0, %v9433_v21  ;;  %v3400_v21 = vpop.f32.mrf.mxu3 }
 0x42a   : > { %v3427_v51 = vadd.f32 %v3400_v21, %v3329_v1 }
 0x42c   : > { %v3496_v14 = vadd.f32 %v3469_v15, %v3427_v51  ;;  %v11536_v15 = vmov 12  }
 0x42d   : > { %v3567_v57 = vpop.f32.mrf.mxu2 }
 0x42e   : > { %v3308_v40 = vpop.f32.mrf.mxu1  ;;  %v3594_v53 = vadd.f32 %v3567_v57, %v3496_v14  ;;  %v3475_v2 = vpop.f32.mrf.mxu0  ;;  %v11520_v57 = vmov 11  }
 0x42f   : > { %v3331_v38 = vadd.f32 %v3308_v40, %v3234_v31 }
 0x431   : > { %v3403_v17 = vpop.f32.mrf.mxu3 }
 0x432   : > { %v3428_v11 = vadd.f32 %v3403_v17, %v3330_v10  ;;  %v11534_v17 = vmov 7  }
 0x434   : > { %v3497_v47 = vadd.f32 %v3472_v59, %v3428_v11  ;;  %v11540_v11 = vmov 10  }
 0x435   : > { %v3570_v39 = vpop.f32.mrf.mxu2 }
 0x436   : > { %v3311_v41 = vpop.f32.mrf.mxu1  ;;  %v3478_v61 = vpop.f32.mrf.mxu0 }
 0x437   : > { %v3332_v45 = vadd.f32 %v3311_v41, %v3235_v50 }
 0x439   : > { %v3406_v56 = vpop.f32.mrf.mxu3 }
 0x43a   : > { %v3429_v13 = vadd.f32 %v3406_v56, %v3331_v38 }
 0x43d   : > { %v3573_v5 = vpop.f32.mrf.mxu2 }
 0x43e   : > { %v3314_v62 = vpop.f32.mrf.mxu1  ;;  %v3481_v54 = vpop.f32.mrf.mxu0 }
 0x43f   : > { %v9525_v23 = vadd.f32 %v3314_v62, %v3236_v27  ;;  %v3595_v27 = vadd.f32 %v3570_v39, %v3497_v47 }
 0x441   : > { %v3409_v6 = vpop.f32.mrf.mxu3 }
 0x445   : > { %v3576_v18 = vpop.f32.mrf.mxu2 }
 0x446   : > { %v3317_v4 = vpop.f32.mrf.mxu1 }
 0x447   : > { %v9527_v16 = vadd.f32 %v3317_v4, %v3237_v28  ;;  %v3498_v28 = vadd.f32 %v3475_v2, %v3429_v13 }
 0x449   : > { %v3596_v46 = vadd.f32 %v3573_v5, %v3498_v28  ;;  %v3412_v9 = vpop.f32.mrf.mxu3  ;;  %v11542_v5 = vmov 15   ;;  %v11532_v28 = vmov 17  }
 0x44a   : > { %v3431_v19 = vadd.f32 %v3412_v9, %v9525_v23 }
 0x44c   : > { %v3500_v41 = vadd.f32 %v3481_v54, %v3431_v19 }
 0x44d   : > { %v3579_v25 = vpop.f32.mrf.mxu2 }
 0x44e   : > { %v3320_v0 = vpop.f32.mrf.mxu1  ;;  %v3598_v23 = vadd.f32 %v3579_v25, %v3500_v41 }
 0x44f   : > { %v9532_v44 = vadd.f32 %v3320_v0, %v3238_v60  ;;  %v3430_v60 = vadd.f32 %v3409_v6, %v3332_v45  ;;  %v3484_v45 = vpop.f32.mrf.mxu0 }
 0x451   : > { %v3499_v22 = vadd.f32 %v3478_v61, %v3430_v60  ;;  %v3415_v40 = vpop.f32.mrf.mxu3 }
 0x452   : > { %v3432_v21 = vadd.f32 %v3415_v40, %v9527_v16  ;;  %v11504_v40 = vmov 16  }
 0x454   : > { %v3501_v16 = vadd.f32 %v3484_v45, %v3432_v21  ;;  %v11546_v21 = vmov 23  }
 0x455   : > { %v3582_v62 = vpop.f32.mrf.mxu2 }
 0x456   : > { %v3323_v34 = vpop.f32.mrf.mxu1 }
 0x457   : > { %v9534_v29 = vadd.f32 %v3323_v34, %v3239_v43  ;;  %v3597_v43 = vadd.f32 %v3576_v18, %v3499_v22  ;;  %v3487_v39 = vpop.f32.mrf.mxu0  ;;  %v11550_v18 = vmov 18  }
 0x459   : > { %v3418_v59 = vpop.f32.mrf.mxu3 }
 0x45a   : > { %v3433_v14 = vadd.f32 %v3418_v59, %v9532_v44 }
 0x45d   : > { %v3585_v51 = vpop.f32.mrf.mxu2 }
 0x45e   : > { %v3326_v36 = vpop.f32.mrf.mxu1 }
 0x45f   : > { %v9536_v31 = vadd.f32 %v3326_v36, %v3240_v26  ;;  %v11516_v26 = vmov 8   ;;  %v3599_v36 = vadd.f32 %v3582_v62, %v3501_v16  ;;  %v11492_v62 = vmov 22  }
 0x460   : > { %v11496_v16 = vmov 26  }
 0x465   : > { %v3588_v13 = vpop.f32.mrf.mxu2 }
 0x466   : > { %v3668_v50 = vpop.f32.mrf.mxu1 }
 0x467   : > { %v3695_v8 = vadd.f32 %v3668_v50, %v3594_v53  ;;  %v11526_v50 = vmov 14  }
 0x469   : > { %v3708_v12 = vadd.f32 %v9541_v3, %v3695_v8  ;;  %v3502_v8 = vadd.f32 %v3487_v39, %v3433_v14  ;;  %v11514_v39 = vmov 27   ;;  %v11500_v14 = vmov 31  }
 0x46b   : > { %v9544_v30 = vmax.f32 %v3708_v12, 0.0  ;;  %v3421_v12 = vpop.f32.mrf.mxu3  ;;  %v3600_v44 = vadd.f32 %v3585_v51, %v3502_v8  ;;  %v11502_v51 = vmov 28  }
 0x46c   : > { %v3434_v6 = vadd.f32 %v3421_v12, %v9534_v29 }
 0x46d   : > { %3937 = vperm.xlu2 %6934, %v9544_v30   ;;  %3873 = vperm.xlu1 %6933, %v9544_v30   ;;  %v3591_v22 = vpop.f32.mrf.mxu2 }
 0x46e   : > { %3737 = vperm.xlu0 %6931, %v9544_v30   ;;  %v3671_v42 = vpop.f32.mrf.mxu1 }
 0x46f   : > { %v3696_v35 = vadd.f32 %v3671_v42, %v3595_v27  ;;  %v3490_v42 = vpop.f32.mrf.mxu0 }
 0x471   : > { %v9550_v52 = vadd.f32 %v9541_v3, %v3696_v35  ;;  %v3503_v35 = vadd.f32 %v3490_v42, %v3434_v6 }
 0x473   : > { %v3601_v9 = vadd.f32 %v3588_v13, %v3503_v35  ;;  %v3424_v29 = vpop.f32.mrf.mxu3  ;;  %v9627_v59 = vmax.f32 %v9550_v52, 0.0  ;;  %v11552_v52 = vmov 29  }
 0x474   : > { %v3435_v60 = vadd.f32 %v3424_v29, %v9536_v31 }
 0x475   : > { %6937 = vset.pattern.permute.xlu2 %v11524_v55  ;;  %6936 = vset.pattern.permute.xlu1 %v11510_v63 }
 0x476   : > { %6932 = vset.pattern.permute.xlu0 %v11522_v49  ;;  %4129 = vperm.xlu2 %6937, %v9544_v30   ;;  %v3674_v32 = vpop.f32.mrf.mxu1 }
 0x477   : > { %4065 = vperm.xlu1 %6936, %v9544_v30   ;;  %3809 = vperm.xlu0 %6932, %v9544_v30   ;;  %v3697_v58 = vadd.f32 %v3674_v32, %v3596_v46  ;;  %v11548_v46 = vmov 13   ;;  %v3493_v25 = vpop.f32.mrf.mxu0 }
 0x479   : > { %v9559_v48 = vadd.f32 %v9541_v3, %v3697_v58 }
 0x47e   : > { %6940 = vset.pattern.permute.xlu2 %v11530_v20  ;;  %v3677_v1 = vpop.f32.mrf.mxu1 }
 0x47f   : > { %6939 = vset.pattern.permute.xlu1 %v11516_v26  ;;  %6935 = vset.pattern.permute.xlu0 %v11528_v24  ;;  %v3698_v10 = vadd.f32 %v3677_v1, %v3597_v43  ;;  %v3504_v43 = vadd.f32 %v3493_v25, %v3435_v60  ;;  %v11498_v1 = vmov 21  }
 0x480   : > { %4321 = vperm.xlu2 %6940, %v9544_v30   ;;  %4257 = vperm.xlu1 %6939, %v9544_v30  }
 0x481   : > { %v9568_v38 = vadd.f32 %v9541_v3, %v3698_v10  ;;  %4001 = vperm.xlu0 %6935, %v9544_v30   ;;  %v3602_v19 = vadd.f32 %v3591_v22, %v3504_v43  ;;  %v11538_v10 = vmov 20  }
 0x486   : > { %v3680_v4 = vpop.f32.mrf.mxu1 }
 0x487   : > { %v3699_v0 = vadd.f32 %v3680_v4, %v3598_v23  ;;  %v11554_v23 = vmov 24   ;;  %v11494_v4 = vmov 19  }
 0x488   : > { %6943 = vset.pattern.permute.xlu2 %v11536_v15  ;;  %6942 = vset.pattern.permute.xlu1 %v11520_v57 }
 0x489   : > { %v9575_v34 = vadd.f32 %v9541_v3, %v3699_v0  ;;  %6938 = vset.pattern.permute.xlu0 %v11534_v17  ;;  %4513 = vperm.xlu2 %6943, %v9544_v30   ;;  %v11508_v0 = vmov 30  }
 0x48a   : > { %4449 = vperm.xlu1 %6942, %v9544_v30   ;;  %4193 = vperm.xlu0 %6938, %v9544_v30  }
 0x48e   : > { %v3683_v56 = vpop.f32.mrf.mxu1 }
 0x48f   : > { %v3700_v53 = vadd.f32 %v3683_v56, %v3599_v36 }
 0x491   : > { %v9583_v2 = vadd.f32 %v9541_v3, %v3700_v53  ;;  %6946 = vset.pattern.permute.xlu2 %v11542_v5 }
 0x492   : > { %6945 = vset.pattern.permute.xlu1 %v11526_v50  ;;  %6941 = vset.pattern.permute.xlu0 %v11540_v11 }
 0x493   : > { %4705 = vperm.xlu2 %6946, %v9544_v30   ;;  %4641 = vperm.xlu1 %6945, %v9544_v30  }
 0x494   : > { %4385 = vperm.xlu0 %6941, %v9544_v30  }
 0x496   : > { %v3686_v47 = vpop.f32.mrf.mxu1 }
 0x497   : > { %v3701_v27 = vadd.f32 %v3686_v47, %v3600_v44 }
 0x499   : > { %v9593_v61 = vadd.f32 %v9541_v3, %v3701_v27 }
 0x49b   : > { %6949 = vset.pattern.permute.xlu2 %v11550_v18  ;;  %6948 = vset.pattern.permute.xlu1 %v11532_v28 }
 0x49c   : > { %6944 = vset.pattern.permute.xlu0 %v11548_v46  ;;  %4897 = vperm.xlu2 %6949, %v9544_v30  }
 0x49d   : > { %4833 = vperm.xlu1 %6948, %v9544_v30   ;;  %4577 = vperm.xlu0 %6944, %v9544_v30  }
 0x49e   : > { %v3689_v32 = vpop.f32.mrf.mxu1 }
 0x49f   : > { %v3702_v58 = vadd.f32 %v3689_v32, %v3601_v9 }
 0x4a1   : > { %v9603_v54 = vadd.f32 %v9541_v3, %v3702_v58 }
 0x4a4   : > { %6952 = vset.pattern.permute.xlu2 %v11498_v1 }
 0x4a5   : > { %6951 = vset.pattern.permute.xlu1 %v11538_v10  ;;  %6947 = vset.pattern.permute.xlu0 %v11504_v40 }
 0x4a6   : > { %5089 = vperm.xlu2 %6952, %v9544_v30   ;;  %5025 = vperm.xlu1 %6951, %v9544_v30   ;;  %v3692_v31 = vpop.f32.mrf.mxu1 }
 0x4a7   : > { %4769 = vperm.xlu0 %6947, %v9544_v30   ;;  %v3703_v41 = vadd.f32 %v3692_v31, %v3602_v19 }
 0x4a9   : > { %v9612_v45 = vadd.f32 %v9541_v3, %v3703_v41  ;;  %v11544_v3 = vmov 25  }
 0x4ab   : > { %11620 = vst [vmem:[#allocation12_spill] sm:$0xff] %v9612_v45  ;;  %v11659_v45 = vmov 26  }
 0x4ae   : > { %6953 = vset.pattern.permute.xlu2 %v11492_v62  ;;  %6955 = vset.pattern.permute.xlu1 %v11554_v23 }
 0x4af   : > { %6950 = vset.pattern.permute.xlu0 %v11494_v4  ;;  %5153 = vperm.xlu2 %6953, %v9544_v30  }
 0x4b0   : > { %5281 = vperm.xlu1 %6955, %v9544_v30   ;;  %4961 = vperm.xlu0 %6950, %v9544_v30  }
 0x4b7   : > { %6954 = vset.pattern.permute.xlu2 %v11546_v21 }
 0x4b8   : > { %6956 = vset.pattern.permute.xlu1 %v11544_v3  ;;  %6961 = vset.pattern.permute.xlu0 %v11508_v0 }
 0x4b9   : > { %5217 = vperm.xlu2 %6954, %v9544_v30   ;;  %5345 = vperm.xlu1 %6956, %v9544_v30  }
 0x4ba   : > { %5665 = vperm.xlu0 %6961, %v9544_v30  }
 0x4c1   : > { %6957 = vset.pattern.permute.xlu2 %v11496_v16  ;;  %6958 = vset.pattern.permute.xlu1 %v11514_v39 }
 0x4c2   : > { %6963 = vset.pattern.permute.xlu0 %v11512_v7  ;;  %5409 = vperm.xlu2 %6957, %v9544_v30  }
 0x4c3   : > { %5473 = vperm.xlu1 %6958, %v9544_v30   ;;  %3742 = vperm.xlu0 %6963, %v9627_v59  }
 0x4c7   : > { %v9635_v36 = vpop.permute.xlu2 %3937 }
 0x4ca   : > { %6959 = vset.pattern.permute.xlu2 %v11502_v51 }
 0x4cb   : > { %6960 = vset.pattern.permute.xlu1 %v11552_v52  ;;  %6966 = vset.pattern.permute.xlu0 %v11518_v37 }
 0x4cc   : > { %5537 = vperm.xlu2 %6959, %v9544_v30   ;;  %5601 = vperm.xlu1 %6960, %v9544_v30  }
 0x4cd   : > { %3941 = vperm.xlu0 %6966, %v9627_v59  }
 0x4d0   : > { %v9643_v56 = vpop.permute.xlu2 %4129 }
 0x4d4   : > { %6962 = vset.pattern.permute.xlu2 %v11500_v14  ;;  %6964 = vset.pattern.permute.xlu1 %v11522_v49 }
 0x4d5   : > { %6969 = vset.pattern.permute.xlu0 %v11524_v55  ;;  %5729 = vperm.xlu2 %6962, %v9544_v30  }
 0x4d6   : > { %3813 = vperm.xlu1 %6964, %v9627_v59   ;;  %4133 = vperm.xlu0 %6969, %v9627_v59  }
 0x4da   : > { %v9651_v53 = vpop.permute.xlu2 %4321 }
 0x4db   : > { %11621 = vst [vmem:[#allocation10_spill] sm:$0xff] %v9651_v53 }
 0x4dd   : > { %6965 = vset.pattern.permute.xlu2 %v11506_v33 }
 0x4de   : > { %6967 = vset.pattern.permute.xlu1 %v11528_v24  ;;  %6972 = vset.pattern.permute.xlu0 %v11530_v20 }
 0x4df   : > { %3877 = vperm.xlu2 %6965, %v9627_v59   ;;  %4005 = vperm.xlu1 %6967, %v9627_v59   ;;  %v9658_v8 = vpop.permute.xlu1 %3873 }
 0x4e0   : > { %4325 = vperm.xlu0 %6972, %v9627_v59   ;;  %v9661_v30 = vpop.permute.xlu0 %3737 }
 0x4e3   : > { %v9663_v12 = vpop.permute.xlu2 %4513 }
 0x4e4   : > { %11622 = vst [vmem:[#allocation11_spill] sm:$0xff] %v9663_v12  ;;  %v11686_v12 = vmov 2  }
 0x4e7   : > { %6968 = vset.pattern.permute.xlu2 %v11510_v63  ;;  %6970 = vset.pattern.permute.xlu1 %v11534_v17 }
 0x4e8   : > { %6975 = vset.pattern.permute.xlu0 %v11536_v15  ;;  %4069 = vperm.xlu2 %6968, %v9627_v59  }
 0x4e9   : > { %4197 = vperm.xlu1 %6970, %v9627_v59   ;;  %4517 = vperm.xlu0 %6975, %v9627_v59   ;;  %v9671_v44 = vpop.permute.xlu1 %4065  ;;  %v9673_v47 = vpop.permute.xlu0 %3809 }
 0x4ed   : > { %v9675_v6 = vpop.permute.xlu2 %4705 }
 0x4ee   : > { %11623 = vst [vmem:[#allocation16_spill] sm:$0xff] %v9675_v6  ;;  %v6582_v6 = vld [vmem:[%s11477_s8 + $0xe8] sm:$0xff] }
 0x4f0   : > { %6971 = vset.pattern.permute.xlu2 %v11516_v26 }
 0x4f1   : > { %6973 = vset.pattern.permute.xlu1 %v11540_v11  ;;  %6978 = vset.pattern.permute.xlu0 %v11542_v5 }
 0x4f2   : > { %4261 = vperm.xlu2 %6971, %v9627_v59   ;;  %4389 = vperm.xlu1 %6973, %v9627_v59   ;;  %v9682_v27 = vpop.permute.xlu1 %4257 }
 0x4f3   : > { %4709 = vperm.xlu0 %6978, %v9627_v59   ;;  %v9685_v42 = vpop.permute.xlu0 %4001 }
 0x4f6   : > { %v9687_v13 = vpop.permute.xlu2 %4897 }
 0x4f7   : > { %11624 = vst [vmem:[#allocation17_spill] sm:$0xff] %v9687_v13 }
 0x4fa   : > { %6974 = vset.pattern.permute.xlu2 %v11520_v57  ;;  %6976 = vset.pattern.permute.xlu1 %v11548_v46 }
 0x4fb   : > { %6981 = vset.pattern.permute.xlu0 %v11550_v18  ;;  %4453 = vperm.xlu2 %6974, %v9627_v59  }
 0x4fc   : > { %4581 = vperm.xlu1 %6976, %v9627_v59   ;;  %4901 = vperm.xlu0 %6981, %v9627_v59   ;;  %v9695_v35 = vpop.permute.xlu1 %4449  ;;  %v9697_v9 = vpop.permute.xlu0 %4193 }
 0x4fd   : > { %11625 = vst [vmem:[#allocation14_spill] sm:$0xff] %v9695_v35  ;;  %v11690_v35 = vmov 5  }
 0x500   : > { %v9699_v29 = vpop.permute.xlu2 %5089 }
 0x501   : > { %11626 = vst [vmem:[#allocation13_spill] sm:$0xff] %v9699_v29  ;;  %v11673_v29 = vmov 27  }
 0x503   : > { %6977 = vset.pattern.permute.xlu2 %v11526_v50 }
 0x504   : > { %6979 = vset.pattern.permute.xlu1 %v11504_v40  ;;  %6984 = vset.pattern.permute.xlu0 %v11498_v1  ;;  %v9751_v1 = vmax.f32 %v9559_v48, 0.0 }
 0x505   : > { %4645 = vperm.xlu2 %6977, %v9627_v59   ;;  %4773 = vperm.xlu1 %6979, %v9627_v59   ;;  %v9706_v32 = vpop.permute.xlu1 %4641 }
 0x506   : > { %11627 = vst [vmem:[#allocation15_spill] sm:$0xff] %v9706_v32  ;;  %5093 = vperm.xlu0 %6984, %v9627_v59   ;;  %v9709_v60 = vpop.permute.xlu0 %4385 }
 0x507   : > { %11628 = vst [vmem:[#allocation18_spill] sm:$0xff] %v9709_v60 }
 0x509   : > { %v9711_v58 = vpop.permute.xlu2 %5153 }
 0x50a   : > { %11629 = vst [vmem:[#allocation19_spill] sm:$0xff] %v9711_v58  ;;  %v11671_v58 = vmov 24  }
 0x50d   : > { %6980 = vset.pattern.permute.xlu2 %v11532_v28  ;;  %6982 = vset.pattern.permute.xlu1 %v11494_v4 }
 0x50e   : > { %6985 = vset.pattern.permute.xlu0 %v11492_v62  ;;  %4837 = vperm.xlu2 %6980, %v9627_v59  }
 0x50f   : > { %4965 = vperm.xlu1 %6982, %v9627_v59   ;;  %5157 = vperm.xlu0 %6985, %v9627_v59   ;;  %v9719_v25 = vpop.permute.xlu1 %4833  ;;  %v9721_v22 = vpop.permute.xlu0 %4577 }
 0x510   : > { %11630 = vst [vmem:[#allocation20_spill] sm:$0xff] %v9719_v25 }
 0x511   : > { %11631 = vst [vmem:[#allocation21_spill] sm:$0xff] %v9721_v22  ;;  %v11685_v22 = vmov 12  }
 0x513   : > { %v9723_v43 = vpop.permute.xlu2 %5217 }
 0x514   : > { %11632 = vst [vmem:[#allocation22_spill] sm:$0xff] %v9723_v43 }
 0x516   : > { %6983 = vset.pattern.permute.xlu2 %v11538_v10 }
 0x517   : > { %6986 = vset.pattern.permute.xlu1 %v11546_v21  ;;  %6989 = vset.pattern.permute.xlu0 %v11496_v16 }
 0x518   : > { %5029 = vperm.xlu2 %6983, %v9627_v59   ;;  %5221 = vperm.xlu1 %6986, %v9627_v59   ;;  %v9730_v19 = vpop.permute.xlu1 %5025 }
 0x519   : > { %11633 = vst [vmem:[#allocation23_spill] sm:$0xff] %v9730_v19  ;;  %5413 = vperm.xlu0 %6989, %v9627_v59   ;;  %v9733_v31 = vpop.permute.xlu0 %4769 }
 0x51a   : > { %11634 = vst [vmem:[#allocation24_spill] sm:$0xff] %v9733_v31  ;;  %v11683_v31 = vmov 9  }
 0x51c   : > { %v9735_v41 = vpop.permute.xlu2 %5409 }
 0x51d   : > { %11635 = vst [vmem:[#allocation25_spill] sm:$0xff] %v9735_v41  ;;  %v11666_v41 = vmov 29  }
 0x520   : > { %6987 = vset.pattern.permute.xlu2 %v11554_v23  ;;  %6991 = vset.pattern.permute.xlu1 %v11502_v51 }
 0x521   : > { %6994 = vset.pattern.permute.xlu0 %v11500_v14  ;;  %5285 = vperm.xlu2 %6987, %v9627_v59  }
 0x522   : > { %5541 = vperm.xlu1 %6991, %v9627_v59   ;;  %5733 = vperm.xlu0 %6994, %v9627_v59   ;;  %v9743_v62 = vpop.permute.xlu1 %5281  ;;  %v9745_v4 = vpop.permute.xlu0 %4961 }
 0x523   : > { %11636 = vst [vmem:[#allocation26_spill] sm:$0xff] %v9743_v62 }
 0x524   : > { %11637 = vst [vmem:[#allocation27_spill] sm:$0xff] %v9745_v4 }
 0x526   : > { %v9747_v16 = vpop.permute.xlu2 %5537 }
 0x527   : > { %11638 = vst [vmem:[#allocation28_spill] sm:$0xff] %v9747_v16 }
 0x529   : > { %6988 = vset.pattern.permute.xlu2 %v11544_v3  ;;  %v11654_v3 = vmov 16  }
 0x52a   : > { %6993 = vset.pattern.permute.xlu1 %v11508_v0  ;;  %6997 = vset.pattern.permute.xlu0 %v11506_v33 }
 0x52b   : > { %5349 = vperm.xlu2 %6988, %v9627_v59   ;;  %5669 = vperm.xlu1 %6993, %v9627_v59   ;;  %v9757_v14 = vpop.permute.xlu1 %5345 }
 0x52c   : > { %11639 = vst [vmem:[#allocation29_spill] sm:$0xff] %v9757_v14  ;;  %3881 = vperm.xlu0 %6997, %v9751_v1   ;;  %v9760_v51 = vpop.permute.xlu0 %5665  ;;  %v11667_v14 = vmov 25  }
 0x52d   : > { %11640 = vst [vmem:[#allocation30_spill] sm:$0xff] %v9760_v51 }
 0x52f   : > { %v9762_v40 = vpop.permute.xlu2 %5729 }
 0x530   : > { %11641 = vst [vmem:[#allocation31_spill] sm:$0xff] %v9762_v40  ;;  %v11660_v40 = vmov 19  }
 0x533   : > { %6990 = vset.pattern.permute.xlu2 %v11514_v39  ;;  %6995 = vset.pattern.permute.xlu1 %v11512_v7 }
 0x534   : > { %7000 = vset.pattern.permute.xlu0 %v11510_v63  ;;  %5477 = vperm.xlu2 %6990, %v9627_v59  }
 0x535   : > { %4073 = vperm.xlu0 %7000, %v9751_v1   ;;  %3747 = vperm.xlu1 %6995, %v9751_v1   ;;  %v9770_v48 = vpop.permute.xlu1 %5473  ;;  %v9772_v33 = vpop.permute.xlu0 %3742 }
 0x536   : > { %11642 = vst [vmem:[#allocation32_spill] sm:$0xff] %v9770_v48  ;;  %v11665_v48 = vmov 28  }
 0x539   : > { %v9774_v0 = vpop.permute.xlu2 %3877 }
 0x53c   : > { %6992 = vset.pattern.permute.xlu2 %v11552_v52 }
 0x53d   : > { %7003 = vset.pattern.permute.xlu0 %v11516_v26  ;;  %6998 = vset.pattern.permute.xlu1 %v11518_v37 }
 0x53e   : > { %5605 = vperm.xlu2 %6992, %v9627_v59   ;;  %4265 = vperm.xlu0 %7003, %v9751_v1   ;;  %v9781_v63 = vpop.permute.xlu1 %5601 }
 0x53f   : > { %11643 = vst [vmem:[#allocation33_spill] sm:$0xff] %v9781_v63  ;;  %3945 = vperm.xlu1 %6998, %v9751_v1   ;;  %v9784_v7 = vpop.permute.xlu0 %3941 }
 0x542   : > { %v9786_v39 = vpop.permute.xlu2 %4069 }
 0x546   : > { %6996 = vset.pattern.permute.xlu2 %v11522_v49  ;;  %7006 = vset.pattern.permute.xlu0 %v11520_v57 }
 0x547   : > { %7001 = vset.pattern.permute.xlu1 %v11524_v55  ;;  %4457 = vperm.xlu0 %7006, %v9751_v1  }
 0x548   : > { %3817 = vperm.xlu2 %6996, %v9751_v1   ;;  %4137 = vperm.xlu1 %7001, %v9751_v1   ;;  %v9794_v59 = vpop.permute.xlu1 %3813  ;;  %v9796_v26 = vpop.permute.xlu0 %4133 }
 0x54c   : > { %v9798_v37 = vpop.permute.xlu2 %4261 }
 0x54f   : > { %7009 = vset.pattern.permute.xlu0 %v11526_v50 }
 0x550   : > { %6999 = vset.pattern.permute.xlu2 %v11528_v24  ;;  %7004 = vset.pattern.permute.xlu1 %v11530_v20 }
 0x551   : > { %4649 = vperm.xlu0 %7009, %v9751_v1   ;;  %4009 = vperm.xlu2 %6999, %v9751_v1   ;;  %v9805_v57 = vpop.permute.xlu1 %4005 }
 0x552   : > { %4329 = vperm.xlu1 %7004, %v9751_v1   ;;  %v9808_v49 = vpop.permute.xlu0 %4325 }
 0x553   : > { %11644 = vst [vmem:[#allocation34_spill] sm:$0xff] %v9808_v49 }
 0x555   : > { %v9810_v55 = vpop.permute.xlu2 %4453 }
 0x556   : > { %11645 = vst [vmem:[#allocation35_spill] sm:$0xff] %v9810_v55  ;;  %v6663_v55 = vld [vmem:[%s11477_s8 + $0x370] sm:$0xff] }
 0x559   : > { %7012 = vset.pattern.permute.xlu0 %v11532_v28  ;;  %7002 = vset.pattern.permute.xlu2 %v11534_v17 }
 0x55a   : > { %7007 = vset.pattern.permute.xlu1 %v11536_v15  ;;  %4841 = vperm.xlu0 %7012, %v9751_v1  }
 0x55b   : > { %4201 = vperm.xlu2 %7002, %v9751_v1   ;;  %4521 = vperm.xlu1 %7007, %v9751_v1   ;;  %v9818_v50 = vpop.permute.xlu1 %4197  ;;  %v9820_v24 = vpop.permute.xlu0 %4517 }
 0x55c   : > { %11646 = vst [vmem:[#allocation36_spill] sm:$0xff] %v9820_v24  ;;  %v11689_v24 = vmov 18  }
 0x55f   : > { %v9822_v20 = vpop.permute.xlu2 %4645 }
 0x560   : > { %11647 = vst [vmem:[#allocation37_spill] sm:$0xff] %v9822_v20  ;;  %v9941_v20 = vmax.f32 %v9583_v2, 0.0 }
 0x562   : > { %7015 = vset.pattern.permute.xlu0 %v11538_v10  ;;  %11684 = vst [vmem:[#allocation57_spill] sm:$0xff] %v9941_v20 }
 0x563   : > { %7005 = vset.pattern.permute.xlu2 %v11540_v11  ;;  %7010 = vset.pattern.permute.xlu1 %v11542_v5 }
 0x564   : > { %5033 = vperm.xlu0 %7015, %v9751_v1   ;;  %4393 = vperm.xlu2 %7005, %v9751_v1   ;;  %v9829_v28 = vpop.permute.xlu1 %4389 }
 0x565   : > { %11648 = vst [vmem:[#allocation38_spill] sm:$0xff] %v9829_v28  ;;  %4713 = vperm.xlu1 %7010, %v9751_v1   ;;  %v9832_v17 = vpop.permute.xlu0 %4709  ;;  %v11693_v28 = vmov 8  }
 0x566   : > { %11649 = vst [vmem:[#allocation39_spill] sm:$0xff] %v9832_v17 }
 0x568   : > { %v9834_v15 = vpop.permute.xlu2 %4837 }
 0x569   : > { %11650 = vst [vmem:[#allocation40_spill] sm:$0xff] %v9834_v15  ;;  %v11682_v15 = vmov 1  }
 0x56c   : > { %7018 = vset.pattern.permute.xlu0 %v11546_v21  ;;  %7008 = vset.pattern.permute.xlu2 %v11548_v46  ;;  %v11655_v21 = vmov 21  }
 0x56d   : > { %7013 = vset.pattern.permute.xlu1 %v11550_v18  ;;  %5225 = vperm.xlu0 %7018, %v9751_v1  }
 0x56e   : > { %4585 = vperm.xlu2 %7008, %v9751_v1   ;;  %4905 = vperm.xlu1 %7013, %v9751_v1   ;;  %v9842_v10 = vpop.permute.xlu1 %4581  ;;  %v9844_v11 = vpop.permute.xlu0 %4901 }
 0x56f   : > { %11651 = vst [vmem:[#allocation41_spill] sm:$0xff] %v9842_v10  ;;  %v11688_v10 = vmov 4  }
 0x570   : > { %11652 = vst [vmem:[#allocation42_spill] sm:$0xff] %v9844_v11  ;;  %v6573_v11 = vld [vmem:[%s11477_s8 + $0xa0] sm:$0xff] }
 0x572   : > { %v9846_v5 = vpop.permute.xlu2 %5029 }
 0x573   : > { %11653 = vst [vmem:[#allocation43_spill] sm:$0xff] %v9846_v5  ;;  %v11681_v5 = vmov 6  }
 0x575   : > { %7019 = vset.pattern.permute.xlu0 %v11554_v23  ;;  %v11661_v23 = vmov 22  }
 0x576   : > { %7011 = vset.pattern.permute.xlu2 %v11654_v3  ;;  %7016 = vset.pattern.permute.xlu1 %v11655_v21 }
 0x577   : > { %5289 = vperm.xlu0 %7019, %v9751_v1   ;;  %4777 = vperm.xlu2 %7011, %v9751_v1   ;;  %v9853_v46 = vpop.permute.xlu1 %4773 }
 0x578   : > { %11656 = vst [vmem:[#allocation44_spill] sm:$0xff] %v9853_v46  ;;  %5097 = vperm.xlu1 %7016, %v9751_v1   ;;  %v9856_v18 = vpop.permute.xlu0 %5093 }
 0x579   : > { %11657 = vst [vmem:[#allocation45_spill] sm:$0xff] %v9856_v18  ;;  %v11678_v18 = vmov 30  }
 0x57b   : > { %v9858_v52 = vpop.permute.xlu2 %5285 }
 0x57c   : > { %11658 = vst [vmem:[#allocation46_spill] sm:$0xff] %v9858_v52 }
 0x57f   : > { %7021 = vset.pattern.permute.xlu0 %v11659_v45  ;;  %7014 = vset.pattern.permute.xlu2 %v11660_v40 }
 0x580   : > { %7017 = vset.pattern.permute.xlu1 %v11661_v23  ;;  %5417 = vperm.xlu0 %7021, %v9751_v1  }
 0x581   : > { %4969 = vperm.xlu2 %7014, %v9751_v1   ;;  %5161 = vperm.xlu1 %7017, %v9751_v1   ;;  %v9866_v51 = vpop.permute.xlu1 %4965  ;;  %v9868_v63 = vpop.permute.xlu0 %5157 }
 0x582   : > { %11662 = vst [vmem:[#allocation47_spill] sm:$0xff] %v9866_v51 }
 0x583   : > { %11663 = vst [vmem:[#allocation48_spill] sm:$0xff] %v9868_v63  ;;  %v11672_v63 = vmov 31  }
 0x585   : > { %v9870_v16 = vpop.permute.xlu2 %5349 }
 0x586   : > { %11664 = vst [vmem:[#allocation49_spill] sm:$0xff] %v9870_v16  ;;  %v9885_v16 = vmax.f32 %v9568_v38, 0.0  ;;  %v11677_v38 = vmov 3  }
 0x588   : > { %7023 = vset.pattern.permute.xlu0 %v11665_v48 }
 0x589   : > { %7024 = vset.pattern.permute.xlu2 %v11666_v41  ;;  %7020 = vset.pattern.permute.xlu1 %v11667_v14 }
 0x58a   : > { %5545 = vperm.xlu0 %7023, %v9751_v1   ;;  %5609 = vperm.xlu2 %7024, %v9751_v1   ;;  %v9877_v62 = vpop.permute.xlu1 %5221 }
 0x58b   : > { %11668 = vst [vmem:[#allocation50_spill] sm:$0xff] %v9877_v62  ;;  %5353 = vperm.xlu1 %7020, %v9751_v1   ;;  %v9880_v52 = vpop.permute.xlu0 %5413 }
 0x58c   : > { %11669 = vst [vmem:[#allocation51_spill] sm:$0xff] %v9880_v52 }
 0x58e   : > { %v9882_v43 = vpop.permute.xlu2 %5477 }
 0x58f   : > { %11670 = vst [vmem:[#allocation52_spill] sm:$0xff] %v9882_v43 }
 0x592   : > { %7051 = vset.pattern.permute.xlu0 %v11671_v58  ;;  %7026 = vset.pattern.permute.xlu2 %v11672_v63 }
 0x593   : > { %7022 = vset.pattern.permute.xlu1 %v11673_v29  ;;  %5737 = vperm.xlu2 %7026, %v9751_v1  }
 0x594   : > { %5481 = vperm.xlu1 %7022, %v9751_v1   ;;  %5293 = vperm.xlu0 %7051, %v9885_v16   ;;  %v9893_v62 = vpop.permute.xlu1 %5541  ;;  %v9895_v52 = vpop.permute.xlu0 %5733 }
 0x595   : > { %11674 = vst [vmem:[#allocation53_spill] sm:$0xff] %v9893_v62 }
 0x596   : > { %11675 = vst [vmem:[#allocation54_spill] sm:$0xff] %v9895_v52  ;;  %v9908_v52 = vmax.f32 %v9575_v34, 0.0  ;;  %v6564_v34 = vld [vmem:[%s11477_s8 + $0x58] sm:$0xff] }
 0x598   : > { %v9897_v43 = vpop.permute.xlu2 %5605 }
 0x599   : > { %11676 = vst [vmem:[#allocation55_spill] sm:$0xff] %v9897_v43  ;;  %v11680_v43 = vmov 0  }
 0x59b   : > { %7030 = vset.pattern.permute.xlu2 %v11677_v38 }
 0x59c   : > { %7025 = vset.pattern.permute.xlu1 %v11678_v18  ;;  %7053 = vset.pattern.permute.xlu0 %v11659_v45 }
 0x59d   : > { %5673 = vperm.xlu1 %7025, %v9751_v1   ;;  %5421 = vperm.xlu0 %7053, %v9885_v16   ;;  %v9904_v58 = vpop.permute.xlu1 %5669  ;;  %v3728_v1 = vld [vmem:[%s11477_s8 + $0x10] sm:$0xff] }
 0x59e   : > { %11679 = vst [vmem:[#allocation56_spill] sm:$0xff] %v9904_v58  ;;  %3949 = vperm.xlu2 %7030, %v9885_v16   ;;  %v3882_v19 = vpop.permute.xlu0 %3881 }
 0x59f   : > { %v3910_v46 = vmul.f32 %v6573_v11, %v3882_v19  ;;  %v6600_v11 = vld [vmem:[%s11477_s8 + $0x178] sm:$0xff] }
 0x5a2   : > { %v3818_v62 = vpop.permute.xlu2 %3817 }
 0x5a3   : > { %v3846_v13 = vmul.f32 %v6564_v34, %v3818_v62 }
 0x5a5   : > { %7027 = vset.pattern.permute.xlu1 %v11680_v43  ;;  %7088 = vset.pattern.permute.xlu0 %v11666_v41 }
 0x5a6   : > { %7033 = vset.pattern.permute.xlu2 %v11681_v5  ;;  %3752 = vperm.xlu1 %7027, %v9885_v16  }
 0x5a7   : > { %4141 = vperm.xlu2 %7033, %v9885_v16   ;;  %5617 = vperm.xlu0 %7088, %v9908_v52   ;;  %v3748_v58 = vpop.permute.xlu1 %3747  ;;  %v4074_v51 = vpop.permute.xlu0 %4073 }
 0x5a8   : > { %v3782_v45 = vmul.f32 %v3748_v58, %v3728_v1 }
 0x5aa   : > { %v3855_v25 = vadd.f32 %v3846_v13, %v3782_v45  ;;  %v6591_v45 = vld [vmem:[%s11477_s8 + $0x130] sm:$0xff] }
 0x5ab   : > { %v4010_v4 = vpop.permute.xlu2 %4009 }
 0x5ac   : > { %v3919_v13 = vadd.f32 %v3910_v46, %v3855_v25  ;;  %v4038_v34 = vmul.f32 %v6591_v45, %v4010_v4  ;;  %v6609_v46 = vld [vmem:[%s11477_s8 + $0x1c0] sm:$0xff] }
 0x5ae   : > { %7028 = vset.pattern.permute.xlu1 %v11682_v15 }
 0x5af   : > { %7036 = vset.pattern.permute.xlu2 %v11683_v31  ;;  %7090 = vset.pattern.permute.xlu0 %v11672_v63 }
 0x5b0   : > { %4333 = vperm.xlu2 %7036, %v9885_v16   ;;  %3821 = vperm.xlu1 %7028, %v9885_v16   ;;  %v4266_v19 = vpop.permute.xlu0 %4265 }
 0x5b1   : > { %5745 = vperm.xlu0 %7090, %v9908_v52   ;;  %v3946_v62 = vpop.permute.xlu1 %3945 }
 0x5b2   : > { %v3974_v58 = vmul.f32 %v6582_v6, %v3946_v62  ;;  %v4102_v6 = vmul.f32 %v6600_v11, %v4074_v51  ;;  %v6618_v62 = vld [vmem:[%s11477_s8 + $0x208] sm:$0xff]  ;;  %v6627_v51 = vld [vmem:[%s11477_s8 + $0x250] sm:$0xff]  ;;  %v11687_v11 = vmov 15  }
 0x5b4   : > { %v3983_v1 = vadd.f32 %v3974_v58, %v3919_v13 }
 0x5b5   : > { %v4202_v17 = vpop.permute.xlu2 %4201 }
 0x5b6   : > { %v4047_v32 = vadd.f32 %v4038_v34, %v3983_v1  ;;  %v4230_v58 = vmul.f32 %v6618_v62, %v4202_v17 }
 0x5b8   : > { %7039 = vset.pattern.permute.xlu2 %v11685_v22  ;;  %7029 = vset.pattern.permute.xlu1 %v11686_v12  ;;  %v4111_v2 = vadd.f32 %v4102_v6, %v4047_v32  ;;  %v6636_v32 = vld [vmem:[%s11477_s8 + $0x298] sm:$0xff]  ;;  %v6645_v6 = vld [vmem:[%s11477_s8 + $0x2e0] sm:$0xff] }
 0x5b9   : > { %7092 = vset.pattern.permute.xlu0 %v11682_v15  ;;  %4525 = vperm.xlu2 %7039, %v9885_v16   ;;  %v4458_v1 = vpop.permute.xlu0 %4457 }
 0x5ba   : > { %3885 = vperm.xlu1 %7029, %v9885_v16   ;;  %3829 = vperm.xlu0 %7092, %v9941_v20   ;;  %v4138_v4 = vpop.permute.xlu1 %4137 }
 0x5bb   : > { %v4166_v25 = vmul.f32 %v6609_v46, %v4138_v4  ;;  %v4294_v46 = vmul.f32 %v6627_v51, %v4266_v19  ;;  %v6654_v19 = vld [vmem:[%s11477_s8 + $0x328] sm:$0xff] }
 0x5bc   : > { %v4486_v60 = vmul.f32 %v6654_v19, %v4458_v1  ;;  %v6681_v1 = vld [vmem:[%s11477_s8 + $0x400] sm:$0xff]  ;;  %v11692_v19 = vmov 10  }
 0x5bd   : > { %v4175_v45 = vadd.f32 %v4166_v25, %v4111_v2 }
 0x5be   : > { %v4394_v13 = vpop.permute.xlu2 %4393 }
 0x5bf   : > { %v4239_v34 = vadd.f32 %v4230_v58, %v4175_v45  ;;  %v4422_v62 = vmul.f32 %v6645_v6, %v4394_v13 }
 0x5c1   : > { %7042 = vset.pattern.permute.xlu2 %v11687_v11  ;;  %v4303_v4 = vadd.f32 %v4294_v46, %v4239_v34  ;;  %v11691_v34 = vmov 7  }
 0x5c2   : > { %7031 = vset.pattern.permute.xlu1 %v11688_v10  ;;  %7095 = vset.pattern.permute.xlu0 %v11688_v10 }
 0x5c3   : > { %4717 = vperm.xlu2 %7042, %v9885_v16   ;;  %4013 = vperm.xlu1 %7031, %v9885_v16   ;;  %v4650_v58 = vpop.permute.xlu0 %4649 }
 0x5c4   : > { %4021 = vperm.xlu0 %7095, %v9941_v20   ;;  %v4330_v17 = vpop.permute.xlu1 %4329 }
 0x5c5   : > { %v4358_v2 = vmul.f32 %v6636_v32, %v4330_v17  ;;  %v6672_v17 = vld [vmem:[%s11477_s8 + $0x3b8] sm:$0xff] }
 0x5c7   : > { %v4367_v25 = vadd.f32 %v4358_v2, %v4303_v4 }
 0x5c8   : > { %v4586_v45 = vpop.permute.xlu2 %4585 }
 0x5c9   : > { %v4431_v51 = vadd.f32 %v4422_v62, %v4367_v25  ;;  %v4614_v2 = vmul.f32 %v6672_v17, %v4586_v45  ;;  %v6699_v45 = vld [vmem:[%s11477_s8 + $0x490] sm:$0xff] }
 0x5cb   : > { %7045 = vset.pattern.permute.xlu2 %v11689_v24  ;;  %7032 = vset.pattern.permute.xlu1 %v11690_v35  ;;  %v4495_v32 = vadd.f32 %v4486_v60, %v4431_v51  ;;  %v4678_v60 = vmul.f32 %v6681_v1, %v4650_v58 }
 0x5cc   : > { %7098 = vset.pattern.permute.xlu0 %v11691_v34  ;;  %4909 = vperm.xlu2 %7045, %v9885_v16   ;;  %v4842_v25 = vpop.permute.xlu0 %4841 }
 0x5cd   : > { %4077 = vperm.xlu1 %7032, %v9885_v16   ;;  %4213 = vperm.xlu0 %7098, %v9941_v20   ;;  %v4522_v13 = vpop.permute.xlu1 %4521 }
 0x5ce   : > { %v4550_v46 = vmul.f32 %v6663_v55, %v4522_v13  ;;  %v6690_v55 = vld [vmem:[%s11477_s8 + $0x448] sm:$0xff] }
 0x5d0   : > { %v4559_v6 = vadd.f32 %v4550_v46, %v4495_v32  ;;  %v6708_v46 = vld [vmem:[%s11477_s8 + $0x4d8] sm:$0xff] }
 0x5d1   : > { %v4778_v4 = vpop.permute.xlu2 %4777 }
 0x5d2   : > { %v4623_v62 = vadd.f32 %v4614_v2, %v4559_v6  ;;  %v4806_v17 = vmul.f32 %v6699_v45, %v4778_v4  ;;  %v4870_v2 = vmul.f32 %v6708_v46, %v4842_v25  ;;  %v6726_v4 = vld [vmem:[%s11477_s8 + $0x568] sm:$0xff]  ;;  %v6735_v45 = vld [vmem:[%s11477_s8 + $0x5b0] sm:$0xff] }
 0x5d4   : > { %7048 = vset.pattern.permute.xlu2 %v11655_v21  ;;  %v4687_v13 = vadd.f32 %v4678_v60, %v4623_v62  ;;  %v6717_v62 = vld [vmem:[%s11477_s8 + $0x520] sm:$0xff] }
 0x5d5   : > { %7034 = vset.pattern.permute.xlu1 %v11691_v34  ;;  %7101 = vset.pattern.permute.xlu0 %v11692_v19 }
 0x5d6   : > { %5101 = vperm.xlu2 %7048, %v9885_v16   ;;  %4205 = vperm.xlu1 %7034, %v9885_v16   ;;  %v5034_v53 = vpop.permute.xlu0 %5033 }
 0x5d7   : > { %4405 = vperm.xlu0 %7101, %v9941_v20   ;;  %v4714_v51 = vpop.permute.xlu1 %4713  ;;  %v5062_v46 = vmul.f32 %v6735_v45, %v5034_v53  ;;  %v6762_v45 = vld [vmem:[%s11477_s8 + $0x688] sm:$0xff] }
 0x5d8   : > { %v4742_v32 = vmul.f32 %v6690_v55, %v4714_v51  ;;  %v11694_v55 = vmov 13  }
 0x5da   : > { %v4751_v6 = vadd.f32 %v4742_v32, %v4687_v13 }
 0x5db   : > { %v4970_v58 = vpop.permute.xlu2 %4969 }
 0x5dc   : > { %v4815_v1 = vadd.f32 %v4806_v17, %v4751_v6  ;;  %v4998_v51 = vmul.f32 %v6726_v4, %v4970_v58  ;;  %v11696_v6 = vmov 23   ;;  %v11698_v4 = vmov 11  }
 0x5de   : > { %7049 = vset.pattern.permute.xlu2 %v11661_v23  ;;  %7035 = vset.pattern.permute.xlu1 %v11693_v28  ;;  %v4879_v49 = vadd.f32 %v4870_v2, %v4815_v1 }
 0x5df   : > { %7104 = vset.pattern.permute.xlu0 %v11694_v55  ;;  %5165 = vperm.xlu2 %7049, %v9885_v16   ;;  %v5226_v1 = vpop.permute.xlu0 %5225 }
 0x5e0   : > { %4269 = vperm.xlu1 %7035, %v9885_v16   ;;  %4597 = vperm.xlu0 %7104, %v9941_v20   ;;  %v4906_v25 = vpop.permute.xlu1 %4905 }
 0x5e1   : > { %v4934_v60 = vmul.f32 %v6717_v62, %v4906_v25  ;;  %v6753_v25 = vld [vmem:[%s11477_s8 + $0x640] sm:$0xff] }
 0x5e3   : > { %v4943_v13 = vadd.f32 %v4934_v60, %v4879_v49  ;;  %v6744_v49 = vld [vmem:[%s11477_s8 + $0x5f8] sm:$0xff] }
 0x5e4   : > { %v10018_v32 = vpop.permute.xlu2 %5609 }
 0x5e5   : > { %11695 = vst [vmem:[#allocation58_spill] sm:$0xff] %v10018_v32  ;;  %v5007_v17 = vadd.f32 %v4998_v51, %v4943_v13 }
 0x5e7   : > { %7050 = vset.pattern.permute.xlu2 %v11696_v6  ;;  %v5071_v2 = vadd.f32 %v5062_v46, %v5007_v17  ;;  %v6771_v17 = vld [vmem:[%s11477_s8 + $0x6d0] sm:$0xff] }
 0x5e8   : > { %7037 = vset.pattern.permute.xlu1 %v11692_v19  ;;  %7107 = vset.pattern.permute.xlu0 %v11654_v3 }
 0x5e9   : > { %5229 = vperm.xlu2 %7050, %v9885_v16   ;;  %4397 = vperm.xlu1 %7037, %v9885_v16   ;;  %v5290_v60 = vpop.permute.xlu0 %5289 }
 0x5ea   : > { %4789 = vperm.xlu0 %7107, %v9941_v20   ;;  %v5098_v58 = vpop.permute.xlu1 %5097 }
 0x5eb   : > { %v5126_v62 = vmul.f32 %v6744_v49, %v5098_v58  ;;  %v5254_v58 = vmul.f32 %v6762_v45, %v5226_v1  ;;  %v6789_v1 = vld [vmem:[%s11477_s8 + $0x760] sm:$0xff] }
 0x5ed   : > { %v10029_v53 = vpop.permute.xlu2 %5737  ;;  %v5135_v13 = vadd.f32 %v5126_v62, %v5071_v2  ;;  %v6780_v2 = vld [vmem:[%s11477_s8 + $0x718] sm:$0xff] }
 0x5ee   : > { %11697 = vst [vmem:[#allocation59_spill] sm:$0xff] %v10029_v53  ;;  %v5318_v53 = vmul.f32 %v6771_v17, %v5290_v60  ;;  %v6798_v17 = vld [vmem:[%s11477_s8 + $0x7a8] sm:$0xff] }
 0x5f1   : > { %7052 = vset.pattern.permute.xlu2 %v11667_v14  ;;  %7038 = vset.pattern.permute.xlu1 %v11698_v4 }
 0x5f2   : > { %7110 = vset.pattern.permute.xlu0 %v11660_v40  ;;  %5357 = vperm.xlu2 %7052, %v9885_v16   ;;  %v5418_v62 = vpop.permute.xlu0 %5417 }
 0x5f3   : > { %4461 = vperm.xlu1 %7038, %v9885_v16   ;;  %4981 = vperm.xlu0 %7110, %v9941_v20   ;;  %v5162_v51 = vpop.permute.xlu1 %5161 }
 0x5f4   : > { %v5190_v46 = vmul.f32 %v6753_v25, %v5162_v51  ;;  %v5446_v25 = vmul.f32 %v6789_v1, %v5418_v62 }
 0x5f6   : > { %v5199_v49 = vadd.f32 %v5190_v46, %v5135_v13  ;;  %v10063_v13 = vmax.f32 %v9593_v61, 0.0  ;;  %v11699_v46 = vmov 14  }
 0x5f8   : > { %v5263_v32 = vadd.f32 %v5254_v58, %v5199_v49  ;;  %v10046_v6 = vpop.permute.xlu2 %3949 }
 0x5fa   : > { %7054 = vset.pattern.permute.xlu2 %v11673_v29  ;;  %v5327_v23 = vadd.f32 %v5318_v53, %v5263_v32 }
 0x5fb   : > { %7040 = vset.pattern.permute.xlu1 %v11694_v55  ;;  %7118 = vset.pattern.permute.xlu0 %v11673_v29  ;;  %v3726_v29 = vld [vmem:[%s11477_s8] sm:$0xff] }
 0x5fc   : > { %5485 = vperm.xlu2 %7054, %v9885_v16   ;;  %4589 = vperm.xlu1 %7040, %v9885_v16   ;;  %v5546_v58 = vpop.permute.xlu0 %5545 }
 0x5fd   : > { %5493 = vperm.xlu0 %7118, %v9941_v20   ;;  %v5354_v32 = vpop.permute.xlu1 %5353 }
 0x5fe   : > { %v5382_v53 = vmul.f32 %v6780_v2, %v5354_v32 }
 0x600   : > { %v5391_v60 = vadd.f32 %v5382_v53, %v5327_v23  ;;  %v6807_v23 = vld [vmem:[%s11477_s8 + $0x7f0] sm:$0xff] }
 0x601   : > { %v10060_v45 = vpop.permute.xlu2 %4141  ;;  %v5574_v2 = vmul.f32 %v6807_v23, %v5546_v58 }
 0x602   : > { %v5455_v51 = vadd.f32 %v5446_v25, %v5391_v60  ;;  %v11702_v60 = vmov 17  }
 0x604   : > { %7056 = vset.pattern.permute.xlu2 %v11666_v41  ;;  %7041 = vset.pattern.permute.xlu1 %v11699_v46 }
 0x605   : > { %7123 = vset.pattern.permute.xlu0 %v11680_v43  ;;  %5613 = vperm.xlu2 %7056, %v9885_v16  }
 0x606   : > { %4653 = vperm.xlu1 %7041, %v9885_v16   ;;  %3767 = vperm.xlu0 %7123, %v10063_v13   ;;  %v5482_v61 = vpop.permute.xlu1 %5481 }
 0x607   : > { %v5510_v49 = vmul.f32 %v6798_v17, %v5482_v61  ;;  %v11703_v61 = vmov 20  }
 0x609   : > { %v5519_v62 = vadd.f32 %v5510_v49, %v5455_v51 }
 0x60a   : > { %v10077_v1 = vpop.permute.xlu2 %4333 }
 0x60b   : > { %v10079_v32 = vadd.f32 %v5574_v2, %v5519_v62 }
 0x60d   : > { %11700 = vst [vmem:[#allocation60_spill] sm:$0xff] %v10079_v32  ;;  %7059 = vset.pattern.permute.xlu2 %v11680_v43  ;;  %v6563_v43 = vld [vmem:[%s11477_s8 + $0x50] sm:$0xff] }
 0x60e   : > { %7043 = vset.pattern.permute.xlu1 %v11654_v3  ;;  %7126 = vset.pattern.permute.xlu0 %v11677_v38 }
 0x60f   : > { %4781 = vperm.xlu1 %7043, %v9885_v16   ;;  %3757 = vperm.xlu2 %7059, %v9908_v52   ;;  %v10086_v53 = vpop.permute.xlu1 %5673 }
 0x610   : > { %11701 = vst [vmem:[#allocation61_spill] sm:$0xff] %v10086_v53  ;;  %3961 = vperm.xlu0 %7126, %v10063_v13  }
 0x613   : > { %v10089_v25 = vpop.permute.xlu2 %4525 }
 0x617   : > { %7044 = vset.pattern.permute.xlu1 %v11702_v60  ;;  %7060 = vset.pattern.permute.xlu2 %v11682_v15  ;;  %v3845_v15 = vmul.f32 %v6563_v43, %v9794_v59  ;;  %v6572_v43 = vld [vmem:[%s11477_s8 + $0x98] sm:$0xff] }
 0x618   : > { %7129 = vset.pattern.permute.xlu0 %v11681_v5  ;;  %4845 = vperm.xlu1 %7044, %v9885_v16   ;;  %v10095_v51 = vpop.permute.xlu1 %3752  ;;  %v3909_v53 = vmul.f32 %v6572_v43, %v9774_v0  ;;  %v6589_v43 = vld [vmem:[%s11477_s8 + $0x120] sm:$0xff] }
 0x619   : > { %3825 = vperm.xlu2 %7060, %v9908_v52   ;;  %4153 = vperm.xlu0 %7129, %v10063_v13  }
 0x61d   : > { %v10099_v17 = vpop.permute.xlu2 %4717 }
 0x620   : > { %7046 = vset.pattern.permute.xlu1 %v11660_v40 }
 0x621   : > { %7061 = vset.pattern.permute.xlu2 %v11686_v12  ;;  %7132 = vset.pattern.permute.xlu0 %v11683_v31 }
 0x622   : > { %4973 = vperm.xlu1 %7046, %v9885_v16   ;;  %3889 = vperm.xlu2 %7061, %v9908_v52   ;;  %v10106_v23 = vpop.permute.xlu1 %3821 }
 0x623   : > { %4345 = vperm.xlu0 %7132, %v10063_v13  }
 0x626   : > { %v10109_v58 = vpop.permute.xlu2 %4909 }
 0x62a   : > { %7047 = vset.pattern.permute.xlu1 %v11703_v61  ;;  %7063 = vset.pattern.permute.xlu2 %v11688_v10 }
 0x62b   : > { %7135 = vset.pattern.permute.xlu0 %v11685_v22  ;;  %5037 = vperm.xlu1 %7047, %v9885_v16  }
 0x62c   : > { %4017 = vperm.xlu2 %7063, %v9908_v52   ;;  %4537 = vperm.xlu0 %7135, %v10063_v13   ;;  %v10117_v49 = vpop.permute.xlu1 %3885 }
 0x630   : > { %v10119_v2 = vpop.permute.xlu2 %5101 }
 0x633   : > { %7055 = vset.pattern.permute.xlu1 %v11665_v48 }
 0x634   : > { %7064 = vset.pattern.permute.xlu2 %v11690_v35  ;;  %7138 = vset.pattern.permute.xlu0 %v11687_v11 }
 0x635   : > { %5549 = vperm.xlu1 %7055, %v9885_v16   ;;  %4081 = vperm.xlu2 %7064, %v9908_v52   ;;  %v10126_v62 = vpop.permute.xlu1 %4013 }
 0x636   : > { %4729 = vperm.xlu0 %7138, %v10063_v13  }
 0x639   : > { %v10129_v41 = vpop.permute.xlu2 %5165 }
 0x63a   : > { %11704 = vst [vmem:[#allocation62_spill] sm:$0xff] %v10129_v41  ;;  %v6590_v41 = vld [vmem:[%s11477_s8 + $0x128] sm:$0xff] }
 0x63d   : > { %7057 = vset.pattern.permute.xlu1 %v11678_v18  ;;  %7066 = vset.pattern.permute.xlu2 %v11691_v34  ;;  %v3727_v34 = vld [vmem:[%s11477_s8 + $0x8] sm:$0xff] }
 0x63e   : > { %7141 = vset.pattern.permute.xlu0 %v11689_v24  ;;  %5677 = vperm.xlu1 %7057, %v9885_v16   ;;  %v6562_v18 = vld [vmem:[%s11477_s8 + $0x48] sm:$0xff]  ;;  %v3781_v32 = vmul.f32 %v9772_v33, %v3727_v34 }
 0x63f   : > { %4209 = vperm.xlu2 %7066, %v9908_v52   ;;  %4921 = vperm.xlu0 %7141, %v10063_v13   ;;  %v10137_v10 = vpop.permute.xlu1 %4077  ;;  %v3844_v33 = vmul.f32 %v6562_v18, %v9673_v47 }
 0x640   : > { %v3854_v34 = vadd.f32 %v3845_v15, %v3781_v32  ;;  %v6580_v32 = vld [vmem:[%s11477_s8 + $0xd8] sm:$0xff] }
 0x642   : > { %v3918_v47 = vadd.f32 %v3909_v53, %v3854_v34 }
 0x643   : > { %v10142_v20 = vpop.permute.xlu2 %5229 }
 0x644   : > { %11705 = vst [vmem:[#allocation63_spill] sm:$0xff] %v10142_v20  ;;  %v6571_v20 = vld [vmem:[%s11477_s8 + $0x90] sm:$0xff] }
 0x646   : > { %7058 = vset.pattern.permute.xlu1 %v11672_v63  ;;  %v3780_v63 = vmul.f32 %v9661_v30, %v3726_v29  ;;  %v3908_v30 = vmul.f32 %v6571_v20, %v9658_v8  ;;  %v4037_v29 = vmul.f32 %v6590_v41, %v9805_v57  ;;  %v3972_v57 = vmul.f32 %v6580_v32, %v9635_v36  ;;  %v6607_v32 = vld [vmem:[%s11477_s8 + $0x1b0] sm:$0xff] }
 0x647   : > { %7067 = vset.pattern.permute.xlu2 %v11693_v28  ;;  %7144 = vset.pattern.permute.xlu0 %v11655_v21  ;;  %v4036_v8 = vmul.f32 %v6589_v43, %v9685_v42  ;;  %v6616_v43 = vld [vmem:[%s11477_s8 + $0x1f8] sm:$0xff] }
 0x648   : > { %5741 = vperm.xlu1 %7058, %v9885_v16   ;;  %4273 = vperm.xlu2 %7067, %v9908_v52   ;;  %v10163_v59 = vpop.permute.xlu1 %4205  ;;  %v6581_v16 = vld [vmem:[%s11477_s8 + $0xe0] sm:$0xff]  ;;  %v3853_v15 = vadd.f32 %v3844_v33, %v3780_v63 }
 0x649   : > { %5113 = vperm.xlu0 %7144, %v10063_v13   ;;  %v3973_v0 = vmul.f32 %v6581_v16, %v9784_v7  ;;  %v6599_v7 = vld [vmem:[%s11477_s8 + $0x170] sm:$0xff]  ;;  %v6598_v16 = vld [vmem:[%s11477_s8 + $0x168] sm:$0xff] }
 0x64a   : > { %v3917_v63 = vadd.f32 %v3908_v30, %v3853_v15  ;;  %v4101_v34 = vmul.f32 %v6599_v7, %v9786_v39  ;;  %v6608_v15 = vld [vmem:[%s11477_s8 + $0x1b8] sm:$0xff]  ;;  %v4228_v7 = vmul.f32 %v6616_v43, %v9697_v9 }
 0x64b   : > { %v3982_v53 = vadd.f32 %v3973_v0, %v3918_v47  ;;  %v6617_v47 = vld [vmem:[%s11477_s8 + $0x200] sm:$0xff]  ;;  %v4100_v0 = vmul.f32 %v6598_v16, %v9671_v44  ;;  %v4165_v39 = vmul.f32 %v6608_v15, %v9796_v26  ;;  %v6635_v16 = vld [vmem:[%s11477_s8 + $0x290] sm:$0xff] }
 0x64c   : > { %v10178_v18 = vpop.permute.xlu2 %5357  ;;  %v3981_v33 = vadd.f32 %v3972_v57, %v3917_v63 }
 0x64d   : > { %v4046_v41 = vadd.f32 %v4037_v29, %v3982_v53  ;;  %v4229_v29 = vmul.f32 %v6617_v47, %v9818_v50  ;;  %v6626_v50 = vld [vmem:[%s11477_s8 + $0x248] sm:$0xff]  ;;  %v4164_v53 = vmul.f32 %v6607_v32, %v9643_v56  ;;  %v6644_v56 = vld [vmem:[%s11477_s8 + $0x2d8] sm:$0xff]  ;;  %v10249_v47 = vmax.f32 %v9603_v54, 0.0  ;;  %v6643_v32 = vld [vmem:[%s11477_s8 + $0x2d0] sm:$0xff] }
 0x64e   : > { %v4045_v36 = vadd.f32 %v4036_v8, %v3981_v33 }
 0x64f   : > { %v4110_v42 = vadd.f32 %v4101_v34, %v4046_v41  ;;  %v4293_v41 = vmul.f32 %v6626_v50, %v9798_v37  ;;  %v6625_v34 = vld [vmem:[%s11477_s8 + $0x240] sm:$0xff] }
 0x650   : > { %7062 = vset.pattern.permute.xlu1 %v11677_v38  ;;  %7069 = vset.pattern.permute.xlu2 %v11692_v19  ;;  %v4109_v63 = vadd.f32 %v4100_v0, %v4045_v36  ;;  %v4292_v37 = vmul.f32 %v6625_v34, %v9682_v27  ;;  %v11706_v36 = vld [vmem:[#allocation34_spill] sm:$0xff]  ;;  %v11710_v34 = vld [vmem:[#allocation35_spill] sm:$0xff] }
 0x651   : > { %7148 = vset.pattern.permute.xlu0 %v11667_v14  ;;  %3953 = vperm.xlu1 %7062, %v9908_v52   ;;  %v4174_v44 = vadd.f32 %v4165_v39, %v4110_v42  ;;  %v4357_v42 = vmul.f32 %v6635_v16, %v11706_v36  ;;  %v11707_v0 = vld [vmem:[#allocation38_spill] sm:$0xff] }
 0x652   : > { %4401 = vperm.xlu2 %7069, %v9908_v52   ;;  %5369 = vperm.xlu0 %7148, %v10063_v13   ;;  %v10198_v20 = vpop.permute.xlu1 %4269  ;;  %v4173_v8 = vadd.f32 %v4164_v53, %v4109_v63  ;;  %v4421_v39 = vmul.f32 %v6644_v56, %v11707_v0  ;;  %v6653_v63 = vld [vmem:[%s11477_s8 + $0x320] sm:$0xff]  ;;  %v3729_v56 = vld [vmem:[%s11477_s8 + $0x18] sm:$0xff]  ;;  %v6662_v36 = vld [vmem:[%s11477_s8 + $0x368] sm:$0xff] }
 0x653   : > { %v4238_v57 = vadd.f32 %v4229_v29, %v4174_v44  ;;  %v6634_v29 = vld [vmem:[%s11477_s8 + $0x288] sm:$0xff]  ;;  %v4485_v16 = vmul.f32 %v6653_v63, %v11710_v34 }
 0x654   : > { %v4237_v15 = vadd.f32 %v4228_v7, %v4173_v8  ;;  %v11708_v44 = vld [vmem:[#allocation10_spill] sm:$0xff] }
 0x655   : > { %v4302_v9 = vadd.f32 %v4293_v41, %v4238_v57  ;;  %v4356_v50 = vmul.f32 %v6634_v29, %v11708_v44  ;;  %v11709_v53 = vld [vmem:[#allocation18_spill] sm:$0xff]  ;;  %v11712_v44 = vld [vmem:[#allocation36_spill] sm:$0xff] }
 0x656   : > { %v10212_v30 = vpop.permute.xlu2 %5485  ;;  %v4301_v54 = vadd.f32 %v4292_v37, %v4237_v15  ;;  %v4420_v7 = vmul.f32 %v6643_v32, %v11709_v53  ;;  %v6565_v8 = vld [vmem:[%s11477_s8 + $0x60] sm:$0xff]  ;;  %v6574_v15 = vld [vmem:[%s11477_s8 + $0xa8] sm:$0xff]  ;;  %v6652_v37 = vld [vmem:[%s11477_s8 + $0x318] sm:$0xff]  ;;  %v3783_v32 = vmul.f32 %v10095_v51, %v3729_v56 }
 0x657   : > { %v4366_v27 = vadd.f32 %v4357_v42, %v4302_v9  ;;  %v6671_v42 = vld [vmem:[%s11477_s8 + $0x3b0] sm:$0xff]  ;;  %v3847_v0 = vmul.f32 %v6565_v8, %v10106_v23  ;;  %v11713_v53 = vld [vmem:[#allocation41_spill] sm:$0xff]  ;;  %v6670_v51 = vld [vmem:[%s11477_s8 + $0x3a8] sm:$0xff] }
 0x658   : > { %v4365_v41 = vadd.f32 %v4356_v50, %v4301_v54  ;;  %v3911_v54 = vmul.f32 %v6574_v15, %v10117_v49  ;;  %v4549_v50 = vmul.f32 %v6662_v36, %v11712_v44  ;;  %v4613_v34 = vmul.f32 %v6671_v42, %v11713_v53  ;;  %v6661_v23 = vld [vmem:[%s11477_s8 + $0x360] sm:$0xff]  ;;  %v6680_v56 = vld [vmem:[%s11477_s8 + $0x3f8] sm:$0xff] }
 0x659   : > { %7065 = vset.pattern.permute.xlu1 %v11681_v5  ;;  %v4430_v57 = vadd.f32 %v4421_v39, %v4366_v27  ;;  %v11711_v27 = vld [vmem:[#allocation14_spill] sm:$0xff]  ;;  %v3856_v49 = vadd.f32 %v3847_v0, %v3783_v32  ;;  %v11715_v42 = vld [vmem:[#allocation21_spill] sm:$0xff] }
 0x65a   : > { %7070 = vset.pattern.permute.xlu2 %v11698_v4  ;;  %7151 = vset.pattern.permute.xlu0 %v11665_v48  ;;  %v4429_v39 = vadd.f32 %v4420_v7, %v4365_v41  ;;  %v4484_v63 = vmul.f32 %v6652_v37, %v11711_v27  ;;  %v6583_v41 = vld [vmem:[%s11477_s8 + $0xf0] sm:$0xff]  ;;  %v4612_v0 = vmul.f32 %v6670_v51, %v11715_v42  ;;  %v11716_v44 = vld [vmem:[#allocation37_spill] sm:$0xff]  ;;  %v6610_v42 = vld [vmem:[%s11477_s8 + $0x1c8] sm:$0xff] }
 0x65b   : > { %4145 = vperm.xlu1 %7065, %v9908_v52   ;;  %4465 = vperm.xlu2 %7070, %v9908_v52   ;;  %v10228_v26 = vpop.permute.xlu1 %4397  ;;  %v4494_v29 = vadd.f32 %v4485_v16, %v4430_v57  ;;  %v6592_v16 = vld [vmem:[%s11477_s8 + $0x138] sm:$0xff]  ;;  %v3920_v15 = vadd.f32 %v3911_v54, %v3856_v49  ;;  %v11714_v37 = vld [vmem:[#allocation11_spill] sm:$0xff]  ;;  %v3975_v32 = vmul.f32 %v6583_v41, %v10046_v6 }
 0x65c   : > { %5561 = vperm.xlu0 %7151, %v10063_v13   ;;  %v4493_v57 = vadd.f32 %v4484_v63, %v4429_v39  ;;  %v4548_v36 = vmul.f32 %v6661_v23, %v11714_v37  ;;  %v4039_v27 = vmul.f32 %v6592_v16, %v10126_v62  ;;  %v6679_v54 = vld [vmem:[%s11477_s8 + $0x3f0] sm:$0xff]  ;;  %v6698_v23 = vld [vmem:[%s11477_s8 + $0x488] sm:$0xff] }
 0x65d   : > { %v4558_v8 = vadd.f32 %v4549_v50, %v4494_v29  ;;  %v6601_v29 = vld [vmem:[%s11477_s8 + $0x180] sm:$0xff]  ;;  %v4677_v50 = vmul.f32 %v6680_v56, %v11716_v44  ;;  %v3984_v6 = vadd.f32 %v3975_v32, %v3920_v15  ;;  %v11718_v16 = vld [vmem:[#allocation39_spill] sm:$0xff]  ;;  %v11719_v37 = vld [vmem:[#allocation44_spill] sm:$0xff] }
 0x65e   : > { %v4557_v63 = vadd.f32 %v4548_v36, %v4493_v57  ;;  %v4103_v62 = vmul.f32 %v6601_v29, %v10137_v10  ;;  %v4805_v36 = vmul.f32 %v6698_v23, %v11719_v37  ;;  %v6619_v10 = vld [vmem:[%s11477_s8 + $0x210] sm:$0xff]  ;;  %v6688_v15 = vld [vmem:[%s11477_s8 + $0x438] sm:$0xff]  ;;  %v6706_v37 = vld [vmem:[%s11477_s8 + $0x4c8] sm:$0xff] }
 0x65f   : > { %v10237_v33 = vpop.permute.xlu2 %5613  ;;  %v4622_v39 = vadd.f32 %v4613_v34, %v4558_v8  ;;  %v6689_v34 = vld [vmem:[%s11477_s8 + $0x440] sm:$0xff]  ;;  %v4048_v57 = vadd.f32 %v4039_v27, %v3984_v6  ;;  %v11717_v8 = vld [vmem:[#allocation15_spill] sm:$0xff]  ;;  %v11721_v6 = vld [vmem:[#allocation24_spill] sm:$0xff] }
 0x660   : > { %v4621_v51 = vadd.f32 %v4612_v0, %v4557_v63  ;;  %v4676_v41 = vmul.f32 %v6679_v54, %v11717_v8  ;;  %v4741_v56 = vmul.f32 %v6689_v34, %v11718_v16  ;;  %v6697_v0 = vld [vmem:[%s11477_s8 + $0x480] sm:$0xff]  ;;  %v6628_v63 = vld [vmem:[%s11477_s8 + $0x258] sm:$0xff]  ;;  %v6707_v44 = vld [vmem:[%s11477_s8 + $0x4d0] sm:$0xff]  ;;  %v4231_v54 = vmul.f32 %v6619_v10, %v10163_v59 }
 0x661   : > { %v4686_v49 = vadd.f32 %v4677_v50, %v4622_v39  ;;  %v4112_v39 = vadd.f32 %v4103_v62, %v4048_v57  ;;  %v4167_v50 = vmul.f32 %v6610_v42, %v10060_v45  ;;  %v11720_v34 = vld [vmem:[#allocation16_spill] sm:$0xff]  ;;  %v4804_v62 = vmul.f32 %v6697_v0, %v11721_v6  ;;  %v6725_v59 = vld [vmem:[%s11477_s8 + $0x560] sm:$0xff] }
 0x662   : > { %v4685_v32 = vadd.f32 %v4676_v41, %v4621_v51  ;;  %v4740_v23 = vmul.f32 %v6688_v15, %v11720_v34  ;;  %v4295_v51 = vmul.f32 %v6628_v63, %v10198_v20  ;;  %v11722_v16 = vld [vmem:[#allocation40_spill] sm:$0xff]  ;;  %v6637_v10 = vld [vmem:[%s11477_s8 + $0x2a0] sm:$0xff]  ;;  %v6646_v15 = vld [vmem:[%s11477_s8 + $0x2e8] sm:$0xff] }
 0x663   : > { %7068 = vset.pattern.permute.xlu1 %v11683_v31  ;;  %7072 = vset.pattern.permute.xlu2 %v11694_v55  ;;  %v4750_v27 = vadd.f32 %v4741_v56, %v4686_v49  ;;  %v4176_v8 = vadd.f32 %v4167_v50, %v4112_v39  ;;  %v4869_v56 = vmul.f32 %v6707_v44, %v11722_v16  ;;  %v6716_v45 = vld [vmem:[%s11477_s8 + $0x518] sm:$0xff]  ;;  %v11725_v44 = vld [vmem:[#allocation47_spill] sm:$0xff] }
 0x664   : > { %7157 = vset.pattern.permute.xlu0 %v11686_v12  ;;  %4337 = vperm.xlu1 %7068, %v9908_v52   ;;  %v4749_v41 = vadd.f32 %v4740_v23, %v4685_v32  ;;  %v11723_v39 = vld [vmem:[#allocation20_spill] sm:$0xff]  ;;  %v4997_v50 = vmul.f32 %v6725_v59, %v11725_v44  ;;  %v11727_v59 = vld [vmem:[#allocation27_spill] sm:$0xff] }
 0x665   : > { %4593 = vperm.xlu2 %7072, %v9908_v52   ;;  %3901 = vperm.xlu0 %7157, %v10249_v47   ;;  %v10266_v43 = vpop.permute.xlu1 %4461  ;;  %v4814_v57 = vadd.f32 %v4805_v36, %v4750_v27  ;;  %v4240_v36 = vadd.f32 %v4231_v54, %v4176_v8  ;;  %v4868_v32 = vmul.f32 %v6706_v37, %v11723_v39  ;;  %v11724_v27 = vld [vmem:[#allocation42_spill] sm:$0xff]  ;;  %v6655_v54 = vld [vmem:[%s11477_s8 + $0x330] sm:$0xff]  ;;  %v6724_v6 = vld [vmem:[%s11477_s8 + $0x558] sm:$0xff] }
 0x666   : > { %v4813_v42 = vadd.f32 %v4804_v62, %v4749_v41  ;;  %v4933_v63 = vmul.f32 %v6716_v45, %v11724_v27  ;;  %v6715_v23 = vld [vmem:[%s11477_s8 + $0x510] sm:$0xff]  ;;  %v4359_v62 = vmul.f32 %v6637_v10, %v10077_v1  ;;  %v6734_v41 = vld [vmem:[%s11477_s8 + $0x5a8] sm:$0xff]  ;;  %v11726_v37 = vld [vmem:[#allocation17_spill] sm:$0xff] }
 0x667   : > { %v4878_v20 = vadd.f32 %v4869_v56, %v4814_v57  ;;  %v4304_v0 = vadd.f32 %v4295_v51, %v4240_v36  ;;  %v4423_v57 = vmul.f32 %v6646_v15, %v10228_v26  ;;  %v4487_v56 = vmul.f32 %v6655_v54, %v10266_v43  ;;  %v11728_v10 = vld [vmem:[#allocation43_spill] sm:$0xff]  ;;  %v6733_v43 = vld [vmem:[%s11477_s8 + $0x5a0] sm:$0xff] }
 0x668   : > { %v4877_v8 = vadd.f32 %v4868_v32, %v4813_v42  ;;  %v4932_v45 = vmul.f32 %v6715_v23, %v11726_v37  ;;  %v4996_v36 = vmul.f32 %v6724_v6, %v11727_v59  ;;  %v5061_v15 = vmul.f32 %v6734_v41, %v11728_v10  ;;  %v6664_v42 = vld [vmem:[%s11477_s8 + $0x378] sm:$0xff]  ;;  %v6742_v41 = vld [vmem:[%s11477_s8 + $0x5e8] sm:$0xff]  ;;  %v6691_v10 = vld [vmem:[%s11477_s8 + $0x450] sm:$0xff] }
 0x669   : > { %v10283_v9 = vpop.permute.xlu2 %3757  ;;  %v4942_v51 = vadd.f32 %v4933_v63, %v4878_v20  ;;  %v4368_v16 = vadd.f32 %v4359_v62, %v4304_v0  ;;  %v6673_v20 = vld [vmem:[%s11477_s8 + $0x3c0] sm:$0xff]  ;;  %v6743_v0 = vld [vmem:[%s11477_s8 + $0x5f0] sm:$0xff]  ;;  %v4551_v54 = vmul.f32 %v6664_v42, %v10089_v25  ;;  %v6752_v25 = vld [vmem:[%s11477_s8 + $0x638] sm:$0xff] }
 0x66a   : > { %v4941_v26 = vadd.f32 %v4932_v45, %v4877_v8  ;;  %v11729_v62 = vld [vmem:[#allocation23_spill] sm:$0xff]  ;;  %v11730_v8 = vld [vmem:[#allocation45_spill] sm:$0xff] }
 0x66b   : > { %v5006_v39 = vadd.f32 %v4997_v50, %v4942_v51  ;;  %v4432_v27 = vadd.f32 %v4423_v57, %v4368_v16  ;;  %v6682_v50 = vld [vmem:[%s11477_s8 + $0x408] sm:$0xff]  ;;  %v5060_v57 = vmul.f32 %v6733_v43, %v11729_v62  ;;  %v5125_v51 = vmul.f32 %v6743_v0, %v11730_v8  ;;  %v6761_v45 = vld [vmem:[%s11477_s8 + $0x680] sm:$0xff]  ;;  %v6751_v42 = vld [vmem:[%s11477_s8 + $0x630] sm:$0xff] }
 0x66c   : > { %7071 = vset.pattern.permute.xlu1 %v11685_v22  ;;  %v5005_v63 = vadd.f32 %v4996_v36, %v4941_v26  ;;  %v11731_v36 = vld [vmem:[#allocation13_spill] sm:$0xff]  ;;  %v11735_v62 = vld [vmem:[#allocation19_spill] sm:$0xff] }
 0x66d   : > { %7073 = vset.pattern.permute.xlu2 %v11699_v46  ;;  %7160 = vset.pattern.permute.xlu0 %v11690_v35  ;;  %v4496_v32 = vadd.f32 %v4487_v56, %v4432_v27  ;;  %v5070_v44 = vadd.f32 %v5061_v15, %v5006_v39  ;;  %v5124_v39 = vmul.f32 %v6742_v41, %v11731_v36  ;;  %v11732_v27 = vld [vmem:[#allocation48_spill] sm:$0xff]  ;;  %v6718_v36 = vld [vmem:[%s11477_s8 + $0x528] sm:$0xff] }
 0x66e   : > { %4529 = vperm.xlu1 %7071, %v9908_v52   ;;  %4657 = vperm.xlu2 %7073, %v9908_v52   ;;  %v10311_v7 = vpop.permute.xlu1 %4589  ;;  %v5069_v56 = vadd.f32 %v5060_v57, %v5005_v63  ;;  %v5189_v26 = vmul.f32 %v6752_v25, %v11732_v27  ;;  %v6700_v15 = vld [vmem:[%s11477_s8 + $0x498] sm:$0xff]  ;;  %v5188_v57 = vmul.f32 %v6751_v42, %v11735_v62  ;;  %v6779_v27 = vld [vmem:[%s11477_s8 + $0x710] sm:$0xff] }
 0x66f   : > { %4093 = vperm.xlu0 %7160, %v10249_v47   ;;  %v4615_v23 = vmul.f32 %v6673_v20, %v10311_v7  ;;  %v4560_v7 = vadd.f32 %v4551_v54, %v4496_v32  ;;  %v5134_v37 = vadd.f32 %v5125_v51, %v5070_v44  ;;  %v11733_v32 = vld [vmem:[#allocation50_spill] sm:$0xff]  ;;  %v6760_v8 = vld [vmem:[%s11477_s8 + $0x678] sm:$0xff] }
 0x670   : > { %v5133_v43 = vadd.f32 %v5124_v39, %v5069_v56  ;;  %v5253_v63 = vmul.f32 %v6761_v45, %v11733_v32  ;;  %v6709_v44 = vld [vmem:[%s11477_s8 + $0x4e0] sm:$0xff]  ;;  %v6770_v51 = vld [vmem:[%s11477_s8 + $0x6c8] sm:$0xff]  ;;  %v6788_v62 = vld [vmem:[%s11477_s8 + $0x758] sm:$0xff] }
 0x671   : > { %v4624_v59 = vadd.f32 %v4615_v23, %v4560_v7  ;;  %v5198_v0 = vadd.f32 %v5189_v26, %v5134_v37  ;;  %v11734_v23 = vmov 22   ;;  %v11736_v56 = vld [vmem:[#allocation22_spill] sm:$0xff] }
 0x672   : > { %v5252_v37 = vmul.f32 %v6760_v8, %v11736_v56  ;;  %v11737_v45 = vld [vmem:[#allocation46_spill] sm:$0xff]  ;;  %v11740_v8 = vmov 24   ;;  %v11742_v56 = vld [vmem:[#allocation29_spill] sm:$0xff] }
 0x673   : > { %v10331_v53 = vpop.permute.xlu2 %3825  ;;  %v5262_v7 = vadd.f32 %v5253_v63, %v5198_v0  ;;  %v6769_v39 = vld [vmem:[%s11477_s8 + $0x6c0] sm:$0xff] }
 0x674   : > { %v11738_v0 = vld [vmem:[#allocation26_spill] sm:$0xff]  ;;  %v11739_v63 = vld [vmem:[#allocation49_spill] sm:$0xff] }
 0x675   : > { %v5316_v32 = vmul.f32 %v6769_v39, %v11738_v0  ;;  %v6797_v39 = vld [vmem:[%s11477_s8 + $0x7a0] sm:$0xff] }
 0x676   : > { %7074 = vset.pattern.permute.xlu1 %v11687_v11  ;;  %7075 = vset.pattern.permute.xlu2 %v11654_v3  ;;  %v11744_v0 = vld [vmem:[#allocation62_spill] sm:$0xff] }
 0x677   : > { %7163 = vset.pattern.permute.xlu0 %v11693_v28  ;;  %4721 = vperm.xlu1 %7074, %v9908_v52  }
 0x678   : > { %4785 = vperm.xlu2 %7075, %v9908_v52   ;;  %4285 = vperm.xlu0 %7163, %v10249_v47   ;;  %v10364_v29 = vpop.permute.xlu1 %4653 }
 0x679   : > { %v4679_v16 = vmul.f32 %v6682_v50, %v10364_v29  ;;  %v4743_v50 = vmul.f32 %v6691_v10, %v10099_v17 }
 0x67b   : > { %v4688_v20 = vadd.f32 %v4679_v16, %v4624_v59  ;;  %v5317_v59 = vmul.f32 %v6770_v51, %v11737_v45  ;;  %v11743_v45 = vld [vmem:[#allocation51_spill] sm:$0xff] }
 0x67c   : > { %v10377_v49 = vpop.permute.xlu2 %3889 }
 0x67d   : > { %v4752_v41 = vadd.f32 %v4743_v50, %v4688_v20  ;;  %v4935_v20 = vmul.f32 %v6718_v36, %v10109_v58  ;;  %v6736_v50 = vld [vmem:[%s11477_s8 + $0x5b8] sm:$0xff]  ;;  %v11741_v58 = vmov 23   ;;  %v6754_v36 = vld [vmem:[%s11477_s8 + $0x648] sm:$0xff] }
 0x67f   : > { %7077 = vset.pattern.permute.xlu1 %v11689_v24 }
 0x680   : > { %7076 = vset.pattern.permute.xlu2 %v11702_v60  ;;  %7166 = vset.pattern.permute.xlu0 %v11698_v4 }
 0x681   : > { %4913 = vperm.xlu1 %7077, %v9908_v52   ;;  %4849 = vperm.xlu2 %7076, %v9908_v52   ;;  %v4782_v34 = vpop.permute.xlu1 %4781 }
 0x682   : > { %4477 = vperm.xlu0 %7166, %v10249_v47   ;;  %v4807_v54 = vmul.f32 %v6700_v15, %v4782_v34  ;;  %v5197_v34 = vadd.f32 %v5188_v57, %v5133_v43  ;;  %v5326_v15 = vadd.f32 %v5317_v59, %v5262_v7  ;;  %v5445_v59 = vmul.f32 %v6788_v62, %v11743_v45  ;;  %v11746_v62 = vld [vmem:[#allocation52_spill] sm:$0xff]  ;;  %v6781_v45 = vld [vmem:[%s11477_s8 + $0x720] sm:$0xff] }
 0x684   : > { %v4816_v16 = vadd.f32 %v4807_v54, %v4752_v41  ;;  %v5261_v10 = vadd.f32 %v5252_v37, %v5197_v34  ;;  %v6778_v54 = vld [vmem:[%s11477_s8 + $0x708] sm:$0xff] }
 0x685   : > { %v5380_v37 = vmul.f32 %v6778_v54, %v11742_v56 }
 0x686   : > { %v10421_v1 = vpop.permute.xlu2 %4017  ;;  %v5325_v51 = vadd.f32 %v5316_v32, %v5261_v10  ;;  %v5191_v32 = vmul.f32 %v6754_v36, %v11744_v0  ;;  %v6805_v36 = vld [vmem:[%s11477_s8 + $0x7e0] sm:$0xff] }
 0x688   : > { %v5389_v10 = vadd.f32 %v5380_v37, %v5325_v51  ;;  %v6772_v51 = vld [vmem:[%s11477_s8 + $0x6d8] sm:$0xff] }
 0x689   : > { %7080 = vset.pattern.permute.xlu1 %v11655_v21  ;;  %7078 = vset.pattern.permute.xlu2 %v11660_v40 }
 0x68a   : > { %7169 = vset.pattern.permute.xlu0 %v11699_v46  ;;  %5105 = vperm.xlu1 %7080, %v9908_v52   ;;  %v4846_v6 = vpop.permute.xlu1 %4845 }
 0x68b   : > { %4977 = vperm.xlu2 %7078, %v9908_v52   ;;  %4669 = vperm.xlu0 %7169, %v10249_v47   ;;  %v4871_v25 = vmul.f32 %v6709_v44, %v4846_v6  ;;  %v6727_v6 = vld [vmem:[%s11477_s8 + $0x570] sm:$0xff]  ;;  %v5381_v44 = vmul.f32 %v6779_v27, %v11739_v63 }
 0x68d   : > { %v4880_v26 = vadd.f32 %v4871_v25, %v4816_v16  ;;  %v5390_v41 = vadd.f32 %v5381_v44, %v5326_v15  ;;  %v5294_v25 = vpop.permute.xlu0 %5293  ;;  %v6796_v15 = vld [vmem:[%s11477_s8 + $0x798] sm:$0xff] }
 0x68f   : > { %v10467_v29 = vpop.permute.xlu2 %4081  ;;  %v4944_v57 = vadd.f32 %v4935_v20, %v4880_v26  ;;  %v5454_v20 = vadd.f32 %v5445_v59, %v5390_v41  ;;  %v11747_v41 = vld [vmem:[#allocation32_spill] sm:$0xff]  ;;  %v11749_v59 = vmov 26  }
 0x692   : > { %7081 = vset.pattern.permute.xlu1 %v11734_v23 }
 0x693   : > { %7079 = vset.pattern.permute.xlu2 %v11703_v61  ;;  %7172 = vset.pattern.permute.xlu0 %v11702_v60 }
 0x694   : > { %5169 = vperm.xlu1 %7081, %v9908_v52   ;;  %5041 = vperm.xlu2 %7079, %v9908_v52   ;;  %v4974_v17 = vpop.permute.xlu1 %4973 }
 0x695   : > { %4861 = vperm.xlu0 %7172, %v10249_v47   ;;  %v4999_v43 = vmul.f32 %v6727_v6, %v4974_v17  ;;  %v6745_v17 = vld [vmem:[%s11477_s8 + $0x600] sm:$0xff]  ;;  %v6787_v6 = vld [vmem:[%s11477_s8 + $0x750] sm:$0xff] }
 0x696   : > { %v5127_v27 = vmul.f32 %v6745_v17, %v10119_v2  ;;  %v5509_v2 = vmul.f32 %v6797_v39, %v11746_v62  ;;  %v5508_v17 = vmul.f32 %v6796_v15, %v11747_v41  ;;  %v11750_v39 = vld [vmem:[#allocation53_spill] sm:$0xff] }
 0x697   : > { %v5008_v7 = vadd.f32 %v4999_v43, %v4944_v57  ;;  %v6763_v43 = vld [vmem:[%s11477_s8 + $0x690] sm:$0xff]  ;;  %v6806_v57 = vld [vmem:[%s11477_s8 + $0x7e8] sm:$0xff]  ;;  %v11752_v62 = vld [vmem:[#allocation33_spill] sm:$0xff] }
 0x698   : > { %v5518_v37 = vadd.f32 %v5509_v2, %v5454_v20  ;;  %v6790_v20 = vld [vmem:[%s11477_s8 + $0x768] sm:$0xff] }
 0x699   : > { %v10504_v42 = vpop.permute.xlu2 %4209 }
 0x69c   : > { %7083 = vset.pattern.permute.xlu1 %v11740_v8  ;;  %7082 = vset.pattern.permute.xlu2 %v11741_v58 }
 0x69d   : > { %7175 = vset.pattern.permute.xlu0 %v11703_v61  ;;  %5297 = vperm.xlu1 %7083, %v9908_v52   ;;  %v5038_v34 = vpop.permute.xlu1 %5037 }
 0x69e   : > { %5233 = vperm.xlu2 %7082, %v9908_v52   ;;  %5053 = vperm.xlu0 %7175, %v10249_v47   ;;  %v5063_v16 = vmul.f32 %v6736_v50, %v5038_v34  ;;  %v11745_v50 = vld [vmem:[#allocation25_spill] sm:$0xff]  ;;  %v11748_v34 = vld [vmem:[#allocation63_spill] sm:$0xff] }
 0x69f   : > { %v5444_v54 = vmul.f32 %v6787_v6, %v11745_v50  ;;  %v6814_v6 = vld [vmem:[%s11477_s8 + $0x828] sm:$0xff]  ;;  %v11751_v50 = vld [vmem:[#allocation28_spill] sm:$0xff] }
 0x6a0   : > { %v5072_v26 = vadd.f32 %v5063_v16, %v5008_v7  ;;  %v5255_v7 = vmul.f32 %v6763_v43, %v11748_v34  ;;  %v5422_v43 = vpop.permute.xlu0 %5421  ;;  %v5636_v2 = vmul.f32 %v6814_v6, %v11752_v62  ;;  %v6824_v34 = vld [vmem:[%s11477_s8 + $0x878] sm:$0xff]  ;;  %v6823_v6 = vld [vmem:[%s11477_s8 + $0x870] sm:$0xff]  ;;  %v11758_v62 = vld [vmem:[#allocation30_spill] sm:$0xff] }
 0x6a1   : > { %v5453_v56 = vadd.f32 %v5444_v54, %v5389_v10  ;;  %v6815_v10 = vld [vmem:[%s11477_s8 + $0x830] sm:$0xff]  ;;  %v5572_v54 = vmul.f32 %v6805_v36, %v11751_v50 }
 0x6a2   : > { %v5136_v63 = vadd.f32 %v5127_v27, %v5072_v26  ;;  %v10546_v44 = vpop.permute.xlu2 %4273  ;;  %v5573_v27 = vmul.f32 %v6806_v57, %v11750_v39  ;;  %v5319_v26 = vmul.f32 %v6772_v51, %v5294_v25  ;;  %v11753_v51 = vld [vmem:[#allocation55_spill] sm:$0xff]  ;;  %v11754_v39 = vld [vmem:[#allocation56_spill] sm:$0xff] }
 0x6a3   : > { %v5517_v25 = vadd.f32 %v5508_v17, %v5453_v56  ;;  %v5637_v41 = vmul.f32 %v6815_v10, %v11753_v51  ;;  %v6799_v17 = vld [vmem:[%s11477_s8 + $0x7b0] sm:$0xff]  ;;  %v6816_v56 = vld [vmem:[%s11477_s8 + $0x838] sm:$0xff]  ;;  %v5700_v51 = vmul.f32 %v6823_v6, %v11758_v62 }
 0x6a4   : > { %v5200_v16 = vadd.f32 %v5191_v32, %v5136_v63  ;;  %v5383_v32 = vmul.f32 %v6781_v45, %v10178_v18  ;;  %v5582_v57 = vadd.f32 %v5573_v27, %v5518_v37  ;;  %v6825_v37 = vld [vmem:[%s11477_s8 + $0x880] sm:$0xff]  ;;  %v5701_v27 = vmul.f32 %v6824_v34, %v11754_v39  ;;  %v11761_v39 = vld [vmem:[#allocation31_spill] sm:$0xff] }
 0x6a5   : > { %7085 = vset.pattern.permute.xlu1 %v11749_v59 }
 0x6a6   : > { %v5264_v15 = vadd.f32 %v5255_v7, %v5200_v16  ;;  %7084 = vset.pattern.permute.xlu2 %v11667_v14  ;;  %7178 = vset.pattern.permute.xlu0 %v11741_v58  ;;  %v5447_v7 = vmul.f32 %v6790_v20, %v5422_v43  ;;  %v5581_v16 = vadd.f32 %v5572_v54, %v5517_v25  ;;  %v6808_v20 = vld [vmem:[%s11477_s8 + $0x7f8] sm:$0xff]  ;;  %v11755_v43 = vld [vmem:[#allocation58_spill] sm:$0xff]  ;;  %v11757_v54 = vmov 27  }
 0x6a7   : > { %5425 = vperm.xlu1 %7085, %v9908_v52   ;;  %5361 = vperm.xlu2 %7084, %v9908_v52   ;;  %v5550_v0 = vpop.permute.xlu1 %5549  ;;  %v5646_v10 = vadd.f32 %v5637_v41, %v5582_v57  ;;  %v5638_v25 = vmul.f32 %v6816_v56, %v11755_v43  ;;  %v11759_v41 = vld [vmem:[#allocation60_spill] sm:$0xff] }
 0x6a8   : > { %5245 = vperm.xlu0 %7178, %v10249_v47   ;;  %v5328_v63 = vadd.f32 %v5319_v26, %v5264_v15  ;;  %v5511_v26 = vmul.f32 %v6799_v17, %v10212_v30  ;;  %v5645_v15 = vadd.f32 %v5636_v2, %v5581_v16  ;;  %v6833_v30 = vld [vmem:[%s11477_s8 + $0x8c0] sm:$0xff]  ;;  %v6832_v17 = vld [vmem:[%s11477_s8 + $0x8b8] sm:$0xff] }
 0x6a9   : > { %v5710_v57 = vadd.f32 %v5701_v27, %v5646_v10  ;;  %v5647_v34 = vadd.f32 %v5638_v25, %v11759_v41  ;;  %v6817_v16 = vld [vmem:[%s11477_s8 + $0x840] sm:$0xff]  ;;  %v5764_v27 = vmul.f32 %v6832_v17, %v11761_v39  ;;  %v11762_v10 = vld [vmem:[#allocation59_spill] sm:$0xff] }
 0x6aa   : > { %v5392_v18 = vadd.f32 %v5383_v32, %v5328_v63  ;;  %v11756_v32 = vld [vmem:[#allocation61_spill] sm:$0xff]  ;;  %v5709_v56 = vadd.f32 %v5700_v51, %v5645_v15  ;;  %v5639_v43 = vmul.f32 %v6817_v16, %v10237_v33 }
 0x6ab   : > { %v5702_v63 = vmul.f32 %v6825_v37, %v11756_v32  ;;  %v11760_v37 = vld [vmem:[#allocation54_spill] sm:$0xff] }
 0x6ac   : > { %v5456_v45 = vadd.f32 %v5447_v7, %v5392_v18  ;;  %v10596_v36 = vpop.permute.xlu2 %4401  ;;  %v5575_v7 = vmul.f32 %v6808_v20, %v5550_v0  ;;  %v6834_v18 = vld [vmem:[%s11477_s8 + $0x8c8] sm:$0xff]  ;;  %v5773_v62 = vadd.f32 %v5764_v27, %v5709_v56 }
 0x6ad   : > { %v5711_v0 = vadd.f32 %v5702_v63, %v5647_v34  ;;  %v5766_v20 = vmul.f32 %v6834_v18, %v11762_v10  ;;  %v6826_v32 = vld [vmem:[%s11477_s8 + $0x888] sm:$0xff]  ;;  %v6835_v63 = vld [vmem:[%s11477_s8 + $0x8d0] sm:$0xff]  ;;  %v11765_v34 = vmov 1  }
 0x6ae   : > { %v5520_v50 = vadd.f32 %v5511_v26, %v5456_v45  ;;  %v5765_v45 = vmul.f32 %v6833_v30, %v11760_v37  ;;  %v5782_v18 = vsel %vm748_vm1, %v5773_v62, 0.0  ;;  %v6575_v62 = vld [vmem:[%s11477_s8 + $0xb0] sm:$0xff] }
 0x6af   : > { %7087 = vset.pattern.permute.xlu1 %v11665_v48  ;;  %7086 = vset.pattern.permute.xlu2 %v11757_v54  ;;  %v5775_v41 = vadd.f32 %v5766_v20, %v5711_v0 }
 0x6b0   : > { %7183 = vset.pattern.permute.xlu0 %v11665_v48  ;;  %5553 = vperm.xlu1 %7087, %v9908_v52   ;;  %v5678_v2 = vpop.permute.xlu1 %5677  ;;  %v5584_v6 = vadd.f32 %v5575_v7, %v5520_v50  ;;  %v5774_v26 = vadd.f32 %v5765_v45, %v5710_v57  ;;  %v11763_v50 = vld [vmem:[#allocation12_spill] sm:$0xff]  ;;  %v11764_v57 = vmov 30   ;;  %v11766_v7 = vld [vmem:[#allocation57_spill] sm:$0xff] }
 0x6b1   : > { %5489 = vperm.xlu2 %7086, %v9908_v52   ;;  %5565 = vperm.xlu0 %7183, %v10249_v47   ;;  %v10642_v51 = vmax.f32 %v11763_v50, 0.0  ;;  %v5703_v30 = vmul.f32 %v6826_v32, %v5678_v2  ;;  %v5785_v16 = vsel %vm748_vm1, %v5775_v41, 0.0  ;;  %v3730_v32 = vld [vmem:[%s11477_s8 + $0x20] sm:$0xff]  ;;  %v11769_v41 = vmov 7   ;;  %v6584_v50 = vld [vmem:[%s11477_s8 + $0xf8] sm:$0xff] }
 0x6b2   : > { %v5648_v15 = vadd.f32 %v5639_v43, %v5584_v6  ;;  %v5783_v33 = vsel %vm748_vm1, %v5774_v26, 0.0  ;;  %v11768_v26 = vmov 4   ;;  %v6566_v43 = vld [vmem:[%s11477_s8 + $0x68] sm:$0xff] }
 0x6b3   : > { %v5784_v45 = vadd.f32 %v5783_v33, %v5782_v18  ;;  %v3784_v33 = vmul.f32 %v10283_v9, %v3730_v32 }
 0x6b4   : > { %v5712_v56 = vadd.f32 %v5703_v30, %v5648_v15  ;;  %v3848_v15 = vmul.f32 %v6566_v43, %v10331_v53  ;;  %v3912_v30 = vmul.f32 %v6575_v62, %v10377_v49 }
 0x6b5   : > { %v10632_v25 = vpop.permute.xlu2 %4465  ;;  %v5786_v2 = vadd.f32 %v5785_v16, %v5784_v45  ;;  %v6602_v45 = vld [vmem:[%s11477_s8 + $0x188] sm:$0xff] }
 0x6b8   : > { %7093 = vset.pattern.permute.xlu1 %v11686_v12 }
 0x6b9   : > { %7089 = vset.pattern.permute.xlu2 %v11764_v57  ;;  %7187 = vset.pattern.permute.xlu0 %v11765_v34 }
 0x6ba   : > { %5681 = vperm.xlu2 %7089, %v9908_v52   ;;  %3893 = vperm.xlu1 %7093, %v11766_v7   ;;  %v5742_v17 = vpop.permute.xlu1 %5741  ;;  %v11767_v52 = vmov 0  }
 0x6bb   : > { %3841 = vperm.xlu0 %7187, %v10642_v51   ;;  %v5767_v37 = vmul.f32 %v6835_v63, %v5742_v17  ;;  %v3857_v17 = vadd.f32 %v3848_v15, %v3784_v33 }
 0x6bd   : > { %v5776_v0 = vadd.f32 %v5767_v37, %v5712_v56  ;;  %v3921_v53 = vadd.f32 %v3912_v30, %v3857_v17  ;;  %v6593_v56 = vld [vmem:[%s11477_s8 + $0x140] sm:$0xff] }
 0x6be   : > { %v4040_v49 = vmul.f32 %v6593_v56, %v10421_v1  ;;  %v6620_v1 = vld [vmem:[%s11477_s8 + $0x218] sm:$0xff] }
 0x6bf   : > { %v5787_v6 = vsel %vm748_vm1, %v5776_v0, 0.0  ;;  %v10653_v39 = vpop.permute.xlu2 %4593  ;;  %v6611_v0 = vld [vmem:[%s11477_s8 + $0x1d0] sm:$0xff]  ;;  %v4232_v15 = vmul.f32 %v6620_v1, %v10504_v42 }
 0x6c0   : > { %v10655_v27 = vadd.f32 %v5787_v6, %v5786_v2  ;;  %v4104_v6 = vmul.f32 %v6602_v45, %v10467_v29  ;;  %v6647_v42 = vld [vmem:[%s11477_s8 + $0x2f0] sm:$0xff] }
 0x6c2   : > { %7091 = vset.pattern.permute.xlu2 %v11767_v52  ;;  %7096 = vset.pattern.permute.xlu1 %v11690_v35 }
 0x6c3   : > { %7190 = vset.pattern.permute.xlu0 %v11768_v26  ;;  %4085 = vperm.xlu1 %7096, %v11766_v7   ;;  %v3954_v10 = vpop.permute.xlu1 %3953 }
 0x6c4   : > { %3762 = vperm.xlu2 %7091, %v11766_v7   ;;  %4033 = vperm.xlu0 %7190, %v10642_v51   ;;  %v3976_v18 = vmul.f32 %v6584_v50, %v3954_v10  ;;  %v6638_v50 = vld [vmem:[%s11477_s8 + $0x2a8] sm:$0xff] }
 0x6c6   : > { %v3985_v37 = vadd.f32 %v3976_v18, %v3921_v53 }
 0x6c8   : > { %v10663_v20 = vpop.permute.xlu2 %4657  ;;  %v4049_v2 = vadd.f32 %v4040_v49, %v3985_v37  ;;  %v6665_v49 = vld [vmem:[%s11477_s8 + $0x380] sm:$0xff] }
 0x6ca   : > { %v4113_v32 = vadd.f32 %v4104_v6, %v4049_v2 }
 0x6cb   : > { %7099 = vset.pattern.permute.xlu1 %v11693_v28 }
 0x6cc   : > { %7094 = vset.pattern.permute.xlu2 %v11677_v38  ;;  %7193 = vset.pattern.permute.xlu0 %v11769_v41 }
 0x6cd   : > { %4277 = vperm.xlu1 %7099, %v11766_v7   ;;  %3957 = vperm.xlu2 %7094, %v11766_v7   ;;  %v4146_v63 = vpop.permute.xlu1 %4145 }
 0x6ce   : > { %4225 = vperm.xlu0 %7193, %v10642_v51   ;;  %v4168_v10 = vmul.f32 %v6611_v0, %v4146_v63  ;;  %v6629_v63 = vld [vmem:[%s11477_s8 + $0x260] sm:$0xff] }
 0x6cf   : > { %v4296_v30 = vmul.f32 %v6629_v63, %v10546_v44  ;;  %v4424_v44 = vmul.f32 %v6647_v42, %v10596_v36  ;;  %v6674_v36 = vld [vmem:[%s11477_s8 + $0x3c8] sm:$0xff] }
 0x6d0   : > { %v4177_v62 = vadd.f32 %v4168_v10, %v4113_v32  ;;  %v6710_v42 = vld [vmem:[%s11477_s8 + $0x4e8] sm:$0xff] }
 0x6d2   : > { %v10686_v16 = vpop.permute.xlu2 %4785  ;;  %v4241_v33 = vadd.f32 %v4232_v15, %v4177_v62  ;;  %v6683_v62 = vld [vmem:[%s11477_s8 + $0x410] sm:$0xff] }
 0x6d4   : > { %v4305_v53 = vadd.f32 %v4296_v30, %v4241_v33 }
 0x6d5   : > { %7102 = vset.pattern.permute.xlu1 %v11698_v4  ;;  %7097 = vset.pattern.permute.xlu2 %v11681_v5 }
 0x6d6   : > { %7196 = vset.pattern.permute.xlu0 %v11692_v19  ;;  %4469 = vperm.xlu1 %7102, %v11766_v7   ;;  %v4338_v9 = vpop.permute.xlu1 %4337 }
 0x6d7   : > { %4149 = vperm.xlu2 %7097, %v11766_v7   ;;  %4417 = vperm.xlu0 %7196, %v10642_v51   ;;  %v4360_v17 = vmul.f32 %v6638_v50, %v4338_v9  ;;  %v6656_v9 = vld [vmem:[%s11477_s8 + $0x338] sm:$0xff]  ;;  %v4680_v50 = vmul.f32 %v6683_v62, %v10663_v20 }
 0x6d8   : > { %v4488_v2 = vmul.f32 %v6656_v9, %v10632_v25  ;;  %v4616_v25 = vmul.f32 %v6674_v36, %v10653_v39  ;;  %v6701_v39 = vld [vmem:[%s11477_s8 + $0x4a0] sm:$0xff] }
 0x6d9   : > { %v4369_v56 = vadd.f32 %v4360_v17, %v4305_v53  ;;  %v4808_v20 = vmul.f32 %v6701_v39, %v10686_v16  ;;  %v6728_v16 = vld [vmem:[%s11477_s8 + $0x578] sm:$0xff] }
 0x6db   : > { %v10705_v43 = vpop.permute.xlu2 %4849  ;;  %v4433_v45 = vadd.f32 %v4424_v44, %v4369_v56  ;;  %v6719_v56 = vld [vmem:[%s11477_s8 + $0x530] sm:$0xff] }
 0x6dc   : > { %v4872_v9 = vmul.f32 %v6710_v42, %v10705_v43  ;;  %v5618_v43 = vpop.permute.xlu0 %5617 }
 0x6dd   : > { %v4497_v10 = vadd.f32 %v4488_v2, %v4433_v45  ;;  %v11770_v2 = vmov 29  }
 0x6de   : > { %7105 = vset.pattern.permute.xlu1 %v11699_v46 }
 0x6df   : > { %7100 = vset.pattern.permute.xlu2 %v11683_v31  ;;  %7199 = vset.pattern.permute.xlu0 %v11694_v55 }
 0x6e0   : > { %4661 = vperm.xlu1 %7105, %v11766_v7   ;;  %4341 = vperm.xlu2 %7100, %v11766_v7   ;;  %v4530_v29 = vpop.permute.xlu1 %4529 }
 0x6e1   : > { %4609 = vperm.xlu0 %7199, %v10642_v51   ;;  %v4552_v6 = vmul.f32 %v6665_v49, %v4530_v29  ;;  %v6692_v29 = vld [vmem:[%s11477_s8 + $0x458] sm:$0xff] }
 0x6e3   : > { %v4561_v32 = vadd.f32 %v4552_v6, %v4497_v10 }
 0x6e5   : > { %v10724_v18 = vpop.permute.xlu2 %4977  ;;  %v4625_v15 = vadd.f32 %v4616_v25, %v4561_v32  ;;  %v6737_v32 = vld [vmem:[%s11477_s8 + $0x5c0] sm:$0xff] }
 0x6e6   : > { %v5000_v36 = vmul.f32 %v6728_v16, %v10724_v18  ;;  %v6791_v16 = vld [vmem:[%s11477_s8 + $0x770] sm:$0xff] }
 0x6e7   : > { %v4689_v30 = vadd.f32 %v4680_v50, %v4625_v15 }
 0x6e8   : > { %7108 = vset.pattern.permute.xlu1 %v11702_v60  ;;  %7103 = vset.pattern.permute.xlu2 %v11685_v22 }
 0x6e9   : > { %7202 = vset.pattern.permute.xlu0 %v11654_v3  ;;  %4853 = vperm.xlu1 %7108, %v11766_v7   ;;  %v4722_v37 = vpop.permute.xlu1 %4721 }
 0x6ea   : > { %4533 = vperm.xlu2 %7103, %v11766_v7   ;;  %4801 = vperm.xlu0 %7202, %v10642_v51   ;;  %v4744_v33 = vmul.f32 %v6692_v29, %v4722_v37  ;;  %v6755_v29 = vld [vmem:[%s11477_s8 + $0x650] sm:$0xff] }
 0x6ec   : > { %v4753_v53 = vadd.f32 %v4744_v33, %v4689_v30  ;;  %v11771_v30 = vmov 31  }
 0x6ee   : > { %v5042_v0 = vpop.permute.xlu2 %5041  ;;  %v4817_v37 = vadd.f32 %v4808_v20, %v4753_v53  ;;  %v5746_v20 = vpop.permute.xlu0 %5745 }
 0x6ef   : > { %v5064_v15 = vmul.f32 %v6737_v32, %v5042_v0  ;;  %v6764_v0 = vld [vmem:[%s11477_s8 + $0x698] sm:$0xff]  ;;  %v6567_v32 = vld [vmem:[%s11477_s8 + $0x70] sm:$0xff] }
 0x6f0   : > { %v4881_v45 = vadd.f32 %v4872_v9, %v4817_v37 }
 0x6f1   : > { %7111 = vset.pattern.permute.xlu1 %v11703_v61 }
 0x6f2   : > { %7106 = vset.pattern.permute.xlu2 %v11687_v11  ;;  %7205 = vset.pattern.permute.xlu0 %v11660_v40 }
 0x6f3   : > { %5045 = vperm.xlu1 %7111, %v11766_v7   ;;  %4725 = vperm.xlu2 %7106, %v11766_v7   ;;  %v4914_v1 = vpop.permute.xlu1 %4913 }
 0x6f4   : > { %4993 = vperm.xlu0 %7205, %v10642_v51   ;;  %v4936_v49 = vmul.f32 %v6719_v56, %v4914_v1  ;;  %v6746_v1 = vld [vmem:[%s11477_s8 + $0x608] sm:$0xff] }
 0x6f6   : > { %v4945_v10 = vadd.f32 %v4936_v49, %v4881_v45  ;;  %v6782_v45 = vld [vmem:[%s11477_s8 + $0x728] sm:$0xff] }
 0x6f8   : > { %v5234_v63 = vpop.permute.xlu2 %5233  ;;  %v5009_v25 = vadd.f32 %v5000_v36, %v4945_v10 }
 0x6f9   : > { %v5256_v37 = vmul.f32 %v6764_v0, %v5234_v63 }
 0x6fa   : > { %v5073_v18 = vadd.f32 %v5064_v15, %v5009_v25  ;;  %v3731_v25 = vld [vmem:[%s11477_s8 + $0x28] sm:$0xff]  ;;  %v6800_v15 = vld [vmem:[%s11477_s8 + $0x7b8] sm:$0xff] }
 0x6fb   : > { %7113 = vset.pattern.permute.xlu1 %v11734_v23  ;;  %7109 = vset.pattern.permute.xlu2 %v11689_v24 }
 0x6fc   : > { %7207 = vset.pattern.permute.xlu0 %v11655_v21  ;;  %5173 = vperm.xlu1 %7113, %v11766_v7   ;;  %v5106_v17 = vpop.permute.xlu1 %5105 }
 0x6fd   : > { %4917 = vperm.xlu2 %7109, %v11766_v7   ;;  %5121 = vperm.xlu0 %7207, %v10642_v51   ;;  %v5128_v50 = vmul.f32 %v6746_v1, %v5106_v17  ;;  %v6773_v17 = vld [vmem:[%s11477_s8 + $0x6e0] sm:$0xff]  ;;  %v3830_v1 = vpop.permute.xlu0 %3829 }
 0x6ff   : > { %v5137_v53 = vadd.f32 %v5128_v50, %v5073_v18  ;;  %v3849_v18 = vmul.f32 %v6567_v32, %v3830_v1 }
 0x701   : > { %v5362_v44 = vpop.permute.xlu2 %5361 }
 0x702   : > { %v5384_v10 = vmul.f32 %v6782_v45, %v5362_v44  ;;  %v6809_v44 = vld [vmem:[%s11477_s8 + $0x800] sm:$0xff] }
 0x704   : > { %7115 = vset.pattern.permute.xlu1 %v11740_v8 }
 0x705   : > { %7112 = vset.pattern.permute.xlu2 %v11655_v21  ;;  %7215 = vset.pattern.permute.xlu0 %v11770_v2  ;;  %v4022_v1 = vpop.permute.xlu0 %4021 }
 0x706   : > { %5301 = vperm.xlu1 %7115, %v11766_v7   ;;  %5109 = vperm.xlu2 %7112, %v11766_v7   ;;  %v5170_v6 = vpop.permute.xlu1 %5169 }
 0x707   : > { %5633 = vperm.xlu0 %7215, %v10642_v51   ;;  %v5192_v33 = vmul.f32 %v6755_v29, %v5170_v6 }
 0x709   : > { %v5201_v42 = vadd.f32 %v5192_v33, %v5137_v53 }
 0x70b   : > { %v5490_v62 = vpop.permute.xlu2 %5489  ;;  %v5265_v49 = vadd.f32 %v5256_v37, %v5201_v42 }
 0x70c   : > { %v5512_v53 = vmul.f32 %v6800_v15, %v5490_v62 }
 0x70e   : > { %7117 = vset.pattern.permute.xlu1 %v11749_v59  ;;  %7114 = vset.pattern.permute.xlu2 %v11741_v58 }
 0x70f   : > { %7218 = vset.pattern.permute.xlu0 %v11771_v30  ;;  %5429 = vperm.xlu1 %7117, %v11766_v7   ;;  %v5298_v39 = vpop.permute.xlu1 %5297 }
 0x710   : > { %5237 = vperm.xlu2 %7114, %v11766_v7   ;;  %5761 = vperm.xlu0 %7218, %v10642_v51   ;;  %v5320_v9 = vmul.f32 %v6773_v17, %v5298_v39  ;;  %v6818_v17 = vld [vmem:[%s11477_s8 + $0x848] sm:$0xff] }
 0x711   : > { %v5640_v45 = vmul.f32 %v6818_v17, %v5618_v43  ;;  %v6576_v43 = vld [vmem:[%s11477_s8 + $0xb8] sm:$0xff] }
 0x712   : > { %v5329_v6 = vadd.f32 %v5320_v9, %v5265_v49  ;;  %v6827_v49 = vld [vmem:[%s11477_s8 + $0x890] sm:$0xff] }
 0x714   : > { %v5682_v56 = vpop.permute.xlu2 %5681  ;;  %v5393_v29 = vadd.f32 %v5384_v10, %v5329_v6 }
 0x715   : > { %v5704_v6 = vmul.f32 %v6827_v49, %v5682_v56  ;;  %v6585_v56 = vld [vmem:[%s11477_s8 + $0x100] sm:$0xff] }
 0x717   : > { %7120 = vset.pattern.permute.xlu1 %v11770_v2 }
 0x718   : > { %7116 = vset.pattern.permute.xlu2 %v11667_v14  ;;  %5621 = vperm.xlu1 %7120, %v11766_v7  }
 0x719   : > { %5365 = vperm.xlu2 %7116, %v11766_v7   ;;  %v5426_v63 = vpop.permute.xlu1 %5425 }
 0x71a   : > { %v5448_v36 = vmul.f32 %v6791_v16, %v5426_v63  ;;  %v6836_v16 = vld [vmem:[%s11477_s8 + $0x8d8] sm:$0xff] }
 0x71c   : > { %v5457_v33 = vadd.f32 %v5448_v36, %v5393_v29  ;;  %v5768_v36 = vmul.f32 %v6836_v16, %v5746_v20 }
 0x71e   : > { %v3763_v50 = vpop.permute.xlu2 %3762  ;;  %v5521_v37 = vadd.f32 %v5512_v53, %v5457_v33 }
 0x71f   : > { %v3785_v39 = vmul.f32 %v3763_v50, %v3731_v25  ;;  %v6594_v50 = vld [vmem:[%s11477_s8 + $0x148] sm:$0xff] }
 0x720   : > { %7124 = vset.pattern.permute.xlu1 %v11765_v34 }
 0x721   : > { %7119 = vset.pattern.permute.xlu2 %v11665_v48  ;;  %v3858_v0 = vadd.f32 %v3849_v18, %v3785_v39  ;;  %3833 = vperm.xlu1 %7124, %v10063_v13  }
 0x722   : > { %5557 = vperm.xlu2 %7119, %v11766_v7   ;;  %v5554_v42 = vpop.permute.xlu1 %5553 }
 0x723   : > { %v5576_v9 = vmul.f32 %v6809_v44, %v5554_v42  ;;  %v4041_v44 = vmul.f32 %v6594_v50, %v4022_v1  ;;  %v6603_v42 = vld [vmem:[%s11477_s8 + $0x190] sm:$0xff] }
 0x725   : > { %v5585_v62 = vadd.f32 %v5576_v9, %v5521_v37 }
 0x727   : > { %v5649_v63 = vadd.f32 %v5640_v45, %v5585_v62  ;;  %v3958_v10 = vpop.permute.xlu2 %3957  ;;  %v6621_v45 = vld [vmem:[%s11477_s8 + $0x220] sm:$0xff] }
 0x728   : > { %v3977_v33 = vmul.f32 %v6585_v56, %v3958_v10  ;;  %v6648_v56 = vld [vmem:[%s11477_s8 + $0x2f8] sm:$0xff] }
 0x729   : > { %v5713_v32 = vadd.f32 %v5704_v6, %v5649_v63  ;;  %7127 = vset.pattern.permute.xlu1 %v11768_v26 }
 0x72a   : > { %7121 = vset.pattern.permute.xlu2 %v11764_v57  ;;  %4025 = vperm.xlu1 %7127, %v10063_v13  }
 0x72b   : > { %v5777_v25 = vadd.f32 %v5768_v36, %v5713_v32  ;;  %5685 = vperm.xlu2 %7121, %v11766_v7   ;;  %v6630_v36 = vld [vmem:[%s11477_s8 + $0x268] sm:$0xff] }
 0x72c   : > { %v3894_v20 = vpop.permute.xlu1 %3893 }
 0x72d   : > { %v3913_v29 = vmul.f32 %v6576_v43, %v3894_v20  ;;  %v5789_v15 = vsel %vm748_vm1, %v5777_v25, 0.0  ;;  %v6639_v43 = vld [vmem:[%s11477_s8 + $0x2b0] sm:$0xff] }
 0x72e   : > { %v10858_v18 = vadd.f32 %v5789_v15, %v10655_v27  ;;  %v4214_v27 = vpop.permute.xlu0 %4213 }
 0x72f   : > { %v3922_v39 = vadd.f32 %v3913_v29, %v3858_v0  ;;  %v6612_v0 = vld [vmem:[%s11477_s8 + $0x1d8] sm:$0xff]  ;;  %v4233_v6 = vmul.f32 %v6621_v45, %v4214_v27  ;;  %v6675_v27 = vld [vmem:[%s11477_s8 + $0x3d0] sm:$0xff] }
 0x731   : > { %v3986_v53 = vadd.f32 %v3977_v33, %v3922_v39  ;;  %v4150_v17 = vpop.permute.xlu2 %4149  ;;  %v6657_v39 = vld [vmem:[%s11477_s8 + $0x340] sm:$0xff] }
 0x732   : > { %7130 = vset.pattern.permute.xlu1 %v11769_v41  ;;  %v4169_v62 = vmul.f32 %v6612_v0, %v4150_v17 }
 0x733   : > { %7122 = vset.pattern.permute.xlu2 %v11771_v30  ;;  %4217 = vperm.xlu1 %7130, %v10063_v13   ;;  %v4050_v37 = vadd.f32 %v4041_v44, %v3986_v53  ;;  %v6666_v53 = vld [vmem:[%s11477_s8 + $0x388] sm:$0xff] }
 0x734   : > { %5749 = vperm.xlu2 %7122, %v11766_v7  }
 0x735   : > { %v4086_v9 = vpop.permute.xlu1 %4085 }
 0x736   : > { %v4105_v49 = vmul.f32 %v6603_v42, %v4086_v9  ;;  %v4406_v32 = vpop.permute.xlu0 %4405 }
 0x737   : > { %v4425_v15 = vmul.f32 %v6648_v56, %v4406_v32  ;;  %v6702_v32 = vld [vmem:[%s11477_s8 + $0x4a8] sm:$0xff] }
 0x738   : > { %v4114_v16 = vadd.f32 %v4105_v49, %v4050_v37 }
 0x73a   : > { %v4178_v63 = vadd.f32 %v4169_v62, %v4114_v16  ;;  %v4342_v10 = vpop.permute.xlu2 %4341 }
 0x73b   : > { %7133 = vset.pattern.permute.xlu1 %v11692_v19  ;;  %v4361_v20 = vmul.f32 %v6639_v43, %v4342_v10 }
 0x73c   : > { %7125 = vset.pattern.permute.xlu2 %v11686_v12  ;;  %4409 = vperm.xlu1 %7133, %v10063_v13   ;;  %v4242_v7 = vadd.f32 %v4233_v6, %v4178_v63  ;;  %v6684_v6 = vld [vmem:[%s11477_s8 + $0x418] sm:$0xff]  ;;  %v6693_v63 = vld [vmem:[%s11477_s8 + $0x460] sm:$0xff] }
 0x73d   : > { %3897 = vperm.xlu2 %7125, %v10063_v13  }
 0x73e   : > { %v4598_v42 = vpop.permute.xlu0 %4597 }
 0x73f   : > { %v4278_v1 = vpop.permute.xlu1 %4277  ;;  %v4617_v49 = vmul.f32 %v6675_v27, %v4598_v42 }
 0x740   : > { %v4297_v25 = vmul.f32 %v6630_v36, %v4278_v1 }
 0x742   : > { %v4306_v29 = vadd.f32 %v4297_v25, %v4242_v7 }
 0x744   : > { %v4370_v50 = vadd.f32 %v4361_v20, %v4306_v29  ;;  %7136 = vset.pattern.permute.xlu1 %v11694_v55  ;;  %v4534_v33 = vpop.permute.xlu2 %4533  ;;  %v6711_v29 = vld [vmem:[%s11477_s8 + $0x4f0] sm:$0xff] }
 0x745   : > { %7128 = vset.pattern.permute.xlu2 %v11690_v35  ;;  %4601 = vperm.xlu1 %7136, %v10063_v13   ;;  %v4553_v0 = vmul.f32 %v6666_v53, %v4534_v33 }
 0x746   : > { %4089 = vperm.xlu2 %7128, %v10063_v13   ;;  %v4434_v44 = vadd.f32 %v4425_v15, %v4370_v50  ;;  %v4790_v7 = vpop.permute.xlu0 %4789  ;;  %v6720_v50 = vld [vmem:[%s11477_s8 + $0x538] sm:$0xff] }
 0x747   : > { %v4809_v25 = vmul.f32 %v6702_v32, %v4790_v7  ;;  %v6765_v32 = vld [vmem:[%s11477_s8 + $0x6a0] sm:$0xff] }
 0x748   : > { %v4470_v17 = vpop.permute.xlu1 %4469 }
 0x749   : > { %v4489_v37 = vmul.f32 %v6657_v39, %v4470_v17 }
 0x74b   : > { %v4498_v9 = vadd.f32 %v4489_v37, %v4434_v44  ;;  %v6729_v44 = vld [vmem:[%s11477_s8 + $0x580] sm:$0xff] }
 0x74d   : > { %v4562_v45 = vadd.f32 %v4553_v0, %v4498_v9  ;;  %7139 = vset.pattern.permute.xlu1 %v11654_v3  ;;  %v4726_v62 = vpop.permute.xlu2 %4725 }
 0x74e   : > { %7131 = vset.pattern.permute.xlu2 %v11693_v28  ;;  %4793 = vperm.xlu1 %7139, %v10063_v13   ;;  %v4745_v43 = vmul.f32 %v6693_v63, %v4726_v62  ;;  %v4982_v53 = vpop.permute.xlu0 %4981 }
 0x74f   : > { %4281 = vperm.xlu2 %7131, %v10063_v13   ;;  %v4626_v16 = vadd.f32 %v4617_v49, %v4562_v45  ;;  %v5001_v37 = vmul.f32 %v6729_v44, %v4982_v53  ;;  %v6738_v49 = vld [vmem:[%s11477_s8 + $0x5c8] sm:$0xff]  ;;  %v6747_v45 = vld [vmem:[%s11477_s8 + $0x610] sm:$0xff] }
 0x752   : > { %v4662_v10 = vpop.permute.xlu1 %4661 }
 0x753   : > { %v4681_v36 = vmul.f32 %v6684_v6, %v4662_v10 }
 0x755   : > { %v4690_v1 = vadd.f32 %v4681_v36, %v4626_v16  ;;  %v6756_v36 = vld [vmem:[%s11477_s8 + $0x658] sm:$0xff] }
 0x756   : > { %7142 = vset.pattern.permute.xlu1 %v11660_v40 }
 0x757   : > { %v4754_v56 = vadd.f32 %v4745_v43, %v4690_v1  ;;  %7134 = vset.pattern.permute.xlu2 %v11698_v4  ;;  %v4918_v20 = vpop.permute.xlu2 %4917  ;;  %4985 = vperm.xlu1 %7142, %v10063_v13  }
 0x758   : > { %4473 = vperm.xlu2 %7134, %v10063_v13   ;;  %v4937_v17 = vmul.f32 %v6720_v50, %v4918_v20  ;;  %v6783_v50 = vld [vmem:[%s11477_s8 + $0x730] sm:$0xff] }
 0x759   : > { %v4818_v15 = vadd.f32 %v4809_v25, %v4754_v56 }
 0x75b   : > { %v4854_v33 = vpop.permute.xlu1 %4853 }
 0x75c   : > { %v4873_v39 = vmul.f32 %v6711_v29, %v4854_v33 }
 0x75e   : > { %v4882_v42 = vadd.f32 %v4873_v39, %v4818_v15  ;;  %v6774_v15 = vld [vmem:[%s11477_s8 + $0x6e8] sm:$0xff] }
 0x75f   : > { %7145 = vset.pattern.permute.xlu1 %v11734_v23 }
 0x760   : > { %v4946_v27 = vadd.f32 %v4937_v17, %v4882_v42  ;;  %7137 = vset.pattern.permute.xlu2 %v11699_v46  ;;  %v5110_v0 = vpop.permute.xlu2 %5109  ;;  %5177 = vperm.xlu1 %7145, %v10063_v13   ;;  %v5494_v42 = vpop.permute.xlu0 %5493 }
 0x761   : > { %4665 = vperm.xlu2 %7137, %v10063_v13   ;;  %v5129_v6 = vmul.f32 %v6747_v45, %v5110_v0  ;;  %v6801_v0 = vld [vmem:[%s11477_s8 + $0x7c0] sm:$0xff]  ;;  %v6810_v45 = vld [vmem:[%s11477_s8 + $0x808] sm:$0xff] }
 0x762   : > { %v5010_v9 = vadd.f32 %v5001_v37, %v4946_v27  ;;  %v6792_v27 = vld [vmem:[%s11477_s8 + $0x778] sm:$0xff] }
 0x765   : > { %v5046_v62 = vpop.permute.xlu1 %5045 }
 0x766   : > { %v5065_v16 = vmul.f32 %v6738_v49, %v5046_v62  ;;  %v5513_v62 = vmul.f32 %v6801_v0, %v5494_v42 }
 0x768   : > { %v5074_v63 = vadd.f32 %v5065_v16, %v5010_v9  ;;  %7147 = vset.pattern.permute.xlu1 %v11740_v8 }
 0x769   : > { %7140 = vset.pattern.permute.xlu2 %v11702_v60  ;;  %5305 = vperm.xlu1 %7147, %v10063_v13  }
 0x76a   : > { %v5238_v10 = vpop.permute.xlu2 %5237  ;;  %4857 = vperm.xlu2 %7140, %v10063_v13   ;;  %v5138_v7 = vadd.f32 %v5129_v6, %v5074_v63 }
 0x76b   : > { %v5257_v25 = vmul.f32 %v6765_v32, %v5238_v10 }
 0x76e   : > { %v5174_v43 = vpop.permute.xlu1 %5173 }
 0x76f   : > { %v5193_v1 = vmul.f32 %v6756_v36, %v5174_v43  ;;  %v6819_v36 = vld [vmem:[%s11477_s8 + $0x850] sm:$0xff]  ;;  %v6828_v43 = vld [vmem:[%s11477_s8 + $0x898] sm:$0xff] }
 0x771   : > { %v5202_v56 = vadd.f32 %v5193_v1, %v5138_v7  ;;  %7150 = vset.pattern.permute.xlu1 %v11757_v54  ;;  %v3768_v7 = vpop.permute.xlu0 %3767 }
 0x772   : > { %7143 = vset.pattern.permute.xlu2 %v11703_v61  ;;  %5497 = vperm.xlu1 %7150, %v10063_v13  }
 0x773   : > { %v5366_v20 = vpop.permute.xlu2 %5365  ;;  %5049 = vperm.xlu2 %7143, %v10063_v13   ;;  %v5266_v29 = vadd.f32 %v5257_v25, %v5202_v56  ;;  %v6837_v56 = vld [vmem:[%s11477_s8 + $0x8e0] sm:$0xff] }
 0x774   : > { %v5385_v44 = vmul.f32 %v6783_v50, %v5366_v20 }
 0x778   : > { %v5302_v33 = vpop.permute.xlu1 %5301 }
 0x779   : > { %v5321_v39 = vmul.f32 %v6774_v15, %v5302_v33 }
 0x77a   : > { %7152 = vset.pattern.permute.xlu1 %v11770_v2 }
 0x77b   : > { %v5330_v53 = vadd.f32 %v5321_v39, %v5266_v29  ;;  %7146 = vset.pattern.permute.xlu2 %v11741_v58  ;;  %5625 = vperm.xlu1 %7152, %v10063_v13   ;;  %v3732_v39 = vld [vmem:[%s11477_s8 + $0x30] sm:$0xff] }
 0x77c   : > { %v5558_v17 = vpop.permute.xlu2 %5557  ;;  %5241 = vperm.xlu2 %7146, %v10063_v13  }
 0x77d   : > { %v5394_v37 = vadd.f32 %v5385_v44, %v5330_v53  ;;  %v5577_v63 = vmul.f32 %v6810_v45, %v5558_v17  ;;  %v3962_v44 = vpop.permute.xlu0 %3961  ;;  %v6568_v17 = vld [vmem:[%s11477_s8 + $0x78] sm:$0xff]  ;;  %v6586_v45 = vld [vmem:[%s11477_s8 + $0x108] sm:$0xff] }
 0x781   : > { %v5430_v9 = vpop.permute.xlu1 %5429 }
 0x782   : > { %v5449_v49 = vmul.f32 %v6792_v27, %v5430_v9  ;;  %v3786_v27 = vmul.f32 %v3768_v7, %v3732_v39  ;;  %v6577_v9 = vld [vmem:[%s11477_s8 + $0xc0] sm:$0xff] }
 0x783   : > { %7153 = vset.pattern.permute.xlu1 %v11764_v57 }
 0x784   : > { %v5458_v16 = vadd.f32 %v5449_v49, %v5394_v37  ;;  %7149 = vset.pattern.permute.xlu2 %v11749_v59  ;;  %5689 = vperm.xlu1 %7153, %v10063_v13  }
 0x785   : > { %v5686_v6 = vpop.permute.xlu2 %5685  ;;  %5433 = vperm.xlu2 %7149, %v10063_v13  }
 0x786   : > { %v5522_v10 = vadd.f32 %v5513_v62, %v5458_v16  ;;  %v5705_v20 = vmul.f32 %v6828_v43, %v5686_v6  ;;  %v3978_v16 = vmul.f32 %v6586_v45, %v3962_v44  ;;  %v6631_v44 = vld [vmem:[%s11477_s8 + $0x270] sm:$0xff] }
 0x788   : > { %v5586_v32 = vadd.f32 %v5577_v63, %v5522_v10  ;;  %v6595_v63 = vld [vmem:[%s11477_s8 + $0x150] sm:$0xff]  ;;  %v4154_v10 = vpop.permute.xlu0 %4153 }
 0x78a   : > { %v5622_v1 = vpop.permute.xlu1 %5621 }
 0x78b   : > { %v5641_v25 = vmul.f32 %v6819_v36, %v5622_v1  ;;  %v6613_v1 = vld [vmem:[%s11477_s8 + $0x1e0] sm:$0xff] }
 0x78c   : > { %7155 = vset.pattern.permute.xlu1 %v11767_v52 }
 0x78d   : > { %v5650_v29 = vadd.f32 %v5641_v25, %v5586_v32  ;;  %7154 = vset.pattern.permute.xlu2 %v11771_v30  ;;  %3772 = vperm.xlu1 %7155, %v10249_v47   ;;  %v6604_v32 = vld [vmem:[%s11477_s8 + $0x198] sm:$0xff] }
 0x78e   : > { %v5750_v15 = vpop.permute.xlu2 %5749  ;;  %5753 = vperm.xlu2 %7154, %v10063_v13  }
 0x78f   : > { %v5714_v50 = vadd.f32 %v5705_v20, %v5650_v29  ;;  %v5769_v33 = vmul.f32 %v6837_v56, %v5750_v15  ;;  %v4170_v20 = vmul.f32 %v6613_v1, %v4154_v10  ;;  %v6622_v15 = vld [vmem:[%s11477_s8 + $0x228] sm:$0xff] }
 0x791   : > { %v5778_v53 = vadd.f32 %v5769_v33, %v5714_v50  ;;  %v4346_v50 = vpop.permute.xlu0 %4345 }
 0x793   : > { %v5791_v42 = vsel %vm748_vm1, %v5778_v53, 0.0  ;;  %v3834_v37 = vpop.permute.xlu1 %3833 }
 0x794   : > { %v10993_v0 = vadd.f32 %v5791_v42, %v10858_v18  ;;  %v3850_v13 = vmul.f32 %v6568_v17, %v3834_v37  ;;  %v6640_v17 = vld [vmem:[%s11477_s8 + $0x2b8] sm:$0xff] }
 0x795   : > { %7158 = vset.pattern.permute.xlu1 %v11677_v38 }
 0x796   : > { %v3859_v49 = vadd.f32 %v3850_v13, %v3786_v27  ;;  %7156 = vset.pattern.permute.xlu2 %v11765_v34  ;;  %3965 = vperm.xlu1 %7158, %v10249_v47   ;;  %v4362_v27 = vmul.f32 %v6640_v17, %v4346_v50 }
 0x797   : > { %v3898_v62 = vpop.permute.xlu2 %3897  ;;  %3837 = vperm.xlu2 %7156, %v10249_v47  }
 0x798   : > { %v3914_v18 = vmul.f32 %v6577_v9, %v3898_v62  ;;  %v6649_v9 = vld [vmem:[%s11477_s8 + $0x300] sm:$0xff] }
 0x799   : > { %v4538_v62 = vpop.permute.xlu0 %4537 }
 0x79a   : > { %v3923_v6 = vadd.f32 %v3914_v18, %v3859_v49  ;;  %v6658_v18 = vld [vmem:[%s11477_s8 + $0x348] sm:$0xff] }
 0x79c   : > { %v4026_v7 = vpop.permute.xlu1 %4025  ;;  %v3987_v36 = vadd.f32 %v3978_v16, %v3923_v6  ;;  %v6667_v6 = vld [vmem:[%s11477_s8 + $0x390] sm:$0xff] }
 0x79d   : > { %v4042_v34 = vmul.f32 %v6595_v63, %v4026_v7  ;;  %v4554_v7 = vmul.f32 %v6667_v6, %v4538_v62  ;;  %v6748_v6 = vld [vmem:[%s11477_s8 + $0x618] sm:$0xff] }
 0x79e   : > { %7161 = vset.pattern.permute.xlu1 %v11681_v5 }
 0x79f   : > { %v4051_v43 = vadd.f32 %v4042_v34, %v3987_v36  ;;  %7159 = vset.pattern.permute.xlu2 %v11768_v26  ;;  %4157 = vperm.xlu1 %7161, %v10249_v47   ;;  %v6676_v34 = vld [vmem:[%s11477_s8 + $0x3d8] sm:$0xff] }
 0x7a0   : > { %v4090_v25 = vpop.permute.xlu2 %4089  ;;  %4029 = vperm.xlu2 %7159, %v10249_v47  }
 0x7a1   : > { %v4106_v56 = vmul.f32 %v6604_v32, %v4090_v25  ;;  %v6685_v25 = vld [vmem:[%s11477_s8 + $0x420] sm:$0xff] }
 0x7a3   : > { %v4115_v29 = vadd.f32 %v4106_v56, %v4051_v43 }
 0x7a5   : > { %v4218_v33 = vpop.permute.xlu1 %4217  ;;  %v4179_v39 = vadd.f32 %v4170_v20, %v4115_v29  ;;  %v6694_v20 = vld [vmem:[%s11477_s8 + $0x468] sm:$0xff] }
 0x7a6   : > { %v4234_v26 = vmul.f32 %v6622_v15, %v4218_v33 }
 0x7a7   : > { %7164 = vset.pattern.permute.xlu1 %v11683_v31 }
 0x7a8   : > { %v4243_v53 = vadd.f32 %v4234_v26, %v4179_v39  ;;  %7162 = vset.pattern.permute.xlu2 %v11769_v41  ;;  %4349 = vperm.xlu1 %7164, %v10249_v47   ;;  %v6703_v39 = vld [vmem:[%s11477_s8 + $0x4b0] sm:$0xff] }
 0x7a9   : > { %v4282_v42 = vpop.permute.xlu2 %4281  ;;  %4221 = vperm.xlu2 %7162, %v10249_v47  }
 0x7aa   : > { %v4298_v37 = vmul.f32 %v6631_v44, %v4282_v42 }
 0x7ac   : > { %v4307_v13 = vadd.f32 %v4298_v37, %v4243_v53  ;;  %v6721_v37 = vld [vmem:[%s11477_s8 + $0x540] sm:$0xff] }
 0x7ae   : > { %v4410_v49 = vpop.permute.xlu1 %4409  ;;  %v4371_v45 = vadd.f32 %v4362_v27, %v4307_v13 }
 0x7af   : > { %v4426_v41 = vmul.f32 %v6649_v9, %v4410_v49 }
 0x7b0   : > { %7167 = vset.pattern.permute.xlu1 %v11685_v22 }
 0x7b1   : > { %v4435_v16 = vadd.f32 %v4426_v41, %v4371_v45  ;;  %7165 = vset.pattern.permute.xlu2 %v11692_v19  ;;  %4541 = vperm.xlu1 %7167, %v10249_v47   ;;  %v4730_v19 = vpop.permute.xlu0 %4729  ;;  %v6730_v45 = vld [vmem:[%s11477_s8 + $0x588] sm:$0xff] }
 0x7b2   : > { %v4474_v63 = vpop.permute.xlu2 %4473  ;;  %4413 = vperm.xlu2 %7165, %v10249_v47   ;;  %v4746_v50 = vmul.f32 %v6694_v20, %v4730_v19 }
 0x7b3   : > { %v4490_v10 = vmul.f32 %v6658_v18, %v4474_v63 }
 0x7b5   : > { %v4499_v36 = vadd.f32 %v4490_v10, %v4435_v16 }
 0x7b7   : > { %v4602_v32 = vpop.permute.xlu1 %4601  ;;  %v4563_v43 = vadd.f32 %v4554_v7, %v4499_v36 }
 0x7b8   : > { %v4618_v1 = vmul.f32 %v6676_v34, %v4602_v32  ;;  %v6757_v34 = vld [vmem:[%s11477_s8 + $0x660] sm:$0xff] }
 0x7b9   : > { %7170 = vset.pattern.permute.xlu1 %v11687_v11  ;;  %v4922_v17 = vpop.permute.xlu0 %4921 }
 0x7ba   : > { %v4627_v56 = vadd.f32 %v4618_v1, %v4563_v43  ;;  %7168 = vset.pattern.permute.xlu2 %v11694_v55  ;;  %4733 = vperm.xlu1 %7170, %v10249_v47   ;;  %v6712_v55 = vld [vmem:[%s11477_s8 + $0x4f8] sm:$0xff]  ;;  %v4938_v9 = vmul.f32 %v6721_v37, %v4922_v17  ;;  %v6766_v1 = vld [vmem:[%s11477_s8 + $0x6a8] sm:$0xff] }
 0x7bb   : > { %v4666_v29 = vpop.permute.xlu2 %4665  ;;  %4605 = vperm.xlu2 %7168, %v10249_v47  }
 0x7bc   : > { %v4682_v15 = vmul.f32 %v6685_v25, %v4666_v29  ;;  %v6775_v29 = vld [vmem:[%s11477_s8 + $0x6f0] sm:$0xff] }
 0x7be   : > { %v4691_v33 = vadd.f32 %v4682_v15, %v4627_v56 }
 0x7c0   : > { %v4794_v26 = vpop.permute.xlu1 %4793  ;;  %v4755_v44 = vadd.f32 %v4746_v50, %v4691_v33  ;;  %v6784_v50 = vld [vmem:[%s11477_s8 + $0x738] sm:$0xff] }
 0x7c1   : > { %v4810_v53 = vmul.f32 %v6703_v39, %v4794_v26  ;;  %v5114_v63 = vpop.permute.xlu0 %5113  ;;  %v6793_v26 = vld [vmem:[%s11477_s8 + $0x780] sm:$0xff] }
 0x7c2   : > { %7173 = vset.pattern.permute.xlu1 %v11689_v24  ;;  %v5130_v36 = vmul.f32 %v6748_v6, %v5114_v63 }
 0x7c3   : > { %v4819_v42 = vadd.f32 %v4810_v53, %v4755_v44  ;;  %7171 = vset.pattern.permute.xlu2 %v11654_v3  ;;  %4925 = vperm.xlu1 %7173, %v10249_v47   ;;  %v6739_v3 = vld [vmem:[%s11477_s8 + $0x5d0] sm:$0xff] }
 0x7c4   : > { %v4858_v27 = vpop.permute.xlu2 %4857  ;;  %4797 = vperm.xlu2 %7171, %v10249_v47  }
 0x7c5   : > { %v4874_v13 = vmul.f32 %v6712_v55, %v4858_v27  ;;  %v6802_v27 = vld [vmem:[%s11477_s8 + $0x7c8] sm:$0xff] }
 0x7c7   : > { %v4883_v49 = vadd.f32 %v4874_v13, %v4819_v42  ;;  %v6811_v13 = vld [vmem:[%s11477_s8 + $0x810] sm:$0xff] }
 0x7c9   : > { %v4986_v62 = vpop.permute.xlu1 %4985  ;;  %v4947_v41 = vadd.f32 %v4938_v9, %v4883_v49  ;;  %v5370_v15 = vpop.permute.xlu0 %5369 }
 0x7ca   : > { %v5002_v18 = vmul.f32 %v6730_v45, %v4986_v62  ;;  %v5386_v44 = vmul.f32 %v6784_v50, %v5370_v15 }
 0x7cb   : > { %7176 = vset.pattern.permute.xlu1 %v11655_v21 }
 0x7cc   : > { %v5011_v16 = vadd.f32 %v5002_v18, %v4947_v41  ;;  %7174 = vset.pattern.permute.xlu2 %v11660_v40  ;;  %5117 = vperm.xlu1 %7176, %v10249_v47  }
 0x7cd   : > { %v5050_v10 = vpop.permute.xlu2 %5049  ;;  %4989 = vperm.xlu2 %7174, %v10249_v47  }
 0x7ce   : > { %v5066_v7 = vmul.f32 %v6739_v3, %v5050_v10 }
 0x7d0   : > { %v5075_v21 = vadd.f32 %v5066_v7, %v5011_v16  ;;  %v6820_v16 = vld [vmem:[%s11477_s8 + $0x858] sm:$0xff] }
 0x7d1   : > { %v5562_v9 = vpop.permute.xlu0 %5561 }
 0x7d2   : > { %v5178_v32 = vpop.permute.xlu1 %5177  ;;  %v5139_v43 = vadd.f32 %v5130_v36, %v5075_v21  ;;  %v5578_v62 = vmul.f32 %v6811_v13, %v5562_v9  ;;  %v6829_v36 = vld [vmem:[%s11477_s8 + $0x8a0] sm:$0xff]  ;;  %v6838_v21 = vld [vmem:[%s11477_s8 + $0x8e8] sm:$0xff] }
 0x7d3   : > { %v5194_v40 = vmul.f32 %v6757_v34, %v5178_v32 }
 0x7d4   : > { %7177 = vset.pattern.permute.xlu1 %v11734_v23 }
 0x7d5   : > { %v5203_v19 = vadd.f32 %v5194_v40, %v5139_v43  ;;  %7179 = vset.pattern.permute.xlu2 %v11740_v8  ;;  %5181 = vperm.xlu1 %7177, %v10249_v47  }
 0x7d6   : > { %v5242_v25 = vpop.permute.xlu2 %5241  ;;  %5309 = vperm.xlu2 %7179, %v10249_v47  }
 0x7d7   : > { %v5258_v56 = vmul.f32 %v6766_v1, %v5242_v25 }
 0x7d9   : > { %v5267_v20 = vadd.f32 %v5258_v56, %v5203_v19  ;;  %v3902_v40 = vpop.permute.xlu0 %3901  ;;  %v6569_v19 = vld [vmem:[%s11477_s8 + $0x80] sm:$0xff] }
 0x7db   : > { %v5306_v33 = vpop.permute.xlu1 %5305 }
 0x7dc   : > { %v5322_v39 = vmul.f32 %v6775_v29, %v5306_v33 }
 0x7dd   : > { %7180 = vset.pattern.permute.xlu1 %v11667_v14 }
 0x7de   : > { %v5331_v53 = vadd.f32 %v5322_v39, %v5267_v20  ;;  %7181 = vset.pattern.permute.xlu2 %v11749_v59  ;;  %5373 = vperm.xlu1 %7180, %v10249_v47  }
 0x7df   : > { %v5434_v55 = vpop.permute.xlu2 %5433  ;;  %5437 = vperm.xlu2 %7181, %v10249_v47  }
 0x7e0   : > { %v5395_v17 = vadd.f32 %v5386_v44, %v5331_v53  ;;  %v5450_v42 = vmul.f32 %v6793_v26, %v5434_v55  ;;  %v6587_v44 = vld [vmem:[%s11477_s8 + $0x110] sm:$0xff]  ;;  %v6596_v53 = vld [vmem:[%s11477_s8 + $0x158] sm:$0xff] }
 0x7e1   : > { %v4094_v26 = vpop.permute.xlu0 %4093 }
 0x7e2   : > { %v5459_v37 = vadd.f32 %v5450_v42, %v5395_v17 }
 0x7e4   : > { %v5498_v49 = vpop.permute.xlu1 %5497 }
 0x7e5   : > { %v5514_v45 = vmul.f32 %v6802_v27, %v5498_v49 }
 0x7e6   : > { %7185 = vset.pattern.permute.xlu1 %v11764_v57 }
 0x7e7   : > { %v5523_v41 = vadd.f32 %v5514_v45, %v5459_v37  ;;  %7182 = vset.pattern.permute.xlu2 %v11757_v54  ;;  %5693 = vperm.xlu1 %7185, %v10249_v47   ;;  %v6614_v45 = vld [vmem:[%s11477_s8 + $0x1e8] sm:$0xff] }
 0x7e8   : > { %v5754_v18 = vpop.permute.xlu2 %5753  ;;  %5501 = vperm.xlu2 %7182, %v10249_v47  }
 0x7e9   : > { %v5587_v3 = vadd.f32 %v5578_v62, %v5523_v41  ;;  %v4286_v9 = vpop.permute.xlu0 %4285 }
 0x7ed   : > { %v5626_v6 = vpop.permute.xlu1 %5625 }
 0x7ee   : > { %v5642_v63 = vmul.f32 %v6820_v16, %v5626_v6 }
 0x7ef   : > { %7188 = vset.pattern.permute.xlu1 %v11686_v12  ;;  %v5770_v12 = vmul.f32 %v6838_v21, %v5754_v18 }
 0x7f0   : > { %v5651_v10 = vadd.f32 %v5642_v63, %v5587_v3  ;;  %7184 = vset.pattern.permute.xlu2 %v11770_v2  ;;  %3905 = vperm.xlu1 %7188, %v10642_v51  }
 0x7f1   : > { %5629 = vperm.xlu2 %7184, %v10249_v47   ;;  %v3838_v7 = vpop.permute.xlu2 %3837 }
 0x7f2   : > { %v3851_v29 = vmul.f32 %v6569_v19, %v3838_v7  ;;  %v6641_v7 = vld [vmem:[%s11477_s8 + $0x2c0] sm:$0xff]  ;;  %v6668_v19 = vld [vmem:[%s11477_s8 + $0x398] sm:$0xff] }
 0x7f6   : > { %v5690_v34 = vpop.permute.xlu1 %5689 }
 0x7f7   : > { %v5706_v32 = vmul.f32 %v6829_v36, %v5690_v34  ;;  %v4478_v36 = vpop.permute.xlu0 %4477 }
 0x7f8   : > { %7191 = vset.pattern.permute.xlu1 %v11690_v35  ;;  %v3733_v35 = vld [vmem:[%s11477_s8 + $0x38] sm:$0xff] }
 0x7f9   : > { %v5715_v43 = vadd.f32 %v5706_v32, %v5651_v10  ;;  %7186 = vset.pattern.permute.xlu2 %v11767_v52  ;;  %4097 = vperm.xlu1 %7191, %v10642_v51   ;;  %v6578_v52 = vld [vmem:[%s11477_s8 + $0xc8] sm:$0xff] }
 0x7fa   : > { %v4030_v2 = vpop.permute.xlu2 %4029  ;;  %3777 = vperm.xlu2 %7186, %v10642_v51   ;;  %v3915_v50 = vmul.f32 %v6578_v52, %v3902_v40 }
 0x7fb   : > { %v5779_v1 = vadd.f32 %v5770_v12, %v5715_v43  ;;  %v4043_v17 = vmul.f32 %v6596_v53, %v4030_v2 }
 0x7fd   : > { %v5793_v25 = vsel %vm748_vm1, %v5779_v1, 0.0 }
 0x7fe   : > { %v11141_v56 = vadd.f32 %v5793_v25, %v10993_v0 }
 0x7ff   : > { %v3773_v20 = vpop.permute.xlu1 %3772  ;;  %v4670_v25 = vpop.permute.xlu0 %4669 }
 0x800   : > { %v3787_v15 = vmul.f32 %v3773_v20, %v3733_v35 }
 0x801   : > { %7194 = vset.pattern.permute.xlu1 %v11693_v28 }
 0x802   : > { %v3860_v33 = vadd.f32 %v3851_v29, %v3787_v15  ;;  %7189 = vset.pattern.permute.xlu2 %v11677_v38  ;;  %4289 = vperm.xlu1 %7194, %v10642_v51   ;;  %v6605_v38 = vld [vmem:[%s11477_s8 + $0x1a0] sm:$0xff] }
 0x803   : > { %v4222_v39 = vpop.permute.xlu2 %4221  ;;  %3969 = vperm.xlu2 %7189, %v10642_v51   ;;  %v4107_v27 = vmul.f32 %v6605_v38, %v4094_v26 }
 0x804   : > { %v3924_v0 = vadd.f32 %v3915_v50, %v3860_v33 }
 0x808   : > { %v3966_v28 = vpop.permute.xlu1 %3965 }
 0x809   : > { %v3979_v55 = vmul.f32 %v6587_v44, %v3966_v28  ;;  %v4862_v44 = vpop.permute.xlu0 %4861 }
 0x80a   : > { %7197 = vset.pattern.permute.xlu1 %v11698_v4  ;;  %v6623_v4 = vld [vmem:[%s11477_s8 + $0x230] sm:$0xff] }
 0x80b   : > { %v3988_v42 = vadd.f32 %v3979_v55, %v3924_v0  ;;  %7192 = vset.pattern.permute.xlu2 %v11681_v5  ;;  %4481 = vperm.xlu1 %7197, %v10642_v51   ;;  %v6632_v5 = vld [vmem:[%s11477_s8 + $0x278] sm:$0xff]  ;;  %v4235_v18 = vmul.f32 %v6623_v4, %v4222_v39  ;;  %v6695_v0 = vld [vmem:[%s11477_s8 + $0x470] sm:$0xff] }
 0x80c   : > { %v4414_v37 = vpop.permute.xlu2 %4413  ;;  %4161 = vperm.xlu2 %7192, %v10642_v51   ;;  %v4299_v6 = vmul.f32 %v6632_v5, %v4286_v9 }
 0x80d   : > { %v4052_v13 = vadd.f32 %v4043_v17, %v3988_v42 }
 0x80f   : > { %v4116_v49 = vadd.f32 %v4107_v27, %v4052_v13  ;;  %v6722_v27 = vld [vmem:[%s11477_s8 + $0x548] sm:$0xff] }
 0x811   : > { %v4158_v62 = vpop.permute.xlu1 %4157 }
 0x812   : > { %v4171_v41 = vmul.f32 %v6614_v45, %v4158_v62 }
 0x813   : > { %7200 = vset.pattern.permute.xlu1 %v11699_v46  ;;  %v6650_v46 = vld [vmem:[%s11477_s8 + $0x308] sm:$0xff] }
 0x814   : > { %v4180_v3 = vadd.f32 %v4171_v41, %v4116_v49  ;;  %7195 = vset.pattern.permute.xlu2 %v11683_v31  ;;  %4673 = vperm.xlu1 %7200, %v10642_v51   ;;  %v6659_v31 = vld [vmem:[%s11477_s8 + $0x350] sm:$0xff]  ;;  %v4427_v32 = vmul.f32 %v6650_v46, %v4414_v37  ;;  %v5054_v49 = vpop.permute.xlu0 %5053 }
 0x815   : > { %v4606_v16 = vpop.permute.xlu2 %4605  ;;  %4353 = vperm.xlu2 %7195, %v10642_v51   ;;  %v4491_v2 = vmul.f32 %v6659_v31, %v4478_v36 }
 0x816   : > { %v4244_v63 = vadd.f32 %v4235_v18, %v4180_v3  ;;  %v6749_v3 = vld [vmem:[%s11477_s8 + $0x620] sm:$0xff] }
 0x818   : > { %v4308_v10 = vadd.f32 %v4299_v6, %v4244_v63  ;;  %v6758_v63 = vld [vmem:[%s11477_s8 + $0x668] sm:$0xff] }
 0x81a   : > { %v4350_v21 = vpop.permute.xlu1 %4349 }
 0x81b   : > { %v4363_v34 = vmul.f32 %v6641_v7, %v4350_v21 }
 0x81c   : > { %7203 = vset.pattern.permute.xlu1 %v11702_v60  ;;  %v6677_v60 = vld [vmem:[%s11477_s8 + $0x3e0] sm:$0xff]  ;;  %v5246_v7 = vpop.permute.xlu0 %5245 }
 0x81d   : > { %v4372_v12 = vadd.f32 %v4363_v34, %v4308_v10  ;;  %7198 = vset.pattern.permute.xlu2 %v11685_v22  ;;  %4865 = vperm.xlu1 %7203, %v10642_v51   ;;  %v6686_v22 = vld [vmem:[%s11477_s8 + $0x428] sm:$0xff]  ;;  %v4619_v20 = vmul.f32 %v6677_v60, %v4606_v16  ;;  %v6767_v10 = vld [vmem:[%s11477_s8 + $0x6b0] sm:$0xff] }
 0x81e   : > { %v4798_v43 = vpop.permute.xlu2 %4797  ;;  %4545 = vperm.xlu2 %7198, %v10642_v51   ;;  %v4683_v50 = vmul.f32 %v6686_v22, %v4670_v25  ;;  %v6812_v25 = vld [vmem:[%s11477_s8 + $0x818] sm:$0xff] }
 0x81f   : > { %v4436_v40 = vadd.f32 %v4427_v32, %v4372_v12 }
 0x821   : > { %v4500_v1 = vadd.f32 %v4491_v2, %v4436_v40 }
 0x823   : > { %v4542_v35 = vpop.permute.xlu1 %4541 }
 0x824   : > { %v4555_v52 = vmul.f32 %v6668_v19, %v4542_v35  ;;  %v5566_v60 = vpop.permute.xlu0 %5565 }
 0x825   : > { %7206 = vset.pattern.permute.xlu1 %v11703_v61  ;;  %v6704_v61 = vld [vmem:[%s11477_s8 + $0x4b8] sm:$0xff] }
 0x826   : > { %v4564_v29 = vadd.f32 %v4555_v52, %v4500_v1  ;;  %7201 = vset.pattern.permute.xlu2 %v11687_v11  ;;  %5057 = vperm.xlu1 %7206, %v10642_v51   ;;  %v6713_v11 = vld [vmem:[%s11477_s8 + $0x500] sm:$0xff]  ;;  %v4811_v28 = vmul.f32 %v6704_v61, %v4798_v43 }
 0x827   : > { %v4990_v15 = vpop.permute.xlu2 %4989  ;;  %4737 = vperm.xlu2 %7201, %v10642_v51   ;;  %v4875_v17 = vmul.f32 %v6713_v11, %v4862_v44  ;;  %v6785_v43 = vld [vmem:[%s11477_s8 + $0x740] sm:$0xff]  ;;  %v6570_v11 = vld [vmem:[%s11477_s8 + $0x88] sm:$0x7] }
 0x828   : > { %v4628_v33 = vadd.f32 %v4619_v20, %v4564_v29  ;;  %v5579_v20 = vmul.f32 %v6812_v25, %v5566_v60  ;;  %v3734_v44 = vld [vmem:[%s11477_s8 + $0x40] sm:$0x7] }
 0x82a   : > { %v4692_v39 = vadd.f32 %v4683_v50, %v4628_v33 }
 0x82c   : > { %v4734_v26 = vpop.permute.xlu1 %4733 }
 0x82d   : > { %v4747_v53 = vmul.f32 %v6695_v0, %v4734_v26  ;;  %v3842_v26 = vpop.permute.xlu0 %3841 }
 0x82e   : > { %7209 = vset.pattern.permute.xlu1 %v11741_v58  ;;  %v6731_v58 = vld [vmem:[%s11477_s8 + $0x590] sm:$0xff] }
 0x82f   : > { %v4756_v55 = vadd.f32 %v4747_v53, %v4692_v39  ;;  %7204 = vset.pattern.permute.xlu2 %v11689_v24  ;;  %5249 = vperm.xlu1 %7209, %v10642_v51   ;;  %v6740_v24 = vld [vmem:[%s11477_s8 + $0x5d8] sm:$0xff]  ;;  %v5003_v45 = vmul.f32 %v6731_v58, %v4990_v15 }
 0x830   : > { %v5310_v38 = vpop.permute.xlu2 %5309  ;;  %4929 = vperm.xlu2 %7204, %v10642_v51   ;;  %v5067_v41 = vmul.f32 %v6740_v24, %v5054_v49  ;;  %v6588_v58 = vld [vmem:[%s11477_s8 + $0x118] sm:$0x7]  ;;  %v6597_v49 = vld [vmem:[%s11477_s8 + $0x160] sm:$0x7] }
 0x831   : > { %v4820_v42 = vadd.f32 %v4811_v28, %v4756_v55  ;;  %v6579_v28 = vld [vmem:[%s11477_s8 + $0xd0] sm:$0x7] }
 0x833   : > { %v4884_v37 = vadd.f32 %v4875_v17, %v4820_v42 }
 0x835   : > { %v4926_v13 = vpop.permute.xlu1 %4925 }
 0x836   : > { %v4939_v9 = vmul.f32 %v6722_v27, %v4926_v13  ;;  %v4034_v27 = vpop.permute.xlu0 %4033 }
 0x837   : > { %7211 = vset.pattern.permute.xlu1 %v11667_v14 }
 0x838   : > { %v4948_v4 = vadd.f32 %v4939_v9, %v4884_v37  ;;  %7208 = vset.pattern.permute.xlu2 %v11734_v23  ;;  %5377 = vperm.xlu1 %7211, %v10642_v51  }
 0x839   : > { %v5438_v62 = vpop.permute.xlu2 %5437  ;;  %5185 = vperm.xlu2 %7208, %v10642_v51  }
 0x83a   : > { %v5012_v5 = vadd.f32 %v5003_v45, %v4948_v4  ;;  %v6606_v45 = vld [vmem:[%s11477_s8 + $0x1a8] sm:$0x7] }
 0x83c   : > { %v5076_v18 = vadd.f32 %v5067_v41, %v5012_v5 }
 0x83e   : > { %v5118_v16 = vpop.permute.xlu1 %5117 }
 0x83f   : > { %v5131_v6 = vmul.f32 %v6749_v3, %v5118_v16  ;;  %v4226_v16 = vpop.permute.xlu0 %4225 }
 0x840   : > { %7212 = vset.pattern.permute.xlu1 %v11749_v59  ;;  %v5259_v59 = vmul.f32 %v6767_v10, %v5246_v7  ;;  %v6624_v10 = vld [vmem:[%s11477_s8 + $0x238] sm:$0x7]  ;;  %v6633_v7 = vld [vmem:[%s11477_s8 + $0x280] sm:$0x7] }
 0x841   : > { %v5140_v14 = vadd.f32 %v5131_v6, %v5076_v18  ;;  %7210 = vset.pattern.permute.xlu2 %v11740_v8  ;;  %5441 = vperm.xlu1 %7212, %v10642_v51   ;;  %v6776_v8 = vld [vmem:[%s11477_s8 + $0x6f8] sm:$0xff]  ;;  %v6615_v6 = vld [vmem:[%s11477_s8 + $0x1f0] sm:$0x7] }
 0x842   : > { %v5502_v23 = vpop.permute.xlu2 %5501  ;;  %5313 = vperm.xlu2 %7210, %v10642_v51   ;;  %v5323_v31 = vmul.f32 %v6776_v8, %v5310_v38  ;;  %v3852_v38 = vmul.f32 %v6570_v11, %v3842_v26  ;;  %v5813_v18 = vld [vmem:[%s11479_s10 + $0x18] sm:$0xff]  ;;  %v4236_v8 = vmul.f32 %v6624_v10, %v4226_v16 }
 0x843   : > { %5830 = vmatpush.msra.mxu3 %v5813_v18  ;;  %v6696_v26 = vld [vmem:[%s11477_s8 + $0x478] sm:$0x7] }
 0x847   : > { %v5182_v36 = vpop.permute.xlu1 %5181 }
 0x848   : > { %v5195_v46 = vmul.f32 %v6758_v63, %v5182_v36 }
 0x849   : > { %7214 = vset.pattern.permute.xlu1 %v11665_v48  ;;  %v6794_v48 = vld [vmem:[%s11477_s8 + $0x788] sm:$0xff] }
 0x84a   : > { %v5204_v21 = vadd.f32 %v5195_v46, %v5140_v14  ;;  %7213 = vset.pattern.permute.xlu2 %v11757_v54  ;;  %5569 = vperm.xlu1 %7214, %v10642_v51   ;;  %v6803_v54 = vld [vmem:[%s11477_s8 + $0x7d0] sm:$0xff]  ;;  %v5451_v1 = vmul.f32 %v6794_v48, %v5438_v62  ;;  %v4044_v62 = vmul.f32 %v6597_v49, %v4034_v27 }
 0x84b   : > { %v5630_v34 = vpop.permute.xlu2 %5629  ;;  %5505 = vperm.xlu2 %7213, %v10642_v51   ;;  %v5515_v52 = vmul.f32 %v6803_v54, %v5502_v23  ;;  %v6651_v48 = vld [vmem:[%s11477_s8 + $0x310] sm:$0x7] }
 0x84c   : > { %v5268_v32 = vadd.f32 %v5259_v59, %v5204_v21 }
 0x84e   : > { %v5332_v12 = vadd.f32 %v5323_v31, %v5268_v32  ;;  %v6642_v31 = vld [vmem:[%s11477_s8 + $0x2c8] sm:$0x7] }
 0x850   : > { %v5374_v2 = vpop.permute.xlu1 %5373 }
 0x851   : > { %v5387_v40 = vmul.f32 %v6785_v43, %v5374_v2  ;;  %v6660_v2 = vld [vmem:[%s11477_s8 + $0x358] sm:$0x7] }
 0x852   : > { %7216 = vset.pattern.permute.xlu1 %v11764_v57  ;;  %v6821_v57 = vld [vmem:[%s11477_s8 + $0x860] sm:$0xff] }
 0x853   : > { %v5396_v19 = vadd.f32 %v5387_v40, %v5332_v12  ;;  %7217 = vset.pattern.permute.xlu2 %v11771_v30  ;;  %5697 = vperm.xlu1 %7216, %v10642_v51   ;;  %v6830_v51 = vld [vmem:[%s11477_s8 + $0x8a8] sm:$0xff]  ;;  %v5643_v30 = vmul.f32 %v6821_v57, %v5630_v34  ;;  %v4418_v34 = vpop.permute.xlu0 %4417 }
 0x854   : > { %5757 = vperm.xlu2 %7217, %v10249_v47   ;;  %v3778_v35 = vpop.permute.xlu2 %3777 }
 0x855   : > { %v5460_v22 = vadd.f32 %v5451_v1, %v5396_v19  ;;  %v3788_v55 = vmul.f32 %v3778_v35, %v3734_v44  ;;  %v5812_v1 = vld [vmem:[%s11479_s10 + $0x10] sm:$0xff]  ;;  %v4428_v19 = vmul.f32 %v6651_v48, %v4418_v34  ;;  %v6786_v48 = vld [vmem:[%s11477_s8 + $0x748] sm:$0x7] }
 0x856   : > { %5831 = vmatpush.msra.mxu3 %v5812_v1 }
 0x857   : > { %v5524_v29 = vadd.f32 %v5515_v52, %v5460_v22  ;;  %v3861_v37 = vadd.f32 %v3852_v38, %v3788_v55  ;;  %v6669_v22 = vld [vmem:[%s11477_s8 + $0x3a0] sm:$0x7]  ;;  %v6714_v38 = vld [vmem:[%s11477_s8 + $0x508] sm:$0x7] }
 0x858   : > { %v6705_v55 = vld [vmem:[%s11477_s8 + $0x4c0] sm:$0x7] }
 0x859   : > { %v5588_v15 = vadd.f32 %v5579_v20, %v5524_v29  ;;  %v5694_v50 = vpop.permute.xlu1 %5693  ;;  %v6678_v29 = vld [vmem:[%s11477_s8 + $0x3e8] sm:$0x7] }
 0x85a   : > { %v5707_v33 = vmul.f32 %v6830_v51, %v5694_v50  ;;  %v6687_v51 = vld [vmem:[%s11477_s8 + $0x430] sm:$0x7] }
 0x85b   : > { %v5652_v39 = vadd.f32 %v5643_v30, %v5588_v15  ;;  %v4610_v52 = vpop.permute.xlu0 %4609 }
 0x85c   : > { %v4620_v50 = vmul.f32 %v6678_v29, %v4610_v52 }
 0x85d   : > { %v11270_v0 = vadd.f32 %v5707_v33, %v5652_v39  ;;  %v3970_v47 = vpop.permute.xlu2 %3969 }
 0x85e   : > { %v3980_v24 = vmul.f32 %v6588_v58, %v3970_v47 }
 0x862   : > { %v3906_v61 = vpop.permute.xlu1 %3905 }
 0x863   : > { %v3916_v17 = vmul.f32 %v6579_v28, %v3906_v61  ;;  %v4802_v61 = vpop.permute.xlu0 %4801 }
 0x865   : > { %v3925_v13 = vadd.f32 %v3916_v17, %v3861_v37 }
 0x866   : > { %v4162_v53 = vpop.permute.xlu2 %4161 }
 0x867   : > { %v3989_v4 = vadd.f32 %v3980_v24, %v3925_v13  ;;  %v4172_v63 = vmul.f32 %v6615_v6, %v4162_v53  ;;  %v5811_v53 = vld [vmem:[%s11479_s10 + $0x8] sm:$0xff] }
 0x868   : > { %5832 = vmatpush.msra.mxu3 %v5811_v53  ;;  %v6750_v6 = vld [vmem:[%s11477_s8 + $0x628] sm:$0x7]  ;;  %v5838_v53 = vld [vmem:[%s11480_s11] sm:$0xff] }
 0x869   : > { %v4053_v3 = vadd.f32 %v4044_v62, %v3989_v4  ;;  %v6732_v4 = vld [vmem:[%s11477_s8 + $0x598] sm:$0x7]  ;;  %v6741_v62 = vld [vmem:[%s11477_s8 + $0x5e0] sm:$0x7] }
 0x86b   : > { %v4098_v42 = vpop.permute.xlu1 %4097  ;;  %v4994_v13 = vpop.permute.xlu0 %4993 }
 0x86c   : > { %v4108_v41 = vmul.f32 %v6606_v45, %v4098_v42  ;;  %v4812_v42 = vmul.f32 %v6705_v55, %v4802_v61  ;;  %v5004_v18 = vmul.f32 %v6732_v4, %v4994_v13  ;;  %v5839_v61 = vld [vmem:[%s11480_s11 + $0x8] sm:$0xff] }
 0x86e   : > { %v4117_v14 = vadd.f32 %v4108_v41, %v4053_v3 }
 0x86f   : > { %v4354_v9 = vpop.permute.xlu2 %4353 }
 0x870   : > { %v4181_v36 = vadd.f32 %v4172_v63, %v4117_v14  ;;  %v4364_v43 = vmul.f32 %v6642_v31, %v4354_v9  ;;  %v6723_v9 = vld [vmem:[%s11477_s8 + $0x550] sm:$0x7] }
 0x872   : > { %v4245_v21 = vadd.f32 %v4236_v8, %v4181_v36  ;;  %v6759_v36 = vld [vmem:[%s11477_s8 + $0x670] sm:$0x7] }
 0x873   : > { %v5122_v14 = vpop.permute.xlu0 %5121 }
 0x874   : > { %v4290_v5 = vpop.permute.xlu1 %4289  ;;  %v5132_v10 = vmul.f32 %v6750_v6, %v5122_v14  ;;  %v5842_v14 = vld [vmem:[%s11482_s13] sm:$0x1] }
 0x875   : > { %v4300_v59 = vmul.f32 %v6633_v7, %v4290_v5  ;;  %v6839_v7 = vld [vmem:[%s11477_s8 + $0x8f0] sm:$0xff] }
 0x877   : > { %v4309_v12 = vadd.f32 %v4300_v59, %v4245_v21 }
 0x878   : > { %v4546_v23 = vpop.permute.xlu2 %4545 }
 0x879   : > { %v4373_v40 = vadd.f32 %v4364_v43, %v4309_v12  ;;  %v4556_v20 = vmul.f32 %v6669_v22, %v4546_v23  ;;  %v6777_v43 = vld [vmem:[%s11477_s8 + $0x700] sm:$0x7] }
 0x87b   : > { %v4437_v60 = vadd.f32 %v4428_v19, %v4373_v40  ;;  %v6795_v19 = vld [vmem:[%s11477_s8 + $0x790] sm:$0x7]  ;;  %v5634_v22 = vpop.permute.xlu0 %5633 }
 0x87d   : > { %v4482_v46 = vpop.permute.xlu1 %4481 }
 0x87e   : > { %v4492_v25 = vmul.f32 %v6660_v2, %v4482_v46  ;;  %v6768_v46 = vld [vmem:[%s11477_s8 + $0x6b8] sm:$0x7] }
 0x880   : > { %v4501_v57 = vadd.f32 %v4492_v25, %v4437_v60 }
 0x881   : > { %v4738_v32 = vpop.permute.xlu2 %4737 }
 0x882   : > { %v4565_v15 = vadd.f32 %v4556_v20, %v4501_v57  ;;  %v4748_v11 = vmul.f32 %v6696_v26, %v4738_v32  ;;  %v6804_v57 = vld [vmem:[%s11477_s8 + $0x7d8] sm:$0x7]  ;;  %v6813_v20 = vld [vmem:[%s11477_s8 + $0x820] sm:$0x7] }
 0x883   : > { %v5762_v55 = vpop.permute.xlu0 %5761 }
 0x884   : > { %v4629_v47 = vadd.f32 %v4620_v50, %v4565_v15  ;;  %v5841_v50 = vld [vmem:[%s11480_s11 + $0x18] sm:$0xff] }
 0x886   : > { %v4674_v54 = vpop.permute.xlu1 %4673 }
 0x887   : > { %v4684_v33 = vmul.f32 %v6687_v51, %v4674_v54  ;;  %v5810_v51 = vld [vmem:[%s11479_s10] sm:$0xff] }
 0x888   : > { %5833 = vmatpush.msra.mxu3 %v5810_v51 }
 0x889   : > { %v4693_v44 = vadd.f32 %v4684_v33, %v4629_v47  ;;  %v5840_v33 = vld [vmem:[%s11480_s11 + $0x10] sm:$0xff]  ;;  %v6822_v47 = vld [vmem:[%s11477_s8 + $0x868] sm:$0x7] }
 0x88a   : > { %v4930_v35 = vpop.permute.xlu2 %4929  ;;  %5858 = vmatpush.msrb.mxu3 %v5841_v50 }
 0x88b   : > { %v4757_v17 = vadd.f32 %v4748_v11, %v4693_v44  ;;  %v4940_v45 = vmul.f32 %v6723_v9, %v4930_v35  ;;  %v6831_v44 = vld [vmem:[%s11477_s8 + $0x8b0] sm:$0x7]  ;;  %v5644_v11 = vmul.f32 %v6822_v47, %v5634_v22 }
 0x88c   : > { %5859 = vmatpush.msrb.mxu3 %v5840_v33  ;;  %v5917_v22 = vld [vmem:[%s11483_s14 + $0x10] sm:$0xff] }
 0x88d   : > { %v4821_v58 = vadd.f32 %v4812_v42, %v4757_v17 }
 0x88e   : > { %5860 = vmatpush.msrb.mxu3 %v5839_v61 }
 0x88f   : > { %v4866_v30 = vpop.permute.xlu1 %4865 }
 0x890   : > { %v4876_v37 = vmul.f32 %v6714_v38, %v4866_v30  ;;  %5861 = vmatpush.msrb.mxu3 %v5838_v53 }
 0x892   : > { %v4885_v24 = vadd.f32 %v4876_v37, %v4821_v58 }
 0x893   : > { %v5186_v39 = vpop.permute.xlu2 %5185 }
 0x894   : > { %v4949_v41 = vadd.f32 %v4940_v45, %v4885_v24  ;;  %v5196_v34 = vmul.f32 %v6759_v36, %v5186_v39 }
 0x896   : > { %v5013_v16 = vadd.f32 %v5004_v18, %v4949_v41  ;;  %v5806_v41 = vld [vmem:[%s11478_s9] sm:$0x1] }
 0x898   : > { %v5058_v28 = vpop.permute.xlu1 %5057 }
 0x899   : > { %v5068_v3 = vmul.f32 %v6741_v62, %v5058_v28  ;;  %v6840_v28 = vld [vmem:[%s11477_s8 + $0x8f8] sm:$0x7] }
 0x89a   : > { %v5772_v37 = vmul.f32 %v6840_v28, %v5762_v55 }
 0x89b   : > { %v5077_v23 = vadd.f32 %v5068_v3, %v5013_v16  ;;  %v5809_v16 = vld [vmem:[%s11406_s24] sm:$0x1] }
 0x89c   : > { %v5314_v27 = vpop.permute.xlu2 %5313 }
 0x89d   : > { %v5141_v8 = vadd.f32 %v5132_v10, %v5077_v23  ;;  %v5814_v10 = vld [vmem:[%s11481_s12] sm:$0x1] }
 0x89f   : > { %v5205_v12 = vadd.f32 %v5196_v34, %v5141_v8 }
 0x8a1   : > { %v5250_v49 = vpop.permute.xlu1 %5249 }
 0x8a2   : > { %v5260_v31 = vmul.f32 %v6768_v46, %v5250_v49 }
 0x8a4   : > { %v5269_v54 = vadd.f32 %v5260_v31, %v5205_v12 }
 0x8a5   : > { %v5506_v5 = vpop.permute.xlu2 %5505 }
 0x8a6   : > { %v5516_v30 = vmul.f32 %v6804_v57, %v5506_v5  ;;  %v5916_v57 = vld [vmem:[%s11483_s14 + $0x8] sm:$0xff] }
 0x8aa   : > { %v5378_v63 = vpop.permute.xlu1 %5377 }
 0x8ab   : > { %v5388_v25 = vmul.f32 %v6786_v48, %v5378_v63 }
 0x8ae   : > { %v5758_v59 = vpop.permute.xlu2 %5757 }
 0x8af   : > { %v5771_v21 = vmul.f32 %v6839_v7, %v5758_v59 }
 0x8b1   : > { %v5780_v32 = vadd.f32 %v5771_v21, %v11270_v0  ;;  %v5324_v0 = vmul.f32 %v6777_v43, %v5314_v27 }
 0x8b3   : > { %v5795_v2 = vsel %vm748_vm1, %v5780_v32, 0.0  ;;  %v5442_v40 = vpop.permute.xlu1 %5441  ;;  %v5333_v60 = vadd.f32 %v5324_v0, %v5269_v54  ;;  %v7222_v0 = vld [vmem:[%s11406_s24] ss:$0 sm:$0xff]  ;;  %s5971_s24 = scalar_lea.sflag [#allocation3], %s556_s30 }
 0x8b4   : > { %v5796_v1 = vadd.f32 %v5795_v2, %v11141_v56  ;;  %v5452_v35 = vmul.f32 %v6795_v19, %v5442_v40 }
 0x8b5   : > { %v5397_v52 = vadd.f32 %v5388_v25, %v5333_v60 }
 0x8b7   : > { %v5461_v29 = vadd.f32 %v5452_v35, %v5397_v52  ;;  %v5918_v52 = vld [vmem:[%s11483_s14 + $0x18] sm:$0xff] }
 0x8b8   : > { %5934 = vmatpush.msra.mxu0 %v5918_v52 }
 0x8b9   : > { %v5525_v39 = vadd.f32 %v5516_v30, %v5461_v29 }
 0x8ba   : > { %5935 = vmatpush.msra.mxu0 %v5917_v22 }
 0x8bc   : > { %v5570_v56 = vpop.permute.xlu1 %5569  ;;  %5936 = vmatpush.msra.mxu0 %v5916_v57 }
 0x8bd   : > { %v5580_v15 = vmul.f32 %v6813_v20, %v5570_v56  ;;  %v5915_v20 = vld [vmem:[%s11483_s14] sm:$0xff] }
 0x8be   : > { %5937 = vmatpush.msra.mxu0 %v5915_v20 }
 0x8bf   : > { %v5589_v26 = vadd.f32 %v5580_v15, %v5525_v39 }
 0x8c1   : > { %v5653_v17 = vadd.f32 %v5644_v11, %v5589_v26 }
 0x8c5   : > { %v5698_v38 = vpop.permute.xlu1 %5697 }
 0x8c6   : > { %v5708_v42 = vmul.f32 %v6831_v44, %v5698_v38 }
 0x8c8   : > { %v5717_v27 = vadd.f32 %v5708_v42, %v5653_v17 }
 0x8ca   : > { %v5781_v58 = vadd.f32 %v5772_v37, %v5717_v27 }
 0x8cc   : > { %v5798_v13 = vsel %vm5797_vm8, %v5781_v58, 0.0 }
 0x8cd   : > { %v5799_v9 = vadd.f32 %v5798_v13, %v5796_v1 }
 0x8cf   : > { %v5800_v24 = vrot.slane %v5799_v9, 4 }
 0x8d1   : > { %v5801_v49 = vadd.f32 %v5800_v24, %v5799_v9 }
 0x8d3   : > { %v5802_v45 = vrot.slane %v5801_v49, 2 }
 0x8d5   : > { %v5803_v4 = vadd.f32 %v5802_v45, %v5801_v49 }
 0x8d7   : > { %v5804_v62 = vrot.slane %v5803_v4, 1 }
 0x8d9   : > { %v5805_v5 = vadd.f32 %v5804_v62, %v5803_v4 }
 0x8db   : > { %v5807_v18 = vadd.f32 %v5806_v41, %v5805_v5 }
 0x8dd   : > { %v5808_v3 = vmax.f32 %v5807_v18, 0.0 }
 0x8df   : > { %6841 = vmatmul.msk.f32.vlgmr.msra.gmra.mxu3 %vm748_vm1, %v5808_v3 }
 0x8e7   : > { %6842 = vmatmul.msk.f32.vlgmr.msrb.gmra.mxu3 %vm748_vm1, %v5809_v16 }
 0x962   : > { %v5835_v6 = vpop.f32.mrf.mxu3 }
 0x963   : > { %v5836_v7 = vadd.f32 %v5835_v6, %v5814_v10 }
 0x96a   : > { %v5863_v23 = vpop.f32.mrf.mxu3 }
 0x96b   : > { %v5864_v63 = vadd.f32 %v5863_v23, %v5842_v14 }
 0x96d   : > { %5887 = vrot.lane.b32.xlu1 %v5864_v63, %s7330_s0  ;;  %v5866_v36 = vadd.f32 %v5864_v63, %v5836_v7 }
 0x96f   : > { %v6843_v46 = vmul.f32 -1.442695, %v5866_v36 }
 0x971   : > { %7223 = vpow2.f32 %v6843_v46 }
 0x977   : > { %v7224_v8 = vpop.eup %7223 }
 0x978   : > { %v5870_v59 = vadd.f32 1.0, %v7224_v8 }
 0x97a   : > { %7225 = vrcp.f32 %v5870_v59  ;;  %v5882_v43 = vand.u32 2147483648, %v5870_v59  ;;  %vm5876_vm10 = vweird.f32 %v5870_v59  ;;  %v5880_v48 = vand.u32 2147483647, %v5870_v59 }
 0x97c   : > { %v5883_v40 = vor.u32 1.1754944e-38, %v5882_v43  ;;  %vm5881_vm12 = vcmp.eq.f32.partialorder %v5880_v48, 8.507059e+37 }
 0x980   : > { %v7226_v21 = vpop.eup %7225 }
 0x981   : > { %v5872_v34 = vmul.f32 %v7226_v21, %v5870_v59  ;;  %vm5877_vm9 = vweird.f32 %v7226_v21 }
 0x982   : > { %vm5878_vm11 = vmor %vm5876_vm10, %vm5877_vm9 }
 0x983   : > { %v5873_v31 = vsub.f32 1.0, %v5872_v34 }
 0x985   : > { %v5874_v32 = vmul.f32 %v7226_v21, %v5873_v31 }
 0x987   : > { %v5875_v12 = vadd.f32 %v7226_v21, %v5874_v32 }
 0x989   : > { %v5879_v2 = vsel %vm5878_vm11, %v7226_v21, %v5875_v12 }
 0x98a   : > { %v5884_v1 = vsel %vm5881_vm12, %v5883_v40, %v5879_v2 }
 0x98b   : > { %v5897_v56 = vsub.f32 1.0, %v5884_v1 }
 0x9df   : > { %v5888_v54 = vpop.permute.xlu1 %5887 }
 0x9e0   : > { %v5890_v19 = vmul.f32 %v5888_v54, %v5884_v1 }
 0x9e2   : > { %5892 = vrot.lane.b32.xlu2 %v5890_v19, %s7330_s0  ;;  %s7248_s0 = sshra.s32 %s5987_s29, 4  ;;  %s7249_s0 = int_to_ptr.hbm [resolvable:$true] %s7248_s0 }
 0x9e3   : > { %p7255_p0 = scmp.lt.s32.totalorder %s7249_s0, %s11486_s17 }
 0x9ea   : > { %5904 = vrot.lane.b32.xlu2 %v7222_v0, %s7331_s21  ;;  %s557_s21 = scalar_lea.vmem [#allocation2], %s556_s30 }
 0x9eb   : > { %s5984_s18 = sshll.u32 %s557_s21, 4  ;;  %s5985_s18 = int_to_ptr.vmem [resolvable:$true] %s5984_s18 }
 0xa3c   : > { %v5893_v25 = vpop.permute.xlu2 %5892 }
 0xa3d   : > { %v5895_v60 = vadd.f32 %v5893_v25, %v5836_v7 }
 0xa3f   : > { %7227 = vtanh.f32 %v5895_v60 }
 0xa44   : > { %v5905_v29 = vpop.permute.xlu2 %5904 }
 0xa45   : > { %v7228_v35 = vpop.eup %7227  ;;  %v5907_v30 = vmul.f32 %v5905_v29, %v5884_v1 }
 0xa46   : > { %5899 = vrot.lane.b32.xlu1 %v7228_v35, %s7332_s22 }
 0xab8   : > { %v5900_v51 = vpop.permute.xlu1 %5899 }
 0xab9   : > { %v5902_v15 = vmul.f32 %v5900_v51, %v5897_v56 }
 0xabb   : > { %v5908_v50 = vadd.f32 %v5907_v30, %v5902_v15 }
 0xabd   : > { %5910 = vrot.lane.b32.xlu0 %v5908_v50, %s7332_s22  ;;  %s7250_s22 = scalar_lea.hbm %s7249_s0, 1 }
 0xabe   : > { %p7251_p11 = scmp.ne.s32.totalorder %s7249_s0, %s7250_s22  ;;  %p7256_p1 = scmp.lt.s32.totalorder %s7254_s4, %s7250_s22 }
 0xac0   : > { %p7252_p12 = pnand %p7251_p11, %p7461_p5  ;;  %p7257_p2 = por %p7256_p1, %p7255_p0 }
 0xac2   : > { %p7253_p13 = pneg %p7252_p12 }
 0xac4   : > { %p7258_p3 = pnand %p7257_p2, %p7253_p13 }
 0xb2f   : > { %v5911_v33 = vpop.permute.xlu0 %5910 }
 0xb30   : > { %5914 = vst.msk [vmem:[%s557_s21] sm:$0x1] %vm5913_vm13, %v5911_v33  ;;  %6844 = vmatmul.msk.f32.vlgmr.msra.gmra.mxu0 %vm748_vm1, %v5911_v33 }
 0xb31   : > { %7261 = shalt.err (!%p7258_p3)
}
 0xb32   : > { %6857 = dma.vmem_to_hbm [thread:$0]  (%p7461_p5), %s5985_s18, 16, %s5987_s29, %s5971_s24   ;;  %v5919_v39 = vld [vmem:[%s11484_s15] sm:$0x1]  ;;  %v5942_v28 = vlaneseq  ;;  %vm5965_vm3 = vcmask 8192  }
 0xb33   : > { %s568_s5 = scalar_lea.vmem %s11485_s16, %s7489_s19 }
 0xb34   : > { %v5943_v17 = vand.u32 127, %v5942_v28 }
 0xb36   : > { %vm5944_vm0 = vcmp.eq.s32.totalorder %v5943_v17, 0 }
 0xbad   : > { %v5939_v47 = vpop.f32.mrf.mxu0 }
 0xbae   : > { %v5940_v61 = vadd.f32 %v5939_v47, %v5919_v39 }
 0xbb0   : > { %v6845_v26 = vmul.f32 -1.442695, %v5940_v61 }
 0xbb2   : > { %7229 = vpow2.f32 %v6845_v26 }
 0xbb8   : > { %v7230_v44 = vpop.eup %7229 }
 0xbb9   : > { %v5948_v53 = vadd.f32 1.0, %v7230_v44 }
 0xbbb   : > { %7231 = vrcp.f32 %v5948_v53  ;;  %v5960_v42 = vand.u32 2147483648, %v5948_v53  ;;  %v5958_v27 = vand.u32 2147483647, %v5948_v53  ;;  %vm5954_vm15 = vweird.f32 %v5948_v53 }
 0xbbd   : > { %v5961_v13 = vor.u32 1.1754944e-38, %v5960_v42  ;;  %vm5959_vm2 = vcmp.eq.f32.partialorder %v5958_v27, 8.507059e+37 }
 0xbc1   : > { %v7232_v11 = vpop.eup %7231 }
 0xbc2   : > { %v5950_v55 = vmul.f32 %v7232_v11, %v5948_v53  ;;  %vm5955_vm14 = vweird.f32 %v7232_v11 }
 0xbc3   : > { %vm5956_vm1 = vmor %vm5954_vm15, %vm5955_vm14 }
 0xbc4   : > { %v5951_v38 = vsub.f32 1.0, %v5950_v55 }
 0xbc6   : > { %v5952_v37 = vmul.f32 %v7232_v11, %v5951_v38 }
 0xbc8   : > { %v5953_v58 = vadd.f32 %v7232_v11, %v5952_v37 }
 0xbca   : > { %v5957_v9 = vsel %vm5956_vm1, %v7232_v11, %v5953_v58 }
 0xbcb   : > { %v5962_v24 = vsel %vm5959_vm2, %v5961_v13, %v5957_v9 }
 0xbcc   : > { %v5964_v49 = vsel %vm5944_vm0, %v5962_v24, %v5940_v61 }
 0xbcd   : > { %5966 = vst.msk [vmem:[%s568_s5] sm:$0x1] %vm5965_vm3, %v5964_v49 }
 0xbce PF: > { %s11773_s6 = sld [smem:[#allocation5_spill]]  ;;  %p6863_p4 = scmp.ge.s32.totalorder %s7296_s27, 2 }
 0xbd0   : > { %p6860_p5 = pnand %p6863_p4, %p7465_p6 }
 0xbd2   : > { %p6861_p7 = pneg %p6860_p5 }
 0xbd4   : > { %s6004_s21 = sand.u32 1, %s11773_s6  }
 0xbd5   : > { %s6005_s23 = scalar_lea.sflag [#allocation3], %s6004_s21 }
 0xbd6   : > { %7279 = dma.done.wait (%p6861_p7), %s6005_s23, 16  }
 0xbd7   : > { %7281 = vsyncadd (%p6861_p7), %s6005_s23, 4294967280  ;;  %s11775_s27 = sld [smem:[#allocation7_spill]]  ;;  %s11778_s24 = smov %s7288_s25 }
 0xbd8   : > { %s11776_s19 = sld [smem:[#allocation6_spill]] }
 0xbd9   : > { %s11777_s26 = sld [smem:[#allocation8_spill]] }
 0xbdd   : > { %p28_p8 = scmp.ge.s32.totalorder %s11775_s27, 4  }
 0xbde   : > { %s11779_s25 = smov %s11776_s19 }
 0xbdf   :  { %30 = sbr.rel (!%p28_p8) target bundleno = 11 (0xb), region = 191 }
 0xbe4   :  { %6010 = vsyncpa [#allocation3], 1 }
 0xbe5   :  { %6012 = vsyncpa [#allocation3 + $0x1], 1 }

</bundles_post_ra>
